<compile_context>
chip_gen: v7x
topology: tpu7x:2x2x1
jax: 0.10.0
libtpu: 0.0.40
codegen_flags: <defaults>
</compile_context>

<pallas_src>
import functools

import jax
import jax.numpy as jnp
from jax import lax
from jax.experimental import pallas as pl
from jax.experimental.pallas import tpu as pltpu

LANE = 128
# Finite "-inf": exp underflows to exactly 0 for masked heads, and fully
# masked (lens == 0) rows stay NaN-free (unlike the torch -inf reference).
MASK_NEG = -1e30


# ---------------------------------------------------------------------------
# Fused kernel: layer_num BiaffineLayers + final Arc score, one batch block
# per "parallel" grid index, layers on the inner "arbitrary" axis.
# ---------------------------------------------------------------------------
def fused_biaffine_kernel(
    # scalar prefetch (SMEM)
    lens_ref,
    # inputs
    x_ref,
    w_dep_ref, b_dep_ref, w_head_ref, b_head_ref, u_ref,
    w_v_ref, b_v_ref, w_proj_ref, gamma_ref, beta_ref,
    fw_dep_ref, fb_dep_ref, fw_head_ref, fb_head_ref, fu_ref,
    # outputs
    f_arc_ref, y_ref,
    # scratch
    mask_ref,
    *, n_layers, bt, true_din):
  b = pl.program_id(0)
  l = pl.program_id(1)
  Bt, L, DINp = x_ref.shape
  cdt = w_dep_ref.dtype                      # MXU operand dtype (bf16 or f32)

  @pl.when(l == 0)
  def _init():
    # Y carry starts as X (kept VMEM-resident across the layer axis).
    # Column mask depends only on head index vs lens -> (bt, 1, L) buffer,
    # built once per batch block and broadcast over the query axis.
    y_ref[...] = x_ref[...]
    col = lax.broadcasted_iota(jnp.int32, (1, L), 1)
    for i in range(bt):                      # static unroll; bt is small
      mask_ref[i] = jnp.where(col < lens_ref[b * bt + i],
                              jnp.float32(0.0), jnp.float32(MASK_NEG))

  x3 = y_ref[...]                            # (Bt, L, DINp) f32 carry
  x2 = x3.reshape(Bt * L, DINp)              # fold batch into the MXU M dim
  x2c = x2.astype(cdt)
  add_mask = mask_ref[...]                   # (Bt, 1, L): 0 / -1e30

  def arc_softmax(w_dep, b_dep, w_head, b_head, u):
    # Arc.Score(X)/FAC -> masked_fill -> softmax(dim=-1).
    # 1/FAC is folded into `u`; padded arc/din columns are exact zeros.
    d = jnp.maximum(
        jnp.dot(x2c, w_dep, preferred_element_type=jnp.float32) + b_dep, 0.0)
    h = jnp.maximum(
        jnp.dot(x2c, w_head, preferred_element_type=jnp.float32) + b_head, 0.0)
    darc = d.shape[-1]
    du = jnp.dot(d.astype(cdt), u, preferred_element_type=jnp.float32)
    du3 = du.reshape(Bt, L, darc).astype(cdt)
    h3 = h.reshape(Bt, L, darc).astype(cdt)
    # Batched contraction over the last dims of both operands -- explicit
    # dot_general (batch dim 0) so Mosaic emits no XLU transposes.
    s = lax.dot_general(du3, h3, (((2,), (2,)), ((0,), (0,))),
                        preferred_element_type=jnp.float32)
    s = s + add_mask                          # broadcast over query axis
    m = jnp.max(s, axis=-1, keepdims=True)
    p = jnp.exp(s - m)
    denom = jnp.sum(p, axis=-1, keepdims=True)
    # Exact reciprocal (tiny operand) so rows of F_arc sum to 1.
    return p * pl.reciprocal(denom, approx=False)

  @pl.when(l < n_layers)
  def _layer():
    s = arc_softmax(w_dep_ref[...], b_dep_ref[...],
                    w_head_ref[...], b_head_ref[...], u_ref[...])
    v = jnp.maximum(
        jnp.dot(x2c, w_v_ref[...], preferred_element_type=jnp.float32)
        + b_v_ref[...], 0.0)                                   # (Bt*L, DARCp)
    darc = v.shape[-1]
    v3 = v.reshape(Bt, L, darc).astype(cdt)
    y_mix = lax.dot_general(s.astype(cdt), v3,
                            (((2,), (1,)), ((0,), (0,))),
                            preferred_element_type=jnp.float32)  # (Bt,L,DARCp)
    y_proj = jnp.dot(y_mix.reshape(Bt * L, darc).astype(cdt), w_proj_ref[...],
                     preferred_element_type=jnp.float32)       # (Bt*L, DINp)
    # Y = LayerNorm(X + proj(S @ V)); stats over the TRUE DIN only (padded
    # columns of X / proj / gamma / beta are exact zeros).
    res = x2 + y_proj
    inv_din = jnp.float32(1.0 / true_din)
    mean = jnp.sum(res, axis=-1, keepdims=True) * inv_din
    centered = res - mean
    if DINp != true_din:
      dmask = lax.broadcasted_iota(jnp.int32, (1, DINp), 1) < true_din
      centered = jnp.where(dmask, centered, 0.0)
    var = jnp.sum(centered * centered, axis=-1, keepdims=True) * inv_din
    normed = centered * lax.rsqrt(var + 1e-5)
    y_ref[...] = (normed * gamma_ref[...] + beta_ref[...]).reshape(Bt, L, DINp)

  @pl.when(l == n_layers)
  def _final():
    # Final Arc score; Y output already holds the last layer's result.
    f_arc_ref[...] = arc_softmax(fw_dep_ref[...], fb_dep_ref[...],
                                 fw_head_ref[...], fb_head_ref[...],
                                 fu_ref[...]).astype(f_arc_ref.dtype)


# ---------------------------------------------------------------------------
# Parameter prep: fold 1/FAC into U, zero-pad din / dim_arc to lane multiples
# (numerically exact), cast MXU operands to the compute dtype.
# ---------------------------------------------------------------------------
def _round_up(n, m):
  return ((n + m - 1) // m) * m


def _pad_to(a, axis, target):
  pad = target - a.shape[axis]
  if pad == 0:
    return a
  widths = [(0, 0)] * a.ndim
  widths[axis] = (0, pad)
  return jnp.pad(a, widths)


def _prep_arc_params(p, fac, cdt, dinp, darcp):
  return [
      _pad_to(_pad_to(p["w_dep"], 0, dinp), 1, darcp).astype(cdt),
      _pad_to(p["b_dep"], 1, darcp),                 # biases stay f32
      _pad_to(_pad_to(p["w_head"], 0, dinp), 1, darcp).astype(cdt),
      _pad_to(p["b_head"], 1, darcp),
      _pad_to(_pad_to(p["u"] / fac, 0, darcp), 1, darcp).astype(cdt),
  ]


def _prep_layer_params(p, fac, cdt, dinp, darcp):
  ws = _prep_arc_params(p, fac, cdt, dinp, darcp)
  ws += [
      _pad_to(_pad_to(p["w_v"], 0, dinp), 1, darcp).astype(cdt),
      _pad_to(p["b_v"], 1, darcp),
      _pad_to(_pad_to(p["w_proj"], 0, darcp), 1, dinp).astype(cdt),
      _pad_to(p["gamma"], 1, dinp),                  # padded cols are zero
      _pad_to(p["beta"], 1, dinp),
  ]
  return ws


def _vmem_capacity_bytes():
  try:
    return int(pltpu.get_tpu_info().vmem_capacity_bytes)
  except Exception:
    pass
  try:
    kind = jax.devices()[0].device_kind.lower()
  except Exception:
    kind = ""
  if "v7" in kind or "7x" in kind:
    return 64 * 1024 * 1024
  return 128 * 1024 * 1024


def _default_batch_block(B):
  # >= 2 batch blocks so the leading "parallel" axis shards across both
  # v7x TensorCores; pick the largest divisor that still gives 2+ blocks.
  if B < 2:
    return B
  for d in range(B // 2, 0, -1):
    if B % d == 0:
      return d
  return B


# ---------------------------------------------------------------------------
# MultiLayerBiaffine.forward (siamese == 'N')
# ---------------------------------------------------------------------------
def multi_layer_biaffine_forward(X, lens, params, *, layer_num, din,
                                 siamese="N", batch_block=None,
                                 compute_dtype=jnp.bfloat16,
                                 lane_pad=LANE, len_pad=LANE,
                                 score_dtype=jnp.float32,
                                 vmem_limit_bytes=None):
  if siamese != "N":
    # TODO(synk): siamese == 'P' path (ex_arc E_arc + per-layer W_arc list).
    raise NotImplementedError("only siamese == 'N' is implemented")
  B, L, DIN = X.shape
  assert DIN == din
  darc = params["layer"]["w_dep"].shape[1]
  Lp = _round_up(L, len_pad)                 # lane-dense F_arc stores
  DINp = _round_up(DIN, lane_pad)            # lane-dense carry / matmul K dim
  DARCp = _round_up(darc, lane_pad)
  bt = _default_batch_block(B) if batch_block is None else batch_block
  assert B % bt == 0
  fac = float(din) ** 0.5

  x_p = _pad_to(_pad_to(X.astype(jnp.float32), 1, Lp), 2, DINp)
  weights = (_prep_layer_params(params["layer"], fac, compute_dtype,
                                DINp, DARCp)
             + _prep_arc_params(params["final_arc"], fac, compute_dtype,
                                DINp, DARCp))

  kernel = functools.partial(fused_biaffine_kernel, n_layers=layer_num,
                             bt=bt, true_din=DIN)

  if vmem_limit_bytes is None:
    vmem_limit_bytes = min(_vmem_capacity_bytes() * 3 // 4, 100 * 1024 * 1024)

  # Advisory cost estimate (padded dims; matmul flops + softmax exps).
  per_layer_mm = 2 * B * Lp * (3 * DINp * DARCp + DARCp * DARCp
                               + 2 * Lp * DARCp + DARCp * DINp)
  final_mm = 2 * B * Lp * (2 * DINp * DARCp + DARCp * DARCp + Lp * DARCp)
  flops = layer_num * per_layer_mm + final_mm
  transcendentals = B * Lp * Lp * (layer_num + 1) + B * Lp * (layer_num + 1)
  weight_bytes = sum(int(w.size) * w.dtype.itemsize for w in weights)
  bytes_accessed = (int(x_p.size) * 4 + weight_bytes
                    + B * Lp * Lp * jnp.dtype(score_dtype).itemsize
                    + B * Lp * DINp * 4)
  cost = pl.CostEstimate(flops=int(flops),
                         transcendentals=int(transcendentals),
                         bytes_accessed=int(bytes_accessed))

  out_shape = (jax.ShapeDtypeStruct((B, Lp, Lp), score_dtype),
               jax.ShapeDtypeStruct((B, Lp, DINp), jnp.float32))

  def _run(single_buffer_weights):
    def wspec(shape):
      imap = lambda b, l, lens: (0,) * len(shape)
      if single_buffer_weights:
        # Constant index map -> fetched once; no need to double-buffer.
        return pl.BlockSpec(shape, imap, pipeline_mode=pl.Buffered(1))
      return pl.BlockSpec(shape, imap)

    grid_spec = pltpu.PrefetchScalarGridSpec(
        num_scalar_prefetch=1,
        grid=(B // bt, layer_num + 1),        # layer (carry) axis innermost
        in_specs=[pl.BlockSpec((bt, Lp, DINp), lambda b, l, lens: (b, 0, 0))]
                 + [wspec(w.shape) for w in weights],
        out_specs=[pl.BlockSpec((bt, Lp, Lp), lambda b, l, lens: (b, 0, 0)),
                   pl.BlockSpec((bt, Lp, DINp), lambda b, l, lens: (b, 0, 0))],
        scratch_shapes=[pltpu.VMEM((bt, 1, Lp), jnp.float32)],
    )
    return pl.pallas_call(
        kernel,
        grid_spec=grid_spec,
        out_shape=out_shape,
        compiler_params=pltpu.CompilerParams(
            dimension_semantics=("parallel", "arbitrary"),
            vmem_limit_bytes=int(vmem_limit_bytes)),
        cost_estimate=cost,
    )(lens.astype(jnp.int32), x_p, *weights)

  try:
    f_arc, y = _run(single_buffer_weights=True)
  except Exception:
    # Pallas version without BlockSpec pipeline_mode / Buffered(1) support:
    # fall back to default double-buffered weight blocks.
    f_arc, y = _run(single_buffer_weights=False)

  return f_arc[:, :L, :L], y[:, :L, :DIN]


# ---------------------------------------------------------------------------
# Pure-JAX reference (same assumed module semantics, f32)
# ---------------------------------------------------------------------------
def reference_forward(X, lens, params, *, layer_num, din):
  fac = float(din) ** 0.5
  _, L, _ = X.shape
  valid = jnp.arange(L)[None, None, :] < lens[:, None, None]   # head mask

  def arc_softmax(x, p):
    d = jax.nn.relu(x @ p["w_dep"] + p["b_dep"])
    h = jax.nn.relu(x @ p["w_head"] + p["b_head"])
    s = jnp.einsum("bqe,ef,bkf->bqk", d, p["u"], h) / fac
    s = jnp.where(valid, s, -jnp.inf)
    return jax.nn.softmax(s, axis=-1)

  lp = params["layer"]
  for _ in range(layer_num):
    s = arc_softmax(X, lp)
    v = jax.nn.relu(X @ lp["w_v"] + lp["b_v"])
    y_arc = jnp.einsum("bqk,bke->bqe", s, v) @ lp["w_proj"]
    res = X + y_arc
    mean = res.mean(-1, keepdims=True)
    var = ((res - mean) ** 2).mean(-1, keepdims=True)
    X = (res - mean) / jnp.sqrt(var + 1e-5) * lp["gamma"] + lp["beta"]
  return arc_softmax(X, params["final_arc"]), X


# ---------------------------------------------------------------------------
# Deterministic parameter construction (Clone => one shared layer param set)
# ---------------------------------------------------------------------------
def init_arc_params(key, din, darc):
  k1, k2, k3 = jax.random.split(key, 3)
  s_in = 1.0 / (din ** 0.5)
  s_arc = 1.0 / (darc ** 0.5)
  return dict(
      w_dep=jax.random.normal(k1, (din, darc), jnp.float32) * s_in,
      b_dep=jnp.zeros((1, darc), jnp.float32),
      w_head=jax.random.normal(k2, (din, darc), jnp.float32) * s_in,
      b_head=jnp.zeros((1, darc), jnp.float32),
      u=jax.random.normal(k3, (darc, darc), jnp.float32) * s_arc,
  )


def init_layer_params(key, din, darc):
  k_arc, k_v, k_proj = jax.random.split(key, 3)
  p = init_arc_params(k_arc, din, darc)
  s_in = 1.0 / (din ** 0.5)
  s_arc = 1.0 / (darc ** 0.5)
  p.update(
      w_v=jax.random.normal(k_v, (din, darc), jnp.float32) * s_in,
      b_v=jnp.zeros((1, darc), jnp.float32),
      # nn.Linear(dim_arc, din, bias=False) applied as y @ W^T -> store (darc, din)
      w_proj=jax.random.normal(k_proj, (darc, din), jnp.float32) * s_arc,
      gamma=jnp.ones((1, din), jnp.float32),
      beta=jnp.zeros((1, din), jnp.float32),
  )
  return p


if __name__ == "__main__":
  B, L = 2, 8
  DIN, DIM_ARC = 32, 16
  LAYER_NUM = 2

  key = jax.random.PRNGKey(0)
  k_x, k_layer, k_final = jax.random.split(key, 3)

  X = jax.random.normal(k_x, (B, L, DIN), jnp.float32)
  lens = jnp.array([8, 5], dtype=jnp.int32)

  params = dict(
      layer=init_layer_params(k_layer, DIN, DIM_ARC),
      final_arc=init_arc_params(k_final, DIN, DIM_ARC),
  )

  # Default (performance) path: bf16 MXU operands, f32 elementwise math.
  F_arc, Y = multi_layer_biaffine_forward(
      X, lens, params, layer_num=LAYER_NUM, din=DIN, siamese="N")
  jax.block_until_ready((F_arc, Y))
  assert F_arc.shape == (B, L, L) and Y.shape == (B, L, DIN)
  assert bool(jnp.all(jnp.isfinite(F_arc))) and bool(jnp.all(jnp.isfinite(Y)))

  F_ref, Y_ref = reference_forward(X, lens, params,
                                   layer_num=LAYER_NUM, din=DIN)

  # Full-f32 kernel path: tight check against the pure-JAX reference.
  F32_arc, Y32 = multi_layer_biaffine_forward(
      X, lens, params, layer_num=LAYER_NUM, din=DIN, siamese="N",
      compute_dtype=jnp.float32)
  jax.block_until_ready((F32_arc, Y32, F_ref, Y_ref))
  assert bool(jnp.allclose(F32_arc, F_ref, atol=5e-2, rtol=5e-2))
  assert bool(jnp.allclose(Y32, Y_ref, atol=5e-2, rtol=5e-2))

  # bf16 MXU path: looser tolerance (probabilities in [0,1], LayerNorm'd Y).
  assert bool(jnp.allclose(F_arc, F_ref, atol=2e-1, rtol=2e-1))
  assert bool(jnp.allclose(Y, Y_ref, atol=3e-1, rtol=3e-1))

  # Zero-length sequence: finite-negative mask keeps the kernel NaN-free
  # (the torch -inf + softmax reference would produce NaN for that row).
  lens0 = jnp.array([8, 0], dtype=jnp.int32)
  F0, Y0 = multi_layer_biaffine_forward(
      X, lens0, params, layer_num=LAYER_NUM, din=DIN, siamese="N")
  jax.block_until_ready((F0, Y0))
  assert bool(jnp.all(jnp.isfinite(F0))) and bool(jnp.all(jnp.isfinite(Y0)))

  print("KERNEL_OK")
</pallas_src>

<mosaic_0001>
module attributes {stable_mosaic.version = 11 : i64} {
  func.func @fused_biaffine_kernel(%arg0: i32, %arg1: i32, %arg2: memref<2xi32, #tpu.memory_space<smem>>, %arg3: memref<1x128x128xf32, #tpu.memory_space<vmem>>, %arg4: memref<128x128xbf16, #tpu.memory_space<vmem>>, %arg5: memref<1x128xf32, #tpu.memory_space<vmem>>, %arg6: memref<128x128xbf16, #tpu.memory_space<vmem>>, %arg7: memref<1x128xf32, #tpu.memory_space<vmem>>, %arg8: memref<128x128xbf16, #tpu.memory_space<vmem>>, %arg9: memref<128x128xbf16, #tpu.memory_space<vmem>>, %arg10: memref<1x128xf32, #tpu.memory_space<vmem>>, %arg11: memref<128x128xbf16, #tpu.memory_space<vmem>>, %arg12: memref<1x128xf32, #tpu.memory_space<vmem>>, %arg13: memref<1x128xf32, #tpu.memory_space<vmem>>, %arg14: memref<128x128xbf16, #tpu.memory_space<vmem>>, %arg15: memref<1x128xf32, #tpu.memory_space<vmem>>, %arg16: memref<128x128xbf16, #tpu.memory_space<vmem>>, %arg17: memref<1x128xf32, #tpu.memory_space<vmem>>, %arg18: memref<128x128xbf16, #tpu.memory_space<vmem>>, %arg19: memref<1x128x128xf32, #tpu.memory_space<vmem>>, %arg20: memref<1x128x128xf32, #tpu.memory_space<vmem>>, %arg21: memref<1x1x128xf32, #tpu.memory_space<vmem>>) attributes {dimension_semantics = [#tpu.dimension_semantics<parallel>, #tpu.dimension_semantics<arbitrary>], iteration_bounds = array<i64: 2, 3>, scalar_prefetch = 1 : i64, scratch_operands = 1 : i64, tpu.core_type = #tpu.core_type<tc>, window_params = [{transform_indices = @transform_0, window_bounds = array<i64: 1, 128, 128>}, {pipeline_mode = #tpu.pipeline_mode<synchronous>, transform_indices = @transform_1, window_bounds = array<i64: 128, 128>}, {pipeline_mode = #tpu.pipeline_mode<synchronous>, transform_indices = @transform_2, window_bounds = array<i64: 1, 128>}, {pipeline_mode = #tpu.pipeline_mode<synchronous>, transform_indices = @transform_3, window_bounds = array<i64: 128, 128>}, {pipeline_mode = #tpu.pipeline_mode<synchronous>, transform_indices = @transform_4, window_bounds = array<i64: 1, 128>}, {pipeline_mode = #tpu.pipeline_mode<synchronous>, transform_indices = @transform_5, window_bounds = array<i64: 128, 128>}, {pipeline_mode = #tpu.pipeline_mode<synchronous>, transform_indices = @transform_6, window_bounds = array<i64: 128, 128>}, {pipeline_mode = #tpu.pipeline_mode<synchronous>, transform_indices = @transform_7, window_bounds = array<i64: 1, 128>}, {pipeline_mode = #tpu.pipeline_mode<synchronous>, transform_indices = @transform_8, window_bounds = array<i64: 128, 128>}, {pipeline_mode = #tpu.pipeline_mode<synchronous>, transform_indices = @transform_9, window_bounds = array<i64: 1, 128>}, {pipeline_mode = #tpu.pipeline_mode<synchronous>, transform_indices = @transform_10, window_bounds = array<i64: 1, 128>}, {pipeline_mode = #tpu.pipeline_mode<synchronous>, transform_indices = @transform_11, window_bounds = array<i64: 128, 128>}, {pipeline_mode = #tpu.pipeline_mode<synchronous>, transform_indices = @transform_12, window_bounds = array<i64: 1, 128>}, {pipeline_mode = #tpu.pipeline_mode<synchronous>, transform_indices = @transform_13, window_bounds = array<i64: 128, 128>}, {pipeline_mode = #tpu.pipeline_mode<synchronous>, transform_indices = @transform_14, window_bounds = array<i64: 1, 128>}, {pipeline_mode = #tpu.pipeline_mode<synchronous>, transform_indices = @transform_15, window_bounds = array<i64: 128, 128>}, {transform_indices = @transform_16, window_bounds = array<i64: 1, 128, 128>}, {transform_indices = @transform_17, window_bounds = array<i64: 1, 128, 128>}]} {
    %c0_i32 = arith.constant 0 : i32
    %0 = arith.cmpi eq, %arg1, %c0_i32 : i32
    %1 = arith.extui %0 : i1 to i32
    %c0_i32_0 = arith.constant 0 : i32
    %2 = arith.cmpi ne, %1, %c0_i32_0 : i32
    scf.if %2 {
      %c0_9 = arith.constant 0 : index
      %c0_10 = arith.constant 0 : index
      %c0_11 = arith.constant 0 : index
      %13 = vector.load %arg3[%c0_9, %c0_10, %c0_11] : memref<1x128x128xf32, #tpu.memory_space<vmem>>, vector<1x128x128xf32>
      %c0_12 = arith.constant 0 : index
      %c0_13 = arith.constant 0 : index
      %c0_14 = arith.constant 0 : index
      %14 = vector.load %arg20[%c0_12, %c0_13, %c0_14] : memref<1x128x128xf32, #tpu.memory_space<vmem>>, vector<1x128x128xf32>
      tpu.vector_store %arg20[%c0_12, %c0_13, %c0_14], %13 {strides = array<i32>} : memref<1x128x128xf32, #tpu.memory_space<vmem>>, vector<1x128x128xf32>,
      %15 = tpu.iota {dimensions = array<i32: 1>} : vector<1x128xi32>
      %c1_i32 = arith.constant 1 : i32
      %16 = arith.muli %arg0, %c1_i32 : i32
      %c0_i32_15 = arith.constant 0 : i32
      %17 = arith.addi %16, %c0_i32_15 : i32
      %18 = arith.index_cast %17 : i32 to index
      %19 = memref.load %arg2[%18] : memref<2xi32, #tpu.memory_space<smem>>
      %20 = vector.broadcast %19 : i32 to vector<1x128xi32>
      %21 = arith.cmpi slt, %15, %20 : vector<1x128xi32>
      %cst = arith.constant 0.000000e+00 : f32
      %cst_16 = arith.constant -1.000000e+30 : f32
      %22 = vector.broadcast %cst : f32 to vector<1x128xf32>
      %23 = vector.broadcast %cst_16 : f32 to vector<1x128xf32>
      %24 = arith.select %21, %22, %23 : vector<1x128xi1>, vector<1x128xf32>
      %c0_17 = arith.constant 0 : index
      %c0_18 = arith.constant 0 : index
      %c0_19 = arith.constant 0 : index
      %25 = vector.load %arg21[%c0_17, %c0_18, %c0_19] : memref<1x1x128xf32, #tpu.memory_space<vmem>>, vector<1x1x128xf32>
      %26 = vector.shape_cast %25 : vector<1x1x128xf32> to vector<1x128xf32>
      %27 = vector.shape_cast %24 : vector<1x128xf32> to vector<1x1x128xf32>
      tpu.vector_store %arg21[%c0_17, %c0_18, %c0_19], %27 {strides = array<i32>} : memref<1x1x128xf32, #tpu.memory_space<vmem>>, vector<1x1x128xf32>,
    } else {
    }
    %c0 = arith.constant 0 : index
    %c0_1 = arith.constant 0 : index
    %c0_2 = arith.constant 0 : index
    %3 = vector.load %arg20[%c0, %c0_1, %c0_2] : memref<1x128x128xf32, #tpu.memory_space<vmem>>, vector<1x128x128xf32>
    %4 = vector.shape_cast %3 : vector<1x128x128xf32> to vector<128x128xf32>
    %5 = arith.truncf %4 : vector<128x128xf32> to vector<128x128xbf16>
    %c0_3 = arith.constant 0 : index
    %c0_4 = arith.constant 0 : index
    %c0_5 = arith.constant 0 : index
    %6 = vector.load %arg21[%c0_3, %c0_4, %c0_5] : memref<1x1x128xf32, #tpu.memory_space<vmem>>, vector<1x1x128xf32>
    %c2_i32 = arith.constant 2 : i32
    %7 = arith.cmpi slt, %arg1, %c2_i32 : i32
    %8 = arith.extui %7 : i1 to i32
    %c0_i32_6 = arith.constant 0 : i32
    %9 = arith.cmpi ne, %8, %c0_i32_6 : i32
    scf.if %9 {
      %c0_9 = arith.constant 0 : index
      %c0_10 = arith.constant 0 : index
      %13 = vector.load %arg4[%c0_9, %c0_10] : memref<128x128xbf16, #tpu.memory_space<vmem>>, vector<128x128xbf16>
      %c0_11 = arith.constant 0 : index
      %c0_12 = arith.constant 0 : index
      %14 = vector.load %arg5[%c0_11, %c0_12] : memref<1x128xf32, #tpu.memory_space<vmem>>, vector<1x128xf32>
      %c0_13 = arith.constant 0 : index
      %c0_14 = arith.constant 0 : index
      %15 = vector.load %arg6[%c0_13, %c0_14] : memref<128x128xbf16, #tpu.memory_space<vmem>>, vector<128x128xbf16>
      %c0_15 = arith.constant 0 : index
      %c0_16 = arith.constant 0 : index
      %16 = vector.load %arg7[%c0_15, %c0_16] : memref<1x128xf32, #tpu.memory_space<vmem>>, vector<1x128xf32>
      %c0_17 = arith.constant 0 : index
      %c0_18 = arith.constant 0 : index
      %17 = vector.load %arg8[%c0_17, %c0_18] : memref<128x128xbf16, #tpu.memory_space<vmem>>, vector<128x128xbf16>
      %cst = arith.constant dense<0.000000e+00> : vector<128x128xf32>
      %18 = tpu.matmul %5, %13, %cst {dimension_numbers = #tpu.dot_dimension_numbers<[1], [0], [0], [1], [0, 0, 1, 1], [], []>} : vector<128x128xbf16>, vector<128x128xbf16>, vector<128x128xf32> -> vector<128x128xf32>
      %19 = vector.broadcast %14 : vector<1x128xf32> to vector<128x128xf32>
      %20 = arith.addf %18, %19 : vector<128x128xf32>
      %cst_19 = arith.constant 0.000000e+00 : f32
      %21 = vector.broadcast %cst_19 : f32 to vector<128x128xf32>
      %22 = arith.maximumf %20, %21 : vector<128x128xf32>
      %cst_20 = arith.constant dense<0.000000e+00> : vector<128x128xf32>
      %23 = tpu.matmul %5, %15, %cst_20 {dimension_numbers = #tpu.dot_dimension_numbers<[1], [0], [0], [1], [0, 0, 1, 1], [], []>} : vector<128x128xbf16>, vector<128x128xbf16>, vector<128x128xf32> -> vector<128x128xf32>
      %24 = vector.broadcast %16 : vector<1x128xf32> to vector<128x128xf32>
      %25 = arith.addf %23, %24 : vector<128x128xf32>
      %cst_21 = arith.constant 0.000000e+00 : f32
      %26 = vector.broadcast %cst_21 : f32 to vector<128x128xf32>
      %27 = arith.maximumf %25, %26 : vector<128x128xf32>
      %28 = arith.truncf %22 : vector<128x128xf32> to vector<128x128xbf16>
      %cst_22 = arith.constant dense<0.000000e+00> : vector<128x128xf32>
      %29 = tpu.matmul %28, %17, %cst_22 {dimension_numbers = #tpu.dot_dimension_numbers<[1], [0], [0], [1], [0, 0, 1, 1], [], []>} : vector<128x128xbf16>, vector<128x128xbf16>, vector<128x128xf32> -> vector<128x128xf32>
      %30 = vector.shape_cast %29 : vector<128x128xf32> to vector<1x128x128xf32>
      %31 = arith.truncf %30 : vector<1x128x128xf32> to vector<1x128x128xbf16>
      %32 = vector.shape_cast %27 : vector<128x128xf32> to vector<1x128x128xf32>
      %33 = arith.truncf %32 : vector<1x128x128xf32> to vector<1x128x128xbf16>
      %cst_23 = arith.constant dense<0.000000e+00> : vector<1x128x128xf32>
      %34 = tpu.matmul %31, %33, %cst_23 {dimension_numbers = #tpu.dot_dimension_numbers<[2], [2], [1], [1], [0, 0, 0, 1, 1, 1], [0], [0]>} : vector<1x128x128xbf16>, vector<1x128x128xbf16>, vector<1x128x128xf32> -> vector<1x128x128xf32>
      %35 = vector.broadcast %6 : vector<1x1x128xf32> to vector<1x128x128xf32>
      %36 = arith.addf %34, %35 : vector<1x128x128xf32>
      %cst_24 = arith.constant dense<0xFF800000> : vector<1x128xf32>
      %37 = vector.multi_reduction <maximumf>, %36, %cst_24 [2] : vector<1x128x128xf32> to vector<1x128xf32>
      %38 = vector.shape_cast %37 : vector<1x128xf32> to vector<1x128x1xf32>
      %39 = vector.broadcast %38 : vector<1x128x1xf32> to vector<1x128x128xf32>
      %40 = arith.subf %36, %39 : vector<1x128x128xf32>
      %41 = math.exp %40 : vector<1x128x128xf32>
      %cst_25 = arith.constant dense<0.000000e+00> : vector<1x128xf32>
      %42 = vector.multi_reduction <add>, %41, %cst_25 [2] : vector<1x128x128xf32> to vector<1x128xf32>
      %43 = vector.shape_cast %42 : vector<1x128xf32> to vector<1x128x1xf32>
      %44 = tpu.reciprocal %43 : vector<1x128x1xf32> -> vector<1x128x1xf32>
      %45 = vector.broadcast %44 : vector<1x128x1xf32> to vector<1x128x128xf32>
      %46 = arith.mulf %41, %45 : vector<1x128x128xf32>
      %c0_26 = arith.constant 0 : index
      %c0_27 = arith.constant 0 : index
      %47 = vector.load %arg9[%c0_26, %c0_27] : memref<128x128xbf16, #tpu.memory_space<vmem>>, vector<128x128xbf16>
      %cst_28 = arith.constant dense<0.000000e+00> : vector<128x128xf32>
      %48 = tpu.matmul %5, %47, %cst_28 {dimension_numbers = #tpu.dot_dimension_numbers<[1], [0], [0], [1], [0, 0, 1, 1], [], []>} : vector<128x128xbf16>, vector<128x128xbf16>, vector<128x128xf32> -> vector<128x128xf32>
      %c0_29 = arith.constant 0 : index
      %c0_30 = arith.constant 0 : index
      %49 = vector.load %arg10[%c0_29, %c0_30] : memref<1x128xf32, #tpu.memory_space<vmem>>, vector<1x128xf32>
      %50 = vector.broadcast %49 : vector<1x128xf32> to vector<128x128xf32>
      %51 = arith.addf %48, %50 : vector<128x128xf32>
      %cst_31 = arith.constant 0.000000e+00 : f32
      %52 = vector.broadcast %cst_31 : f32 to vector<128x128xf32>
      %53 = arith.maximumf %51, %52 : vector<128x128xf32>
      %54 = vector.shape_cast %53 : vector<128x128xf32> to vector<1x128x128xf32>
      %55 = arith.truncf %54 : vector<1x128x128xf32> to vector<1x128x128xbf16>
      %56 = arith.truncf %46 : vector<1x128x128xf32> to vector<1x128x128xbf16>
      %cst_32 = arith.constant dense<0.000000e+00> : vector<1x128x128xf32>
      %57 = tpu.matmul %56, %55, %cst_32 {dimension_numbers = #tpu.dot_dimension_numbers<[2], [1], [1], [2], [0, 0, 0, 1, 1, 2], [0], [0]>} : vector<1x128x128xbf16>, vector<1x128x128xbf16>, vector<1x128x128xf32> -> vector<1x128x128xf32>
      %58 = vector.shape_cast %57 : vector<1x128x128xf32> to vector<128x128xf32>
      %59 = arith.truncf %58 : vector<128x128xf32> to vector<128x128xbf16>
      %c0_33 = arith.constant 0 : index
      %c0_34 = arith.constant 0 : index
      %60 = vector.load %arg11[%c0_33, %c0_34] : memref<128x128xbf16, #tpu.memory_space<vmem>>, vector<128x128xbf16>
      %cst_35 = arith.constant dense<0.000000e+00> : vector<128x128xf32>
      %61 = tpu.matmul %59, %60, %cst_35 {dimension_numbers = #tpu.dot_dimension_numbers<[1], [0], [0], [1], [0, 0, 1, 1], [], []>} : vector<128x128xbf16>, vector<128x128xbf16>, vector<128x128xf32> -> vector<128x128xf32>
      %62 = arith.addf %4, %61 : vector<128x128xf32>
      %cst_36 = arith.constant dense<0.000000e+00> : vector<128xf32>
      %63 = vector.multi_reduction <add>, %62, %cst_36 [1] : vector<128x128xf32> to vector<128xf32>
      %64 = vector.shape_cast %63 : vector<128xf32> to vector<128x1xf32>
      %cst_37 = arith.constant 3.125000e-02 : f32
      %65 = vector.broadcast %cst_37 : f32 to vector<128x1xf32>
      %66 = arith.mulf %64, %65 : vector<128x1xf32>
      %67 = vector.broadcast %66 : vector<128x1xf32> to vector<128x128xf32>
      %68 = arith.subf %62, %67 : vector<128x128xf32>
      %69 = tpu.iota {dimensions = array<i32: 1>} : vector<1x128xi32>
      %c32_i32 = arith.constant 32 : i32
      %70 = vector.broadcast %c32_i32 : i32 to vector<1x128xi32>
      %71 = arith.cmpi slt, %69, %70 : vector<1x128xi32>
      %cst_38 = arith.constant 0.000000e+00 : f32
      %72 = vector.shape_cast %71 : vector<1x128xi1> to vector<1x128xi1>
      %73 = vector.broadcast %72 : vector<1x128xi1> to vector<128x128xi1>
      %74 = vector.broadcast %cst_38 : f32 to vector<128x128xf32>
      %75 = arith.select %73, %68, %74 : vector<128x128xi1>, vector<128x128xf32>
      %76 = arith.mulf %75, %75 : vector<128x128xf32>
      %cst_39 = arith.constant dense<0.000000e+00> : vector<128xf32>
      %77 = vector.multi_reduction <add>, %76, %cst_39 [1] : vector<128x128xf32> to vector<128xf32>
      %78 = vector.shape_cast %77 : vector<128xf32> to vector<128x1xf32>
      %cst_40 = arith.constant 3.125000e-02 : f32
      %79 = vector.broadcast %cst_40 : f32 to vector<128x1xf32>
      %80 = arith.mulf %78, %79 : vector<128x1xf32>
      %cst_41 = arith.constant 9.99999974E-6 : f32
      %81 = vector.broadcast %cst_41 : f32 to vector<128x1xf32>
      %82 = arith.addf %80, %81 : vector<128x1xf32>
      %83 = math.rsqrt %82 : vector<128x1xf32>
      %84 = vector.broadcast %83 : vector<128x1xf32> to vector<128x128xf32>
      %85 = arith.mulf %75, %84 : vector<128x128xf32>
      %c0_42 = arith.constant 0 : index
      %c0_43 = arith.constant 0 : index
      %86 = vector.load %arg12[%c0_42, %c0_43] : memref<1x128xf32, #tpu.memory_space<vmem>>, vector<1x128xf32>
      %87 = vector.broadcast %86 : vector<1x128xf32> to vector<128x128xf32>
      %88 = arith.mulf %85, %87 : vector<128x128xf32>
      %c0_44 = arith.constant 0 : index
      %c0_45 = arith.constant 0 : index
      %89 = vector.load %arg13[%c0_44, %c0_45] : memref<1x128xf32, #tpu.memory_space<vmem>>, vector<1x128xf32>
      %90 = vector.broadcast %89 : vector<1x128xf32> to vector<128x128xf32>
      %91 = arith.addf %88, %90 : vector<128x128xf32>
      %92 = vector.shape_cast %91 : vector<128x128xf32> to vector<1x128x128xf32>
      %c0_46 = arith.constant 0 : index
      %c0_47 = arith.constant 0 : index
      %c0_48 = arith.constant 0 : index
      %93 = vector.load %arg20[%c0_46, %c0_47, %c0_48] : memref<1x128x128xf32, #tpu.memory_space<vmem>>, vector<1x128x128xf32>
      tpu.vector_store %arg20[%c0_46, %c0_47, %c0_48], %92 {strides = array<i32>} : memref<1x128x128xf32, #tpu.memory_space<vmem>>, vector<1x128x128xf32>,
    } else {
    }
    %c2_i32_7 = arith.constant 2 : i32
    %10 = arith.cmpi eq, %arg1, %c2_i32_7 : i32
    %11 = arith.extui %10 : i1 to i32
    %c0_i32_8 = arith.constant 0 : i32
    %12 = arith.cmpi ne, %11, %c0_i32_8 : i32
    scf.if %12 {
      %c0_9 = arith.constant 0 : index
      %c0_10 = arith.constant 0 : index
      %13 = vector.load %arg14[%c0_9, %c0_10] : memref<128x128xbf16, #tpu.memory_space<vmem>>, vector<128x128xbf16>
      %c0_11 = arith.constant 0 : index
      %c0_12 = arith.constant 0 : index
      %14 = vector.load %arg15[%c0_11, %c0_12] : memref<1x128xf32, #tpu.memory_space<vmem>>, vector<1x128xf32>
      %c0_13 = arith.constant 0 : index
      %c0_14 = arith.constant 0 : index
      %15 = vector.load %arg16[%c0_13, %c0_14] : memref<128x128xbf16, #tpu.memory_space<vmem>>, vector<128x128xbf16>
      %c0_15 = arith.constant 0 : index
      %c0_16 = arith.constant 0 : index
      %16 = vector.load %arg17[%c0_15, %c0_16] : memref<1x128xf32, #tpu.memory_space<vmem>>, vector<1x128xf32>
      %c0_17 = arith.constant 0 : index
      %c0_18 = arith.constant 0 : index
      %17 = vector.load %arg18[%c0_17, %c0_18] : memref<128x128xbf16, #tpu.memory_space<vmem>>, vector<128x128xbf16>
      %cst = arith.constant dense<0.000000e+00> : vector<128x128xf32>
      %18 = tpu.matmul %5, %13, %cst {dimension_numbers = #tpu.dot_dimension_numbers<[1], [0], [0], [1], [0, 0, 1, 1], [], []>} : vector<128x128xbf16>, vector<128x128xbf16>, vector<128x128xf32> -> vector<128x128xf32>
      %19 = vector.broadcast %14 : vector<1x128xf32> to vector<128x128xf32>
      %20 = arith.addf %18, %19 : vector<128x128xf32>
      %cst_19 = arith.constant 0.000000e+00 : f32
      %21 = vector.broadcast %cst_19 : f32 to vector<128x128xf32>
      %22 = arith.maximumf %20, %21 : vector<128x128xf32>
      %cst_20 = arith.constant dense<0.000000e+00> : vector<128x128xf32>
      %23 = tpu.matmul %5, %15, %cst_20 {dimension_numbers = #tpu.dot_dimension_numbers<[1], [0], [0], [1], [0, 0, 1, 1], [], []>} : vector<128x128xbf16>, vector<128x128xbf16>, vector<128x128xf32> -> vector<128x128xf32>
      %24 = vector.broadcast %16 : vector<1x128xf32> to vector<128x128xf32>
      %25 = arith.addf %23, %24 : vector<128x128xf32>
      %cst_21 = arith.constant 0.000000e+00 : f32
      %26 = vector.broadcast %cst_21 : f32 to vector<128x128xf32>
      %27 = arith.maximumf %25, %26 : vector<128x128xf32>
      %28 = arith.truncf %22 : vector<128x128xf32> to vector<128x128xbf16>
      %cst_22 = arith.constant dense<0.000000e+00> : vector<128x128xf32>
      %29 = tpu.matmul %28, %17, %cst_22 {dimension_numbers = #tpu.dot_dimension_numbers<[1], [0], [0], [1], [0, 0, 1, 1], [], []>} : vector<128x128xbf16>, vector<128x128xbf16>, vector<128x128xf32> -> vector<128x128xf32>
      %30 = vector.shape_cast %29 : vector<128x128xf32> to vector<1x128x128xf32>
      %31 = arith.truncf %30 : vector<1x128x128xf32> to vector<1x128x128xbf16>
      %32 = vector.shape_cast %27 : vector<128x128xf32> to vector<1x128x128xf32>
      %33 = arith.truncf %32 : vector<1x128x128xf32> to vector<1x128x128xbf16>
      %cst_23 = arith.constant dense<0.000000e+00> : vector<1x128x128xf32>
      %34 = tpu.matmul %31, %33, %cst_23 {dimension_numbers = #tpu.dot_dimension_numbers<[2], [2], [1], [1], [0, 0, 0, 1, 1, 1], [0], [0]>} : vector<1x128x128xbf16>, vector<1x128x128xbf16>, vector<1x128x128xf32> -> vector<1x128x128xf32>
      %35 = vector.broadcast %6 : vector<1x1x128xf32> to vector<1x128x128xf32>
      %36 = arith.addf %34, %35 : vector<1x128x128xf32>
      %cst_24 = arith.constant dense<0xFF800000> : vector<1x128xf32>
      %37 = vector.multi_reduction <maximumf>, %36, %cst_24 [2] : vector<1x128x128xf32> to vector<1x128xf32>
      %38 = vector.shape_cast %37 : vector<1x128xf32> to vector<1x128x1xf32>
      %39 = vector.broadcast %38 : vector<1x128x1xf32> to vector<1x128x128xf32>
      %40 = arith.subf %36, %39 : vector<1x128x128xf32>
      %41 = math.exp %40 : vector<1x128x128xf32>
      %cst_25 = arith.constant dense<0.000000e+00> : vector<1x128xf32>
      %42 = vector.multi_reduction <add>, %41, %cst_25 [2] : vector<1x128x128xf32> to vector<1x128xf32>
      %43 = vector.shape_cast %42 : vector<1x128xf32> to vector<1x128x1xf32>
      %44 = tpu.reciprocal %43 : vector<1x128x1xf32> -> vector<1x128x1xf32>
      %45 = vector.broadcast %44 : vector<1x128x1xf32> to vector<1x128x128xf32>
      %46 = arith.mulf %41, %45 : vector<1x128x128xf32>
      %c0_26 = arith.constant 0 : index
      %c0_27 = arith.constant 0 : index
      %c0_28 = arith.constant 0 : index
      %47 = vector.load %arg19[%c0_26, %c0_27, %c0_28] : memref<1x128x128xf32, #tpu.memory_space<vmem>>, vector<1x128x128xf32>
      tpu.vector_store %arg19[%c0_26, %c0_27, %c0_28], %46 {strides = array<i32>} : memref<1x128x128xf32, #tpu.memory_space<vmem>>, vector<1x128x128xf32>,
    } else {
    }
    return
  }
  func.func @transform_0(%arg0: i32, %arg1: i32, %arg2: memref<2xi32, #tpu.memory_space<smem>>) -> (i32, i32, i32) {
    %c0_i32 = arith.constant 0 : i32
    %c0_i32_0 = arith.constant 0 : i32
    %c0_i32_1 = arith.constant 0 : i32
    return %arg0, %c0_i32, %c0_i32_0 : i32, i32, i32
  }
  func.func @transform_1(%arg0: i32, %arg1: i32, %arg2: memref<2xi32, #tpu.memory_space<smem>>) -> (i32, i32) {
    %c0_i32 = arith.constant 0 : i32
    %c0_i32_0 = arith.constant 0 : i32
    %c0_i32_1 = arith.constant 0 : i32
    return %c0_i32, %c0_i32_0 : i32, i32
  }
  func.func @transform_2(%arg0: i32, %arg1: i32, %arg2: memref<2xi32, #tpu.memory_space<smem>>) -> (i32, i32) {
    %c0_i32 = arith.constant 0 : i32
    %c0_i32_0 = arith.constant 0 : i32
    %c0_i32_1 = arith.constant 0 : i32
    return %c0_i32, %c0_i32_0 : i32, i32
  }
  func.func @transform_3(%arg0: i32, %arg1: i32, %arg2: memref<2xi32, #tpu.memory_space<smem>>) -> (i32, i32) {
    %c0_i32 = arith.constant 0 : i32
    %c0_i32_0 = arith.constant 0 : i32
    %c0_i32_1 = arith.constant 0 : i32
    return %c0_i32, %c0_i32_0 : i32, i32
  }
  func.func @transform_4(%arg0: i32, %arg1: i32, %arg2: memref<2xi32, #tpu.memory_space<smem>>) -> (i32, i32) {
    %c0_i32 = arith.constant 0 : i32
    %c0_i32_0 = arith.constant 0 : i32
    %c0_i32_1 = arith.constant 0 : i32
    return %c0_i32, %c0_i32_0 : i32, i32
  }
  func.func @transform_5(%arg0: i32, %arg1: i32, %arg2: memref<2xi32, #tpu.memory_space<smem>>) -> (i32, i32) {
    %c0_i32 = arith.constant 0 : i32
    %c0_i32_0 = arith.constant 0 : i32
    %c0_i32_1 = arith.constant 0 : i32
    return %c0_i32, %c0_i32_0 : i32, i32
  }
  func.func @transform_6(%arg0: i32, %arg1: i32, %arg2: memref<2xi32, #tpu.memory_space<smem>>) -> (i32, i32) {
    %c0_i32 = arith.constant 0 : i32
    %c0_i32_0 = arith.constant 0 : i32
    %c0_i32_1 = arith.constant 0 : i32
    return %c0_i32, %c0_i32_0 : i32, i32
  }
  func.func @transform_7(%arg0: i32, %arg1: i32, %arg2: memref<2xi32, #tpu.memory_space<smem>>) -> (i32, i32) {
    %c0_i32 = arith.constant 0 : i32
    %c0_i32_0 = arith.constant 0 : i32
    %c0_i32_1 = arith.constant 0 : i32
    return %c0_i32, %c0_i32_0 : i32, i32
  }
  func.func @transform_8(%arg0: i32, %arg1: i32, %arg2: memref<2xi32, #tpu.memory_space<smem>>) -> (i32, i32) {
    %c0_i32 = arith.constant 0 : i32
    %c0_i32_0 = arith.constant 0 : i32
    %c0_i32_1 = arith.constant 0 : i32
    return %c0_i32, %c0_i32_0 : i32, i32
  }
  func.func @transform_9(%arg0: i32, %arg1: i32, %arg2: memref<2xi32, #tpu.memory_space<smem>>) -> (i32, i32) {
    %c0_i32 = arith.constant 0 : i32
    %c0_i32_0 = arith.constant 0 : i32
    %c0_i32_1 = arith.constant 0 : i32
    return %c0_i32, %c0_i32_0 : i32, i32
  }
  func.func @transform_10(%arg0: i32, %arg1: i32, %arg2: memref<2xi32, #tpu.memory_space<smem>>) -> (i32, i32) {
    %c0_i32 = arith.constant 0 : i32
    %c0_i32_0 = arith.constant 0 : i32
    %c0_i32_1 = arith.constant 0 : i32
    return %c0_i32, %c0_i32_0 : i32, i32
  }
  func.func @transform_11(%arg0: i32, %arg1: i32, %arg2: memref<2xi32, #tpu.memory_space<smem>>) -> (i32, i32) {
    %c0_i32 = arith.constant 0 : i32
    %c0_i32_0 = arith.constant 0 : i32
    %c0_i32_1 = arith.constant 0 : i32
    return %c0_i32, %c0_i32_0 : i32, i32
  }
  func.func @transform_12(%arg0: i32, %arg1: i32, %arg2: memref<2xi32, #tpu.memory_space<smem>>) -> (i32, i32) {
    %c0_i32 = arith.constant 0 : i32
    %c0_i32_0 = arith.constant 0 : i32
    %c0_i32_1 = arith.constant 0 : i32
    return %c0_i32, %c0_i32_0 : i32, i32
  }
  func.func @transform_13(%arg0: i32, %arg1: i32, %arg2: memref<2xi32, #tpu.memory_space<smem>>) -> (i32, i32) {
    %c0_i32 = arith.constant 0 : i32
    %c0_i32_0 = arith.constant 0 : i32
    %c0_i32_1 = arith.constant 0 : i32
    return %c0_i32, %c0_i32_0 : i32, i32
  }
  func.func @transform_14(%arg0: i32, %arg1: i32, %arg2: memref<2xi32, #tpu.memory_space<smem>>) -> (i32, i32) {
    %c0_i32 = arith.constant 0 : i32
    %c0_i32_0 = arith.constant 0 : i32
    %c0_i32_1 = arith.constant 0 : i32
    return %c0_i32, %c0_i32_0 : i32, i32
  }
  func.func @transform_15(%arg0: i32, %arg1: i32, %arg2: memref<2xi32, #tpu.memory_space<smem>>) -> (i32, i32) {
    %c0_i32 = arith.constant 0 : i32
    %c0_i32_0 = arith.constant 0 : i32
    %c0_i32_1 = arith.constant 0 : i32
    return %c0_i32, %c0_i32_0 : i32, i32
  }
  func.func @transform_16(%arg0: i32, %arg1: i32, %arg2: memref<2xi32, #tpu.memory_space<smem>>) -> (i32, i32, i32) {
    %c0_i32 = arith.constant 0 : i32
    %c0_i32_0 = arith.constant 0 : i32
    %c0_i32_1 = arith.constant 0 : i32
    return %arg0, %c0_i32, %c0_i32_0 : i32, i32, i32
  }
  func.func @transform_17(%arg0: i32, %arg1: i32, %arg2: memref<2xi32, #tpu.memory_space<smem>>) -> (i32, i32, i32) {
    %c0_i32 = arith.constant 0 : i32
    %c0_i32_0 = arith.constant 0 : i32
    %c0_i32_1 = arith.constant 0 : i32
    return %arg0, %c0_i32, %c0_i32_0 : i32, i32, i32
  }
}

module attributes {stable_mosaic.version = 11 : i64} {
  func.func @fused_biaffine_kernel(%arg0: i32, %arg1: i32, %arg2: memref<2xi32, #tpu.memory_space<smem>>, %arg3: memref<1x128x128xf32, #tpu.memory_space<vmem>>, %arg4: memref<128x128xbf16, #tpu.memory_space<vmem>>, %arg5: memref<1x128xf32, #tpu.memory_space<vmem>>, %arg6: memref<128x128xbf16, #tpu.memory_space<vmem>>, %arg7: memref<1x128xf32, #tpu.memory_space<vmem>>, %arg8: memref<128x128xbf16, #tpu.memory_space<vmem>>, %arg9: memref<128x128xbf16, #tpu.memory_space<vmem>>, %arg10: memref<1x128xf32, #tpu.memory_space<vmem>>, %arg11: memref<128x128xbf16, #tpu.memory_space<vmem>>, %arg12: memref<1x128xf32, #tpu.memory_space<vmem>>, %arg13: memref<1x128xf32, #tpu.memory_space<vmem>>, %arg14: memref<128x128xbf16, #tpu.memory_space<vmem>>, %arg15: memref<1x128xf32, #tpu.memory_space<vmem>>, %arg16: memref<128x128xbf16, #tpu.memory_space<vmem>>, %arg17: memref<1x128xf32, #tpu.memory_space<vmem>>, %arg18: memref<128x128xbf16, #tpu.memory_space<vmem>>, %arg19: memref<1x128x128xf32, #tpu.memory_space<vmem>>, %arg20: memref<1x128x128xf32, #tpu.memory_space<vmem>>, %arg21: memref<1x1x128xf32, #tpu.memory_space<vmem>>) attributes {dimension_semantics = [#tpu.dimension_semantics<parallel>, #tpu.dimension_semantics<arbitrary>], iteration_bounds = array<i64: 2, 3>, scalar_prefetch = 1 : i64, scratch_operands = 1 : i64, tpu.core_type = #tpu.core_type<tc>, window_params = [{transform_indices = @transform_0, window_bounds = array<i64: 1, 128, 128>}, {pipeline_mode = #tpu.pipeline_mode<synchronous>, transform_indices = @transform_1, window_bounds = array<i64: 128, 128>}, {pipeline_mode = #tpu.pipeline_mode<synchronous>, transform_indices = @transform_2, window_bounds = array<i64: 1, 128>}, {pipeline_mode = #tpu.pipeline_mode<synchronous>, transform_indices = @transform_3, window_bounds = array<i64: 128, 128>}, {pipeline_mode = #tpu.pipeline_mode<synchronous>, transform_indices = @transform_4, window_bounds = array<i64: 1, 128>}, {pipeline_mode = #tpu.pipeline_mode<synchronous>, transform_indices = @transform_5, window_bounds = array<i64: 128, 128>}, {pipeline_mode = #tpu.pipeline_mode<synchronous>, transform_indices = @transform_6, window_bounds = array<i64: 128, 128>}, {pipeline_mode = #tpu.pipeline_mode<synchronous>, transform_indices = @transform_7, window_bounds = array<i64: 1, 128>}, {pipeline_mode = #tpu.pipeline_mode<synchronous>, transform_indices = @transform_8, window_bounds = array<i64: 128, 128>}, {pipeline_mode = #tpu.pipeline_mode<synchronous>, transform_indices = @transform_9, window_bounds = array<i64: 1, 128>}, {pipeline_mode = #tpu.pipeline_mode<synchronous>, transform_indices = @transform_10, window_bounds = array<i64: 1, 128>}, {pipeline_mode = #tpu.pipeline_mode<synchronous>, transform_indices = @transform_11, window_bounds = array<i64: 128, 128>}, {pipeline_mode = #tpu.pipeline_mode<synchronous>, transform_indices = @transform_12, window_bounds = array<i64: 1, 128>}, {pipeline_mode = #tpu.pipeline_mode<synchronous>, transform_indices = @transform_13, window_bounds = array<i64: 128, 128>}, {pipeline_mode = #tpu.pipeline_mode<synchronous>, transform_indices = @transform_14, window_bounds = array<i64: 1, 128>}, {pipeline_mode = #tpu.pipeline_mode<synchronous>, transform_indices = @transform_15, window_bounds = array<i64: 128, 128>}, {transform_indices = @transform_16, window_bounds = array<i64: 1, 128, 128>}, {transform_indices = @transform_17, window_bounds = array<i64: 1, 128, 128>}]} {
    %c0_i32 = arith.constant 0 : i32
    %0 = arith.cmpi eq, %arg1, %c0_i32 : i32
    %1 = arith.extui %0 : i1 to i32
    %c0_i32_0 = arith.constant 0 : i32
    %2 = arith.cmpi ne, %1, %c0_i32_0 : i32
    scf.if %2 {
      %c0_9 = arith.constant 0 : index
      %c0_10 = arith.constant 0 : index
      %c0_11 = arith.constant 0 : index
      %13 = vector.load %arg3[%c0_9, %c0_10, %c0_11] : memref<1x128x128xf32, #tpu.memory_space<vmem>>, vector<1x128x128xf32>
      %c0_12 = arith.constant 0 : index
      %c0_13 = arith.constant 0 : index
      %c0_14 = arith.constant 0 : index
      %14 = vector.load %arg20[%c0_12, %c0_13, %c0_14] : memref<1x128x128xf32, #tpu.memory_space<vmem>>, vector<1x128x128xf32>
      tpu.vector_store %arg20[%c0_12, %c0_13, %c0_14], %13 {strides = array<i32>} : memref<1x128x128xf32, #tpu.memory_space<vmem>>, vector<1x128x128xf32>,
      %15 = tpu.iota {dimensions = array<i32: 1>} : vector<1x128xi32>
      %c1_i32 = arith.constant 1 : i32
      %16 = arith.muli %arg0, %c1_i32 : i32
      %c0_i32_15 = arith.constant 0 : i32
      %17 = arith.addi %16, %c0_i32_15 : i32
      %18 = arith.index_cast %17 : i32 to index
      %19 = memref.load %arg2[%18] : memref<2xi32, #tpu.memory_space<smem>>
      %20 = vector.broadcast %19 : i32 to vector<1x128xi32>
      %21 = arith.cmpi slt, %15, %20 : vector<1x128xi32>
      %cst = arith.constant 0.000000e+00 : f32
      %cst_16 = arith.constant -1.000000e+30 : f32
      %22 = vector.broadcast %cst : f32 to vector<1x128xf32>
      %23 = vector.broadcast %cst_16 : f32 to vector<1x128xf32>
      %24 = arith.select %21, %22, %23 : vector<1x128xi1>, vector<1x128xf32>
      %c0_17 = arith.constant 0 : index
      %c0_18 = arith.constant 0 : index
      %c0_19 = arith.constant 0 : index
      %25 = vector.load %arg21[%c0_17, %c0_18, %c0_19] : memref<1x1x128xf32, #tpu.memory_space<vmem>>, vector<1x1x128xf32>
      %26 = vector.shape_cast %25 : vector<1x1x128xf32> to vector<1x128xf32>
      %27 = vector.shape_cast %24 : vector<1x128xf32> to vector<1x1x128xf32>
      tpu.vector_store %arg21[%c0_17, %c0_18, %c0_19], %27 {strides = array<i32>} : memref<1x1x128xf32, #tpu.memory_space<vmem>>, vector<1x1x128xf32>,
    } else {
    }
    %c0 = arith.constant 0 : index
    %c0_1 = arith.constant 0 : index
    %c0_2 = arith.constant 0 : index
    %3 = vector.load %arg20[%c0, %c0_1, %c0_2] : memref<1x128x128xf32, #tpu.memory_space<vmem>>, vector<1x128x128xf32>
    %4 = vector.shape_cast %3 : vector<1x128x128xf32> to vector<128x128xf32>
    %5 = arith.truncf %4 : vector<128x128xf32> to vector<128x128xbf16>
    %c0_3 = arith.constant 0 : index
    %c0_4 = arith.constant 0 : index
    %c0_5 = arith.constant 0 : index
    %6 = vector.load %arg21[%c0_3, %c0_4, %c0_5] : memref<1x1x128xf32, #tpu.memory_space<vmem>>, vector<1x1x128xf32>
    %c2_i32 = arith.constant 2 : i32
    %7 = arith.cmpi slt, %arg1, %c2_i32 : i32
    %8 = arith.extui %7 : i1 to i32
    %c0_i32_6 = arith.constant 0 : i32
    %9 = arith.cmpi ne, %8, %c0_i32_6 : i32
    scf.if %9 {
      %c0_9 = arith.constant 0 : index
      %c0_10 = arith.constant 0 : index
      %13 = vector.load %arg4[%c0_9, %c0_10] : memref<128x128xbf16, #tpu.memory_space<vmem>>, vector<128x128xbf16>
      %c0_11 = arith.constant 0 : index
      %c0_12 = arith.constant 0 : index
      %14 = vector.load %arg5[%c0_11, %c0_12] : memref<1x128xf32, #tpu.memory_space<vmem>>, vector<1x128xf32>
      %c0_13 = arith.constant 0 : index
      %c0_14 = arith.constant 0 : index
      %15 = vector.load %arg6[%c0_13, %c0_14] : memref<128x128xbf16, #tpu.memory_space<vmem>>, vector<128x128xbf16>
      %c0_15 = arith.constant 0 : index
      %c0_16 = arith.constant 0 : index
      %16 = vector.load %arg7[%c0_15, %c0_16] : memref<1x128xf32, #tpu.memory_space<vmem>>, vector<1x128xf32>
      %c0_17 = arith.constant 0 : index
      %c0_18 = arith.constant 0 : index
      %17 = vector.load %arg8[%c0_17, %c0_18] : memref<128x128xbf16, #tpu.memory_space<vmem>>, vector<128x128xbf16>
      %cst = arith.constant dense<0.000000e+00> : vector<128x128xf32>
      %18 = tpu.matmul %5, %13, %cst {dimension_numbers = #tpu.dot_dimension_numbers<[1], [0], [0], [1], [0, 0, 1, 1], [], []>} : vector<128x128xbf16>, vector<128x128xbf16>, vector<128x128xf32> -> vector<128x128xf32>
      %19 = vector.broadcast %14 : vector<1x128xf32> to vector<128x128xf32>
      %20 = arith.addf %18, %19 : vector<128x128xf32>
      %cst_19 = arith.constant 0.000000e+00 : f32
      %21 = vector.broadcast %cst_19 : f32 to vector<128x128xf32>
      %22 = arith.maximumf %20, %21 : vector<128x128xf32>
      %cst_20 = arith.constant dense<0.000000e+00> : vector<128x128xf32>
      %23 = tpu.matmul %5, %15, %cst_20 {dimension_numbers = #tpu.dot_dimension_numbers<[1], [0], [0], [1], [0, 0, 1, 1], [], []>} : vector<128x128xbf16>, vector<128x128xbf16>, vector<128x128xf32> -> vector<128x128xf32>
      %24 = vector.broadcast %16 : vector<1x128xf32> to vector<128x128xf32>
      %25 = arith.addf %23, %24 : vector<128x128xf32>
      %cst_21 = arith.constant 0.000000e+00 : f32
      %26 = vector.broadcast %cst_21 : f32 to vector<128x128xf32>
      %27 = arith.maximumf %25, %26 : vector<128x128xf32>
      %28 = arith.truncf %22 : vector<128x128xf32> to vector<128x128xbf16>
      %cst_22 = arith.constant dense<0.000000e+00> : vector<128x128xf32>
      %29 = tpu.matmul %28, %17, %cst_22 {dimension_numbers = #tpu.dot_dimension_numbers<[1], [0], [0], [1], [0, 0, 1, 1], [], []>} : vector<128x128xbf16>, vector<128x128xbf16>, vector<128x128xf32> -> vector<128x128xf32>
      %30 = vector.shape_cast %29 : vector<128x128xf32> to vector<1x128x128xf32>
      %31 = arith.truncf %30 : vector<1x128x128xf32> to vector<1x128x128xbf16>
      %32 = vector.shape_cast %27 : vector<128x128xf32> to vector<1x128x128xf32>
      %33 = arith.truncf %32 : vector<1x128x128xf32> to vector<1x128x128xbf16>
      %cst_23 = arith.constant dense<0.000000e+00> : vector<1x128x128xf32>
      %34 = tpu.matmul %31, %33, %cst_23 {dimension_numbers = #tpu.dot_dimension_numbers<[2], [2], [1], [1], [0, 0, 0, 1, 1, 1], [0], [0]>} : vector<1x128x128xbf16>, vector<1x128x128xbf16>, vector<1x128x128xf32> -> vector<1x128x128xf32>
      %35 = vector.broadcast %6 : vector<1x1x128xf32> to vector<1x128x128xf32>
      %36 = arith.addf %34, %35 : vector<1x128x128xf32>
      %cst_24 = arith.constant dense<0xFF800000> : vector<1x128xf32>
      %37 = vector.multi_reduction <maximumf>, %36, %cst_24 [2] : vector<1x128x128xf32> to vector<1x128xf32>
      %38 = vector.shape_cast %37 : vector<1x128xf32> to vector<1x128x1xf32>
      %39 = vector.broadcast %38 : vector<1x128x1xf32> to vector<1x128x128xf32>
      %40 = arith.subf %36, %39 : vector<1x128x128xf32>
      %41 = math.exp %40 : vector<1x128x128xf32>
      %cst_25 = arith.constant dense<0.000000e+00> : vector<1x128xf32>
      %42 = vector.multi_reduction <add>, %41, %cst_25 [2] : vector<1x128x128xf32> to vector<1x128xf32>
      %43 = vector.shape_cast %42 : vector<1x128xf32> to vector<1x128x1xf32>
      %44 = tpu.reciprocal %43 : vector<1x128x1xf32> -> vector<1x128x1xf32>
      %45 = vector.broadcast %44 : vector<1x128x1xf32> to vector<1x128x128xf32>
      %46 = arith.mulf %41, %45 : vector<1x128x128xf32>
      %c0_26 = arith.constant 0 : index
      %c0_27 = arith.constant 0 : index
      %47 = vector.load %arg9[%c0_26, %c0_27] : memref<128x128xbf16, #tpu.memory_space<vmem>>, vector<128x128xbf16>
      %cst_28 = arith.constant dense<0.000000e+00> : vector<128x128xf32>
      %48 = tpu.matmul %5, %47, %cst_28 {dimension_numbers = #tpu.dot_dimension_numbers<[1], [0], [0], [1], [0, 0, 1, 1], [], []>} : vector<128x128xbf16>, vector<128x128xbf16>, vector<128x128xf32> -> vector<128x128xf32>
      %c0_29 = arith.constant 0 : index
      %c0_30 = arith.constant 0 : index
      %49 = vector.load %arg10[%c0_29, %c0_30] : memref<1x128xf32, #tpu.memory_space<vmem>>, vector<1x128xf32>
      %50 = vector.broadcast %49 : vector<1x128xf32> to vector<128x128xf32>
      %51 = arith.addf %48, %50 : vector<128x128xf32>
      %cst_31 = arith.constant 0.000000e+00 : f32
      %52 = vector.broadcast %cst_31 : f32 to vector<128x128xf32>
      %53 = arith.maximumf %51, %52 : vector<128x128xf32>
      %54 = vector.shape_cast %53 : vector<128x128xf32> to vector<1x128x128xf32>
      %55 = arith.truncf %54 : vector<1x128x128xf32> to vector<1x128x128xbf16>
      %56 = arith.truncf %46 : vector<1x128x128xf32> to vector<1x128x128xbf16>
      %cst_32 = arith.constant dense<0.000000e+00> : vector<1x128x128xf32>
      %57 = tpu.matmul %56, %55, %cst_32 {dimension_numbers = #tpu.dot_dimension_numbers<[2], [1], [1], [2], [0, 0, 0, 1, 1, 2], [0], [0]>} : vector<1x128x128xbf16>, vector<1x128x128xbf16>, vector<1x128x128xf32> -> vector<1x128x128xf32>
      %58 = vector.shape_cast %57 : vector<1x128x128xf32> to vector<128x128xf32>
      %59 = arith.truncf %58 : vector<128x128xf32> to vector<128x128xbf16>
      %c0_33 = arith.constant 0 : index
      %c0_34 = arith.constant 0 : index
      %60 = vector.load %arg11[%c0_33, %c0_34] : memref<128x128xbf16, #tpu.memory_space<vmem>>, vector<128x128xbf16>
      %cst_35 = arith.constant dense<0.000000e+00> : vector<128x128xf32>
      %61 = tpu.matmul %59, %60, %cst_35 {dimension_numbers = #tpu.dot_dimension_numbers<[1], [0], [0], [1], [0, 0, 1, 1], [], []>} : vector<128x128xbf16>, vector<128x128xbf16>, vector<128x128xf32> -> vector<128x128xf32>
      %62 = arith.addf %4, %61 : vector<128x128xf32>
      %cst_36 = arith.constant dense<0.000000e+00> : vector<128xf32>
      %63 = vector.multi_reduction <add>, %62, %cst_36 [1] : vector<128x128xf32> to vector<128xf32>
      %64 = vector.shape_cast %63 : vector<128xf32> to vector<128x1xf32>
      %cst_37 = arith.constant 3.125000e-02 : f32
      %65 = vector.broadcast %cst_37 : f32 to vector<128x1xf32>
      %66 = arith.mulf %64, %65 : vector<128x1xf32>
      %67 = vector.broadcast %66 : vector<128x1xf32> to vector<128x128xf32>
      %68 = arith.subf %62, %67 : vector<128x128xf32>
      %69 = tpu.iota {dimensions = array<i32: 1>} : vector<1x128xi32>
      %c32_i32 = arith.constant 32 : i32
      %70 = vector.broadcast %c32_i32 : i32 to vector<1x128xi32>
      %71 = arith.cmpi slt, %69, %70 : vector<1x128xi32>
      %cst_38 = arith.constant 0.000000e+00 : f32
      %72 = vector.shape_cast %71 : vector<1x128xi1> to vector<1x128xi1>
      %73 = vector.broadcast %72 : vector<1x128xi1> to vector<128x128xi1>
      %74 = vector.broadcast %cst_38 : f32 to vector<128x128xf32>
      %75 = arith.select %73, %68, %74 : vector<128x128xi1>, vector<128x128xf32>
      %76 = arith.mulf %75, %75 : vector<128x128xf32>
      %cst_39 = arith.constant dense<0.000000e+00> : vector<128xf32>
      %77 = vector.multi_reduction <add>, %76, %cst_39 [1] : vector<128x128xf32> to vector<128xf32>
      %78 = vector.shape_cast %77 : vector<128xf32> to vector<128x1xf32>
      %cst_40 = arith.constant 3.125000e-02 : f32
      %79 = vector.broadcast %cst_40 : f32 to vector<128x1xf32>
      %80 = arith.mulf %78, %79 : vector<128x1xf32>
      %cst_41 = arith.constant 9.99999974E-6 : f32
      %81 = vector.broadcast %cst_41 : f32 to vector<128x1xf32>
      %82 = arith.addf %80, %81 : vector<128x1xf32>
      %83 = math.rsqrt %82 : vector<128x1xf32>
      %84 = vector.broadcast %83 : vector<128x1xf32> to vector<128x128xf32>
      %85 = arith.mulf %75, %84 : vector<128x128xf32>
      %c0_42 = arith.constant 0 : index
      %c0_43 = arith.constant 0 : index
      %86 = vector.load %arg12[%c0_42, %c0_43] : memref<1x128xf32, #tpu.memory_space<vmem>>, vector<1x128xf32>
      %87 = vector.broadcast %86 : vector<1x128xf32> to vector<128x128xf32>
      %88 = arith.mulf %85, %87 : vector<128x128xf32>
      %c0_44 = arith.constant 0 : index
      %c0_45 = arith.constant 0 : index
      %89 = vector.load %arg13[%c0_44, %c0_45] : memref<1x128xf32, #tpu.memory_space<vmem>>, vector<1x128xf32>
      %90 = vector.broadcast %89 : vector<1x128xf32> to vector<128x128xf32>
      %91 = arith.addf %88, %90 : vector<128x128xf32>
      %92 = vector.shape_cast %91 : vector<128x128xf32> to vector<1x128x128xf32>
      %c0_46 = arith.constant 0 : index
      %c0_47 = arith.constant 0 : index
      %c0_48 = arith.constant 0 : index
      %93 = vector.load %arg20[%c0_46, %c0_47, %c0_48] : memref<1x128x128xf32, #tpu.memory_space<vmem>>, vector<1x128x128xf32>
      tpu.vector_store %arg20[%c0_46, %c0_47, %c0_48], %92 {strides = array<i32>} : memref<1x128x128xf32, #tpu.memory_space<vmem>>, vector<1x128x128xf32>,
    } else {
    }
    %c2_i32_7 = arith.constant 2 : i32
    %10 = arith.cmpi eq, %arg1, %c2_i32_7 : i32
    %11 = arith.extui %10 : i1 to i32
    %c0_i32_8 = arith.constant 0 : i32
    %12 = arith.cmpi ne, %11, %c0_i32_8 : i32
    scf.if %12 {
      %c0_9 = arith.constant 0 : index
      %c0_10 = arith.constant 0 : index
      %13 = vector.load %arg14[%c0_9, %c0_10] : memref<128x128xbf16, #tpu.memory_space<vmem>>, vector<128x128xbf16>
      %c0_11 = arith.constant 0 : index
      %c0_12 = arith.constant 0 : index
      %14 = vector.load %arg15[%c0_11, %c0_12] : memref<1x128xf32, #tpu.memory_space<vmem>>, vector<1x128xf32>
      %c0_13 = arith.constant 0 : index
      %c0_14 = arith.constant 0 : index
      %15 = vector.load %arg16[%c0_13, %c0_14] : memref<128x128xbf16, #tpu.memory_space<vmem>>, vector<128x128xbf16>
      %c0_15 = arith.constant 0 : index
      %c0_16 = arith.constant 0 : index
      %16 = vector.load %arg17[%c0_15, %c0_16] : memref<1x128xf32, #tpu.memory_space<vmem>>, vector<1x128xf32>
      %c0_17 = arith.constant 0 : index
      %c0_18 = arith.constant 0 : index
      %17 = vector.load %arg18[%c0_17, %c0_18] : memref<128x128xbf16, #tpu.memory_space<vmem>>, vector<128x128xbf16>
      %cst = arith.constant dense<0.000000e+00> : vector<128x128xf32>
      %18 = tpu.matmul %5, %13, %cst {dimension_numbers = #tpu.dot_dimension_numbers<[1], [0], [0], [1], [0, 0, 1, 1], [], []>} : vector<128x128xbf16>, vector<128x128xbf16>, vector<128x128xf32> -> vector<128x128xf32>
      %19 = vector.broadcast %14 : vector<1x128xf32> to vector<128x128xf32>
      %20 = arith.addf %18, %19 : vector<128x128xf32>
      %cst_19 = arith.constant 0.000000e+00 : f32
      %21 = vector.broadcast %cst_19 : f32 to vector<128x128xf32>
      %22 = arith.maximumf %20, %21 : vector<128x128xf32>
      %cst_20 = arith.constant dense<0.000000e+00> : vector<128x128xf32>
      %23 = tpu.matmul %5, %15, %cst_20 {dimension_numbers = #tpu.dot_dimension_numbers<[1], [0], [0], [1], [0, 0, 1, 1], [], []>} : vector<128x128xbf16>, vector<128x128xbf16>, vector<128x128xf32> -> vector<128x128xf32>
      %24 = vector.broadcast %16 : vector<1x128xf32> to vector<128x128xf32>
      %25 = arith.addf %23, %24 : vector<128x128xf32>
      %cst_21 = arith.constant 0.000000e+00 : f32
      %26 = vector.broadcast %cst_21 : f32 to vector<128x128xf32>
      %27 = arith.maximumf %25, %26 : vector<128x128xf32>
      %28 = arith.truncf %22 : vector<128x128xf32> to vector<128x128xbf16>
      %cst_22 = arith.constant dense<0.000000e+00> : vector<128x128xf32>
      %29 = tpu.matmul %28, %17, %cst_22 {dimension_numbers = #tpu.dot_dimension_numbers<[1], [0], [0], [1], [0, 0, 1, 1], [], []>} : vector<128x128xbf16>, vector<128x128xbf16>, vector<128x128xf32> -> vector<128x128xf32>
      %30 = vector.shape_cast %29 : vector<128x128xf32> to vector<1x128x128xf32>
      %31 = arith.truncf %30 : vector<1x128x128xf32> to vector<1x128x128xbf16>
      %32 = vector.shape_cast %27 : vector<128x128xf32> to vector<1x128x128xf32>
      %33 = arith.truncf %32 : vector<1x128x128xf32> to vector<1x128x128xbf16>
      %cst_23 = arith.constant dense<0.000000e+00> : vector<1x128x128xf32>
      %34 = tpu.matmul %31, %33, %cst_23 {dimension_numbers = #tpu.dot_dimension_numbers<[2], [2], [1], [1], [0, 0, 0, 1, 1, 1], [0], [0]>} : vector<1x128x128xbf16>, vector<1x128x128xbf16>, vector<1x128x128xf32> -> vector<1x128x128xf32>
      %35 = vector.broadcast %6 : vector<1x1x128xf32> to vector<1x128x128xf32>
      %36 = arith.addf %34, %35 : vector<1x128x128xf32>
      %cst_24 = arith.constant dense<0xFF800000> : vector<1x128xf32>
      %37 = vector.multi_reduction <maximumf>, %36, %cst_24 [2] : vector<1x128x128xf32> to vector<1x128xf32>
      %38 = vector.shape_cast %37 : vector<1x128xf32> to vector<1x128x1xf32>
      %39 = vector.broadcast %38 : vector<1x128x1xf32> to vector<1x128x128xf32>
      %40 = arith.subf %36, %39 : vector<1x128x128xf32>
      %41 = math.exp %40 : vector<1x128x128xf32>
      %cst_25 = arith.constant dense<0.000000e+00> : vector<1x128xf32>
      %42 = vector.multi_reduction <add>, %41, %cst_25 [2] : vector<1x128x128xf32> to vector<1x128xf32>
      %43 = vector.shape_cast %42 : vector<1x128xf32> to vector<1x128x1xf32>
      %44 = tpu.reciprocal %43 : vector<1x128x1xf32> -> vector<1x128x1xf32>
      %45 = vector.broadcast %44 : vector<1x128x1xf32> to vector<1x128x128xf32>
      %46 = arith.mulf %41, %45 : vector<1x128x128xf32>
      %c0_26 = arith.constant 0 : index
      %c0_27 = arith.constant 0 : index
      %c0_28 = arith.constant 0 : index
      %47 = vector.load %arg19[%c0_26, %c0_27, %c0_28] : memref<1x128x128xf32, #tpu.memory_space<vmem>>, vector<1x128x128xf32>
      tpu.vector_store %arg19[%c0_26, %c0_27, %c0_28], %46 {strides = array<i32>} : memref<1x128x128xf32, #tpu.memory_space<vmem>>, vector<1x128x128xf32>,
    } else {
    }
    return
  }
  func.func @transform_0(%arg0: i32, %arg1: i32, %arg2: memref<2xi32, #tpu.memory_space<smem>>) -> (i32, i32, i32) {
    %c0_i32 = arith.constant 0 : i32
    %c0_i32_0 = arith.constant 0 : i32
    %c0_i32_1 = arith.constant 0 : i32
    return %arg0, %c0_i32, %c0_i32_0 : i32, i32, i32
  }
  func.func @transform_1(%arg0: i32, %arg1: i32, %arg2: memref<2xi32, #tpu.memory_space<smem>>) -> (i32, i32) {
    %c0_i32 = arith.constant 0 : i32
    %c0_i32_0 = arith.constant 0 : i32
    %c0_i32_1 = arith.constant 0 : i32
    return %c0_i32, %c0_i32_0 : i32, i32
  }
  func.func @transform_2(%arg0: i32, %arg1: i32, %arg2: memref<2xi32, #tpu.memory_space<smem>>) -> (i32, i32) {
    %c0_i32 = arith.constant 0 : i32
    %c0_i32_0 = arith.constant 0 : i32
    %c0_i32_1 = arith.constant 0 : i32
    return %c0_i32, %c0_i32_0 : i32, i32
  }
  func.func @transform_3(%arg0: i32, %arg1: i32, %arg2: memref<2xi32, #tpu.memory_space<smem>>) -> (i32, i32) {
    %c0_i32 = arith.constant 0 : i32
    %c0_i32_0 = arith.constant 0 : i32
    %c0_i32_1 = arith.constant 0 : i32
    return %c0_i32, %c0_i32_0 : i32, i32
  }
  func.func @transform_4(%arg0: i32, %arg1: i32, %arg2: memref<2xi32, #tpu.memory_space<smem>>) -> (i32, i32) {
    %c0_i32 = arith.constant 0 : i32
    %c0_i32_0 = arith.constant 0 : i32
    %c0_i32_1 = arith.constant 0 : i32
    return %c0_i32, %c0_i32_0 : i32, i32
  }
  func.func @transform_5(%arg0: i32, %arg1: i32, %arg2: memref<2xi32, #tpu.memory_space<smem>>) -> (i32, i32) {
    %c0_i32 = arith.constant 0 : i32
    %c0_i32_0 = arith.constant 0 : i32
    %c0_i32_1 = arith.constant 0 : i32
    return %c0_i32, %c0_i32_0 : i32, i32
  }
  func.func @transform_6(%arg0: i32, %arg1: i32, %arg2: memref<2xi32, #tpu.memory_space<smem>>) -> (i32, i32) {
    %c0_i32 = arith.constant 0 : i32
    %c0_i32_0 = arith.constant 0 : i32
    %c0_i32_1 = arith.constant 0 : i32
    return %c0_i32, %c0_i32_0 : i32, i32
  }
  func.func @transform_7(%arg0: i32, %arg1: i32, %arg2: memref<2xi32, #tpu.memory_space<smem>>) -> (i32, i32) {
    %c0_i32 = arith.constant 0 : i32
    %c0_i32_0 = arith.constant 0 : i32
    %c0_i32_1 = arith.constant 0 : i32
    return %c0_i32, %c0_i32_0 : i32, i32
  }
  func.func @transform_8(%arg0: i32, %arg1: i32, %arg2: memref<2xi32, #tpu.memory_space<smem>>) -> (i32, i32) {
    %c0_i32 = arith.constant 0 : i32
    %c0_i32_0 = arith.constant 0 : i32
    %c0_i32_1 = arith.constant 0 : i32
    return %c0_i32, %c0_i32_0 : i32, i32
  }
  func.func @transform_9(%arg0: i32, %arg1: i32, %arg2: memref<2xi32, #tpu.memory_space<smem>>) -> (i32, i32) {
    %c0_i32 = arith.constant 0 : i32
    %c0_i32_0 = arith.constant 0 : i32
    %c0_i32_1 = arith.constant 0 : i32
    return %c0_i32, %c0_i32_0 : i32, i32
  }
  func.func @transform_10(%arg0: i32, %arg1: i32, %arg2: memref<2xi32, #tpu.memory_space<smem>>) -> (i32, i32) {
    %c0_i32 = arith.constant 0 : i32
    %c0_i32_0 = arith.constant 0 : i32
    %c0_i32_1 = arith.constant 0 : i32
    return %c0_i32, %c0_i32_0 : i32, i32
  }
  func.func @transform_11(%arg0: i32, %arg1: i32, %arg2: memref<2xi32, #tpu.memory_space<smem>>) -> (i32, i32) {
    %c0_i32 = arith.constant 0 : i32
    %c0_i32_0 = arith.constant 0 : i32
    %c0_i32_1 = arith.constant 0 : i32
    return %c0_i32, %c0_i32_0 : i32, i32
  }
  func.func @transform_12(%arg0: i32, %arg1: i32, %arg2: memref<2xi32, #tpu.memory_space<smem>>) -> (i32, i32) {
    %c0_i32 = arith.constant 0 : i32
    %c0_i32_0 = arith.constant 0 : i32
    %c0_i32_1 = arith.constant 0 : i32
    return %c0_i32, %c0_i32_0 : i32, i32
  }
  func.func @transform_13(%arg0: i32, %arg1: i32, %arg2: memref<2xi32, #tpu.memory_space<smem>>) -> (i32, i32) {
    %c0_i32 = arith.constant 0 : i32
    %c0_i32_0 = arith.constant 0 : i32
    %c0_i32_1 = arith.constant 0 : i32
    return %c0_i32, %c0_i32_0 : i32, i32
  }
  func.func @transform_14(%arg0: i32, %arg1: i32, %arg2: memref<2xi32, #tpu.memory_space<smem>>) -> (i32, i32) {
    %c0_i32 = arith.constant 0 : i32
    %c0_i32_0 = arith.constant 0 : i32
    %c0_i32_1 = arith.constant 0 : i32
    return %c0_i32, %c0_i32_0 : i32, i32
  }
  func.func @transform_15(%arg0: i32, %arg1: i32, %arg2: memref<2xi32, #tpu.memory_space<smem>>) -> (i32, i32) {
    %c0_i32 = arith.constant 0 : i32
    %c0_i32_0 = arith.constant 0 : i32
    %c0_i32_1 = arith.constant 0 : i32
    return %c0_i32, %c0_i32_0 : i32, i32
  }
  func.func @transform_16(%arg0: i32, %arg1: i32, %arg2: memref<2xi32, #tpu.memory_space<smem>>) -> (i32, i32, i32) {
    %c0_i32 = arith.constant 0 : i32
    %c0_i32_0 = arith.constant 0 : i32
    %c0_i32_1 = arith.constant 0 : i32
    return %arg0, %c0_i32, %c0_i32_0 : i32, i32, i32
  }
  func.func @transform_17(%arg0: i32, %arg1: i32, %arg2: memref<2xi32, #tpu.memory_space<smem>>) -> (i32, i32, i32) {
    %c0_i32 = arith.constant 0 : i32
    %c0_i32_0 = arith.constant 0 : i32
    %c0_i32_1 = arith.constant 0 : i32
    return %arg0, %c0_i32, %c0_i32_0 : i32, i32, i32
  }
}

</mosaic_0001>

<bundles_post_ra>
// kernel: tpu_custom_call.1
= control target key start
LH: loop header
LB: loop body
LE: loop exit
PB: predicated region body
PF: predicated region fallthrough
CT: control target
= control target key end

     0   :  { %s6741_s0 = inlined_call_operand.hbm [shape: s32[2], index: 0, kind: input, shape index: {}]   ;;  %s6742_s1 = inlined_call_operand.hbm [shape: f32[2,128,128], index: 1, kind: input, shape index: {}]   ;;  %s6743_s2 = inlined_call_operand.hbm [shape: bf16[128,128], index: 2, kind: input, shape index: {}]   ;;  %s6744_s3 = inlined_call_operand.hbm [shape: f32[1,128], index: 3, kind: input, shape index: {}]   ;;  %s6745_s4 = inlined_call_operand.hbm [shape: bf16[128,128], index: 4, kind: input, shape index: {}]   ;;  %s6746_s5 = inlined_call_operand.hbm [shape: f32[1,128], index: 5, kind: input, shape index: {}]   ;;  %s6747_s6 = inlined_call_operand.hbm [shape: bf16[128,128], index: 6, kind: input, shape index: {}]   ;;  %s6748_s7 = inlined_call_operand.hbm [shape: bf16[128,128], index: 7, kind: input, shape index: {}]   ;;  %s6749_s8 = inlined_call_operand.hbm [shape: f32[1,128], index: 8, kind: input, shape index: {}]   ;;  %s6750_s9 = inlined_call_operand.hbm [shape: bf16[128,128], index: 9, kind: input, shape index: {}]   ;;  %s6751_s10 = inlined_call_operand.hbm [shape: f32[1,128], index: 10, kind: input, shape index: {}]   ;;  %s6752_s11 = inlined_call_operand.hbm [shape: f32[1,128], index: 11, kind: input, shape index: {}]   ;;  %s6753_s12 = inlined_call_operand.hbm [shape: bf16[128,128], index: 12, kind: input, shape index: {}]   ;;  %s6754_s13 = inlined_call_operand.hbm [shape: f32[1,128], index: 13, kind: input, shape index: {}]   ;;  %s6755_s14 = inlined_call_operand.hbm [shape: bf16[128,128], index: 14, kind: input, shape index: {}]   ;;  %s6756_s15 = inlined_call_operand.hbm [shape: f32[1,128], index: 15, kind: input, shape index: {}]   ;;  %s6757_s16 = inlined_call_operand.hbm [shape: bf16[128,128], index: 16, kind: input, shape index: {}]   ;;  %s6758_s17 = inlined_call_operand.hbm [shape: f32[2,128,128], index: 17, kind: output, shape index: {0}]   ;;  %s6759_s18 = inlined_call_operand.hbm [shape: f32[2,128,128], index: 18, kind: output, shape index: {1}]  }
   0x1   :  { %6781 = sst [smem:[#allocation55_spill]] %s6741_s0 }
   0x2   :  { %6782 = sst [smem:[#allocation56_spill]] %s6742_s1  ;;  %s6794_s29 = sld [smem:[#allocation55_spill]] }
   0x3   :  { %6783 = sst [smem:[#allocation57_spill]] %s6743_s2 }
   0x4   :  { %6784 = sst [smem:[#allocation58_spill]] %s6744_s3 }
   0x5   :  { %6785 = sst [smem:[#allocation59_spill]] %s6745_s4 }
   0x6   :  { %6786 = sst [smem:[#allocation60_spill]] %s6746_s5 }
   0x7   :  { %6787 = sst [smem:[#allocation61_spill]] %s6747_s6 }
   0x8   :  { %6788 = sst [smem:[#allocation62_spill]] %s6748_s7 }
   0x9   :  { %6789 = sst [smem:[#allocation63_spill]] %s6749_s8 }
   0xa   :  { %6790 = sst [smem:[#allocation64_spill]] %s6750_s9 }
   0xb   :  { %6791 = sst [smem:[#allocation65_spill]] %s6752_s11  ;;  %s4647_s11 = scalar_lea.hbm %s6794_s29, 16 }
   0xc   :  { %6792 = sst [smem:[#allocation66_spill]] %s6758_s17  ;;  %p4648_p0 = scmp.ne.s32.totalorder %s6794_s29, %s4647_s11 }
   0xd   :  { %6793 = sst [smem:[#allocation67_spill]] %s6759_s18  ;;  %p4651_p1 = scmp.lt.u32.totalorder %s4647_s11, %s6794_s29 }
   0xf   :  { %p4653_p2 = pnand %p4651_p1, %p4648_p0 }
  0x11   :  { %4656 = shalt.err (!%p4653_p2)  }
  0x12   :  { %s5273_s20 = smov [#allocation4]  }
  0x13   :  { %25 = dma.hbm_to_smem %s6794_s29, 16, %s5273_s20, [#allocation3] }
  0x14   :  { %5195 = dma.done.wait [#allocation3], 16 }
  0x15   :  { %5196 = vsyncadd [#allocation3], 4294967280 }
  0x16   :  { %27 = sfence }
  0x17   :  { %28 = vsyncpa [#allocation6], 0 }
  0x18   :  { %30 = vsyncpa [#allocation6 + $0x1], 0 }
  0x19   :  { %31 = vsyncpa [#allocation9], 0 }
  0x1a   :  { %32 = vsyncpa [#allocation12], 0 }
  0x1b   :  { %33 = vsyncpa [#allocation15], 0 }
  0x1c   :  { %34 = vsyncpa [#allocation18], 0 }
  0x1d   :  { %35 = vsyncpa [#allocation21], 0 }
  0x1e   :  { %36 = vsyncpa [#allocation24], 0 }
  0x1f   :  { %37 = vsyncpa [#allocation27], 0 }
  0x20   :  { %38 = vsyncpa [#allocation30], 0 }
  0x21   :  { %39 = vsyncpa [#allocation7], 0 }
  0x22   :  { %41 = vsyncpa [#allocation7 + $0x1], 0 }
  0x23   :  { %42 = vsyncpa [#allocation33], 0 }
  0x24   :  { %44 = vsyncpa [#allocation33 + $0x1], 0  ;;  %s5406_s11 = smov 0   ;;  %s5408_s2 = smov 0  }
  0x25   :  { %s5410_s23 = smov 0   ;;  %s5412_s24 = smov 0  }
  0x26   :  { %s5414_s25 = smov 0   ;;  %s5416_s26 = smov 0  }
  0x27   :  { %s5418_s27 = smov 0   ;;  %s5420_s28 = smov 0  }
  0x28 LB: > { %6795 = sst [smem:[#allocation46_spill]] %s5243_s11  ;;  %s6764_s29 = sadd.s32 4294967295, %s5271_s28   ;;  %s5271_s28 = sphi %s5420_s28, %s50_s28   ;;  %s5267_s27 = sphi %s5418_s27, %s6853_s27   ;;  %s5263_s26 = sphi %s5416_s26, %s6852_s26   ;;  %s5259_s25 = sphi %s5414_s25, %s6850_s25   ;;  %s5255_s24 = sphi %s5412_s24, %s6849_s24   ;;  %s5251_s23 = sphi %s5410_s23, %s6851_s23   ;;  %s5247_s2 = sphi %s5408_s2, %s6848_s2   ;;  %s5243_s11 = sphi %s5406_s11, %s6847_s11  }
  0x29   : > { %6796 = sst [smem:[#allocation47_spill]] %s5247_s2  ;;  %p3529_p3 = scmp.ge.s32.totalorder %s5271_s28, 1 }
  0x2a   : > { %6797 = sst [smem:[#allocation48_spill]] %s5251_s23  ;;  %p5450_p4 = scmp.eq.s32.totalorder %s6764_s29, 0 }
  0x2b   : > { %6798 = sst [smem:[#allocation49_spill]] %s5255_s24  ;;  %p460_p5 = scmp.lt.s32.totalorder %s5271_s28, 7 }
  0x2c   : > { %6799 = sst [smem:[#allocation50_spill]] %s5259_s25  ;;  %s5274_s19 = smov [#allocation8]  }
  0x2d   : > { %6800 = sst [smem:[#allocation51_spill]] %s5263_s26  ;;  %p5455_p6 = pnand %p3529_p3, %p460_p5 }
  0x2e   : > { %6801 = sst [smem:[#allocation52_spill]] %s5267_s27  ;;  %s472_s1 = sshll.u32 %s5274_s19, 4  ;;  %s5459_s1 = int_to_ptr.vmem [resolvable:$true] %s472_s1 }
  0x2f   : > { %s6802_s30 = scalar_select %p5450_p4, 1, 0 }
  0x30   : > { %s6804_s0 = scalar_select %p5455_p6, 1, 0 }
  0x31   : > { %6803 = sst [smem:[#allocation53_spill]] %s6802_s30  ;;  %p4247_p7 = pneg %p5455_p6 }
  0x32   : > { %6805 = sst [smem:[#allocation54_spill]] %s6804_s0  ;;  %s5275_s21 = smov [#allocation11]  }
  0x33   : > { %p5465_p8 = pnand %p4247_p7, %p5450_p4  ;;  %s496_s22 = sshll.u32 %s5275_s21, 4  ;;  %s5469_s22 = int_to_ptr.vmem [resolvable:$true] %s496_s22 }
  0x34   : > { %s5276_s29 = smov [#allocation14]   ;;  %s6807_s19 = sld [smem:[#allocation57_spill]] }
  0x35   : > { %s5471_s18 = sshll.u32 %s5276_s29, 4  ;;  %p5481_p10 = pneg %p5465_p8  ;;  %s521_s18 = int_to_ptr.vmem [resolvable:$true] %s5471_s18 }
  0x3a   : > { %s4657_s24 = scalar_lea.hbm %s6807_s19, 1024 }
  0x3b   : > { %p4658_p9 = scmp.ne.s32.totalorder %s6807_s19, %s4657_s24  ;;  %p4664_p13 = scmp.lt.u32.totalorder %s4657_s24, %s6807_s19 }
  0x3d   : > { %p4660_p11 = pnand %p5481_p10, %p4658_p9 }
  0x3f   : > { %p4661_p12 = pneg %p4660_p11 }
  0x41   : > { %p4666_p0 = pnand %p4664_p13, %p4661_p12 }
  0x43   : > { %4669 = shalt.err (!%p4666_p0)
}
  0x44   : > { %s4670_s17 = scalar_lea.vmem %s5459_s1, 1024  ;;  %p4678_p5 = scmp.lt.s32.totalorder %s5459_s1, %s5459_s1 }
  0x45   : > { %p4671_p1 = scmp.ne.s32.totalorder %s5459_s1, %s4670_s17  ;;  %p4679_p7 = scmp.lt.s32.totalorder %s4670_s17, %s4670_s17 }
  0x47   : > { %p4673_p2 = pnand %p4671_p1, %p5481_p10  ;;  %p4680_p9 = por %p4679_p7, %p4678_p5 }
  0x49   : > { %p4674_p3 = pneg %p4673_p2 }
  0x4b   : > { %p4681_p11 = pnand %p4680_p9, %p4674_p3 }
  0x4d   : > { %4684 = shalt.err (!%p4681_p11)
}
  0x4e   : > { %s5277_s11 = smov 64   ;;  %s5278_s24 = smov 4  }
  0x4f   : > { %4250 = dma.hbm_to_vmem [thread:$0]  (!%p5465_p8), %s6807_s19, 1024, %s5459_s1, [#allocation9], %s5277_s11, %s5277_s11, %s5278_s24  }
  0x50   : > { %s6809_s4 = sld [smem:[#allocation59_spill]] }
  0x56   : > { %s4685_s17 = scalar_lea.hbm %s6809_s4, 1024 }
  0x57   : > { %p4686_p12 = scmp.ne.s32.totalorder %s6809_s4, %s4685_s17  ;;  %p4692_p1 = scmp.lt.u32.totalorder %s4685_s17, %s6809_s4 }
  0x59   : > { %p4688_p13 = pnand %p4686_p12, %p5481_p10 }
  0x5b   : > { %p4689_p0 = pneg %p4688_p13 }
  0x5d   : > { %p4694_p2 = pnand %p4692_p1, %p4689_p0 }
  0x5f   : > { %4697 = shalt.err (!%p4694_p2)
}
  0x60   : > { %s4698_s1 = scalar_lea.vmem %s5469_s22, 1024  ;;  %p4706_p9 = scmp.lt.s32.totalorder %s5469_s22, %s5469_s22 }
  0x61   : > { %p4699_p3 = scmp.ne.s32.totalorder %s5469_s22, %s4698_s1  ;;  %p4707_p11 = scmp.lt.s32.totalorder %s4698_s1, %s4698_s1 }
  0x63   : > { %p4701_p5 = pnand %p4699_p3, %p5481_p10  ;;  %p4708_p12 = por %p4707_p11, %p4706_p9 }
  0x65   : > { %p4702_p7 = pneg %p4701_p5 }
  0x67   : > { %p4709_p13 = pnand %p4708_p12, %p4702_p7 }
  0x69   : > { %4712 = shalt.err (!%p4709_p13)
}
  0x6a   : > { %4256 = dma.hbm_to_vmem [thread:$0]  (!%p5465_p8), %s6809_s4, 1024, %s5469_s22, [#allocation12], %s5277_s11, %s5277_s11, %s5278_s24  }
  0x6b   : > { %s6810_s6 = sld [smem:[#allocation61_spill]] }
  0x71   : > { %s4713_s25 = scalar_lea.hbm %s6810_s6, 1024 }
  0x72   : > { %p4714_p0 = scmp.ne.s32.totalorder %s6810_s6, %s4713_s25  ;;  %p4720_p3 = scmp.lt.u32.totalorder %s4713_s25, %s6810_s6 }
  0x74   : > { %p4716_p1 = pnand %p4714_p0, %p5481_p10 }
  0x76   : > { %p4717_p2 = pneg %p4716_p1 }
  0x78   : > { %p4722_p5 = pnand %p4720_p3, %p4717_p2 }
  0x7a   : > { %4725 = shalt.err (!%p4722_p5)
}
  0x7b   : > { %s4726_s1 = scalar_lea.vmem %s521_s18, 1024  ;;  %p4734_p12 = scmp.lt.s32.totalorder %s521_s18, %s521_s18 }
  0x7c   : > { %p4727_p7 = scmp.ne.s32.totalorder %s521_s18, %s4726_s1  ;;  %p4735_p13 = scmp.lt.s32.totalorder %s4726_s1, %s4726_s1 }
  0x7e   : > { %p4729_p9 = pnand %p4727_p7, %p5481_p10  ;;  %p4736_p6 = por %p4735_p13, %p4734_p12 }
  0x80   : > { %p4730_p11 = pneg %p4729_p9 }
  0x82   : > { %p4737_p4 = pnand %p4736_p6, %p4730_p11 }
  0x84   : > { %4740 = shalt.err (!%p4737_p4)
}
  0x85   : > { %4262 = dma.hbm_to_vmem [thread:$0]  (!%p5465_p8), %s6810_s6, 1024, %s521_s18, [#allocation15], %s5277_s11, %s5277_s11, %s5278_s24  }
  0x86   : > { %s5279_s23 = smov [#allocation17]   ;;  %s5280_s27 = smov [#allocation20]  }
  0x87   : > { %s547_s26 = sshll.u32 %s5279_s23, 4  ;;  %s571_s25 = sshll.u32 %s5280_s27, 4  ;;  %s548_s26 = int_to_ptr.vmem [resolvable:$true] %s547_s26  ;;  %s572_s25 = int_to_ptr.vmem [resolvable:$true] %s571_s25 }
  0x88   : > { %s6811_s8 = sld [smem:[#allocation63_spill]] }
  0x8e   : > { %s4741_s29 = scalar_lea.hbm %s6811_s8, 16 }
  0x8f   : > { %p4742_p4 = scmp.ne.s32.totalorder %s6811_s8, %s4741_s29  ;;  %p4748_p1 = scmp.lt.u32.totalorder %s4741_s29, %s6811_s8 }
  0x91   : > { %p4744_p6 = pnand %p4742_p4, %p5481_p10 }
  0x93   : > { %p4745_p0 = pneg %p4744_p6 }
  0x95   : > { %p4750_p2 = pnand %p4748_p1, %p4745_p0 }
  0x97   : > { %4753 = shalt.err (!%p4750_p2)
}
  0x98   : > { %s4754_s18 = scalar_lea.vmem %s548_s26, 16  ;;  %s4761_s2 = scalar_lea.vmem %s548_s26, 32 }
  0x99   : > { %p4755_p3 = scmp.ne.s32.totalorder %s548_s26, %s4754_s18  ;;  %p4762_p9 = scmp.lt.s32.totalorder %s548_s26, %s548_s26 }
  0x9a   : > { %p4763_p11 = scmp.lt.s32.totalorder %s4761_s2, %s4754_s18 }
  0x9b   : > { %p4757_p5 = pnand %p4755_p3, %p5481_p10 }
  0x9c   : > { %p4764_p12 = por %p4763_p11, %p4762_p9 }
  0x9d   : > { %p4758_p7 = pneg %p4757_p5 }
  0x9f   : > { %p4765_p13 = pnand %p4764_p12, %p4758_p7 }
  0xa1   : > { %4768 = shalt.err (!%p4765_p13)
}
  0xa2   : > { %4268 = dma.hbm_to_vmem [thread:$0]  (!%p5465_p8), %s6811_s8, 16, %s548_s26, [#allocation18]  }
  0xa3   : > { %s4769_s21 = scalar_lea.hbm %s6751_s10, 16 }
  0xa4   : > { %p4770_p4 = scmp.ne.s32.totalorder %s6751_s10, %s4769_s21  ;;  %p4776_p1 = scmp.lt.u32.totalorder %s4769_s21, %s6751_s10 }
  0xa6   : > { %p4772_p6 = pnand %p4770_p4, %p5481_p10 }
  0xa8   : > { %p4773_p0 = pneg %p4772_p6 }
  0xaa   : > { %p4778_p2 = pnand %p4776_p1, %p4773_p0 }
  0xac   : > { %4781 = shalt.err (!%p4778_p2)
}
  0xad   : > { %s4782_s18 = scalar_lea.vmem %s572_s25, 16  ;;  %s4789_s26 = scalar_lea.vmem %s572_s25, 32 }
  0xae   : > { %p4783_p3 = scmp.ne.s32.totalorder %s572_s25, %s4782_s18  ;;  %p4790_p9 = scmp.lt.s32.totalorder %s572_s25, %s572_s25 }
  0xaf   : > { %p4791_p11 = scmp.lt.s32.totalorder %s4789_s26, %s4782_s18 }
  0xb0   : > { %p4785_p5 = pnand %p4783_p3, %p5481_p10 }
  0xb1   : > { %p4792_p12 = por %p4791_p11, %p4790_p9 }
  0xb2   : > { %p4786_p7 = pneg %p4785_p5 }
  0xb4   : > { %p4793_p13 = pnand %p4792_p12, %p4786_p7 }
  0xb6   : > { %4796 = shalt.err (!%p4793_p13)
}
  0xb7   : > { %4274 = dma.hbm_to_vmem [thread:$0]  (!%p5465_p8), %s6751_s10, 16, %s572_s25, [#allocation21]  }
  0xb8   : > { %s5281_s27 = smov [#allocation23]   ;;  %s5282_s0 = smov [#allocation26]  }
  0xb9   : > { %s592_s4 = sshll.u32 %s5281_s27, 4  ;;  %s616_s21 = sshll.u32 %s5282_s0, 4  ;;  %s593_s4 = int_to_ptr.vmem [resolvable:$true] %s592_s4  ;;  %s617_s21 = int_to_ptr.vmem [resolvable:$true] %s616_s21 }
  0xba   : > { %s4797_s1 = scalar_lea.hbm %s6753_s12, 1024 }
  0xbb   : > { %p4798_p4 = scmp.ne.s32.totalorder %s6753_s12, %s4797_s1  ;;  %p4804_p1 = scmp.lt.u32.totalorder %s4797_s1, %s6753_s12 }
  0xbd   : > { %p4800_p6 = pnand %p4798_p4, %p5481_p10 }
  0xbf   : > { %p4801_p0 = pneg %p4800_p6 }
  0xc1   : > { %p4806_p2 = pnand %p4804_p1, %p4801_p0 }
  0xc3   : > { %4809 = shalt.err (!%p4806_p2)
}
  0xc4   : > { %s4810_s25 = scalar_lea.vmem %s593_s4, 1024  ;;  %p4818_p9 = scmp.lt.s32.totalorder %s593_s4, %s593_s4 }
  0xc5   : > { %p4811_p3 = scmp.ne.s32.totalorder %s593_s4, %s4810_s25  ;;  %p4819_p11 = scmp.lt.s32.totalorder %s4810_s25, %s4810_s25 }
  0xc7   : > { %p4813_p5 = pnand %p4811_p3, %p5481_p10  ;;  %p4820_p12 = por %p4819_p11, %p4818_p9 }
  0xc9   : > { %p4814_p7 = pneg %p4813_p5 }
  0xcb   : > { %p4821_p13 = pnand %p4820_p12, %p4814_p7 }
  0xcd   : > { %4824 = shalt.err (!%p4821_p13)
}
  0xce   : > { %4280 = dma.hbm_to_vmem [thread:$0]  (!%p5465_p8), %s6753_s12, 1024, %s593_s4, [#allocation24], %s5277_s11, %s5277_s11, %s5278_s24  }
  0xcf   : > { %s4825_s17 = scalar_lea.hbm %s6755_s14, 1024 }
  0xd0   : > { %p4826_p4 = scmp.ne.s32.totalorder %s6755_s14, %s4825_s17  ;;  %p4832_p1 = scmp.lt.u32.totalorder %s4825_s17, %s6755_s14 }
  0xd2   : > { %p4828_p6 = pnand %p4826_p4, %p5481_p10 }
  0xd4   : > { %p4829_p0 = pneg %p4828_p6 }
  0xd6   : > { %p4834_p2 = pnand %p4832_p1, %p4829_p0 }
  0xd8   : > { %4837 = shalt.err (!%p4834_p2)
}
  0xd9   : > { %s4838_s2 = scalar_lea.vmem %s617_s21, 1024  ;;  %p4846_p9 = scmp.lt.s32.totalorder %s617_s21, %s617_s21 }
  0xda   : > { %p4839_p3 = scmp.ne.s32.totalorder %s617_s21, %s4838_s2  ;;  %p4847_p11 = scmp.lt.s32.totalorder %s4838_s2, %s4838_s2 }
  0xdc   : > { %p4841_p5 = pnand %p4839_p3, %p5481_p10  ;;  %p4848_p12 = por %p4847_p11, %p4846_p9 }
  0xde   : > { %p4842_p7 = pneg %p4841_p5 }
  0xe0   : > { %p4849_p13 = pnand %p4848_p12, %p4842_p7 }
  0xe2   : > { %4852 = shalt.err (!%p4849_p13)
}
  0xe3   : > { %4286 = dma.hbm_to_vmem [thread:$0]  (!%p5465_p8), %s6755_s14, 1024, %s617_s21, [#allocation27], %s5277_s11, %s5277_s11, %s5278_s24  }
  0xe4   : > { %s5283_s23 = smov [#allocation10]   ;;  %s5284_s0 = smov [#allocation13]  }
  0xe5   : > { %s486_s27 = sshll.u32 %s5283_s23, 4  ;;  %s510_s29 = sshll.u32 %s5284_s0, 4  ;;  %s487_s27 = int_to_ptr.vmem [resolvable:$true] %s486_s27  ;;  %s511_s29 = int_to_ptr.vmem [resolvable:$true] %s510_s29 }
  0xe6   : > { %s6812_s3 = sld [smem:[#allocation58_spill]] }
  0xec   : > { %s4853_s22 = scalar_lea.hbm %s6812_s3, 16 }
  0xed   : > { %p4854_p4 = scmp.ne.s32.totalorder %s6812_s3, %s4853_s22  ;;  %p4860_p1 = scmp.lt.u32.totalorder %s4853_s22, %s6812_s3 }
  0xef   : > { %p4856_p6 = pnand %p4854_p4, %p5481_p10 }
  0xf1   : > { %p4857_p0 = pneg %p4856_p6 }
  0xf3   : > { %p4862_p2 = pnand %p4860_p1, %p4857_p0 }
  0xf5   : > { %4865 = shalt.err (!%p4862_p2)
}
  0xf6   : > { %s4866_s21 = scalar_lea.vmem %s487_s27, 16  ;;  %s4873_s25 = scalar_lea.vmem %s487_s27, 32 }
  0xf7   : > { %p4867_p3 = scmp.ne.s32.totalorder %s487_s27, %s4866_s21  ;;  %p4874_p9 = scmp.lt.s32.totalorder %s487_s27, %s487_s27 }
  0xf8   : > { %p4875_p11 = scmp.lt.s32.totalorder %s4873_s25, %s4866_s21 }
  0xf9   : > { %p4869_p5 = pnand %p4867_p3, %p5481_p10 }
  0xfa   : > { %p4876_p12 = por %p4875_p11, %p4874_p9 }
  0xfb   : > { %p4870_p7 = pneg %p4869_p5 }
  0xfd   : > { %p4877_p13 = pnand %p4876_p12, %p4870_p7 }
  0xff   : > { %4880 = shalt.err (!%p4877_p13)
}
 0x100   : > { %4253 = dma.hbm_to_vmem [thread:$0]  (!%p5465_p8), %s6812_s3, 16, %s487_s27, [#allocation9]  }
 0x101   : > { %s6813_s5 = sld [smem:[#allocation60_spill]] }
 0x107   : > { %s4881_s22 = scalar_lea.hbm %s6813_s5, 16 }
 0x108   : > { %p4882_p4 = scmp.ne.s32.totalorder %s6813_s5, %s4881_s22  ;;  %p4888_p1 = scmp.lt.u32.totalorder %s4881_s22, %s6813_s5 }
 0x10a   : > { %p4884_p6 = pnand %p4882_p4, %p5481_p10 }
 0x10c   : > { %p4885_p0 = pneg %p4884_p6 }
 0x10e   : > { %p4890_p2 = pnand %p4888_p1, %p4885_p0 }
 0x110   : > { %4893 = shalt.err (!%p4890_p2)
}
 0x111   : > { %s4894_s21 = scalar_lea.vmem %s511_s29, 16  ;;  %s4901_s27 = scalar_lea.vmem %s511_s29, 32 }
 0x112   : > { %p4895_p3 = scmp.ne.s32.totalorder %s511_s29, %s4894_s21  ;;  %p4902_p9 = scmp.lt.s32.totalorder %s511_s29, %s511_s29 }
 0x113   : > { %p4903_p11 = scmp.lt.s32.totalorder %s4901_s27, %s4894_s21 }
 0x114   : > { %p4897_p5 = pnand %p4895_p3, %p5481_p10 }
 0x115   : > { %p4904_p12 = por %p4903_p11, %p4902_p9 }
 0x116   : > { %p4898_p7 = pneg %p4897_p5 }
 0x118   : > { %p4905_p13 = pnand %p4904_p12, %p4898_p7 }
 0x11a   : > { %4908 = shalt.err (!%p4905_p13)
}
 0x11b   : > { %4259 = dma.hbm_to_vmem [thread:$0]  (!%p5465_p8), %s6813_s5, 16, %s511_s29, [#allocation12]  }
 0x11c   : > { %s5285_s0 = smov [#allocation16]   ;;  %s5286_s1 = smov [#allocation19]  }
 0x11d   : > { %s533_s17 = sshll.u32 %s5285_s0, 4  ;;  %s557_s22 = sshll.u32 %s5286_s1, 4  ;;  %s534_s17 = int_to_ptr.vmem [resolvable:$true] %s533_s17  ;;  %s558_s22 = int_to_ptr.vmem [resolvable:$true] %s557_s22 }
 0x11e   : > { %s6814_s7 = sld [smem:[#allocation62_spill]] }
 0x124   : > { %s4909_s2 = scalar_lea.hbm %s6814_s7, 1024 }
 0x125   : > { %p4910_p4 = scmp.ne.s32.totalorder %s6814_s7, %s4909_s2  ;;  %p4916_p1 = scmp.lt.u32.totalorder %s4909_s2, %s6814_s7 }
 0x127   : > { %p4912_p6 = pnand %p4910_p4, %p5481_p10 }
 0x129   : > { %p4913_p0 = pneg %p4912_p6 }
 0x12b   : > { %p4918_p2 = pnand %p4916_p1, %p4913_p0 }
 0x12d   : > { %4921 = shalt.err (!%p4918_p2)
}
 0x12e   : > { %s4922_s29 = scalar_lea.vmem %s534_s17, 1024  ;;  %p4930_p9 = scmp.lt.s32.totalorder %s534_s17, %s534_s17 }
 0x12f   : > { %p4923_p3 = scmp.ne.s32.totalorder %s534_s17, %s4922_s29  ;;  %p4931_p11 = scmp.lt.s32.totalorder %s4922_s29, %s4922_s29 }
 0x131   : > { %p4925_p5 = pnand %p4923_p3, %p5481_p10  ;;  %p4932_p12 = por %p4931_p11, %p4930_p9 }
 0x133   : > { %p4926_p7 = pneg %p4925_p5 }
 0x135   : > { %p4933_p13 = pnand %p4932_p12, %p4926_p7 }
 0x137   : > { %4936 = shalt.err (!%p4933_p13)
}
 0x138   : > { %4265 = dma.hbm_to_vmem [thread:$0]  (!%p5465_p8), %s6814_s7, 1024, %s534_s17, [#allocation15], %s5277_s11, %s5277_s11, %s5278_s24  }
 0x139   : > { %s6815_s9 = sld [smem:[#allocation64_spill]] }
 0x13f   : > { %s4937_s26 = scalar_lea.hbm %s6815_s9, 1024 }
 0x140   : > { %p4938_p4 = scmp.ne.s32.totalorder %s6815_s9, %s4937_s26  ;;  %p4944_p1 = scmp.lt.u32.totalorder %s4937_s26, %s6815_s9 }
 0x142   : > { %p4940_p6 = pnand %p4938_p4, %p5481_p10 }
 0x144   : > { %p4941_p0 = pneg %p4940_p6 }
 0x146   : > { %p4946_p2 = pnand %p4944_p1, %p4941_p0 }
 0x148   : > { %4949 = shalt.err (!%p4946_p2)
}
 0x149   : > { %s4950_s25 = scalar_lea.vmem %s558_s22, 1024  ;;  %p4958_p9 = scmp.lt.s32.totalorder %s558_s22, %s558_s22 }
 0x14a   : > { %p4951_p3 = scmp.ne.s32.totalorder %s558_s22, %s4950_s25  ;;  %p4959_p11 = scmp.lt.s32.totalorder %s4950_s25, %s4950_s25 }
 0x14c   : > { %p4953_p5 = pnand %p4951_p3, %p5481_p10  ;;  %p4960_p12 = por %p4959_p11, %p4958_p9 }
 0x14e   : > { %p4954_p7 = pneg %p4953_p5 }
 0x150   : > { %p4961_p13 = pnand %p4960_p12, %p4954_p7 }
 0x152   : > { %4964 = shalt.err (!%p4961_p13)
}
 0x153   : > { %4271 = dma.hbm_to_vmem [thread:$0]  (!%p5465_p8), %s6815_s9, 1024, %s558_s22, [#allocation18], %s5277_s11, %s5277_s11, %s5278_s24  }
 0x154   : > { %s5287_s23 = smov [#allocation22]   ;;  %s5288_s1 = smov [#allocation25]  }
 0x155   : > { %s582_s0 = sshll.u32 %s5287_s23, 4  ;;  %s606_s18 = sshll.u32 %s5288_s1, 4  ;;  %s583_s0 = int_to_ptr.vmem [resolvable:$true] %s582_s0  ;;  %s607_s18 = int_to_ptr.vmem [resolvable:$true] %s606_s18 }
 0x156   : > { %s6816_s4 = sld [smem:[#allocation65_spill]] }
 0x15c   : > { %s4965_s21 = scalar_lea.hbm %s6816_s4, 16 }
 0x15d   : > { %p4966_p4 = scmp.ne.s32.totalorder %s6816_s4, %s4965_s21  ;;  %p4972_p1 = scmp.lt.u32.totalorder %s4965_s21, %s6816_s4 }
 0x15f   : > { %p4968_p6 = pnand %p4966_p4, %p5481_p10 }
 0x161   : > { %p4969_p0 = pneg %p4968_p6 }
 0x163   : > { %p4974_p2 = pnand %p4972_p1, %p4969_p0 }
 0x165   : > { %4977 = shalt.err (!%p4974_p2)
}
 0x166   : > { %s4978_s22 = scalar_lea.vmem %s583_s0, 16  ;;  %s4985_s29 = scalar_lea.vmem %s583_s0, 32 }
 0x167   : > { %p4979_p3 = scmp.ne.s32.totalorder %s583_s0, %s4978_s22  ;;  %p4986_p9 = scmp.lt.s32.totalorder %s583_s0, %s583_s0 }
 0x168   : > { %p4987_p11 = scmp.lt.s32.totalorder %s4985_s29, %s4978_s22 }
 0x169   : > { %p4981_p5 = pnand %p4979_p3, %p5481_p10 }
 0x16a   : > { %p4988_p12 = por %p4987_p11, %p4986_p9 }
 0x16b   : > { %p4982_p7 = pneg %p4981_p5 }
 0x16d   : > { %p4989_p13 = pnand %p4988_p12, %p4982_p7 }
 0x16f   : > { %4992 = shalt.err (!%p4989_p13)
}
 0x170   : > { %4277 = dma.hbm_to_vmem [thread:$0]  (!%p5465_p8), %s6816_s4, 16, %s583_s0, [#allocation21]  }
 0x171   : > { %s4993_s2 = scalar_lea.hbm %s6754_s13, 16 }
 0x172   : > { %p4994_p4 = scmp.ne.s32.totalorder %s6754_s13, %s4993_s2  ;;  %p5000_p1 = scmp.lt.u32.totalorder %s4993_s2, %s6754_s13 }
 0x174   : > { %p4996_p6 = pnand %p4994_p4, %p5481_p10 }
 0x176   : > { %p4997_p0 = pneg %p4996_p6 }
 0x178   : > { %p5002_p2 = pnand %p5000_p1, %p4997_p0 }
 0x17a   : > { %5005 = shalt.err (!%p5002_p2)
}
 0x17b   : > { %s5006_s22 = scalar_lea.vmem %s607_s18, 16  ;;  %s5013_s0 = scalar_lea.vmem %s607_s18, 32 }
 0x17c   : > { %p5007_p3 = scmp.ne.s32.totalorder %s607_s18, %s5006_s22  ;;  %p5014_p9 = scmp.lt.s32.totalorder %s607_s18, %s607_s18 }
 0x17d   : > { %p5015_p11 = scmp.lt.s32.totalorder %s5013_s0, %s5006_s22 }
 0x17e   : > { %p5009_p5 = pnand %p5007_p3, %p5481_p10 }
 0x17f   : > { %p5016_p12 = por %p5015_p11, %p5014_p9 }
 0x180   : > { %p5010_p7 = pneg %p5009_p5 }
 0x182   : > { %p5017_p13 = pnand %p5016_p12, %p5010_p7 }
 0x184   : > { %5020 = shalt.err (!%p5017_p13)
}
 0x185   : > { %4283 = dma.hbm_to_vmem [thread:$0]  (!%p5465_p8), %s6754_s13, 16, %s607_s18, [#allocation24]  }
 0x186   : > { %s5289_s1 = smov [#allocation28]   ;;  %s5290_s26 = smov [#allocation29]  }
 0x187   : > { %s630_s3 = sshll.u32 %s5289_s1, 4  ;;  %s640_s2 = sshll.u32 %s5290_s26, 4  ;;  %s631_s3 = int_to_ptr.vmem [resolvable:$true] %s630_s3  ;;  %s641_s2 = int_to_ptr.vmem [resolvable:$true] %s640_s2 }
 0x188   : > { %s5021_s25 = scalar_lea.hbm %s6756_s15, 16 }
 0x189   : > { %p5022_p4 = scmp.ne.s32.totalorder %s6756_s15, %s5021_s25  ;;  %p5028_p1 = scmp.lt.u32.totalorder %s5021_s25, %s6756_s15 }
 0x18b   : > { %p5024_p6 = pnand %p5022_p4, %p5481_p10 }
 0x18d   : > { %p5025_p0 = pneg %p5024_p6 }
 0x18f   : > { %p5030_p2 = pnand %p5028_p1, %p5025_p0 }
 0x191   : > { %5033 = shalt.err (!%p5030_p2)
}
 0x192   : > { %s5034_s18 = scalar_lea.vmem %s631_s3, 16  ;;  %s5041_s23 = scalar_lea.vmem %s631_s3, 32 }
 0x193   : > { %p5035_p3 = scmp.ne.s32.totalorder %s631_s3, %s5034_s18  ;;  %p5042_p9 = scmp.lt.s32.totalorder %s631_s3, %s631_s3 }
 0x194   : > { %p5043_p11 = scmp.lt.s32.totalorder %s5041_s23, %s5034_s18 }
 0x195   : > { %p5037_p5 = pnand %p5035_p3, %p5481_p10 }
 0x196   : > { %p5044_p12 = por %p5043_p11, %p5042_p9 }
 0x197   : > { %p5038_p7 = pneg %p5037_p5 }
 0x199   : > { %p5045_p13 = pnand %p5044_p12, %p5038_p7 }
 0x19b   : > { %5048 = shalt.err (!%p5045_p13)
}
 0x19c   : > { %4289 = dma.hbm_to_vmem [thread:$0]  (!%p5465_p8), %s6756_s15, 16, %s631_s3, [#allocation27]  }
 0x19d   : > { %s5049_s25 = scalar_lea.hbm %s6757_s16, 1024 }
 0x19e   : > { %p5050_p4 = scmp.ne.s32.totalorder %s6757_s16, %s5049_s25  ;;  %p5056_p1 = scmp.lt.u32.totalorder %s5049_s25, %s6757_s16 }
 0x1a0   : > { %p5052_p6 = pnand %p5050_p4, %p5481_p10 }
 0x1a2   : > { %p5053_p0 = pneg %p5052_p6 }
 0x1a4   : > { %p5058_p2 = pnand %p5056_p1, %p5053_p0 }
 0x1a6   : > { %5061 = shalt.err (!%p5058_p2)
}
 0x1a7   : > { %s5062_s18 = scalar_lea.vmem %s641_s2, 1024  ;;  %p5070_p9 = scmp.lt.s32.totalorder %s641_s2, %s641_s2 }
 0x1a8   : > { %p5063_p3 = scmp.ne.s32.totalorder %s641_s2, %s5062_s18  ;;  %p5071_p11 = scmp.lt.s32.totalorder %s5062_s18, %s5062_s18 }
 0x1aa   : > { %p5065_p5 = pnand %p5063_p3, %p5481_p10  ;;  %p5072_p12 = por %p5071_p11, %p5070_p9 }
 0x1ac   : > { %p5066_p7 = pneg %p5065_p5 }
 0x1ae   : > { %p5073_p13 = pnand %p5072_p12, %p5066_p7 }
 0x1b0   : > { %5076 = shalt.err (!%p5073_p13)
}
 0x1b1   : > { %s6817_s1 = sld [smem:[#allocation51_spill]]  ;;  %s6818_s26 = sld [smem:[#allocation52_spill]] }
 0x1b2   : > { %s6819_s21 = sld [smem:[#allocation48_spill]]  ;;  %s6820_s30 = sld [smem:[#allocation47_spill]] }
 0x1b3   : > { %s6821_s27 = sld [smem:[#allocation46_spill]]  ;;  %s6822_s25 = sld [smem:[#allocation53_spill]] }
 0x1b4   : > { %4292 = dma.hbm_to_vmem [thread:$0]  (!%p5465_p8), %s6757_s16, 1024, %s641_s2, [#allocation30], %s5277_s11, %s5277_s11, %s5278_s24  }
 0x1b5   : > { %s3528_s20 = sadd.s32 4294967294, %s5271_s28   ;;  %p77_p6 = scmp.eq.s32.totalorder %s5271_s28, 0 }
 0x1b6   : > { %s6824_s11 = sadd.s32 4294967295, %s5271_s28   ;;  %p427_p7 = scmp.eq.s32.totalorder %s3528_s20, 5 }
 0x1b7   : > { %s59_s17 = sadd.s32 1, %s6817_s1  ;;  %s62_s22 = sadd.s32 1, %s6818_s26 }
 0x1b8   : > { %p60_p10 = scmp.ge.s32.totalorder %s59_s17, 3  ;;  %s69_s0 = sadd.s32 1, %s6819_s21 }
 0x1b9   : > { %p76_p4 = scmp.ne.s32.totalorder %s6819_s21, %s6820_s30  ;;  %p82_p8 = scmp.ne.s32.totalorder %s6820_s30, %s6821_s27 }
 0x1ba   : > { %s6855_s17 = smov (%p60_p10, %s59_s17), 0  ;;  %s6857_s22 = smov (!%p60_p10, %s62_s22), %s6818_s26 }
 0x1bb   : > { %p5794_p0 = por %p77_p6, %p76_p4  ;;  %p64_p1 = scmp.ge.s32.totalorder %s6857_s22, 2 }
 0x1bc   : > { %p421_p2 = scmp.eq.s32.totalorder %s6824_s11, 5  ;;  %p6825_p3 = scmp.ne.s32.totalorder %s6822_s25, 0 }
 0x1bd   : > { %s6859_s22 = smov (%p64_p1, %s6857_s22), 0  ;;  %p5814_p11 = por %p427_p7, %p82_p8 }
 0x1be   : > { %p5804_p5 = por %p6825_p3, %p82_p8  ;;  %p5810_p9 = por %p421_p2, %p76_p4 }
 0x1bf   : > { %s6828_s18 = scalar_select %p5814_p11, 1, 0 }
 0x1c0   : > { %s6827_s2 = scalar_select %p5810_p9, 1, 0 }
 0x1c1   : > { %s66_s3 = ssub.s32 %s6818_s26, %s6859_s22  ;;  %p4319_p12 = scmp.lt.s32.totalorder %s5271_s28, 6 }
 0x1c2   : > { %p67_p13 = scmp.eq.s32.totalorder %s66_s3, 0  ;;  %s654_s23 = sand.u32 1, %s6819_s21  }
 0x1c3   : > { %s3546_s1 = sshll.u32 %s654_s23, 7  ;;  %s3650_s30 = sshll.u32 %s6818_s26, 11 }
 0x1c4   : > { %s6861_s21 = smov (!%p67_p13, %s6819_s21), %s69_s0  ;;  %s6829_s20 = sld [smem:[#allocation56_spill]] }
 0x1c5   : > { %s658_s4 = scalar_lea.vmem [#allocation5], %s3546_s1  ;;  %p5835_p10 = pnand %p4319_p12, %p5794_p0 }
 0x1c6   : > { %s665_s5 = sshll.u32 %s658_s4, 4  ;;  %s5839_s26 = scalar_lea.sflag [#allocation6], %s654_s23  ;;  %s5831_s5 = int_to_ptr.vmem [resolvable:$true] %s665_s5 }
 0x1c7   : > { %p5079_p6 = pneg %p5835_p10 }
 0x1ca   : > { %s5829_s11 = scalar_lea.hbm %s6829_s20, %s3650_s30  ;;  %s5082_s29 = scalar_lea.hbm %s6829_s20, 4096 }
 0x1cb   : > { %s5077_s0 = scalar_lea.hbm %s5829_s11, 2048  ;;  %p5083_p0 = scmp.lt.u32.totalorder %s5829_s11, %s6829_s20 }
 0x1cc   : > { %p5078_p4 = scmp.ne.s32.totalorder %s5829_s11, %s5077_s0  ;;  %p5084_p2 = scmp.lt.u32.totalorder %s5082_s29, %s5077_s0 }
 0x1cd   : > { %p5086_p7 = scmp.lt.u32.totalorder %s5077_s0, %s5829_s11 }
 0x1ce   : > { %p5080_p8 = pnand %p5079_p6, %p5078_p4  ;;  %p5085_p3 = por %p5084_p2, %p5083_p0 }
 0x1d0   : > { %p5081_p1 = pneg %p5080_p8  ;;  %p5087_p12 = por %p5086_p7, %p5085_p3 }
 0x1d2   : > { %p5088_p13 = pnand %p5087_p12, %p5081_p1 }
 0x1d4   : > { %5091 = shalt.err (!%p5088_p13)
}
 0x1d5   : > { %s5092_s23 = scalar_lea.vmem %s5831_s5, 2048  ;;  %s5291_s25 = smov [#allocation5]  }
 0x1d6   : > { %p5093_p4 = scmp.ne.s32.totalorder %s5831_s5, %s5092_s23  ;;  %s5097_s4 = sshll.u32 %s5291_s25, 4  ;;  %s5098_s4 = int_to_ptr.vmem [resolvable:$false] %s5097_s4 }
 0x1d7   : > { %s5099_s1 = scalar_lea.vmem %s5098_s4, 4096  ;;  %p5100_p9 = scmp.lt.s32.totalorder %s5831_s5, %s5098_s4 }
 0x1d8   : > { %p5095_p8 = pnand %p5093_p4, %p5079_p6  ;;  %p5101_p0 = scmp.lt.s32.totalorder %s5099_s1, %s5092_s23 }
 0x1da   : > { %p5096_p11 = pneg %p5095_p8  ;;  %p5102_p2 = por %p5101_p0, %p5100_p9 }
 0x1dc   : > { %p5103_p3 = pnand %p5102_p2, %p5096_p11 }
 0x1de   : > { %5106 = shalt.err (!%p5103_p3)
}
 0x1df   : > { %s5292_s0 = smov 128   ;;  %s5293_s29 = smov 8  }
 0x1e0   : > { %4296 = dma.hbm_to_vmem [thread:$0]  (!%p5835_p10), %s5829_s11, 2048, %s5831_s5, %s5839_s26, %s5292_s0, %s5292_s0, %s5293_s29  }
 0x1e1   : > { %s6831_s30 = sld [smem:[#allocation54_spill]] }
 0x1e7   : > { %p6832_p6 = scmp.ne.s32.totalorder %s6831_s30, 0 }
 0x1e8   : > { %s6833_s27 = sld [smem:[#allocation47_spill]] (!%p6832_p6) }
 0x1e9   : > { %677 = sbr.rel (%p6832_p6) target bundleno = 3430 (0xd66), region = 84 }
 0x1ee   : > { %s5870_s25 = sand.u32 (!%p6832_p6), 1, %s6833_s27  }
 0x1ef   : > { %s3550_s23 = sshll.u32 (!%p6832_p6), %s5870_s25, 7  ;;  %s680_s4 = scalar_lea.sflag (!%p6832_p6), [#allocation6], %s5870_s25 }
 0x1f0   : > { %s5874_s1 = scalar_lea.vmem [#allocation5], %s3550_s23 }
 0x1f1   : > { %5198 = dma.done.wait (%p5804_p5), %s680_s4, 2048  }
 0x1f2   : > { %5200 = vsyncadd (%p5804_p5), %s680_s4, 4294965248  ;;  %s6834_s3 = sld [smem:[#allocation53_spill]] }
 0x1f8   : > { %p6835_p9 = scmp.ne.s32.totalorder %s6834_s3, 0 }
 0x1fa   : > { %5202 = dma.done.wait (%p6835_p9), [#allocation9], 1040  }
 0x1fb   : > { %5204 = vsyncadd (%p6835_p9), [#allocation9], 4294966256 }
 0x1fc   : > { %5206 = dma.done.wait (%p6835_p9), [#allocation12], 1040  }
 0x1fd   : > { %5208 = vsyncadd (%p6835_p9), [#allocation12], 4294966256 }
 0x1fe   : > { %5210 = dma.done.wait (%p6835_p9), [#allocation15], 2048  }
 0x1ff   : > { %5212 = vsyncadd (%p6835_p9), [#allocation15], 4294965248 }
 0x200   : > { %5214 = dma.done.wait (%p6835_p9), [#allocation18], 1040  }
 0x201   : > { %5216 = vsyncadd (%p6835_p9), [#allocation18], 4294966256 }
 0x202   : > { %5218 = dma.done.wait (%p6835_p9), [#allocation21], 32  }
 0x203   : > { %5220 = vsyncadd (%p6835_p9), [#allocation21], 4294967264 }
 0x204   : > { %5222 = dma.done.wait (%p6835_p9), [#allocation24], 1040  }
 0x205   : > { %5224 = vsyncadd (%p6835_p9), [#allocation24], 4294966256 }
 0x206   : > { %5226 = dma.done.wait (%p6835_p9), [#allocation27], 1040  }
 0x207   : > { %5228 = vsyncadd (%p6835_p9), [#allocation27], 4294966256 }
 0x208   : > { %5230 = dma.done.wait (%p6835_p9), [#allocation30], 1024  }
 0x209   : > { %5232 = vsyncadd (%p6835_p9), [#allocation30], 4294966272  ;;  %s5912_s5 = scalar_lea.vmem [#allocation31], %s3550_s23  ;;  %s5914_s24 = scalar_lea.vmem [#allocation32], %s3550_s23 }
 0x20a   : > { %s6836_s11 = sld [smem:[#allocation49_spill]] }
 0x210   : > { %p3568_p5 = scmp.ne.s32.totalorder %s6836_s11, 0 }
 0x211   : > { %s6837_s26 = sld [smem:[#allocation50_spill]] (!%p3568_p5)  ;;  %v804_v0 = vld [vmem:[%s5874_s1] sm:$0xff] (!%p3568_p5)  ;;  %v805_v1 = vld [vmem:[%s5874_s1 + $0x8] sm:$0xff] (!%p3568_p5)  ;;  %v806_v2 = vld [vmem:[%s5874_s1 + $0x10] sm:$0xff] (!%p3568_p5)  ;;  %v836_v3 = vlaneseq (!%p3568_p5)  ;;  %v5294_v19 = vmov (!%p3568_p5), -1e+30  }
 0x212   : > { %803 = sbr.rel (%p3568_p5) target bundleno = 545 (0x221), region = 152  ;;  %820 = vst [vmem:[%s5914_s24] sm:$0xff] (!%p3568_p5), %v804_v0  ;;  %821 = vst [vmem:[%s5914_s24 + $0x8] sm:$0xff] (!%p3568_p5), %v805_v1  ;;  %v807_v4 = vld [vmem:[%s5874_s1 + $0x18] sm:$0xff] (!%p3568_p5)  ;;  %v808_v5 = vld [vmem:[%s5874_s1 + $0x20] sm:$0xff] (!%p3568_p5) }
 0x213   : > { %822 = vst [vmem:[%s5914_s24 + $0x10] sm:$0xff] (!%p3568_p5), %v806_v2  ;;  %v809_v6 = vld [vmem:[%s5874_s1 + $0x28] sm:$0xff] (!%p3568_p5)  ;;  %823 = vst [vmem:[%s5914_s24 + $0x18] sm:$0xff] (!%p3568_p5), %v807_v4  ;;  %v810_v7 = vld [vmem:[%s5874_s1 + $0x30] sm:$0xff] (!%p3568_p5)  ;;  %v837_v13 = vand.u32 (!%p3568_p5), 127, %v836_v3 }
 0x214   : > { %824 = vst [vmem:[%s5914_s24 + $0x20] sm:$0xff] (!%p3568_p5), %v808_v5  ;;  %825 = vst [vmem:[%s5914_s24 + $0x28] sm:$0xff] (!%p3568_p5), %v809_v6  ;;  %v811_v8 = vld [vmem:[%s5874_s1 + $0x38] sm:$0xff] (!%p3568_p5)  ;;  %v812_v9 = vld [vmem:[%s5874_s1 + $0x40] sm:$0xff] (!%p3568_p5) }
 0x215   : > { %826 = vst [vmem:[%s5914_s24 + $0x30] sm:$0xff] (!%p3568_p5), %v810_v7  ;;  %827 = vst [vmem:[%s5914_s24 + $0x38] sm:$0xff] (!%p3568_p5), %v811_v8  ;;  %v813_v10 = vld [vmem:[%s5874_s1 + $0x48] sm:$0xff] (!%p3568_p5)  ;;  %v814_v11 = vld [vmem:[%s5874_s1 + $0x50] sm:$0xff] (!%p3568_p5) }
 0x216   : > { %828 = vst [vmem:[%s5914_s24 + $0x40] sm:$0xff] (!%p3568_p5), %v812_v9  ;;  %v815_v12 = vld [vmem:[%s5874_s1 + $0x58] sm:$0xff] (!%p3568_p5)  ;;  %829 = vst [vmem:[%s5914_s24 + $0x48] sm:$0xff] (!%p3568_p5), %v813_v10  ;;  %v816_v14 = vld [vmem:[%s5874_s1 + $0x60] sm:$0xff] (!%p3568_p5) }
 0x217   : > { %s5921_s0 = sld [smem:[#allocation4 + %s6837_s26]] (!%p3568_p5)  ;;  %830 = vst [vmem:[%s5914_s24 + $0x50] sm:$0xff] (!%p3568_p5), %v814_v11  ;;  %831 = vst [vmem:[%s5914_s24 + $0x58] sm:$0xff] (!%p3568_p5), %v815_v12  ;;  %v817_v15 = vld [vmem:[%s5874_s1 + $0x68] sm:$0xff] (!%p3568_p5)  ;;  %v818_v16 = vld [vmem:[%s5874_s1 + $0x70] sm:$0xff] (!%p3568_p5) }
 0x218   : > { %832 = vst [vmem:[%s5914_s24 + $0x60] sm:$0xff] (!%p3568_p5), %v816_v14  ;;  %833 = vst [vmem:[%s5914_s24 + $0x68] sm:$0xff] (!%p3568_p5), %v817_v15  ;;  %v819_v17 = vld [vmem:[%s5874_s1 + $0x78] sm:$0xff] (!%p3568_p5) }
 0x219   : > { %834 = vst [vmem:[%s5914_s24 + $0x70] sm:$0xff] %v818_v16  ;;  %835 = vst [vmem:[%s5914_s24 + $0x78] sm:$0xff] %v819_v17 }
 0x21d   : > { %v839_v18 = vstv %s5921_s0 }
 0x21e   : > { %vm840_vm0 = vcmp.lt.s32.totalorder %v837_v13, %v839_v18 }
 0x21f   : > { %v841_v20 = vsel %vm840_vm0, 0.0, %v5294_v19 }
 0x220   : > { %842 = vst [vmem:[#allocation2] sm:$0x1] %v841_v20 }
 0x221 PF: > { %v5954_v21 = vld [vmem:[%s5914_s24] sm:$0xff]  ;;  %v5957_v22 = vld [vmem:[%s5914_s24 + $0x8] sm:$0xff]  ;;  %s6838_s29 = sld [smem:[#allocation49_spill]] }
 0x222   : > { %v5960_v23 = vld [vmem:[%s5914_s24 + $0x10] sm:$0xff]  ;;  %v5963_v24 = vld [vmem:[%s5914_s24 + $0x18] sm:$0xff]  ;;  %v5973_v27 = vpack.c.bf16 %v5957_v22, %v5954_v21 }
 0x223   : > { %v5966_v25 = vld [vmem:[%s5914_s24 + $0x20] sm:$0xff]  ;;  %v5969_v26 = vld [vmem:[%s5914_s24 + $0x28] sm:$0xff]  ;;  %v5986_v31 = vpack.c.bf16 %v5963_v24, %v5960_v23 }
 0x224   : > { %v5976_v28 = vld [vmem:[%s5914_s24 + $0x30] sm:$0xff]  ;;  %v5979_v29 = vld [vmem:[%s5914_s24 + $0x38] sm:$0xff]  ;;  %v5990_v32 = vpack.c.bf16 %v5969_v26, %v5966_v25 }
 0x225   : > { %v5982_v30 = vld [vmem:[%s5914_s24 + $0x40] sm:$0xff]  ;;  %v5993_v33 = vld [vmem:[%s5914_s24 + $0x48] sm:$0xff]  ;;  %v6003_v36 = vpack.c.bf16 %v5979_v29, %v5976_v28 }
 0x226   : > { %v5996_v34 = vld [vmem:[%s5914_s24 + $0x50] sm:$0xff]  ;;  %v5999_v35 = vld [vmem:[%s5914_s24 + $0x58] sm:$0xff]  ;;  %v6016_v40 = vpack.c.bf16 %v5993_v33, %v5982_v30 }
 0x227   : > { %v6006_v37 = vld [vmem:[%s5914_s24 + $0x60] sm:$0xff]  ;;  %v6009_v38 = vld [vmem:[%s5914_s24 + $0x68] sm:$0xff]  ;;  %v6020_v41 = vpack.c.bf16 %v5999_v35, %v5996_v34  ;;  %v6029_v44 = vld [vmem:[#allocation2] sm:$0x1]  ;;  %p3569_p11 = scmp.ge.s32.totalorder %s6838_s29, 2 }
 0x228   : > { %v6012_v39 = vld [vmem:[%s5914_s24 + $0x70] sm:$0xff]  ;;  %v6023_v42 = vld [vmem:[%s5914_s24 + $0x78] sm:$0xff]  ;;  %v6027_v43 = vpack.c.bf16 %v6009_v38, %v6006_v37  ;;  %3845 = vmatprep.mubr.bf16.mxu0 (!%p3569_p11), %v5973_v27  ;;  %3877 = vmatprep.mubr.bf16.mxu1 (!%p3569_p11), %v5973_v27  ;;  %v4425_v48 = vld [vmem:[#allocation8 + $0x10] sm:$0xff] (!%p3569_p11)  }
 0x229   : > { %v6033_v45 = vpack.c.bf16 %v6023_v42, %v6012_v39  ;;  %871 = sbr.rel (%p3569_p11) target bundleno = 2339 (0x923), region = 156  ;;  %v4423_v46 = vld [vmem:[#allocation8] sm:$0xff] (!%p3569_p11)   ;;  %v4424_v47 = vld [vmem:[#allocation8 + $0x8] sm:$0xff] (!%p3569_p11)   ;;  %v4426_v49 = vld [vmem:[#allocation8 + $0x18] sm:$0xff] (!%p3569_p11)  }
 0x22a   : > { %3829 = vmatprep.subr.bf16.mxu0 (!%p3569_p11), %v4423_v46  ;;  %v4431_v50 = vld [vmem:[#allocation11] sm:$0xff] (!%p3569_p11)   ;;  %v4432_v51 = vld [vmem:[#allocation11 + $0x8] sm:$0xff] (!%p3569_p11)   ;;  %v4433_v53 = vld [vmem:[#allocation11 + $0x10] sm:$0xff] (!%p3569_p11)  }
 0x22b   : > { %3830 = vmatpush3.bf16.msra.mxu0 (!%p3569_p11), %v4423_v46  ;;  %3861 = vmatprep.subr.bf16.mxu1 (!%p3569_p11), %v4431_v50  ;;  %v4427_v52 = vld [vmem:[#allocation8 + $0x20] sm:$0xff] (!%p3569_p11)   ;;  %v4428_v54 = vld [vmem:[#allocation8 + $0x28] sm:$0xff] (!%p3569_p11)   ;;  %v4429_v56 = vld [vmem:[#allocation8 + $0x30] sm:$0xff] (!%p3569_p11)  }
 0x22c   : > { %3831 = vmatprep.subr.bf16.mxu0 (!%p3569_p11), %v4424_v47  ;;  %3862 = vmatpush3.bf16.msra.mxu1 (!%p3569_p11), %v4431_v50  ;;  %v4434_v55 = vld [vmem:[#allocation11 + $0x18] sm:$0xff] (!%p3569_p11)   ;;  %v4435_v57 = vld [vmem:[#allocation11 + $0x20] sm:$0xff] (!%p3569_p11)   ;;  %v4436_v59 = vld [vmem:[#allocation11 + $0x28] sm:$0xff] (!%p3569_p11)  }
 0x22d   : > { %3863 = vmatprep.subr.bf16.mxu1 (!%p3569_p11), %v4432_v51  ;;  %v4430_v58 = vld [vmem:[#allocation8 + $0x38] sm:$0xff] (!%p3569_p11)   ;;  %v4439_v61 = vld [vmem:[#allocation14] sm:$0xff] (!%p3569_p11)   ;;  %v4440_v63 = vld [vmem:[#allocation14 + $0x8] sm:$0xff] (!%p3569_p11)  }
 0x22e   : > { %v4437_v60 = vld [vmem:[#allocation11 + $0x30] sm:$0xff] (!%p3569_p11)   ;;  %v4438_v62 = vld [vmem:[#allocation11 + $0x38] sm:$0xff] (!%p3569_p11)   ;;  %v4443_v2 = vld [vmem:[#allocation14 + $0x20] sm:$0xff] (!%p3569_p11)  }
 0x22f   : > { %3832 = vmatpush3.bf16.msra.mxu0 (!%p3569_p11), %v4424_v47  ;;  %v4441_v0 = vld [vmem:[#allocation14 + $0x10] sm:$0xff] (!%p3569_p11)   ;;  %v4442_v1 = vld [vmem:[#allocation14 + $0x18] sm:$0xff] (!%p3569_p11)   ;;  %v4444_v3 = vld [vmem:[#allocation14 + $0x28] sm:$0xff] (!%p3569_p11)  }
 0x230   : > { %3833 = vmatprep.subr.bf16.mxu0 %v4425_v48  ;;  %3864 = vmatpush3.bf16.msra.mxu1 %v4432_v51  ;;  %v4445_v4 = vld [vmem:[#allocation14 + $0x30] sm:$0xff]   ;;  %v4446_v5 = vld [vmem:[#allocation14 + $0x38] sm:$0xff]  }
 0x231   : > { %3865 = vmatprep.subr.bf16.mxu1 %v4433_v53  ;;  %v6052_v6 = vld [vmem:[#allocation10] ss:$0 sm:$0xff]  ;;  %v6058_v20 = vld [vmem:[#allocation13] ss:$0 sm:$0xff] }
 0x233   : > { %3834 = vmatpush3.bf16.msra.mxu0 %v4425_v48 }
 0x234   : > { %3835 = vmatprep.subr.bf16.mxu0 %v4426_v49  ;;  %3866 = vmatpush3.bf16.msra.mxu1 %v4433_v53 }
 0x235   : > { %3867 = vmatprep.subr.bf16.mxu1 %v4434_v55 }
 0x237   : > { %3836 = vmatpush3.bf16.msra.mxu0 %v4426_v49 }
 0x238   : > { %3837 = vmatprep.subr.bf16.mxu0 %v4427_v52  ;;  %3868 = vmatpush3.bf16.msra.mxu1 %v4434_v55 }
 0x239   : > { %3869 = vmatprep.subr.bf16.mxu1 %v4435_v57 }
 0x23b   : > { %3838 = vmatpush3.bf16.msra.mxu0 %v4427_v52 }
 0x23c   : > { %3839 = vmatprep.subr.bf16.mxu0 %v4428_v54  ;;  %3870 = vmatpush3.bf16.msra.mxu1 %v4435_v57 }
 0x23d   : > { %3871 = vmatprep.subr.bf16.mxu1 %v4436_v59 }
 0x23f   : > { %3840 = vmatpush3.bf16.msra.mxu0 %v4428_v54 }
 0x240   : > { %3841 = vmatprep.subr.bf16.mxu0 %v4429_v56  ;;  %3872 = vmatpush3.bf16.msra.mxu1 %v4436_v59 }
 0x241   : > { %3873 = vmatprep.subr.bf16.mxu1 %v4437_v60 }
 0x243   : > { %3842 = vmatpush3.bf16.msra.mxu0 %v4429_v56 }
 0x244   : > { %3843 = vmatprep.subr.bf16.mxu0 %v4430_v58  ;;  %3874 = vmatpush3.bf16.msra.mxu1 %v4437_v60 }
 0x245   : > { %3875 = vmatprep.subr.bf16.mxu1 %v4438_v62 }
 0x247   : > { %3844 = vmatpush3.bf16.msra.mxu0 %v4430_v58 }
 0x248   : > { %3893 = vmatprep.subr.bf16.mxu0 %v4439_v61  ;;  %3876 = vmatpush3.bf16.msra.mxu1 %v4438_v62 }
 0x24a   : > { %3846 = vmatmul.mubr.bf16.vlgmr.msra.gmra.mrb[0].mxu0 %v5986_v31 }
 0x24b   : > { %3849 = vmatprep.mubr.bf16.mxu0 %v5990_v32  ;;  %3894 = vmatpush3.bf16.msra.mxu0 %v4439_v61 }
 0x24c   : > { %3895 = vmatprep.subr.bf16.mxu0 %v4440_v63  ;;  %3878 = vmatmul.mubr.bf16.vlgmr.msra.gmra.mrb[0].mxu1 %v5986_v31 }
 0x24d   : > { %3881 = vmatprep.mubr.bf16.mxu1 %v5990_v32 }
 0x24f   : > { %3896 = vmatpush3.bf16.msra.mxu0 %v4440_v63 }
 0x250   : > { %3897 = vmatprep.subr.bf16.mxu0 %v4441_v0 }
 0x252   : > { %3850 = vmatmul.mubr.bf16.gmra.mrb[4].mxu0 %v6003_v36 }
 0x253   : > { %3853 = vmatprep.mubr.bf16.mxu0 %v6016_v40  ;;  %3898 = vmatpush3.bf16.msra.mxu0 %v4441_v0 }
 0x254   : > { %3899 = vmatprep.subr.bf16.mxu0 %v4442_v1  ;;  %3882 = vmatmul.mubr.bf16.gmra.mrb[4].mxu1 %v6003_v36 }
 0x255   : > { %3885 = vmatprep.mubr.bf16.mxu1 %v6016_v40 }
 0x257   : > { %3900 = vmatpush3.bf16.msra.mxu0 %v4442_v1 }
 0x258   : > { %3901 = vmatprep.subr.bf16.mxu0 %v4443_v2 }
 0x25a   : > { %3854 = vmatmul.mubr.bf16.gmra.mrb[8].mxu0 %v6020_v41 }
 0x25b   : > { %3857 = vmatprep.mubr.bf16.mxu0 %v6027_v43  ;;  %3902 = vmatpush3.bf16.msra.mxu0 %v4443_v2 }
 0x25c   : > { %3903 = vmatprep.subr.bf16.mxu0 %v4444_v3  ;;  %3886 = vmatmul.mubr.bf16.gmra.mrb[8].mxu1 %v6020_v41 }
 0x25d   : > { %3889 = vmatprep.mubr.bf16.mxu1 %v6027_v43 }
 0x25f   : > { %3904 = vmatpush3.bf16.msra.mxu0 %v4444_v3 }
 0x260   : > { %3905 = vmatprep.subr.bf16.mxu0 %v4445_v4 }
 0x262   : > { %3858 = vmatmul.mubr.bf16.gmra.mrb[12].mxu0 %v6033_v45 }
 0x263   : > { %3906 = vmatpush3.bf16.msra.mxu0 %v4445_v4 }
 0x264   : > { %3890 = vmatmul.mubr.bf16.gmra.mrb[12].mxu1 %v6033_v45  ;;  %3907 = vmatprep.subr.bf16.mxu0 %v4446_v5 }
 0x267   : > { %3908 = vmatpush3.bf16.msra.mxu0 %v4446_v5 }
 0x31d   : > { %v3847_v7 = vpop.f32.mrb[0].mxu0 }
 0x31e   : > { %v1019_v8 = vadd.f32 %v3847_v7, %v6052_v6  ;;  %v1010_v9 = vpop.f32.mrb[1].mxu0 }
 0x31f   : > { %v1011_v10 = vadd.f32 %v6052_v6, %v1010_v9  ;;  %v3848_v11 = vpop.f32.mrb[2].mxu0  ;;  %v3879_v48 = vpop.f32.mrb[0].mxu1 }
 0x320   : > { %v1022_v12 = vadd.f32 %v3848_v11, %v6052_v6  ;;  %v1013_v13 = vpop.f32.mrb[3].mxu0  ;;  %v1075_v15 = vmax.f32 %v1019_v8, 0.0  ;;  %v1186_v51 = vadd.f32 %v3879_v48, %v6058_v20  ;;  %v1177_v52 = vpop.f32.mrb[1].mxu1 }
 0x321   : > { %v1014_v14 = vadd.f32 %v6052_v6, %v1013_v13  ;;  %v1073_v17 = vmax.f32 %v1011_v10, 0.0  ;;  %v1178_v55 = vadd.f32 %v6058_v20, %v1177_v52  ;;  %v3880_v56 = vpop.f32.mrb[2].mxu1 }
 0x322   : > { %v1076_v16 = vmax.f32 %v1022_v12, 0.0  ;;  %v1242_v60 = vmax.f32 %v1186_v51, 0.0  ;;  %v1189_v61 = vadd.f32 %v3880_v56, %v6058_v20  ;;  %v1180_v62 = vpop.f32.mrb[3].mxu1 }
 0x323   : > { %v1074_v18 = vmax.f32 %v1014_v14, 0.0  ;;  %v1240_v1 = vmax.f32 %v1178_v55, 0.0  ;;  %v1181_v2 = vadd.f32 %v6058_v20, %v1180_v62 }
 0x324   : > { %v1257_v19 = vpack.c.bf16 %v1076_v16, %v1075_v15  ;;  %v1243_v4 = vmax.f32 %v1189_v61, 0.0 }
 0x325   : > { %v1256_v46 = vpack.c.bf16 %v1074_v18, %v1073_v17  ;;  %v3851_v47 = vpop.f32.mrb[4].mxu0  ;;  %v1241_v7 = vmax.f32 %v1181_v2, 0.0 }
 0x326   : > { %v1035_v49 = vadd.f32 %v3851_v47, %v6052_v6  ;;  %v1026_v50 = vpop.f32.mrb[5].mxu0  ;;  %v1418_v9 = vpack.c.bf16 %v1243_v4, %v1242_v60 }
 0x327   : > { %v1027_v53 = vadd.f32 %v6052_v6, %v1026_v50  ;;  %v3852_v54 = vpop.f32.mrb[6].mxu0  ;;  %3909 = vmatprep.mubr.bf16.mxu0 %v1256_v46  ;;  %v1417_v12 = vpack.c.bf16 %v1241_v7, %v1240_v1  ;;  %v3883_v13 = vpop.f32.mrb[4].mxu1 }
 0x328   : > { %v1079_v57 = vmax.f32 %v1035_v49, 0.0  ;;  %v1038_v58 = vadd.f32 %v3852_v54, %v6052_v6  ;;  %v1029_v59 = vpop.f32.mrb[7].mxu0  ;;  %3910 = vmatmul.mubr.bf16.vlgmr.msra.gmra.mrb[16].mxu0 %v1257_v19  ;;  %v1202_v16 = vadd.f32 %v3883_v13, %v6058_v20  ;;  %v1193_v17 = vpop.f32.mrb[5].mxu1 }
 0x329   : > { %v1077_v63 = vmax.f32 %v1027_v53, 0.0  ;;  %v1030_v0 = vadd.f32 %v6052_v6, %v1029_v59  ;;  %3925 = vmatprep.subr.bf16.mxu1 %v1417_v12  ;;  %v1194_v46 = vadd.f32 %v6058_v20, %v1193_v17  ;;  %v3884_v47 = vpop.f32.mrb[6].mxu1 }
 0x32a   : > { %v1080_v3 = vmax.f32 %v1038_v58, 0.0  ;;  %3926 = vmatpush3.bf16.xpose.msra.mxu1 %v1417_v12  ;;  %v1246_v51 = vmax.f32 %v1202_v16, 0.0  ;;  %v1205_v52 = vadd.f32 %v3884_v47, %v6058_v20  ;;  %v1196_v53 = vpop.f32.mrb[7].mxu1 }
 0x32b   : > { %v1078_v5 = vmax.f32 %v1030_v0, 0.0  ;;  %v1244_v56 = vmax.f32 %v1194_v46, 0.0  ;;  %3927 = vmatprep.subr.bf16.mxu1 %v1418_v9 }
 0x32c   : > { %v1259_v8 = vpack.c.bf16 %v1080_v3, %v1079_v57  ;;  %v1197_v57 = vadd.f32 %v6058_v20, %v1196_v53  ;;  %v1247_v59 = vmax.f32 %v1205_v52, 0.0 }
 0x32d   : > { %v1258_v10 = vpack.c.bf16 %v1078_v5, %v1077_v63  ;;  %v3855_v11 = vpop.f32.mrb[8].mxu0 }
 0x32e   : > { %v1051_v14 = vadd.f32 %v3855_v11, %v6052_v6  ;;  %v1042_v15 = vpop.f32.mrb[9].mxu0  ;;  %v1245_v61 = vmax.f32 %v1197_v57, 0.0  ;;  %v1420_v63 = vpack.c.bf16 %v1247_v59, %v1246_v51 }
 0x32f   : > { %v1043_v18 = vadd.f32 %v6052_v6, %v1042_v15  ;;  %v3856_v19 = vpop.f32.mrb[10].mxu0  ;;  %3913 = vmatprep.mubr.bf16.mxu0 %v1258_v10  ;;  %v3887_v3 = vpop.f32.mrb[8].mxu1 }
 0x330   : > { %v1083_v48 = vmax.f32 %v1051_v14, 0.0  ;;  %v1054_v49 = vadd.f32 %v3856_v19, %v6052_v6  ;;  %v1045_v50 = vpop.f32.mrb[11].mxu0  ;;  %3914 = vmatmul.mubr.bf16.gmra.mrb[20].mxu0 %v1259_v8  ;;  %v1419_v2 = vpack.c.bf16 %v1245_v61, %v1244_v56  ;;  %v1218_v7 = vadd.f32 %v3887_v3, %v6058_v20  ;;  %v1209_v8 = vpop.f32.mrb[9].mxu1 }
 0x331   : > { %v1081_v54 = vmax.f32 %v1043_v18, 0.0  ;;  %v1046_v55 = vadd.f32 %v6052_v6, %v1045_v50  ;;  %v1210_v12 = vadd.f32 %v6058_v20, %v1209_v8  ;;  %v3888_v13 = vpop.f32.mrb[10].mxu1 }
 0x332   : > { %v1084_v58 = vmax.f32 %v1054_v49, 0.0  ;;  %3928 = vmatpush3.bf16.xpose.msra.mxu1 %v1418_v9  ;;  %v1250_v17 = vmax.f32 %v1218_v7, 0.0  ;;  %v1221_v18 = vadd.f32 %v3888_v13, %v6058_v20  ;;  %v1212_v19 = vpop.f32.mrb[11].mxu1 }
 0x333   : > { %v1082_v60 = vmax.f32 %v1046_v55, 0.0  ;;  %3929 = vmatprep.subr.bf16.mxu1 %v1419_v2  ;;  %v1213_v49 = vadd.f32 %v6058_v20, %v1212_v19 }
 0x334   : > { %v1261_v62 = vpack.c.bf16 %v1084_v58, %v1083_v48  ;;  %v1248_v48 = vmax.f32 %v1210_v12, 0.0  ;;  %v1251_v51 = vmax.f32 %v1221_v18, 0.0 }
 0x335   : > { %v1260_v0 = vpack.c.bf16 %v1082_v60, %v1081_v54  ;;  %v3859_v1 = vpop.f32.mrb[12].mxu0  ;;  %v1249_v53 = vmax.f32 %v1213_v49, 0.0 }
 0x336   : > { %v1067_v4 = vadd.f32 %v3859_v1, %v6052_v6  ;;  %v1058_v5 = vpop.f32.mrb[13].mxu0  ;;  %v1422_v55 = vpack.c.bf16 %v1251_v51, %v1250_v17 }
 0x337   : > { %v1059_v10 = vadd.f32 %v6052_v6, %v1058_v5  ;;  %v3860_v11 = vpop.f32.mrb[14].mxu0  ;;  %3917 = vmatprep.mubr.bf16.mxu0 %v1260_v0  ;;  %v1421_v57 = vpack.c.bf16 %v1249_v53, %v1248_v48  ;;  %v3891_v9 = vpop.f32.mrb[12].mxu1 }
 0x338   : > { %v1087_v14 = vmax.f32 %v1067_v4, 0.0  ;;  %v1070_v15 = vadd.f32 %v3860_v11, %v6052_v6  ;;  %v1061_v16 = vpop.f32.mrb[15].mxu0  ;;  %3918 = vmatmul.mubr.bf16.gmra.mrb[24].mxu0 %v1261_v62  ;;  %v1234_v58 = vadd.f32 %v3891_v9, %v6058_v20  ;;  %v1225_v59 = vpop.f32.mrb[13].mxu1  ;;  %v4448_v9 = vld [vmem:[#allocation16 + $0x8] sm:$0xff]  }
 0x339   : > { %v1085_v46 = vmax.f32 %v1059_v10, 0.0  ;;  %v1062_v47 = vadd.f32 %v6052_v6, %v1061_v16  ;;  %v1226_v60 = vadd.f32 %v6058_v20, %v1225_v59  ;;  %v3892_v6 = vpop.f32.mrb[14].mxu1  ;;  %v4450_v59 = vld [vmem:[#allocation16 + $0x18] sm:$0xff]  }
 0x33a   : > { %v1088_v50 = vmax.f32 %v1070_v15, 0.0  ;;  %3930 = vmatpush3.bf16.xpose.msra.mxu1 %v1419_v2  ;;  %v1254_v61 = vmax.f32 %v1234_v58, 0.0  ;;  %v1237_v62 = vadd.f32 %v3892_v6, %v6058_v20  ;;  %v1228_v0 = vpop.f32.mrb[15].mxu1  ;;  %v4449_v58 = vld [vmem:[#allocation16 + $0x10] sm:$0xff]   ;;  %v4452_v6 = vld [vmem:[#allocation16 + $0x28] sm:$0xff]  }
 0x33b   : > { %v1086_v52 = vmax.f32 %v1062_v47, 0.0  ;;  %3931 = vmatprep.subr.bf16.mxu1 %v1420_v63  ;;  %v1252_v1 = vmax.f32 %v1226_v60, 0.0  ;;  %v1229_v3 = vadd.f32 %v6058_v20, %v1228_v0  ;;  %v4451_v60 = vld [vmem:[#allocation16 + $0x20] sm:$0xff]   ;;  %v1426_v0 = vlaneseq }
 0x33c   : > { %v1263_v54 = vpack.c.bf16 %v1088_v50, %v1087_v14  ;;  %v1255_v4 = vmax.f32 %v1237_v62, 0.0  ;;  %v4454_v62 = vld [vmem:[#allocation16 + $0x38] sm:$0xff]  }
 0x33d   : > { %v1262_v56 = vpack.c.bf16 %v1086_v52, %v1085_v46  ;;  %v1253_v5 = vmax.f32 %v1229_v3, 0.0 }
 0x33e   : > { %v1424_v7 = vpack.c.bf16 %v1255_v4, %v1254_v61  ;;  %v4453_v61 = vld [vmem:[#allocation16 + $0x30] sm:$0xff]  }
 0x33f   : > { %3921 = vmatprep.mubr.bf16.mxu0 %v1262_v56  ;;  %v1423_v8 = vpack.c.bf16 %v1253_v5, %v1252_v1  ;;  %v1427_v1 = vshrl.u32 %v1426_v0, 7 }
 0x340   : > { %3922 = vmatmul.mubr.bf16.gmra.mrb[28].mxu0 %v1263_v54 }
 0x341   : > { %3973 = vmatprep.mubr.bf16.mxu0 %v5973_v27  ;;  %v1428_v3 = vsub.s32 0, %v1427_v1 }
 0x342   : > { %3932 = vmatpush3.bf16.xpose.msra.mxu1 %v1420_v63 }
 0x343   : > { %3933 = vmatprep.subr.bf16.mxu1 %v1421_v57  ;;  %v1429_v4 = vrot.slane %v6029_v44, %v1428_v3  ;;  %v6137_v3 = vld [vmem:[#allocation17] ss:$0 sm:$0xff] }
 0x34a   : > { %3934 = vmatpush3.bf16.xpose.msra.mxu1 %v1421_v57  ;;  %v4447_v57 = vld [vmem:[#allocation16] sm:$0xff]  }
 0x34b   : > { %3935 = vmatprep.subr.bf16.mxu1 %v1422_v55  ;;  %3957 = vmatprep.subr.bf16.mxu0 %v4447_v57 }
 0x34c   : > { %3958 = vmatpush3.bf16.msra.mxu0 %v4447_v57 }
 0x34d   : > { %3959 = vmatprep.subr.bf16.mxu0 %v4448_v9 }
 0x350   : > { %3960 = vmatpush3.bf16.msra.mxu0 %v4448_v9 }
 0x351   : > { %3961 = vmatprep.subr.bf16.mxu0 %v4449_v58 }
 0x352   : > { %3936 = vmatpush3.bf16.xpose.msra.mxu1 %v1422_v55 }
 0x353   : > { %3937 = vmatprep.subr.bf16.mxu1 %v1423_v8 }
 0x354   : > { %3962 = vmatpush3.bf16.msra.mxu0 %v4449_v58 }
 0x355   : > { %3963 = vmatprep.subr.bf16.mxu0 %v4450_v59 }
 0x358   : > { %3964 = vmatpush3.bf16.msra.mxu0 %v4450_v59 }
 0x359   : > { %3965 = vmatprep.subr.bf16.mxu0 %v4451_v60 }
 0x35a   : > { %3938 = vmatpush3.bf16.xpose.msra.mxu1 %v1423_v8 }
 0x35b   : > { %3939 = vmatprep.subr.bf16.mxu1 %v1424_v7 }
 0x35c   : > { %3966 = vmatpush3.bf16.msra.mxu0 %v4451_v60 }
 0x35d   : > { %3967 = vmatprep.subr.bf16.mxu0 %v4452_v6 }
 0x360   : > { %3968 = vmatpush3.bf16.msra.mxu0 %v4452_v6 }
 0x361   : > { %3969 = vmatprep.subr.bf16.mxu0 %v4453_v61 }
 0x362   : > { %3940 = vmatpush3.bf16.xpose.msra.mxu1 %v1424_v7 }
 0x364   : > { %3970 = vmatpush3.bf16.msra.mxu0 %v4453_v61 }
 0x365   : > { %3971 = vmatprep.subr.bf16.mxu0 %v4454_v62 }
 0x368   : > { %3972 = vmatpush3.bf16.msra.mxu0 %v4454_v62 }
 0x36b   : > { %3974 = vmatmul.mubr.bf16.vlgmr.msra.gmra.mrb[32].mxu0 %v5986_v31 }
 0x36c   : > { %3977 = vmatprep.mubr.bf16.mxu0 %v5990_v32 }
 0x373   : > { %3978 = vmatmul.mubr.bf16.gmra.mrb[36].mxu0 %v6003_v36 }
 0x374   : > { %3981 = vmatprep.mubr.bf16.mxu0 %v6016_v40 }
 0x37b   : > { %3982 = vmatmul.mubr.bf16.gmra.mrb[40].mxu0 %v6020_v41 }
 0x37c   : > { %3985 = vmatprep.mubr.bf16.mxu0 %v6027_v43 }
 0x383   : > { %3986 = vmatmul.mubr.bf16.gmra.mrb[44].mxu0 %v6033_v45 }
 0x3fb   : > { %v3911_v2 = vpop.f32.mrb[16].mxu0 }
 0x3fc   : > { %v1346_v10 = vpop.f32.mrb[17].mxu0 }
 0x3fd   : > { %v3912_v11 = vpop.f32.mrb[18].mxu0 }
 0x3fe   : > { %v1410_v12 = vpack.c.bf16 %v3912_v11, %v3911_v2  ;;  %v1349_v20 = vpop.f32.mrb[19].mxu0 }
 0x3ff   : > { %v1409_v13 = vpack.c.bf16 %v1349_v20, %v1346_v10 }
 0x401   : > { %3941 = vmatprep.mubr.bf16.mxu1 %v1409_v13 }
 0x402   : > { %3942 = vmatmul.mubr.bf16.vlgmr.msra.gmra.mrb[16].mxu1 %v1410_v12 }
 0x403   : > { %v3915_v14 = vpop.f32.mrb[20].mxu0 }
 0x404   : > { %v1362_v15 = vpop.f32.mrb[21].mxu0 }
 0x405   : > { %v3916_v16 = vpop.f32.mrb[22].mxu0 }
 0x406   : > { %v1412_v63 = vpack.c.bf16 %v3916_v16, %v3915_v14  ;;  %v1365_v17 = vpop.f32.mrb[23].mxu0 }
 0x407   : > { %v1411_v18 = vpack.c.bf16 %v1365_v17, %v1362_v15 }
 0x409   : > { %3945 = vmatprep.mubr.bf16.mxu1 %v1411_v18 }
 0x40a   : > { %3946 = vmatmul.mubr.bf16.gmra.mrb[20].mxu1 %v1412_v63 }
 0x40b   : > { %v3919_v19 = vpop.f32.mrb[24].mxu0 }
 0x40c   : > { %v1378_v46 = vpop.f32.mrb[25].mxu0 }
 0x40d   : > { %v3920_v47 = vpop.f32.mrb[26].mxu0 }
 0x40e   : > { %v1414_v48 = vpack.c.bf16 %v3920_v47, %v3919_v19  ;;  %v1381_v49 = vpop.f32.mrb[27].mxu0 }
 0x40f   : > { %v1413_v50 = vpack.c.bf16 %v1381_v49, %v1378_v46 }
 0x411   : > { %3949 = vmatprep.mubr.bf16.mxu1 %v1413_v50 }
 0x412   : > { %3950 = vmatmul.mubr.bf16.gmra.mrb[24].mxu1 %v1414_v48 }
 0x413   : > { %v3923_v51 = vpop.f32.mrb[28].mxu0 }
 0x414   : > { %v1394_v52 = vpop.f32.mrb[29].mxu0 }
 0x415   : > { %v3924_v53 = vpop.f32.mrb[30].mxu0 }
 0x416   : > { %v1416_v54 = vpack.c.bf16 %v3924_v53, %v3923_v51  ;;  %v1397_v55 = vpop.f32.mrb[31].mxu0 }
 0x417   : > { %v1415_v56 = vpack.c.bf16 %v1397_v55, %v1394_v52 }
 0x419   : > { %3953 = vmatprep.mubr.bf16.mxu1 %v1415_v56 }
 0x41a   : > { %3954 = vmatmul.mubr.bf16.gmra.mrb[28].mxu1 %v1416_v54 }
 0x4d5   : > { %v3943_v5 = vpop.f32.mrb[16].mxu1 }
 0x4d6   : > { %v1474_v7 = vadd.f32 %v3943_v5, %v1429_v4  ;;  %v1465_v8 = vpop.f32.mrb[17].mxu1  ;;  %v3975_v5 = vpop.f32.mrb[32].mxu0 }
 0x4d7   : > { %v1466_v2 = vadd.f32 %v1465_v8, %v1429_v4  ;;  %v3944_v10 = vpop.f32.mrb[18].mxu1 }
 0x4d8   : > { %1532 = vmax.xlane.f32.xlu1 %v1474_v7  ;;  %v1468_v11 = vpop.f32.mrb[19].mxu1  ;;  %v6098_v12 = vadd.f32 %v3944_v10, %v1429_v4 }
 0x4d9   : > { %1528 = vmax.xlane.f32.xlu0 %v1466_v2  ;;  %v1469_v20 = vadd.f32 %v1468_v11, %v1429_v4  ;;  %v1786_v11 = vadd.f32 %v3975_v5, %v6137_v3 }
 0x4dc   : > { %1534 = vmax.xlane.f32.xlu1 %v6098_v12 }
 0x4dd   : > { %1530 = vmax.xlane.f32.xlu0 %v1469_v20  ;;  %v3947_v13 = vpop.f32.mrb[20].mxu1 }
 0x4de   : > { %v1481_v14 = vpop.f32.mrb[21].mxu1  ;;  %v6106_v18 = vadd.f32 %v3947_v13, %v1429_v4  ;;  %v1777_v13 = vpop.f32.mrb[33].mxu0 }
 0x4df   : > { %v6101_v15 = vadd.f32 %v1481_v14, %v1429_v4  ;;  %v3948_v16 = vpop.f32.mrb[22].mxu1 }
 0x4e0   : > { %v1484_v63 = vpop.f32.mrb[23].mxu1  ;;  %v6109_v19 = vadd.f32 %v3948_v16, %v1429_v4 }
 0x4e1   : > { %v6103_v17 = vadd.f32 %v1484_v63, %v1429_v4  ;;  %1536 = vmax.xlane.f32.xlu0 %v6101_v15  ;;  %v1778_v63 = vadd.f32 %v6137_v3, %v1777_v13 }
 0x4e3   : > { %1538 = vmax.xlane.f32.xlu1 %v6103_v17 }
 0x4e5   : > { %1540 = vmax.xlane.f32.xlu0 %v6106_v18  ;;  %v3951_v46 = vpop.f32.mrb[24].mxu1 }
 0x4e6   : > { %v1497_v47 = vpop.f32.mrb[25].mxu1  ;;  %v6118_v52 = vadd.f32 %v3951_v46, %v1429_v4  ;;  %v3976_v46 = vpop.f32.mrb[34].mxu0 }
 0x4e7   : > { %v6112_v48 = vadd.f32 %v1497_v47, %v1429_v4  ;;  %1542 = vmax.xlane.f32.xlu1 %v6109_v19  ;;  %v3952_v49 = vpop.f32.mrb[26].mxu1 }
 0x4e8   : > { %v1500_v50 = vpop.f32.mrb[27].mxu1  ;;  %v6121_v53 = vadd.f32 %v3952_v49, %v1429_v4  ;;  %v1780_v49 = vpop.f32.mrb[35].mxu0 }
 0x4e9   : > { %v6115_v51 = vadd.f32 %v1500_v50, %v1429_v4  ;;  %1544 = vmax.xlane.f32.xlu0 %v6112_v48  ;;  %v1840_v50 = vmax.f32 %v1778_v63, 0.0 }
 0x4eb   : > { %1546 = vmax.xlane.f32.xlu1 %v6115_v51 }
 0x4ed   : > { %1548 = vmax.xlane.f32.xlu0 %v6118_v52  ;;  %v3955_v54 = vpop.f32.mrb[28].mxu1 }
 0x4ee   : > { %v1513_v55 = vpop.f32.mrb[29].mxu1  ;;  %v6130_v59 = vadd.f32 %v3955_v54, %v1429_v4  ;;  %v1781_v54 = vadd.f32 %v6137_v3, %v1780_v49 }
 0x4ef   : > { %v6124_v56 = vadd.f32 %v1513_v55, %v1429_v4  ;;  %1550 = vmax.xlane.f32.xlu1 %v6121_v53  ;;  %v3956_v57 = vpop.f32.mrb[30].mxu1 }
 0x4f0   : > { %v1516_v9 = vpop.f32.mrb[31].mxu1  ;;  %v6133_v60 = vadd.f32 %v3956_v57, %v1429_v4 }
 0x4f1   : > { %v6127_v58 = vadd.f32 %v1516_v9, %v1429_v4  ;;  %1552 = vmax.xlane.f32.xlu0 %v6124_v56 }
 0x4f3   : > { %1554 = vmax.xlane.f32.xlu1 %v6127_v58 }
 0x4f5   : > { %1556 = vmax.xlane.f32.xlu0 %v6130_v59 }
 0x4f7   : > { %1558 = vmax.xlane.f32.xlu1 %v6133_v60 }
 0x565   : > { %v1533_v6 = vpop.xlane.xlu1 %1532 }
 0x566   : > { %v1562_v61 = vsub.f32 %v1474_v7, %v1533_v6  ;;  %v1529_v62 = vpop.xlane.xlu0 %1528  ;;  %v1842_v7 = vmax.f32 %v1786_v11, 0.0 }
 0x567   : > { %v1560_v1 = vsub.f32 %v1466_v2, %v1529_v62  ;;  %v1789_v2 = vadd.f32 %v3976_v46, %v6137_v3 }
 0x568   : > { %v1580_v14 = vmul.f32 1.442695, %v1562_v61  ;;  %v1841_v61 = vmax.f32 %v1781_v54, 0.0 }
 0x569   : > { %v1576_v8 = vmul.f32 1.442695, %v1560_v1  ;;  %v1535_v10 = vpop.xlane.xlu1 %1534  ;;  %v1843_v57 = vmax.f32 %v1789_v2, 0.0 }
 0x56a   : > { %v1563_v4 = vsub.f32 %v6098_v12, %v1535_v10  ;;  %v1531_v16 = vpop.xlane.xlu0 %1530  ;;  %v1856_v5 = vpack.c.bf16 %v1841_v61, %v1840_v50 }
 0x56b   : > { %4463 = vpow2.f32 %v1576_v8  ;;  %v1561_v47 = vsub.f32 %v1469_v20, %v1531_v16  ;;  %v1857_v62 = vpack.c.bf16 %v1843_v57, %v1842_v7  ;;  %v3979_v20 = vpop.f32.mrb[36].mxu0 }
 0x56c   : > { %4465 = vpow2.f32 %v1580_v14  ;;  %v1582_v9 = vmul.f32 1.442695, %v1563_v4  ;;  %v1802_v11 = vadd.f32 %v3979_v20, %v6137_v3  ;;  %v1793_v13 = vpop.f32.mrb[37].mxu0  ;;  %3989 = vmatprep.subr.bf16.mxu0 %v1856_v5 }
 0x56d   : > { %v1578_v55 = vmul.f32 1.442695, %v1561_v47  ;;  %v1794_v14 = vadd.f32 %v6137_v3, %v1793_v13  ;;  %v3980_v4 = vpop.f32.mrb[38].mxu0  ;;  %3990 = vmatpush3.bf16.msra.mxu0 %v1856_v5 }
 0x56e   : > { %v1537_v6 = vpop.xlane.xlu0 %1536  ;;  %v1796_v46 = vpop.f32.mrb[39].mxu0  ;;  %v1846_v7 = vmax.f32 %v1802_v11, 0.0  ;;  %3991 = vmatprep.subr.bf16.mxu0 %v1857_v62 }
 0x56f   : > { %4467 = vpow2.f32 %v1578_v55  ;;  %v1564_v12 = vsub.f32 %v6101_v15, %v1537_v6  ;;  %v1844_v2 = vmax.f32 %v1794_v14, 0.0  ;;  %v1797_v49 = vadd.f32 %v6137_v3, %v1796_v46 }
 0x570   : > { %v1539_v1 = vpop.xlane.xlu1 %1538  ;;  %4469 = vpow2.f32 %v1582_v9 }
 0x571   : > { %v1584_v8 = vmul.f32 1.442695, %v1564_v12  ;;  %v1565_v10 = vsub.f32 %v6103_v17, %v1539_v1  ;;  %v1805_v17 = vadd.f32 %v3980_v4, %v6137_v3  ;;  %v1845_v9 = vmax.f32 %v1797_v49, 0.0  ;;  %3992 = vmatpush3.bf16.msra.mxu0 %v1857_v62 }
 0x572   : > { %v1541_v16 = vpop.xlane.xlu0 %1540 }
 0x573   : > { %4471 = vpow2.f32 %v1584_v8  ;;  %v1586_v63 = vmul.f32 1.442695, %v1565_v10  ;;  %v1566_v15 = vsub.f32 %v6106_v18, %v1541_v16  ;;  %v1847_v18 = vmax.f32 %v1805_v17, 0.0  ;;  %v3983_v8 = vpop.f32.mrb[40].mxu0 }
 0x574   : > { %v1543_v47 = vpop.xlane.xlu1 %1542  ;;  %v1858_v20 = vpack.c.bf16 %v1845_v9, %v1844_v2  ;;  %v1818_v13 = vadd.f32 %v3983_v8, %v6137_v3  ;;  %v1809_v16 = vpop.f32.mrb[41].mxu0 }
 0x575   : > { %v6151_v50 = vpop.eup %4463  ;;  %v1588_v54 = vmul.f32 1.442695, %v1566_v15  ;;  %v1567_v55 = vsub.f32 %v6109_v19, %v1543_v47  ;;  %4473 = vpow2.f32 %v1586_v63  ;;  %v1859_v5 = vpack.c.bf16 %v1847_v18, %v1846_v7  ;;  %v3984_v62 = vpop.f32.mrb[42].mxu0 }
 0x576   : > { %v1545_v57 = vpop.xlane.xlu0 %1544  ;;  %1608 = vadd.xlane.f32.xlu0 %v6151_v50  ;;  %v6156_v12 = vpop.eup %4465  ;;  %3993 = vmatprep.subr.bf16.mxu0 %v1858_v20  ;;  %v1850_v47 = vmax.f32 %v1818_v13, 0.0  ;;  %v1821_v2 = vadd.f32 %v3984_v62, %v6137_v3 }
 0x577   : > { %4475 = vpow2.f32 %v1588_v54  ;;  %v1590_v6 = vmul.f32 1.442695, %v1567_v55  ;;  %v1568_v61 = vsub.f32 %v6112_v48, %v1545_v57  ;;  %v1810_v48 = vadd.f32 %v6137_v3, %v1809_v16  ;;  %v1812_v15 = vpop.f32.mrb[43].mxu0  ;;  %3994 = vmatpush3.bf16.msra.mxu0 %v1858_v20 }
 0x578   : > { %v1547_v1 = vpop.xlane.xlu1 %1546  ;;  %v1813_v17 = vadd.f32 %v6137_v3, %v1812_v15  ;;  %3995 = vmatprep.subr.bf16.mxu0 %v1859_v5  ;;  %v1851_v57 = vmax.f32 %v1821_v2, 0.0 }
 0x579   : > { %v6158_v10 = vpop.eup %4467  ;;  %v1592_v19 = vmul.f32 1.442695, %v1568_v61  ;;  %v1569_v11 = vsub.f32 %v6115_v51, %v1547_v1  ;;  %4477 = vpow2.f32 %v1590_v6  ;;  %v1848_v7 = vmax.f32 %v1810_v48, 0.0 }
 0x57a   : > { %v1549_v14 = vpop.xlane.xlu0 %1548  ;;  %1610 = vadd.xlane.f32.xlu1 %v6158_v10  ;;  %1612 = vadd.xlane.f32.xlu0 %v6156_v12  ;;  %v6166_v46 = vpop.eup %4469  ;;  %v1849_v18 = vmax.f32 %v1813_v17, 0.0  ;;  %v1861_v20 = vpack.c.bf16 %v1851_v57, %v1850_v47 }
 0x57b   : > { %4479 = vpow2.f32 %v1592_v19  ;;  %v1594_v4 = vmul.f32 1.442695, %v1569_v11  ;;  %v1570_v63 = vsub.f32 %v6118_v52, %v1549_v14  ;;  %3996 = vmatpush3.bf16.msra.mxu0 %v1859_v5 }
 0x57c   : > { %v1551_v51 = vpop.xlane.xlu1 %1550  ;;  %v1860_v8 = vpack.c.bf16 %v1849_v18, %v1848_v7 }
 0x57d   : > { %v6170_v49 = vpop.eup %4471  ;;  %v1596_v54 = vmul.f32 1.442695, %v1570_v63  ;;  %v1571_v55 = vsub.f32 %v6121_v53, %v1551_v51  ;;  %4481 = vpow2.f32 %v1594_v4  ;;  %v3987_v53 = vpop.f32.mrb[44].mxu0 }
 0x57e   : > { %1614 = vadd.xlane.f32.xlu1 %v6166_v46  ;;  %1616 = vadd.xlane.f32.xlu0 %v6170_v49  ;;  %v1553_v52 = vpop.xlane.xlu0 %1552  ;;  %v1834_v16 = vadd.f32 %v3987_v53, %v6137_v3  ;;  %v1825_v14 = vpop.f32.mrb[45].mxu0 }
 0x57f   : > { %4483 = vpow2.f32 %v1596_v54  ;;  %v1598_v9 = vmul.f32 1.442695, %v1571_v55  ;;  %v1572_v6 = vsub.f32 %v6124_v56, %v1553_v52  ;;  %v6176_v61 = vpop.eup %4473  ;;  %v1826_v48 = vadd.f32 %v6137_v3, %v1825_v14  ;;  %v3988_v62 = vpop.f32.mrb[46].mxu0  ;;  %3997 = vmatprep.subr.bf16.mxu0 %v1860_v8  ;;  %v4458_v14 = vld [vmem:[#allocation19 + $0x18] sm:$0xff]  }
 0x580   : > { %v1555_v1 = vpop.xlane.xlu1 %1554  ;;  %v1828_v63 = vpop.f32.mrb[47].mxu0  ;;  %v1854_v51 = vmax.f32 %v1834_v16, 0.0  ;;  %v1837_v7 = vadd.f32 %v3988_v62, %v6137_v3  ;;  %3998 = vmatpush3.bf16.msra.mxu0 %v1860_v8  ;;  %v4457_v16 = vld [vmem:[#allocation19 + $0x10] sm:$0xff]  }
 0x581   : > { %v6178_v19 = vpop.eup %4475  ;;  %v1600_v11 = vmul.f32 1.442695, %v1572_v6  ;;  %v1573_v13 = vsub.f32 %v6127_v58, %v1555_v1  ;;  %4485 = vpow2.f32 %v1598_v9  ;;  %v1852_v47 = vmax.f32 %v1826_v48, 0.0  ;;  %3999 = vmatprep.subr.bf16.mxu0 %v1861_v20  ;;  %v4460_v48 = vld [vmem:[#allocation19 + $0x28] sm:$0xff]   ;;  %v4461_v62 = vld [vmem:[#allocation19 + $0x30] sm:$0xff]  }
 0x582   : > { %1618 = vadd.xlane.f32.xlu1 %v6176_v61  ;;  %1620 = vadd.xlane.f32.xlu0 %v6178_v19  ;;  %v1557_v56 = vpop.xlane.xlu0 %1556  ;;  %v1829_v2 = vadd.f32 %v6137_v3, %v1828_v63 }
 0x583   : > { %4487 = vpow2.f32 %v1600_v11  ;;  %v1602_v5 = vmul.f32 1.442695, %v1573_v13  ;;  %v1574_v4 = vsub.f32 %v6130_v59, %v1557_v56  ;;  %v6186_v15 = vpop.eup %4477  ;;  %v1855_v59 = vmax.f32 %v1837_v7, 0.0  ;;  %v4455_v11 = vld [vmem:[#allocation19] sm:$0xff]   ;;  %v4456_v13 = vld [vmem:[#allocation19 + $0x8] sm:$0xff]  }
 0x584   : > { %v1559_v58 = vpop.xlane.xlu1 %1558  ;;  %v1853_v52 = vmax.f32 %v1829_v2, 0.0  ;;  %4000 = vmatpush3.bf16.msra.mxu0 %v1861_v20  ;;  %4021 = vmatprep.subr.bf16.mxu1 %v4455_v11  ;;  %v4459_v56 = vld [vmem:[#allocation19 + $0x20] sm:$0xff]  }
 0x585   : > { %v6190_v17 = vpop.eup %4479  ;;  %v1604_v54 = vmul.f32 1.442695, %v1574_v4  ;;  %v1575_v55 = vsub.f32 %v6133_v60, %v1559_v58  ;;  %4489 = vpow2.f32 %v1602_v5  ;;  %v1863_v9 = vpack.c.bf16 %v1855_v59, %v1854_v51  ;;  %4022 = vmatpush3.bf16.msra.mxu1 %v4455_v11 }
 0x586   : > { %1622 = vadd.xlane.f32.xlu1 %v6186_v15  ;;  %1624 = vadd.xlane.f32.xlu0 %v6190_v17  ;;  %v1862_v3 = vpack.c.bf16 %v1853_v52, %v1852_v47 }
 0x587   : > { %4491 = vpow2.f32 %v1604_v54  ;;  %v1606_v57 = vmul.f32 1.442695, %v1575_v55  ;;  %v6195_v18 = vpop.eup %4481  ;;  %4023 = vmatprep.subr.bf16.mxu1 %v4456_v13 }
 0x588   : > { %4001 = vmatprep.subr.bf16.mxu0 %v1862_v3 }
 0x589   : > { %v6197_v6 = vpop.eup %4483  ;;  %4493 = vpow2.f32 %v1606_v57  ;;  %4002 = vmatpush3.bf16.msra.mxu0 %v1862_v3  ;;  %4024 = vmatpush3.bf16.msra.mxu1 %v4456_v13 }
 0x58a   : > { %1626 = vadd.xlane.f32.xlu1 %v6195_v18  ;;  %1628 = vadd.xlane.f32.xlu0 %v6197_v6 }
 0x58b   : > { %v6201_v60 = vpop.eup %4485  ;;  %4003 = vmatprep.subr.bf16.mxu0 %v1863_v9  ;;  %4025 = vmatprep.subr.bf16.mxu1 %v4457_v16 }
 0x58d   : > { %v6203_v1 = vpop.eup %4487  ;;  %4004 = vmatpush3.bf16.msra.mxu0 %v1863_v9  ;;  %4026 = vmatpush3.bf16.msra.mxu1 %v4457_v16 }
 0x58e   : > { %1630 = vadd.xlane.f32.xlu1 %v6201_v60  ;;  %1632 = vadd.xlane.f32.xlu0 %v6203_v1 }
 0x58f   : > { %v6207_v8 = vpop.eup %4489  ;;  %4027 = vmatprep.subr.bf16.mxu1 %v4458_v14 }
 0x591   : > { %v6209_v20 = vpop.eup %4491  ;;  %4028 = vmatpush3.bf16.msra.mxu1 %v4458_v14 }
 0x592   : > { %1634 = vadd.xlane.f32.xlu1 %v6207_v8  ;;  %1636 = vadd.xlane.f32.xlu0 %v6209_v20 }
 0x593   : > { %v6213_v53 = vpop.eup %4493  ;;  %4029 = vmatprep.subr.bf16.mxu1 %v4459_v56 }
 0x595   : > { %4030 = vmatpush3.bf16.msra.mxu1 %v4459_v56 }
 0x596   : > { %1638 = vadd.xlane.f32.xlu1 %v6213_v53  ;;  %4031 = vmatprep.subr.bf16.mxu1 %v4460_v48 }
 0x599   : > { %4032 = vmatpush3.bf16.msra.mxu1 %v4460_v48 }
 0x59a   : > { %4033 = vmatprep.subr.bf16.mxu1 %v4461_v62 }
 0x59d   : > { %4034 = vmatpush3.bf16.msra.mxu1 %v4461_v62 }
 0x603   : > { %v1609_v5 = vpop.xlane.xlu0 %1608 }
 0x604   : > { %4495 = vrcp.f32 %v1609_v5 }
 0x607   : > { %v1611_v4 = vpop.xlane.xlu1 %1610  ;;  %v1613_v63 = vpop.xlane.xlu0 %1612 }
 0x608   : > { %4497 = vrcp.f32 %v1611_v4 }
 0x609   : > { %4499 = vrcp.f32 %v1613_v63 }
 0x60b   : > { %v1615_v58 = vpop.xlane.xlu1 %1614  ;;  %v1617_v51 = vpop.xlane.xlu0 %1616 }
 0x60c   : > { %4501 = vrcp.f32 %v1615_v58 }
 0x60d   : > { %4503 = vrcp.f32 %v1617_v51 }
 0x60e   : > { %v4496_v2 = vpop.eup %4495 }
 0x60f   : > { %v1619_v47 = vpop.xlane.xlu1 %1618  ;;  %v1621_v7 = vpop.xlane.xlu0 %1620  ;;  %v1656_v52 = vmul.f32 %v4496_v2, %v6151_v50 }
 0x610   : > { %4505 = vrcp.f32 %v1619_v47 }
 0x611   : > { %4507 = vrcp.f32 %v1621_v7 }
 0x612   : > { %v4498_v54 = vpop.eup %4497 }
 0x613   : > { %v1623_v55 = vpop.xlane.xlu1 %1622  ;;  %v1625_v59 = vpop.xlane.xlu0 %1624  ;;  %v1657_v57 = vmul.f32 %v4498_v54, %v6158_v10 }
 0x614   : > { %v4500_v9 = vpop.eup %4499  ;;  %4509 = vrcp.f32 %v1623_v55 }
 0x615   : > { %v1864_v3 = vpack.c.bf16 %v1657_v57, %v1656_v52  ;;  %4511 = vrcp.f32 %v1625_v59  ;;  %v1658_v13 = vmul.f32 %v4500_v9, %v6156_v12 }
 0x616   : > { %v4502_v11 = vpop.eup %4501 }
 0x617   : > { %v1659_v16 = vmul.f32 %v4502_v11, %v6166_v46  ;;  %v1627_v14 = vpop.xlane.xlu1 %1626  ;;  %4005 = vmatprep.mubr.bf16.mxu0 %v1864_v3  ;;  %v1629_v56 = vpop.xlane.xlu0 %1628 }
 0x618   : > { %v4504_v48 = vpop.eup %4503  ;;  %4513 = vrcp.f32 %v1627_v14 }
 0x619   : > { %v1865_v62 = vpack.c.bf16 %v1659_v16, %v1658_v13  ;;  %4515 = vrcp.f32 %v1629_v56  ;;  %v1660_v4 = vmul.f32 %v4504_v48, %v6170_v49 }
 0x61a   : > { %v4506_v5 = vpop.eup %4505 }
 0x61b   : > { %v1631_v50 = vpop.xlane.xlu1 %1630  ;;  %4006 = vmatmul.mubr.bf16.vlgmr.msra.gmra.mrb[48].mxu0 %v1865_v62  ;;  %v1633_v10 = vpop.xlane.xlu0 %1632  ;;  %v1661_v63 = vmul.f32 %v4506_v5, %v6176_v61 }
 0x61c   : > { %v4508_v58 = vpop.eup %4507  ;;  %4517 = vrcp.f32 %v1631_v50 }
 0x61d   : > { %v1866_v12 = vpack.c.bf16 %v1661_v63, %v1660_v4  ;;  %4519 = vrcp.f32 %v1633_v10  ;;  %v1662_v7 = vmul.f32 %v4508_v58, %v6178_v19 }
 0x61e   : > { %v4510_v51 = vpop.eup %4509 }
 0x61f   : > { %v1635_v46 = vpop.xlane.xlu1 %1634  ;;  %4009 = vmatprep.mubr.bf16.mxu0 %v1866_v12  ;;  %v1637_v47 = vpop.xlane.xlu0 %1636  ;;  %v1663_v2 = vmul.f32 %v4510_v51, %v6186_v15 }
 0x620   : > { %v4512_v54 = vpop.eup %4511  ;;  %4521 = vrcp.f32 %v1635_v46 }
 0x621   : > { %v1867_v55 = vpack.c.bf16 %v1663_v2, %v1662_v7  ;;  %4523 = vrcp.f32 %v1637_v47  ;;  %v1664_v61 = vmul.f32 %v4512_v54, %v6190_v17 }
 0x622   : > { %v4514_v59 = vpop.eup %4513 }
 0x623   : > { %v1639_v49 = vpop.xlane.xlu1 %1638  ;;  %4010 = vmatmul.mubr.bf16.gmra.mrb[52].mxu0 %v1867_v55  ;;  %v1665_v52 = vmul.f32 %v4514_v59, %v6195_v18  ;;  %v4516_v57 = vpop.eup %4515 }
 0x624   : > { %4525 = vrcp.f32 %v1639_v49  ;;  %v1666_v19 = vmul.f32 %v4516_v57, %v6197_v6  ;;  %v4462_v6 = vld [vmem:[#allocation19 + $0x38] sm:$0xff]  }
 0x625   : > { %v1868_v9 = vpack.c.bf16 %v1665_v52, %v1664_v61  ;;  %4035 = vmatprep.subr.bf16.mxu1 %v4462_v6 }
 0x626   : > { %v4518_v3 = vpop.eup %4517  ;;  %4036 = vmatpush3.bf16.msra.mxu1 %v4462_v6 }
 0x627   : > { %4013 = vmatprep.mubr.bf16.mxu0 %v1868_v9  ;;  %v1667_v15 = vmul.f32 %v4518_v3, %v6201_v60  ;;  %v4520_v11 = vpop.eup %4519 }
 0x628   : > { %v1668_v14 = vmul.f32 %v4520_v11, %v6203_v1 }
 0x629   : > { %v1869_v13 = vpack.c.bf16 %v1667_v15, %v1666_v19 }
 0x62a   : > { %v4522_v16 = vpop.eup %4521 }
 0x62b   : > { %4014 = vmatmul.mubr.bf16.gmra.mrb[56].mxu0 %v1869_v13  ;;  %v1669_v56 = vmul.f32 %v4522_v16, %v6207_v8  ;;  %v4524_v17 = vpop.eup %4523 }
 0x62c   : > { %v1670_v62 = vmul.f32 %v4524_v17, %v6209_v20 }
 0x62d   : > { %v1870_v48 = vpack.c.bf16 %v1669_v56, %v1668_v14 }
 0x62e   : > { %v4526_v18 = vpop.eup %4525 }
 0x62f   : > { %4017 = vmatprep.mubr.bf16.mxu0 %v1870_v48  ;;  %v1671_v5 = vmul.f32 %v4526_v18, %v6213_v53 }
 0x631   : > { %v1871_v50 = vpack.c.bf16 %v1671_v5, %v1670_v62 }
 0x633   : > { %4018 = vmatmul.mubr.bf16.gmra.mrb[60].mxu0 %v1871_v50 }
 0x6ee   : > { %v4007_v60 = vpop.f32.mrb[48].mxu0 }
 0x6ef   : > { %v1906_v10 = vpop.f32.mrb[49].mxu0 }
 0x6f0   : > { %v4008_v4 = vpop.f32.mrb[50].mxu0 }
 0x6f1   : > { %v1970_v63 = vpack.c.bf16 %v4008_v4, %v4007_v60  ;;  %v1909_v1 = vpop.f32.mrb[51].mxu0 }
 0x6f2   : > { %v1969_v58 = vpack.c.bf16 %v1909_v1, %v1906_v10 }
 0x6f4   : > { %4037 = vmatprep.mubr.bf16.mxu1 %v1969_v58 }
 0x6f5   : > { %4038 = vmatmul.mubr.bf16.vlgmr.msra.gmra.mrb[32].mxu1 %v1970_v63 }
 0x6f6   : > { %v4011_v8 = vpop.f32.mrb[52].mxu0 }
 0x6f7   : > { %v1922_v12 = vpop.f32.mrb[53].mxu0 }
 0x6f8   : > { %v4012_v51 = vpop.f32.mrb[54].mxu0 }
 0x6f9   : > { %v1972_v46 = vpack.c.bf16 %v4012_v51, %v4011_v8  ;;  %v1925_v20 = vpop.f32.mrb[55].mxu0 }
 0x6fa   : > { %v1971_v47 = vpack.c.bf16 %v1925_v20, %v1922_v12 }
 0x6fc   : > { %4041 = vmatprep.mubr.bf16.mxu1 %v1971_v47 }
 0x6fd   : > { %4042 = vmatmul.mubr.bf16.gmra.mrb[36].mxu1 %v1972_v46 }
 0x6fe   : > { %v4015_v53 = vpop.f32.mrb[56].mxu0 }
 0x6ff   : > { %v1938_v7 = vpop.f32.mrb[57].mxu0 }
 0x700   : > { %v4016_v2 = vpop.f32.mrb[58].mxu0 }
 0x701   : > { %v1974_v54 = vpack.c.bf16 %v4016_v2, %v4015_v53  ;;  %v1941_v55 = vpop.f32.mrb[59].mxu0 }
 0x702   : > { %v1973_v59 = vpack.c.bf16 %v1941_v55, %v1938_v7 }
 0x704   : > { %4045 = vmatprep.mubr.bf16.mxu1 %v1973_v59 }
 0x705   : > { %4046 = vmatmul.mubr.bf16.gmra.mrb[40].mxu1 %v1974_v54 }
 0x706   : > { %v4019_v49 = vpop.f32.mrb[60].mxu0 }
 0x707   : > { %v1954_v61 = vpop.f32.mrb[61].mxu0 }
 0x708   : > { %v4020_v52 = vpop.f32.mrb[62].mxu0 }
 0x709   : > { %v1976_v57 = vpack.c.bf16 %v4020_v52, %v4019_v49  ;;  %v1957_v9 = vpop.f32.mrb[63].mxu0 }
 0x70a   : > { %v1975_v3 = vpack.c.bf16 %v1957_v9, %v1954_v61 }
 0x70c   : > { %4049 = vmatprep.mubr.bf16.mxu1 %v1975_v3 }
 0x70d   : > { %4050 = vmatmul.mubr.bf16.gmra.mrb[44].mxu1 %v1976_v57 }
 0x7c8   : > { %v4039_v19 = vpop.f32.mrb[32].mxu1 }
 0x7c9   : > { %v2140_v15 = vadd.f32 %v4039_v19, %v5960_v23  ;;  %v2075_v11 = vpop.f32.mrb[33].mxu1 }
 0x7ca   : > { %v4040_v13 = vpop.f32.mrb[34].mxu1  ;;  %v6235_v56 = vadd.f32 %v2075_v11, %v5954_v21 }
 0x7cb   : > { %v2141_v16 = vadd.f32 %v4040_v13, %v5963_v24  ;;  %2158 = vadd.xlane.f32.xlu0 %v2140_v15  ;;  %v2078_v14 = vpop.f32.mrb[35].mxu1 }
 0x7cc   : > { %v6238_v17 = vadd.f32 %v2078_v14, %v5957_v22 }
 0x7cd   : > { %2160 = vadd.xlane.f32.xlu1 %v2141_v16 }
 0x7cf   : > { %2154 = vadd.xlane.f32.xlu0 %v6235_v56 }
 0x7d0   : > { %v4043_v48 = vpop.f32.mrb[36].mxu1 }
 0x7d1   : > { %v6242_v18 = vadd.f32 %v4043_v48, %v5976_v28  ;;  %2156 = vadd.xlane.f32.xlu1 %v6238_v17  ;;  %v2091_v23 = vpop.f32.mrb[37].mxu1 }
 0x7d2   : > { %v4044_v62 = vpop.f32.mrb[38].mxu1  ;;  %v6250_v5 = vadd.f32 %v2091_v23, %v5966_v25 }
 0x7d3   : > { %v6246_v24 = vadd.f32 %v4044_v62, %v5979_v29  ;;  %2166 = vadd.xlane.f32.xlu0 %v6242_v18  ;;  %v2094_v21 = vpop.f32.mrb[39].mxu1 }
 0x7d4   : > { %v6254_v22 = vadd.f32 %v2094_v21, %v5969_v26 }
 0x7d5   : > { %2168 = vadd.xlane.f32.xlu1 %v6246_v24 }
 0x7d7   : > { %2162 = vadd.xlane.f32.xlu0 %v6250_v5 }
 0x7d8   : > { %v4047_v28 = vpop.f32.mrb[40].mxu1 }
 0x7d9   : > { %v6258_v50 = vadd.f32 %v4047_v28, %v5996_v34  ;;  %2164 = vadd.xlane.f32.xlu1 %v6254_v22  ;;  %v2107_v29 = vpop.f32.mrb[41].mxu1 }
 0x7da   : > { %v4048_v6 = vpop.f32.mrb[42].mxu1  ;;  %v6266_v10 = vadd.f32 %v2107_v29, %v5982_v30 }
 0x7db   : > { %v6262_v60 = vadd.f32 %v4048_v6, %v5999_v35  ;;  %2174 = vadd.xlane.f32.xlu0 %v6258_v50  ;;  %v2110_v25 = vpop.f32.mrb[43].mxu1 }
 0x7dc   : > { %v6270_v26 = vadd.f32 %v2110_v25, %v5993_v33 }
 0x7dd   : > { %2176 = vadd.xlane.f32.xlu1 %v6262_v60 }
 0x7df   : > { %2170 = vadd.xlane.f32.xlu0 %v6266_v10 }
 0x7e0   : > { %v4051_v34 = vpop.f32.mrb[44].mxu1 }
 0x7e1   : > { %2172 = vadd.xlane.f32.xlu1 %v6270_v26  ;;  %v2123_v4 = vpop.f32.mrb[45].mxu1  ;;  %v6282_v30 = vadd.f32 %v4051_v34, %v6012_v39 }
 0x7e2   : > { %v6275_v35 = vadd.f32 %v2123_v4, %v6006_v37  ;;  %v4052_v63 = vpop.f32.mrb[46].mxu1  ;;  %v6291_v37 = vand.u32 127, %v1426_v0 }
 0x7e3   : > { %v2126_v1 = vpop.f32.mrb[47].mxu1  ;;  %v6286_v33 = vadd.f32 %v4052_v63, %v6023_v42 }
 0x7e4   : > { %v6278_v58 = vadd.f32 %v2126_v1, %v6009_v38  ;;  %2178 = vadd.xlane.f32.xlu0 %v6275_v35  ;;  %vm2220_vm1 = vcmp.lt.s32.totalorder %v6291_v37, 32 }
 0x7e6   : > { %2180 = vadd.xlane.f32.xlu1 %v6278_v58 }
 0x7e8   : > { %2182 = vadd.xlane.f32.xlu0 %v6282_v30 }
 0x7ea   : > { %2184 = vadd.xlane.f32.xlu1 %v6286_v33 }
 0x858   : > { %v2159_v8 = vpop.xlane.xlu0 %2158 }
 0x859   : > { %v2188_v38 = vmul.f32 0.03125, %v2159_v8 }
 0x85a   : > { %v2161_v12 = vpop.xlane.xlu1 %2160 }
 0x85b   : > { %v2204_v51 = vsub.f32 %v2140_v15, %v2188_v38  ;;  %v2189_v39 = vmul.f32 0.03125, %v2161_v12 }
 0x85c   : > { %v2155_v46 = vpop.xlane.xlu0 %2154 }
 0x85d   : > { %v2205_v20 = vsub.f32 %v2141_v16, %v2189_v39  ;;  %v2186_v47 = vmul.f32 0.03125, %v2155_v46  ;;  %v6296_v42 = vsel %vm2220_vm1, %v2204_v51, 0.0 }
 0x85e   : > { %v2157_v53 = vpop.xlane.xlu1 %2156  ;;  %v2241_v7 = vmul.f32 %v6296_v42, %v6296_v42 }
 0x85f   : > { %v2202_v0 = vsub.f32 %v6235_v56, %v2186_v47  ;;  %v2187_v2 = vmul.f32 0.03125, %v2157_v53  ;;  %v6303_v54 = vsel %vm2220_vm1, %v2205_v20, 0.0 }
 0x860   : > { %2259 = vadd.xlane.f32.xlu0 %v2241_v7  ;;  %v2167_v55 = vpop.xlane.xlu0 %2166  ;;  %v2242_v59 = vmul.f32 %v6303_v54, %v6303_v54 }
 0x861   : > { %v2203_v49 = vsub.f32 %v6238_v17, %v2187_v2  ;;  %v2192_v61 = vmul.f32 0.03125, %v2167_v55  ;;  %v6310_v52 = vsel %vm2220_vm1, %v2202_v0, 0.0 }
 0x862   : > { %v2169_v57 = vpop.xlane.xlu1 %2168  ;;  %2261 = vadd.xlane.f32.xlu1 %v2242_v59  ;;  %v2239_v9 = vmul.f32 %v6310_v52, %v6310_v52 }
 0x863   : > { %v2208_v3 = vsub.f32 %v6242_v18, %v2192_v61  ;;  %v2193_v19 = vmul.f32 0.03125, %v2169_v57  ;;  %v6317_v15 = vsel %vm2220_vm1, %v2203_v49, 0.0 }
 0x864   : > { %2255 = vadd.xlane.f32.xlu0 %v2239_v9  ;;  %v2163_v11 = vpop.xlane.xlu0 %2162  ;;  %v2240_v13 = vmul.f32 %v6317_v15, %v6317_v15 }
 0x865   : > { %v2209_v16 = vsub.f32 %v6246_v24, %v2193_v19  ;;  %v2190_v14 = vmul.f32 0.03125, %v2163_v11  ;;  %v6324_v56 = vsel %vm2220_vm1, %v2208_v3, 0.0 }
 0x866   : > { %v2165_v17 = vpop.xlane.xlu1 %2164  ;;  %2257 = vadd.xlane.f32.xlu1 %v2240_v13  ;;  %v2245_v48 = vmul.f32 %v6324_v56, %v6324_v56 }
 0x867   : > { %v2206_v18 = vsub.f32 %v6250_v5, %v2190_v14  ;;  %v2191_v23 = vmul.f32 0.03125, %v2165_v17  ;;  %v6331_v62 = vsel %vm2220_vm1, %v2209_v16, 0.0 }
 0x868   : > { %2267 = vadd.xlane.f32.xlu0 %v2245_v48  ;;  %v2175_v21 = vpop.xlane.xlu0 %2174  ;;  %v2246_v24 = vmul.f32 %v6331_v62, %v6331_v62 }
 0x869   : > { %v2207_v28 = vsub.f32 %v6254_v22, %v2191_v23  ;;  %v2196_v29 = vmul.f32 0.03125, %v2175_v21  ;;  %v6338_v6 = vsel %vm2220_vm1, %v2206_v18, 0.0 }
 0x86a   : > { %v2177_v25 = vpop.xlane.xlu1 %2176  ;;  %2269 = vadd.xlane.f32.xlu1 %v2246_v24  ;;  %v2243_v5 = vmul.f32 %v6338_v6, %v6338_v6 }
 0x86b   : > { %v2212_v34 = vsub.f32 %v6258_v50, %v2196_v29  ;;  %v2197_v4 = vmul.f32 0.03125, %v2177_v25  ;;  %v6345_v63 = vsel %vm2220_vm1, %v2207_v28, 0.0 }
 0x86c   : > { %2263 = vadd.xlane.f32.xlu0 %v2243_v5  ;;  %v2171_v1 = vpop.xlane.xlu0 %2170  ;;  %v2244_v22 = vmul.f32 %v6345_v63, %v6345_v63 }
 0x86d   : > { %v2213_v8 = vsub.f32 %v6262_v60, %v2197_v4  ;;  %v2194_v38 = vmul.f32 0.03125, %v2171_v1  ;;  %v6352_v12 = vsel %vm2220_vm1, %v2212_v34, 0.0 }
 0x86e   : > { %v2173_v51 = vpop.xlane.xlu1 %2172  ;;  %2265 = vadd.xlane.f32.xlu1 %v2244_v22  ;;  %v2249_v50 = vmul.f32 %v6352_v12, %v6352_v12 }
 0x86f   : > { %v2210_v39 = vsub.f32 %v6266_v10, %v2194_v38  ;;  %v2195_v46 = vmul.f32 0.03125, %v2173_v51  ;;  %v6359_v20 = vsel %vm2220_vm1, %v2213_v8, 0.0 }
 0x870   : > { %2275 = vadd.xlane.f32.xlu0 %v2249_v50  ;;  %v2250_v60 = vmul.f32 %v6359_v20, %v6359_v20 }
 0x871   : > { %v2211_v47 = vsub.f32 %v6270_v26, %v2195_v46  ;;  %v2179_v53 = vpop.xlane.xlu0 %2178  ;;  %v6366_v7 = vsel %vm2220_vm1, %v2210_v39, 0.0 }
 0x872   : > { %v2198_v0 = vmul.f32 0.03125, %v2179_v53  ;;  %2277 = vadd.xlane.f32.xlu1 %v2250_v60  ;;  %v2247_v10 = vmul.f32 %v6366_v7, %v6366_v7 }
 0x873   : > { %v2181_v2 = vpop.xlane.xlu1 %2180  ;;  %v6372_v55 = vsel %vm2220_vm1, %v2211_v47, 0.0 }
 0x874   : > { %v2214_v59 = vsub.f32 %v6275_v35, %v2198_v0  ;;  %v2199_v49 = vmul.f32 0.03125, %v2181_v2  ;;  %2271 = vadd.xlane.f32.xlu0 %v2247_v10  ;;  %v2248_v26 = vmul.f32 %v6372_v55, %v6372_v55  ;;  %v6404_v0 = vld [vmem:[#allocation20] ss:$0 sm:$0xff] }
 0x875   : > { %v2183_v61 = vpop.xlane.xlu0 %2182 }
 0x876   : > { %v2215_v57 = vsub.f32 %v6278_v58, %v2199_v49  ;;  %v2200_v9 = vmul.f32 0.03125, %v2183_v61  ;;  %2273 = vadd.xlane.f32.xlu1 %v2248_v26  ;;  %v6380_v3 = vsel %vm2220_vm1, %v2214_v59, 0.0  ;;  %v6407_v61 = vld [vmem:[#allocation22] ss:$0 sm:$0xff] }
 0x877   : > { %v2185_v19 = vpop.xlane.xlu1 %2184  ;;  %v2251_v11 = vmul.f32 %v6380_v3, %v6380_v3 }
 0x878   : > { %v2216_v35 = vsub.f32 %v6282_v30, %v2200_v9  ;;  %v2201_v13 = vmul.f32 0.03125, %v2185_v19  ;;  %v6387_v16 = vsel %vm2220_vm1, %v2215_v57, 0.0 }
 0x879   : > { %2279 = vadd.xlane.f32.xlu0 %v2251_v11  ;;  %v2252_v58 = vmul.f32 %v6387_v16, %v6387_v16 }
 0x87a   : > { %v2217_v14 = vsub.f32 %v6286_v33, %v2201_v13  ;;  %v6394_v17 = vsel %vm2220_vm1, %v2216_v35, 0.0 }
 0x87b   : > { %2281 = vadd.xlane.f32.xlu1 %v2252_v58  ;;  %v2253_v48 = vmul.f32 %v6394_v17, %v6394_v17 }
 0x87c   : > { %v6400_v30 = vsel %vm2220_vm1, %v2217_v14, 0.0 }
 0x87d   : > { %2283 = vadd.xlane.f32.xlu0 %v2253_v48  ;;  %v2254_v18 = vmul.f32 %v6400_v30, %v6400_v30 }
 0x87f   : > { %2285 = vadd.xlane.f32.xlu1 %v2254_v18 }
 0x8ed   : > { %v2260_v23 = vpop.xlane.xlu0 %2259 }
 0x8ee   : > { %v2289_v21 = vmul.f32 0.03125, %v2260_v23 }
 0x8ef   : > { %v2262_v33 = vpop.xlane.xlu1 %2261 }
 0x8f0   : > { %v2305_v24 = vadd.f32 1e-05, %v2289_v21  ;;  %v2290_v28 = vmul.f32 0.03125, %v2262_v33 }
 0x8f1   : > { %v2256_v29 = vpop.xlane.xlu0 %2255 }
 0x8f2   : > { %4527 = vrsqrt.f32 %v2305_v24  ;;  %v2306_v25 = vadd.f32 1e-05, %v2290_v28  ;;  %v2287_v5 = vmul.f32 0.03125, %v2256_v29 }
 0x8f3   : > { %v2258_v34 = vpop.xlane.xlu1 %2257 }
 0x8f4   : > { %4529 = vrsqrt.f32 %v2306_v25  ;;  %v2303_v4 = vadd.f32 1e-05, %v2287_v5  ;;  %v2288_v37 = vmul.f32 0.03125, %v2258_v34 }
 0x8f5   : > { %v2268_v1 = vpop.xlane.xlu0 %2267 }
 0x8f6   : > { %4531 = vrsqrt.f32 %v2303_v4  ;;  %v2304_v22 = vadd.f32 1e-05, %v2288_v37  ;;  %v2293_v8 = vmul.f32 0.03125, %v2268_v1 }
 0x8f7   : > { %v2270_v38 = vpop.xlane.xlu1 %2269 }
 0x8f8   : > { %4533 = vrsqrt.f32 %v2304_v22  ;;  %v2309_v51 = vadd.f32 1e-05, %v2293_v8  ;;  %v2294_v50 = vmul.f32 0.03125, %v2270_v38 }
 0x8f9   : > { %v2264_v39 = vpop.xlane.xlu0 %2263 }
 0x8fa   : > { %4535 = vrsqrt.f32 %v2309_v51  ;;  %v2310_v46 = vadd.f32 1e-05, %v2294_v50  ;;  %v2291_v60 = vmul.f32 0.03125, %v2264_v39 }
 0x8fb   : > { %v2266_v47 = vpop.xlane.xlu1 %2265 }
 0x8fc   : > { %v4528_v53 = vpop.eup %4527  ;;  %4537 = vrsqrt.f32 %v2310_v46  ;;  %v2307_v10 = vadd.f32 1e-05, %v2291_v60  ;;  %v2292_v2 = vmul.f32 0.03125, %v2266_v47 }
 0x8fd   : > { %v2337_v59 = vmul.f32 %v4528_v53, %v6296_v42  ;;  %v2276_v49 = vpop.xlane.xlu0 %2275 }
 0x8fe   : > { %v4530_v26 = vpop.eup %4529  ;;  %4539 = vrsqrt.f32 %v2307_v10  ;;  %v2308_v57 = vadd.f32 1e-05, %v2292_v2  ;;  %v2297_v9 = vmul.f32 0.03125, %v2276_v49 }
 0x8ff   : > { %v2360_v19 = vmul.f32 %v6404_v0, %v2337_v59  ;;  %v2338_v11 = vmul.f32 %v4530_v26, %v6303_v54  ;;  %v2278_v35 = vpop.xlane.xlu1 %2277 }
 0x900   : > { %v4532_v13 = vpop.eup %4531  ;;  %4541 = vrsqrt.f32 %v2308_v57  ;;  %v2313_v58 = vadd.f32 1e-05, %v2297_v9  ;;  %v2298_v14 = vmul.f32 0.03125, %v2278_v35 }
 0x901   : > { %v2383_v48 = vadd.f32 %v6407_v61, %v2360_v19  ;;  %v2361_v42 = vmul.f32 %v6404_v0, %v2338_v11  ;;  %v2335_v18 = vmul.f32 %v4532_v13, %v6310_v52  ;;  %v2272_v23 = vpop.xlane.xlu0 %2271 }
 0x902   : > { %v4534_v21 = vpop.eup %4533  ;;  %4543 = vrsqrt.f32 %v2313_v58  ;;  %v2314_v33 = vadd.f32 1e-05, %v2298_v14  ;;  %v2295_v24 = vmul.f32 0.03125, %v2272_v23 }
 0x903   : > { %2399 = vst [vmem:[%s5914_s24 + $0x10] sm:$0xff] %v2383_v48  ;;  %v2384_v54 = vadd.f32 %v6407_v61, %v2361_v42  ;;  %v2358_v28 = vmul.f32 %v6404_v0, %v2335_v18  ;;  %v2336_v29 = vmul.f32 %v4534_v21, %v6317_v15  ;;  %v2274_v25 = vpop.xlane.xlu1 %2273 }
 0x904   : > { %v4536_v5 = vpop.eup %4535  ;;  %4545 = vrsqrt.f32 %v2314_v33  ;;  %v2311_v34 = vadd.f32 1e-05, %v2295_v24  ;;  %v2296_v4 = vmul.f32 0.03125, %v2274_v25 }
 0x905   : > { %2400 = vst [vmem:[%s5914_s24 + $0x18] sm:$0xff] %v2384_v54  ;;  %v2381_v52 = vadd.f32 %v6407_v61, %v2358_v28  ;;  %v2359_v37 = vmul.f32 %v6404_v0, %v2336_v29  ;;  %v2341_v1 = vmul.f32 %v4536_v5, %v6324_v56 }
 0x906   : > { %v4538_v22 = vpop.eup %4537  ;;  %4547 = vrsqrt.f32 %v2311_v34  ;;  %v2312_v8 = vadd.f32 1e-05, %v2296_v4  ;;  %v2280_v38 = vpop.xlane.xlu0 %2279 }
 0x907   : > { %2397 = vst [vmem:[%s5914_s24] sm:$0xff] %v2381_v52  ;;  %v2382_v15 = vadd.f32 %v6407_v61, %v2359_v37  ;;  %v2364_v51 = vmul.f32 %v6404_v0, %v2341_v1  ;;  %v2342_v50 = vmul.f32 %v4538_v22, %v6331_v62  ;;  %v2299_v39 = vmul.f32 0.03125, %v2280_v38 }
 0x908   : > { %v4540_v46 = vpop.eup %4539  ;;  %4549 = vrsqrt.f32 %v2312_v8  ;;  %v2282_v60 = vpop.xlane.xlu1 %2281 }
 0x909   : > { %2398 = vst [vmem:[%s5914_s24 + $0x8] sm:$0xff] %v2382_v15  ;;  %v2387_v47 = vadd.f32 %v6407_v61, %v2364_v51  ;;  %v2365_v56 = vmul.f32 %v6404_v0, %v2342_v50  ;;  %v2339_v53 = vmul.f32 %v4540_v46, %v6338_v6  ;;  %v2315_v10 = vadd.f32 1e-05, %v2299_v39 }
 0x90a   : > { %v4542_v2 = vpop.eup %4541  ;;  %v2300_v59 = vmul.f32 0.03125, %v2282_v60  ;;  %v2284_v49 = vpop.xlane.xlu0 %2283 }
 0x90b   : > { %2403 = vst [vmem:[%s5914_s24 + $0x30] sm:$0xff] %v2387_v47  ;;  %v2388_v26 = vadd.f32 %v6407_v61, %v2365_v56  ;;  %v2362_v62 = vmul.f32 %v6404_v0, %v2339_v53  ;;  %v2340_v57 = vmul.f32 %v4542_v2, %v6345_v63  ;;  %4551 = vrsqrt.f32 %v2315_v10 }
 0x90c   : > { %v4544_v9 = vpop.eup %4543  ;;  %v2316_v19 = vadd.f32 1e-05, %v2300_v59  ;;  %v2301_v11 = vmul.f32 0.03125, %v2284_v49  ;;  %v2286_v35 = vpop.xlane.xlu1 %2285 }
 0x90d   : > { %2404 = vst [vmem:[%s5914_s24 + $0x38] sm:$0xff] %v2388_v26  ;;  %v2385_v6 = vadd.f32 %v6407_v61, %v2362_v62  ;;  %v2363_v13 = vmul.f32 %v6404_v0, %v2340_v57  ;;  %v2345_v58 = vmul.f32 %v4544_v9, %v6352_v12  ;;  %v2302_v14 = vmul.f32 0.03125, %v2286_v35 }
 0x90e   : > { %v4546_v48 = vpop.eup %4545  ;;  %4553 = vrsqrt.f32 %v2316_v19  ;;  %v2317_v42 = vadd.f32 1e-05, %v2301_v11 }
 0x90f   : > { %2401 = vst [vmem:[%s5914_s24 + $0x20] sm:$0xff] %v2385_v6  ;;  %v2386_v63 = vadd.f32 %v6407_v61, %v2363_v13  ;;  %v2368_v18 = vmul.f32 %v6404_v0, %v2345_v58  ;;  %v2346_v23 = vmul.f32 %v4546_v48, %v6359_v20  ;;  %v2318_v21 = vadd.f32 1e-05, %v2302_v14 }
 0x910   : > { %v4548_v33 = vpop.eup %4547  ;;  %4555 = vrsqrt.f32 %v2317_v42 }
 0x911   : > { %2402 = vst [vmem:[%s5914_s24 + $0x28] sm:$0xff] %v2386_v63  ;;  %v2391_v12 = vadd.f32 %v6407_v61, %v2368_v18  ;;  %v2369_v24 = vmul.f32 %v6404_v0, %v2346_v23  ;;  %v2343_v54 = vmul.f32 %v4548_v33, %v6366_v7  ;;  %4557 = vrsqrt.f32 %v2318_v21 }
 0x912   : > { %v4550_v28 = vpop.eup %4549 }
 0x913   : > { %2407 = vst [vmem:[%s5914_s24 + $0x50] sm:$0xff] %v2391_v12  ;;  %v2392_v29 = vadd.f32 %v6407_v61, %v2369_v24  ;;  %v2366_v25 = vmul.f32 %v6404_v0, %v2343_v54  ;;  %v2344_v20 = vmul.f32 %v4550_v28, %v6372_v55 }
 0x915   : > { %v4552_v5 = vpop.eup %4551  ;;  %2408 = vst [vmem:[%s5914_s24 + $0x58] sm:$0xff] %v2392_v29  ;;  %v2389_v34 = vadd.f32 %v6407_v61, %v2366_v25  ;;  %v2367_v4 = vmul.f32 %v6404_v0, %v2344_v20 }
 0x916   : > { %v2347_v52 = vmul.f32 %v4552_v5, %v6380_v3 }
 0x917   : > { %2405 = vst [vmem:[%s5914_s24 + $0x40] sm:$0xff] %v2389_v34  ;;  %v2390_v7 = vadd.f32 %v6407_v61, %v2367_v4 }
 0x918   : > { %v4554_v37 = vpop.eup %4553  ;;  %v2370_v1 = vmul.f32 %v6404_v0, %v2347_v52 }
 0x919   : > { %2406 = vst [vmem:[%s5914_s24 + $0x48] sm:$0xff] %v2390_v7  ;;  %v2348_v55 = vmul.f32 %v4554_v37, %v6387_v16 }
 0x91a   : > { %v4556_v22 = vpop.eup %4555  ;;  %v2393_v8 = vadd.f32 %v6407_v61, %v2370_v1 }
 0x91b   : > { %v4558_v38 = vpop.eup %4557  ;;  %v2371_v15 = vmul.f32 %v6404_v0, %v2348_v55  ;;  %v2349_v3 = vmul.f32 %v4556_v22, %v6394_v17 }
 0x91c   : > { %2409 = vst [vmem:[%s5914_s24 + $0x60] sm:$0xff] %v2393_v8  ;;  %v2350_v51 = vmul.f32 %v4558_v38, %v6400_v30 }
 0x91d   : > { %v2394_v50 = vadd.f32 %v6407_v61, %v2371_v15  ;;  %v2372_v39 = vmul.f32 %v6404_v0, %v2349_v3 }
 0x91e   : > { %v2373_v46 = vmul.f32 %v6404_v0, %v2350_v51 }
 0x91f   : > { %2410 = vst [vmem:[%s5914_s24 + $0x68] sm:$0xff] %v2394_v50  ;;  %v2395_v16 = vadd.f32 %v6407_v61, %v2372_v39 }
 0x920   : > { %v2396_v60 = vadd.f32 %v6407_v61, %v2373_v46 }
 0x921   : > { %2411 = vst [vmem:[%s5914_s24 + $0x70] sm:$0xff] %v2395_v16 }
 0x922   : > { %2412 = vst [vmem:[%s5914_s24 + $0x78] sm:$0xff] %v2396_v60 }
 0x923 PF: > { %s6839_s30 = sld [smem:[#allocation49_spill]] }
 0x929   : > { %p3615_p10 = scmp.ne.s32.totalorder %s6839_s30, 2 }
 0x92a   : > { %v4559_v17 = vld [vmem:[#allocation23] sm:$0xff] (!%p3615_p10)   ;;  %4069 = vmatprep.mubr.bf16.mxu0 (!%p3615_p10), %v5973_v27  ;;  %4101 = vmatprep.mubr.bf16.mxu1 (!%p3615_p10), %v5973_v27  ;;  %v4560_v30 = vld [vmem:[#allocation23 + $0x8] sm:$0xff] (!%p3615_p10)   ;;  %v4561_v0 = vld [vmem:[#allocation23 + $0x10] sm:$0xff] (!%p3615_p10)  }
 0x92b   : > { %2416 = sbr.rel (%p3615_p10) target bundleno = 3378 (0xd32), region = 160  ;;  %4053 = vmatprep.subr.bf16.mxu0 (!%p3615_p10), %v4559_v17  ;;  %v4562_v47 = vld [vmem:[#allocation23 + $0x18] sm:$0xff] (!%p3615_p10)   ;;  %v4567_v61 = vld [vmem:[#allocation26] sm:$0xff] (!%p3615_p10)   ;;  %v4568_v56 = vld [vmem:[#allocation26 + $0x8] sm:$0xff] (!%p3615_p10)  }
 0x92c   : > { %4054 = vmatpush3.bf16.msra.mxu0 (!%p3615_p10), %v4559_v17  ;;  %4085 = vmatprep.subr.bf16.mxu1 (!%p3615_p10), %v4567_v61  ;;  %v4563_v53 = vld [vmem:[#allocation23 + $0x20] sm:$0xff] (!%p3615_p10)   ;;  %v4569_v10 = vld [vmem:[#allocation26 + $0x10] sm:$0xff] (!%p3615_p10)   ;;  %v4564_v2 = vld [vmem:[#allocation23 + $0x28] sm:$0xff] (!%p3615_p10)  }
 0x92d   : > { %4055 = vmatprep.subr.bf16.mxu0 (!%p3615_p10), %v4560_v30  ;;  %4086 = vmatpush3.bf16.msra.mxu1 (!%p3615_p10), %v4567_v61  ;;  %v4570_v27 = vld [vmem:[#allocation26 + $0x18] sm:$0xff] (!%p3615_p10)   ;;  %v4565_v59 = vld [vmem:[#allocation23 + $0x30] sm:$0xff] (!%p3615_p10)   ;;  %v4571_v49 = vld [vmem:[#allocation26 + $0x20] sm:$0xff] (!%p3615_p10)  }
 0x92e   : > { %4087 = vmatprep.subr.bf16.mxu1 (!%p3615_p10), %v4568_v56  ;;  %v4566_v26 = vld [vmem:[#allocation23 + $0x38] sm:$0xff] (!%p3615_p10)   ;;  %v4572_v62 = vld [vmem:[#allocation26 + $0x28] sm:$0xff] (!%p3615_p10)   ;;  %v6495_v24 = vld [vmem:[#allocation28] ss:$0 sm:$0xff] (!%p3615_p10) }
 0x92f   : > { %v4573_v57 = vld [vmem:[#allocation26 + $0x30] sm:$0xff] (!%p3615_p10)   ;;  %v4575_v9 = vld [vmem:[#allocation29] sm:$0xff] (!%p3615_p10)   ;;  %v4574_v19 = vld [vmem:[#allocation26 + $0x38] sm:$0xff] (!%p3615_p10)  }
 0x930   : > { %4056 = vmatpush3.bf16.msra.mxu0 (!%p3615_p10), %v4560_v30  ;;  %v4576_v11 = vld [vmem:[#allocation29 + $0x8] sm:$0xff] (!%p3615_p10)   ;;  %v4577_v35 = vld [vmem:[#allocation29 + $0x10] sm:$0xff] (!%p3615_p10)   ;;  %v4578_v6 = vld [vmem:[#allocation29 + $0x18] sm:$0xff] (!%p3615_p10)  }
 0x931   : > { %4057 = vmatprep.subr.bf16.mxu0 (!%p3615_p10), %v4561_v0  ;;  %4088 = vmatpush3.bf16.msra.mxu1 (!%p3615_p10), %v4568_v56  ;;  %v4579_v13 = vld [vmem:[#allocation29 + $0x20] sm:$0xff] (!%p3615_p10)   ;;  %v4580_v58 = vld [vmem:[#allocation29 + $0x28] sm:$0xff] (!%p3615_p10)  }
 0x932   : > { %4089 = vmatprep.subr.bf16.mxu1 %v4569_v10 }
 0x934   : > { %4058 = vmatpush3.bf16.msra.mxu0 %v4561_v0 }
 0x935   : > { %4059 = vmatprep.subr.bf16.mxu0 %v4562_v47  ;;  %4090 = vmatpush3.bf16.msra.mxu1 %v4569_v10 }
 0x936   : > { %4091 = vmatprep.subr.bf16.mxu1 %v4570_v27 }
 0x938   : > { %4060 = vmatpush3.bf16.msra.mxu0 %v4562_v47 }
 0x939   : > { %4061 = vmatprep.subr.bf16.mxu0 %v4563_v53  ;;  %4092 = vmatpush3.bf16.msra.mxu1 %v4570_v27 }
 0x93a   : > { %4093 = vmatprep.subr.bf16.mxu1 %v4571_v49 }
 0x93c   : > { %4062 = vmatpush3.bf16.msra.mxu0 %v4563_v53 }
 0x93d   : > { %4063 = vmatprep.subr.bf16.mxu0 %v4564_v2  ;;  %4094 = vmatpush3.bf16.msra.mxu1 %v4571_v49 }
 0x93e   : > { %4095 = vmatprep.subr.bf16.mxu1 %v4572_v62 }
 0x940   : > { %4064 = vmatpush3.bf16.msra.mxu0 %v4564_v2 }
 0x941   : > { %4065 = vmatprep.subr.bf16.mxu0 %v4565_v59  ;;  %4096 = vmatpush3.bf16.msra.mxu1 %v4572_v62 }
 0x942   : > { %4097 = vmatprep.subr.bf16.mxu1 %v4573_v57 }
 0x944   : > { %4066 = vmatpush3.bf16.msra.mxu0 %v4565_v59 }
 0x945   : > { %4067 = vmatprep.subr.bf16.mxu0 %v4566_v26  ;;  %4098 = vmatpush3.bf16.msra.mxu1 %v4573_v57 }
 0x946   : > { %4099 = vmatprep.subr.bf16.mxu1 %v4574_v19 }
 0x948   : > { %4068 = vmatpush3.bf16.msra.mxu0 %v4566_v26 }
 0x949   : > { %4117 = vmatprep.subr.bf16.mxu0 %v4575_v9  ;;  %4100 = vmatpush3.bf16.msra.mxu1 %v4574_v19 }
 0x94b   : > { %4070 = vmatmul.mubr.bf16.vlgmr.msra.gmra.mrb[0].mxu0 %v5986_v31 }
 0x94c   : > { %4073 = vmatprep.mubr.bf16.mxu0 %v5990_v32  ;;  %4118 = vmatpush3.bf16.msra.mxu0 %v4575_v9 }
 0x94d   : > { %4119 = vmatprep.subr.bf16.mxu0 %v4576_v11  ;;  %4102 = vmatmul.mubr.bf16.vlgmr.msra.gmra.mrb[0].mxu1 %v5986_v31  ;;  %v4581_v31 = vld [vmem:[#allocation29 + $0x30] sm:$0xff]  }
 0x94e   : > { %4105 = vmatprep.mubr.bf16.mxu1 %v5990_v32  ;;  %v4582_v32 = vld [vmem:[#allocation29 + $0x38] sm:$0xff]  }
 0x950   : > { %4120 = vmatpush3.bf16.msra.mxu0 %v4576_v11 }
 0x951   : > { %4121 = vmatprep.subr.bf16.mxu0 %v4577_v35 }
 0x953   : > { %4074 = vmatmul.mubr.bf16.gmra.mrb[4].mxu0 %v6003_v36 }
 0x954   : > { %4077 = vmatprep.mubr.bf16.mxu0 %v6016_v40  ;;  %4122 = vmatpush3.bf16.msra.mxu0 %v4577_v35 }
 0x955   : > { %4123 = vmatprep.subr.bf16.mxu0 %v4578_v6  ;;  %4106 = vmatmul.mubr.bf16.gmra.mrb[4].mxu1 %v6003_v36  ;;  %v6489_v36 = vld [vmem:[#allocation25] ss:$0 sm:$0xff] }
 0x956   : > { %4109 = vmatprep.mubr.bf16.mxu1 %v6016_v40 }
 0x958   : > { %4124 = vmatpush3.bf16.msra.mxu0 %v4578_v6 }
 0x959   : > { %4125 = vmatprep.subr.bf16.mxu0 %v4579_v13 }
 0x95b   : > { %4078 = vmatmul.mubr.bf16.gmra.mrb[8].mxu0 %v6020_v41 }
 0x95c   : > { %4081 = vmatprep.mubr.bf16.mxu0 %v6027_v43  ;;  %4126 = vmatpush3.bf16.msra.mxu0 %v4579_v13 }
 0x95d   : > { %4127 = vmatprep.subr.bf16.mxu0 %v4580_v58  ;;  %4110 = vmatmul.mubr.bf16.gmra.mrb[8].mxu1 %v6020_v41 }
 0x95e   : > { %4113 = vmatprep.mubr.bf16.mxu1 %v6027_v43 }
 0x960   : > { %4128 = vmatpush3.bf16.msra.mxu0 %v4580_v58 }
 0x961   : > { %4129 = vmatprep.subr.bf16.mxu0 %v4581_v31 }
 0x963   : > { %4082 = vmatmul.mubr.bf16.gmra.mrb[12].mxu0 %v6033_v45 }
 0x964   : > { %4130 = vmatpush3.bf16.msra.mxu0 %v4581_v31 }
 0x965   : > { %4114 = vmatmul.mubr.bf16.gmra.mrb[12].mxu1 %v6033_v45  ;;  %4131 = vmatprep.subr.bf16.mxu0 %v4582_v32 }
 0x968   : > { %4132 = vmatpush3.bf16.msra.mxu0 %v4582_v32 }
 0xa1e   : > { %v4071_v40 = vpop.f32.mrb[0].mxu0 }
 0xa1f   : > { %v2564_v14 = vadd.f32 %v4071_v40, %v6489_v36  ;;  %v2555_v48 = vpop.f32.mrb[1].mxu0 }
 0xa20   : > { %v2556_v42 = vadd.f32 %v6489_v36, %v2555_v48  ;;  %v4072_v63 = vpop.f32.mrb[2].mxu0  ;;  %v4103_v29 = vpop.f32.mrb[0].mxu1 }
 0xa21   : > { %v2567_v41 = vadd.f32 %v4072_v63, %v6489_v36  ;;  %v2558_v43 = vpop.f32.mrb[3].mxu0  ;;  %v2620_v18 = vmax.f32 %v2564_v14, 0.0  ;;  %v2731_v5 = vadd.f32 %v4103_v29, %v6495_v24  ;;  %v2722_v34 = vpop.f32.mrb[1].mxu1 }
 0xa22   : > { %v2559_v45 = vadd.f32 %v6489_v36, %v2558_v43  ;;  %v2618_v21 = vmax.f32 %v2556_v42, 0.0  ;;  %v2723_v7 = vadd.f32 %v6495_v24, %v2722_v34  ;;  %v4104_v37 = vpop.f32.mrb[2].mxu1 }
 0xa23   : > { %v2621_v23 = vmax.f32 %v2567_v41, 0.0  ;;  %v2787_v8 = vmax.f32 %v2731_v5, 0.0  ;;  %v2734_v38 = vadd.f32 %v4104_v37, %v6495_v24  ;;  %v2725_v15 = vpop.f32.mrb[3].mxu1 }
 0xa24   : > { %v2619_v33 = vmax.f32 %v2559_v45, 0.0  ;;  %v2785_v51 = vmax.f32 %v2723_v7, 0.0  ;;  %v2726_v50 = vadd.f32 %v6495_v24, %v2725_v15 }
 0xa25   : > { %v2802_v12 = vpack.c.bf16 %v2621_v23, %v2620_v18  ;;  %v2788_v46 = vmax.f32 %v2734_v38, 0.0 }
 0xa26   : > { %v2801_v54 = vpack.c.bf16 %v2619_v33, %v2618_v21  ;;  %v4075_v28 = vpop.f32.mrb[4].mxu0  ;;  %v2786_v17 = vmax.f32 %v2726_v50, 0.0 }
 0xa27   : > { %v2580_v25 = vadd.f32 %v4075_v28, %v6489_v36  ;;  %v2571_v20 = vpop.f32.mrb[5].mxu0  ;;  %v2963_v0 = vpack.c.bf16 %v2788_v46, %v2787_v8 }
 0xa28   : > { %v2572_v4 = vadd.f32 %v6489_v36, %v2571_v20  ;;  %v4076_v52 = vpop.f32.mrb[6].mxu0  ;;  %4133 = vmatprep.mubr.bf16.mxu0 %v2801_v54  ;;  %v2962_v56 = vpack.c.bf16 %v2786_v17, %v2785_v51  ;;  %v4107_v53 = vpop.f32.mrb[4].mxu1 }
 0xa29   : > { %v2624_v1 = vmax.f32 %v2580_v25, 0.0  ;;  %v2583_v55 = vadd.f32 %v4076_v52, %v6489_v36  ;;  %v2574_v22 = vpop.f32.mrb[7].mxu0  ;;  %4134 = vmatmul.mubr.bf16.vlgmr.msra.gmra.mrb[16].mxu0 %v2802_v12  ;;  %v2747_v27 = vadd.f32 %v4107_v53, %v6495_v24  ;;  %v2738_v59 = vpop.f32.mrb[5].mxu1 }
 0xa2a   : > { %v2575_v3 = vadd.f32 %v6489_v36, %v2574_v22  ;;  %v2622_v16 = vmax.f32 %v2572_v4, 0.0  ;;  %4149 = vmatprep.subr.bf16.mxu1 %v2962_v56  ;;  %v2739_v62 = vadd.f32 %v6495_v24, %v2738_v59  ;;  %v4108_v57 = vpop.f32.mrb[6].mxu1 }
 0xa2b   : > { %v2625_v39 = vmax.f32 %v2583_v55, 0.0  ;;  %4150 = vmatpush3.bf16.xpose.msra.mxu1 %v2962_v56  ;;  %v2791_v35 = vmax.f32 %v2747_v27, 0.0  ;;  %v2750_v6 = vadd.f32 %v4108_v57, %v6495_v24  ;;  %v2741_v13 = vpop.f32.mrb[7].mxu1 }
 0xa2c   : > { %v2623_v60 = vmax.f32 %v2575_v3, 0.0  ;;  %v2789_v31 = vmax.f32 %v2739_v62, 0.0  ;;  %4151 = vmatprep.subr.bf16.mxu1 %v2963_v0  ;;  %v2742_v32 = vadd.f32 %v6495_v24, %v2741_v13 }
 0xa2d   : > { %v2804_v30 = vpack.c.bf16 %v2625_v39, %v2624_v1  ;;  %v2792_v14 = vmax.f32 %v2750_v6, 0.0 }
 0xa2e   : > { %v2803_v47 = vpack.c.bf16 %v2623_v60, %v2622_v16  ;;  %v4079_v61 = vpop.f32.mrb[8].mxu0  ;;  %v2790_v63 = vmax.f32 %v2742_v32, 0.0 }
 0xa2f   : > { %v2596_v10 = vadd.f32 %v4079_v61, %v6489_v36  ;;  %v2587_v2 = vpop.f32.mrb[9].mxu0  ;;  %v2965_v43 = vpack.c.bf16 %v2792_v14, %v2791_v35 }
 0xa30   : > { %v2588_v49 = vadd.f32 %v6489_v36, %v2587_v2  ;;  %v4080_v26 = vpop.f32.mrb[10].mxu0  ;;  %4137 = vmatprep.mubr.bf16.mxu0 %v2803_v47  ;;  %v2964_v23 = vpack.c.bf16 %v2790_v63, %v2789_v31  ;;  %v4111_v21 = vpop.f32.mrb[8].mxu1 }
 0xa31   : > { %v2628_v9 = vmax.f32 %v2596_v10, 0.0  ;;  %v2599_v19 = vadd.f32 %v4080_v26, %v6489_v36  ;;  %v2590_v11 = vpop.f32.mrb[11].mxu0  ;;  %4138 = vmatmul.mubr.bf16.gmra.mrb[20].mxu0 %v2804_v30  ;;  %v2763_v54 = vadd.f32 %v4111_v21, %v6495_v24  ;;  %v2754_v28 = vpop.f32.mrb[9].mxu1 }
 0xa32   : > { %v2591_v58 = vadd.f32 %v6489_v36, %v2590_v11  ;;  %v2626_v48 = vmax.f32 %v2588_v49, 0.0  ;;  %v2755_v20 = vadd.f32 %v6495_v24, %v2754_v28  ;;  %v4112_v5 = vpop.f32.mrb[10].mxu1 }
 0xa33   : > { %v2629_v40 = vmax.f32 %v2599_v19, 0.0  ;;  %4152 = vmatpush3.bf16.xpose.msra.mxu1 %v2963_v0  ;;  %v2795_v7 = vmax.f32 %v2763_v54, 0.0  ;;  %v2766_v37 = vadd.f32 %v4112_v5, %v6495_v24  ;;  %v2757_v1 = vpop.f32.mrb[11].mxu1 }
 0xa34   : > { %v2627_v42 = vmax.f32 %v2591_v58, 0.0  ;;  %4153 = vmatprep.subr.bf16.mxu1 %v2964_v23  ;;  %v2793_v22 = vmax.f32 %v2755_v20, 0.0  ;;  %v2758_v8 = vadd.f32 %v6495_v24, %v2757_v1 }
 0xa35   : > { %v2806_v41 = vpack.c.bf16 %v2629_v40, %v2628_v9  ;;  %v2796_v15 = vmax.f32 %v2766_v37, 0.0 }
 0xa36   : > { %v2805_v45 = vpack.c.bf16 %v2627_v42, %v2626_v48  ;;  %v4083_v18 = vpop.f32.mrb[12].mxu0  ;;  %v2794_v50 = vmax.f32 %v2758_v8, 0.0 }
 0xa37   : > { %v2612_v33 = vadd.f32 %v4083_v18, %v6489_v36  ;;  %v2603_v12 = vpop.f32.mrb[13].mxu0  ;;  %v2967_v46 = vpack.c.bf16 %v2796_v15, %v2795_v7 }
 0xa38   : > { %v2604_v29 = vadd.f32 %v6489_v36, %v2603_v12  ;;  %v4084_v25 = vpop.f32.mrb[14].mxu0  ;;  %4141 = vmatprep.mubr.bf16.mxu0 %v2805_v45  ;;  %v2966_v60 = vpack.c.bf16 %v2794_v50, %v2793_v22  ;;  %v4115_v17 = vpop.f32.mrb[12].mxu1  ;;  %v2971_v12 = vlaneseq }
 0xa39   : > { %v2632_v34 = vmax.f32 %v2612_v33, 0.0  ;;  %v2615_v4 = vadd.f32 %v4084_v25, %v6489_v36  ;;  %v2606_v52 = vpop.f32.mrb[15].mxu0  ;;  %4142 = vmatmul.mubr.bf16.gmra.mrb[24].mxu0 %v2806_v41  ;;  %v2779_v30 = vadd.f32 %v4115_v17, %v6495_v24  ;;  %v2770_v0 = vpop.f32.mrb[13].mxu1 }
 0xa3a   : > { %v2607_v55 = vadd.f32 %v6489_v36, %v2606_v52  ;;  %v2630_v3 = vmax.f32 %v2604_v29, 0.0  ;;  %v2771_v36 = vadd.f32 %v6495_v24, %v2770_v0  ;;  %v4116_v47 = vpop.f32.mrb[14].mxu1  ;;  %v2972_v54 = vshrl.u32 %v2971_v12, 7 }
 0xa3b   : > { %v2633_v38 = vmax.f32 %v2615_v4, 0.0  ;;  %4154 = vmatpush3.bf16.xpose.msra.mxu1 %v2964_v23  ;;  %v2799_v61 = vmax.f32 %v2779_v30, 0.0  ;;  %v2782_v56 = vadd.f32 %v4116_v47, %v6495_v24  ;;  %v2773_v53 = vpop.f32.mrb[15].mxu1 }
 0xa3c   : > { %v2631_v51 = vmax.f32 %v2607_v55, 0.0  ;;  %4155 = vmatprep.subr.bf16.mxu1 %v2965_v43  ;;  %v2797_v10 = vmax.f32 %v2771_v36, 0.0  ;;  %v2774_v2 = vadd.f32 %v6495_v24, %v2773_v53  ;;  %v2973_v28 = vsub.s32 0, %v2972_v54 }
 0xa3d   : > { %v2808_v39 = vpack.c.bf16 %v2633_v38, %v2632_v34  ;;  %v2800_v27 = vmax.f32 %v2782_v56, 0.0 }
 0xa3e   : > { %v2807_v16 = vpack.c.bf16 %v2631_v51, %v2630_v3  ;;  %v2798_v59 = vmax.f32 %v2774_v2, 0.0  ;;  %v2974_v29 = vrot.slane %v6029_v44, %v2973_v28 }
 0xa3f   : > { %v2969_v49 = vpack.c.bf16 %v2800_v27, %v2799_v61 }
 0xa40   : > { %4145 = vmatprep.mubr.bf16.mxu0 %v2807_v16  ;;  %v2968_v26 = vpack.c.bf16 %v2798_v59, %v2797_v10 }
 0xa41   : > { %4146 = vmatmul.mubr.bf16.gmra.mrb[28].mxu0 %v2808_v39 }
 0xa43   : > { %4156 = vmatpush3.bf16.xpose.msra.mxu1 %v2965_v43 }
 0xa44   : > { %4157 = vmatprep.subr.bf16.mxu1 %v2966_v60 }
 0xa4b   : > { %4158 = vmatpush3.bf16.xpose.msra.mxu1 %v2966_v60 }
 0xa4c   : > { %4159 = vmatprep.subr.bf16.mxu1 %v2967_v46 }
 0xa53   : > { %4160 = vmatpush3.bf16.xpose.msra.mxu1 %v2967_v46 }
 0xa54   : > { %4161 = vmatprep.subr.bf16.mxu1 %v2968_v26 }
 0xa5b   : > { %4162 = vmatpush3.bf16.xpose.msra.mxu1 %v2968_v26 }
 0xa5c   : > { %4163 = vmatprep.subr.bf16.mxu1 %v2969_v49 }
 0xa63   : > { %4164 = vmatpush3.bf16.xpose.msra.mxu1 %v2969_v49 }
 0xafc   : > { %v4135_v62 = vpop.f32.mrb[16].mxu0 }
 0xafd   : > { %v2891_v57 = vpop.f32.mrb[17].mxu0 }
 0xafe   : > { %v4136_v9 = vpop.f32.mrb[18].mxu0 }
 0xaff   : > { %v2955_v19 = vpack.c.bf16 %v4136_v9, %v4135_v62  ;;  %v2894_v11 = vpop.f32.mrb[19].mxu0 }
 0xb00   : > { %v2954_v35 = vpack.c.bf16 %v2894_v11, %v2891_v57 }
 0xb02   : > { %4165 = vmatprep.mubr.bf16.mxu1 %v2954_v35 }
 0xb03   : > { %4166 = vmatmul.mubr.bf16.vlgmr.msra.gmra.mrb[16].mxu1 %v2955_v19 }
 0xb04   : > { %v4139_v24 = vpop.f32.mrb[20].mxu0 }
 0xb05   : > { %v2907_v6 = vpop.f32.mrb[21].mxu0 }
 0xb06   : > { %v4140_v13 = vpop.f32.mrb[22].mxu0 }
 0xb07   : > { %v2957_v58 = vpack.c.bf16 %v4140_v13, %v4139_v24  ;;  %v2910_v31 = vpop.f32.mrb[23].mxu0 }
 0xb08   : > { %v2956_v32 = vpack.c.bf16 %v2910_v31, %v2907_v6 }
 0xb0a   : > { %4169 = vmatprep.mubr.bf16.mxu1 %v2956_v32 }
 0xb0b   : > { %4170 = vmatmul.mubr.bf16.gmra.mrb[20].mxu1 %v2957_v58 }
 0xb0c   : > { %v4143_v40 = vpop.f32.mrb[24].mxu0 }
 0xb0d   : > { %v2923_v14 = vpop.f32.mrb[25].mxu0 }
 0xb0e   : > { %v4144_v48 = vpop.f32.mrb[26].mxu0 }
 0xb0f   : > { %v2959_v42 = vpack.c.bf16 %v4144_v48, %v4143_v40  ;;  %v2926_v63 = vpop.f32.mrb[27].mxu0 }
 0xb10   : > { %v2958_v41 = vpack.c.bf16 %v2926_v63, %v2923_v14 }
 0xb12   : > { %4173 = vmatprep.mubr.bf16.mxu1 %v2958_v41 }
 0xb13   : > { %4174 = vmatmul.mubr.bf16.gmra.mrb[24].mxu1 %v2959_v42 }
 0xb14   : > { %v4147_v43 = vpop.f32.mrb[28].mxu0 }
 0xb15   : > { %v2939_v45 = vpop.f32.mrb[29].mxu0 }
 0xb16   : > { %v4148_v18 = vpop.f32.mrb[30].mxu0 }
 0xb17   : > { %v2961_v23 = vpack.c.bf16 %v4148_v18, %v4147_v43  ;;  %v2942_v21 = vpop.f32.mrb[31].mxu0 }
 0xb18   : > { %v2960_v33 = vpack.c.bf16 %v2942_v21, %v2939_v45 }
 0xb1a   : > { %4177 = vmatprep.mubr.bf16.mxu1 %v2960_v33 }
 0xb1b   : > { %4178 = vmatmul.mubr.bf16.gmra.mrb[28].mxu1 %v2961_v23 }
 0xbd6   : > { %v4167_v25 = vpop.f32.mrb[16].mxu1 }
 0xbd7   : > { %v3019_v20 = vadd.f32 %v4167_v25, %v2974_v29  ;;  %v3010_v5 = vpop.f32.mrb[17].mxu1 }
 0xbd8   : > { %v3011_v34 = vadd.f32 %v3010_v5, %v2974_v29  ;;  %v4168_v4 = vpop.f32.mrb[18].mxu1 }
 0xbd9   : > { %3077 = vmax.xlane.f32.xlu1 %v3019_v20  ;;  %v3013_v52 = vpop.f32.mrb[19].mxu1  ;;  %v3022_v7 = vadd.f32 %v4168_v4, %v2974_v29 }
 0xbda   : > { %3073 = vmax.xlane.f32.xlu0 %v3011_v34  ;;  %v3014_v37 = vadd.f32 %v3013_v52, %v2974_v29 }
 0xbdd   : > { %3079 = vmax.xlane.f32.xlu1 %v3022_v7 }
 0xbde   : > { %3075 = vmax.xlane.f32.xlu0 %v3014_v37  ;;  %v4171_v1 = vpop.f32.mrb[20].mxu1 }
 0xbdf   : > { %v3035_v55 = vadd.f32 %v4171_v1, %v2974_v29  ;;  %v3026_v22 = vpop.f32.mrb[21].mxu1 }
 0xbe0   : > { %v4172_v8 = vpop.f32.mrb[22].mxu1  ;;  %v3027_v44 = vadd.f32 %v3026_v22, %v2974_v29 }
 0xbe1   : > { %v3038_v38 = vadd.f32 %v4172_v8, %v2974_v29  ;;  %v3029_v15 = vpop.f32.mrb[23].mxu1 }
 0xbe2   : > { %3085 = vmax.xlane.f32.xlu0 %v3035_v55  ;;  %v3030_v3 = vadd.f32 %v3029_v15, %v2974_v29 }
 0xbe3   : > { %3087 = vmax.xlane.f32.xlu1 %v3038_v38 }
 0xbe6   : > { %3081 = vmax.xlane.f32.xlu0 %v3027_v44  ;;  %v4175_v51 = vpop.f32.mrb[24].mxu1 }
 0xbe7   : > { %v6526_v50 = vadd.f32 %v4175_v51, %v2974_v29  ;;  %3083 = vmax.xlane.f32.xlu1 %v3030_v3  ;;  %v3042_v39 = vpop.f32.mrb[25].mxu1 }
 0xbe8   : > { %v4176_v46 = vpop.f32.mrb[26].mxu1  ;;  %v6532_v17 = vadd.f32 %v3042_v39, %v2974_v29 }
 0xbe9   : > { %v6528_v16 = vadd.f32 %v4176_v46, %v2974_v29  ;;  %v3045_v60 = vpop.f32.mrb[27].mxu1 }
 0xbea   : > { %3093 = vmax.xlane.f32.xlu0 %v6526_v50  ;;  %v6534_v30 = vadd.f32 %v3045_v60, %v2974_v29 }
 0xbeb   : > { %3095 = vmax.xlane.f32.xlu1 %v6528_v16 }
 0xbee   : > { %3089 = vmax.xlane.f32.xlu0 %v6532_v17  ;;  %v4179_v0 = vpop.f32.mrb[28].mxu1 }
 0xbef   : > { %3091 = vmax.xlane.f32.xlu1 %v6534_v30  ;;  %v3058_v36 = vpop.f32.mrb[29].mxu1  ;;  %v6543_v10 = vadd.f32 %v4179_v0, %v2974_v29 }
 0xbf0   : > { %v6538_v47 = vadd.f32 %v3058_v36, %v2974_v29  ;;  %v4180_v61 = vpop.f32.mrb[30].mxu1 }
 0xbf1   : > { %v3061_v56 = vpop.f32.mrb[31].mxu1  ;;  %v6546_v2 = vadd.f32 %v4180_v61, %v2974_v29 }
 0xbf2   : > { %v6540_v53 = vadd.f32 %v3061_v56, %v2974_v29  ;;  %3097 = vmax.xlane.f32.xlu0 %v6538_v47 }
 0xbf4   : > { %3099 = vmax.xlane.f32.xlu1 %v6540_v53 }
 0xbf6   : > { %3101 = vmax.xlane.f32.xlu0 %v6543_v10 }
 0xbf8   : > { %3103 = vmax.xlane.f32.xlu1 %v6546_v2 }
 0xc66   : > { %v3078_v27 = vpop.xlane.xlu1 %3077 }
 0xc67   : > { %v3107_v59 = vsub.f32 %v3019_v20, %v3078_v27  ;;  %v3074_v49 = vpop.xlane.xlu0 %3073 }
 0xc68   : > { %v3105_v26 = vsub.f32 %v3011_v34, %v3074_v49 }
 0xc69   : > { %v3125_v62 = vmul.f32 1.442695, %v3107_v59 }
 0xc6a   : > { %v3121_v57 = vmul.f32 1.442695, %v3105_v26  ;;  %v3080_v9 = vpop.xlane.xlu1 %3079 }
 0xc6b   : > { %4583 = vpow2.f32 %v3125_v62  ;;  %v3108_v19 = vsub.f32 %v3022_v7, %v3080_v9  ;;  %v3076_v11 = vpop.xlane.xlu0 %3075 }
 0xc6c   : > { %v3106_v35 = vsub.f32 %v3014_v37, %v3076_v11  ;;  %4585 = vpow2.f32 %v3121_v57 }
 0xc6d   : > { %v3127_v24 = vmul.f32 1.442695, %v3108_v19 }
 0xc6e   : > { %v3123_v6 = vmul.f32 1.442695, %v3106_v35 }
 0xc6f   : > { %4587 = vpow2.f32 %v3127_v24  ;;  %v3086_v13 = vpop.xlane.xlu0 %3085 }
 0xc70   : > { %v3111_v58 = vsub.f32 %v3035_v55, %v3086_v13  ;;  %v3088_v31 = vpop.xlane.xlu1 %3087  ;;  %4589 = vpow2.f32 %v3123_v6 }
 0xc71   : > { %v3112_v32 = vsub.f32 %v3038_v38, %v3088_v31 }
 0xc72   : > { %v3133_v40 = vmul.f32 1.442695, %v3111_v58 }
 0xc73   : > { %v3135_v14 = vmul.f32 1.442695, %v3112_v32  ;;  %v3082_v48 = vpop.xlane.xlu0 %3081 }
 0xc74   : > { %4591 = vpow2.f32 %v3133_v40  ;;  %v3109_v42 = vsub.f32 %v3027_v44, %v3082_v48  ;;  %v3084_v63 = vpop.xlane.xlu1 %3083 }
 0xc75   : > { %v6550_v41 = vpop.eup %4583  ;;  %v3110_v43 = vsub.f32 %v3030_v3, %v3084_v63  ;;  %4593 = vpow2.f32 %v3135_v14 }
 0xc76   : > { %v3129_v45 = vmul.f32 1.442695, %v3109_v42  ;;  %3157 = vadd.xlane.f32.xlu0 %v6550_v41  ;;  %v6553_v21 = vpop.eup %4585 }
 0xc77   : > { %v3131_v18 = vmul.f32 1.442695, %v3110_v43  ;;  %v3094_v23 = vpop.xlane.xlu0 %3093 }
 0xc78   : > { %4595 = vpow2.f32 %v3129_v45  ;;  %v3115_v33 = vsub.f32 %v6526_v50, %v3094_v23  ;;  %v3096_v12 = vpop.xlane.xlu1 %3095 }
 0xc79   : > { %v6556_v54 = vpop.eup %4587  ;;  %v3116_v28 = vsub.f32 %v6528_v16, %v3096_v12  ;;  %4597 = vpow2.f32 %v3131_v18 }
 0xc7a   : > { %v3141_v29 = vmul.f32 1.442695, %v3115_v33  ;;  %3159 = vadd.xlane.f32.xlu1 %v6556_v54  ;;  %3153 = vadd.xlane.f32.xlu0 %v6553_v21  ;;  %v6562_v4 = vpop.eup %4589 }
 0xc7b   : > { %v3143_v25 = vmul.f32 1.442695, %v3116_v28  ;;  %v3090_v20 = vpop.xlane.xlu0 %3089 }
 0xc7c   : > { %4599 = vpow2.f32 %v3141_v29  ;;  %v3113_v5 = vsub.f32 %v6532_v17, %v3090_v20  ;;  %v3092_v34 = vpop.xlane.xlu1 %3091 }
 0xc7d   : > { %v3114_v52 = vsub.f32 %v6534_v30, %v3092_v34  ;;  %4601 = vpow2.f32 %v3143_v25 }
 0xc7e   : > { %v6565_v7 = vpop.eup %4591  ;;  %v3137_v37 = vmul.f32 1.442695, %v3113_v5  ;;  %3155 = vadd.xlane.f32.xlu1 %v6562_v4 }
 0xc7f   : > { %v3139_v1 = vmul.f32 1.442695, %v3114_v52  ;;  %3165 = vadd.xlane.f32.xlu0 %v6565_v7  ;;  %v3098_v55 = vpop.xlane.xlu0 %3097  ;;  %v6570_v8 = vpop.eup %4593 }
 0xc80   : > { %4603 = vpow2.f32 %v3137_v37  ;;  %v3117_v22 = vsub.f32 %v6538_v47, %v3098_v55 }
 0xc81   : > { %v3100_v38 = vpop.xlane.xlu1 %3099  ;;  %4605 = vpow2.f32 %v3139_v1 }
 0xc82   : > { %v6572_v15 = vpop.eup %4595  ;;  %v3145_v44 = vmul.f32 1.442695, %v3117_v22  ;;  %v3118_v3 = vsub.f32 %v6540_v53, %v3100_v38  ;;  %3167 = vadd.xlane.f32.xlu1 %v6570_v8 }
 0xc83   : > { %3161 = vadd.xlane.f32.xlu0 %v6572_v15  ;;  %v3102_v51 = vpop.xlane.xlu0 %3101  ;;  %v6578_v46 = vpop.eup %4597 }
 0xc84   : > { %4607 = vpow2.f32 %v3145_v44  ;;  %v3147_v50 = vmul.f32 1.442695, %v3118_v3  ;;  %v3119_v39 = vsub.f32 %v6543_v10, %v3102_v51 }
 0xc85   : > { %v3104_v16 = vpop.xlane.xlu1 %3103 }
 0xc86   : > { %v6580_v60 = vpop.eup %4599  ;;  %4609 = vpow2.f32 %v3147_v50  ;;  %v3149_v17 = vmul.f32 1.442695, %v3119_v39  ;;  %v3120_v30 = vsub.f32 %v6546_v2, %v3104_v16  ;;  %3163 = vadd.xlane.f32.xlu1 %v6578_v46 }
 0xc87   : > { %3173 = vadd.xlane.f32.xlu0 %v6580_v60  ;;  %v6585_v36 = vpop.eup %4601 }
 0xc88   : > { %4611 = vpow2.f32 %v3149_v17  ;;  %v3151_v0 = vmul.f32 1.442695, %v3120_v30 }
 0xc8a   : > { %v6587_v47 = vpop.eup %4603  ;;  %4613 = vpow2.f32 %v3151_v0  ;;  %3175 = vadd.xlane.f32.xlu1 %v6585_v36 }
 0xc8b   : > { %3169 = vadd.xlane.f32.xlu0 %v6587_v47  ;;  %v6591_v61 = vpop.eup %4605 }
 0xc8e   : > { %v6593_v56 = vpop.eup %4607  ;;  %3171 = vadd.xlane.f32.xlu1 %v6591_v61 }
 0xc8f   : > { %3177 = vadd.xlane.f32.xlu0 %v6593_v56 }
 0xc90   : > { %v6597_v53 = vpop.eup %4609 }
 0xc92   : > { %v6599_v10 = vpop.eup %4611  ;;  %3179 = vadd.xlane.f32.xlu1 %v6597_v53 }
 0xc93   : > { %3181 = vadd.xlane.f32.xlu0 %v6599_v10 }
 0xc94   : > { %v6603_v2 = vpop.eup %4613 }
 0xc96   : > { %3183 = vadd.xlane.f32.xlu1 %v6603_v2 }
 0xd03   : > { %v3158_v27 = vpop.xlane.xlu0 %3157 }
 0xd04   : > { %4615 = vrcp.f32 %v3158_v27 }
 0xd07   : > { %v3160_v59 = vpop.xlane.xlu1 %3159  ;;  %v3154_v49 = vpop.xlane.xlu0 %3153 }
 0xd08   : > { %4617 = vrcp.f32 %v3160_v59 }
 0xd09   : > { %4619 = vrcp.f32 %v3154_v49 }
 0xd0b   : > { %v3156_v26 = vpop.xlane.xlu1 %3155 }
 0xd0c   : > { %4621 = vrcp.f32 %v3156_v26  ;;  %v3166_v62 = vpop.xlane.xlu0 %3165 }
 0xd0d   : > { %4623 = vrcp.f32 %v3166_v62 }
 0xd0e   : > { %v4616_v57 = vpop.eup %4615 }
 0xd0f   : > { %v3203_v9 = vmul.f32 %v4616_v57, %v6550_v41  ;;  %v3168_v19 = vpop.xlane.xlu1 %3167 }
 0xd10   : > { %4625 = vrcp.f32 %v3168_v19  ;;  %v3162_v11 = vpop.xlane.xlu0 %3161 }
 0xd11   : > { %3219 = vst [vmem:[%s5912_s5 + $0x10] sm:$0xff] %v3203_v9  ;;  %4627 = vrcp.f32 %v3162_v11 }
 0xd12   : > { %v4618_v35 = vpop.eup %4617 }
 0xd13   : > { %v4620_v24 = vpop.eup %4619  ;;  %v3204_v6 = vmul.f32 %v4618_v35, %v6556_v54  ;;  %v3164_v13 = vpop.xlane.xlu1 %3163 }
 0xd14   : > { %v3201_v58 = vmul.f32 %v4620_v24, %v6553_v21  ;;  %4629 = vrcp.f32 %v3164_v13  ;;  %v3174_v31 = vpop.xlane.xlu0 %3173 }
 0xd15   : > { %3220 = vst [vmem:[%s5912_s5 + $0x18] sm:$0xff] %v3204_v6  ;;  %4631 = vrcp.f32 %v3174_v31 }
 0xd16   : > { %v4622_v32 = vpop.eup %4621  ;;  %3217 = vst [vmem:[%s5912_s5] sm:$0xff] %v3201_v58 }
 0xd17   : > { %v4624_v40 = vpop.eup %4623  ;;  %v3202_v14 = vmul.f32 %v4622_v32, %v6562_v4  ;;  %v3176_v48 = vpop.xlane.xlu1 %3175 }
 0xd18   : > { %v3207_v42 = vmul.f32 %v4624_v40, %v6565_v7  ;;  %4633 = vrcp.f32 %v3176_v48  ;;  %v3170_v63 = vpop.xlane.xlu0 %3169 }
 0xd19   : > { %3218 = vst [vmem:[%s5912_s5 + $0x8] sm:$0xff] %v3202_v14  ;;  %4635 = vrcp.f32 %v3170_v63 }
 0xd1a   : > { %v4626_v41 = vpop.eup %4625  ;;  %3223 = vst [vmem:[%s5912_s5 + $0x30] sm:$0xff] %v3207_v42 }
 0xd1b   : > { %v4628_v43 = vpop.eup %4627  ;;  %v3208_v45 = vmul.f32 %v4626_v41, %v6570_v8  ;;  %v3172_v18 = vpop.xlane.xlu1 %3171 }
 0xd1c   : > { %v3205_v23 = vmul.f32 %v4628_v43, %v6572_v15  ;;  %4637 = vrcp.f32 %v3172_v18  ;;  %v3178_v21 = vpop.xlane.xlu0 %3177 }
 0xd1d   : > { %3224 = vst [vmem:[%s5912_s5 + $0x38] sm:$0xff] %v3208_v45  ;;  %4639 = vrcp.f32 %v3178_v21 }
 0xd1e   : > { %v4630_v33 = vpop.eup %4629  ;;  %3221 = vst [vmem:[%s5912_s5 + $0x20] sm:$0xff] %v3205_v23 }
 0xd1f   : > { %v4632_v12 = vpop.eup %4631  ;;  %v3206_v54 = vmul.f32 %v4630_v33, %v6578_v46  ;;  %v3180_v28 = vpop.xlane.xlu1 %3179 }
 0xd20   : > { %v3211_v29 = vmul.f32 %v4632_v12, %v6580_v60  ;;  %4641 = vrcp.f32 %v3180_v28  ;;  %v3182_v25 = vpop.xlane.xlu0 %3181 }
 0xd21   : > { %3222 = vst [vmem:[%s5912_s5 + $0x28] sm:$0xff] %v3206_v54  ;;  %4643 = vrcp.f32 %v3182_v25 }
 0xd22   : > { %v4634_v20 = vpop.eup %4633  ;;  %3227 = vst [vmem:[%s5912_s5 + $0x50] sm:$0xff] %v3211_v29 }
 0xd23   : > { %v4636_v5 = vpop.eup %4635  ;;  %v3212_v34 = vmul.f32 %v4634_v20, %v6585_v36  ;;  %v3184_v4 = vpop.xlane.xlu1 %3183 }
 0xd24   : > { %v3209_v52 = vmul.f32 %v4636_v5, %v6587_v47  ;;  %4645 = vrcp.f32 %v3184_v4 }
 0xd25   : > { %3228 = vst [vmem:[%s5912_s5 + $0x58] sm:$0xff] %v3212_v34 }
 0xd26   : > { %v4638_v7 = vpop.eup %4637  ;;  %3225 = vst [vmem:[%s5912_s5 + $0x40] sm:$0xff] %v3209_v52 }
 0xd27   : > { %v4640_v37 = vpop.eup %4639  ;;  %v3210_v1 = vmul.f32 %v4638_v7, %v6591_v61 }
 0xd28   : > { %v3213_v55 = vmul.f32 %v4640_v37, %v6593_v56 }
 0xd29   : > { %3226 = vst [vmem:[%s5912_s5 + $0x48] sm:$0xff] %v3210_v1 }
 0xd2a   : > { %v4642_v22 = vpop.eup %4641  ;;  %3229 = vst [vmem:[%s5912_s5 + $0x60] sm:$0xff] %v3213_v55 }
 0xd2b   : > { %v4644_v8 = vpop.eup %4643  ;;  %v3214_v38 = vmul.f32 %v4642_v22, %v6597_v53 }
 0xd2c   : > { %v3215_v15 = vmul.f32 %v4644_v8, %v6599_v10 }
 0xd2d   : > { %3230 = vst [vmem:[%s5912_s5 + $0x68] sm:$0xff] %v3214_v38 }
 0xd2e   : > { %v4646_v44 = vpop.eup %4645  ;;  %3231 = vst [vmem:[%s5912_s5 + $0x70] sm:$0xff] %v3215_v15 }
 0xd2f   : > { %v3216_v3 = vmul.f32 %v4646_v44, %v6603_v2 }
 0xd31   : > { %3232 = vst [vmem:[%s5912_s5 + $0x78] sm:$0xff] %v3216_v3 }
 0xd32 PF: > { %s6840_s27 = sld [smem:[#allocation50_spill]]  ;;  %s3252_s26 = sshll.u32 %s5912_s5, 4  ;;  %s6647_s26 = int_to_ptr.vmem [resolvable:$true] %s3252_s26 }
 0xd33   : > { %s6841_s3 = sld [smem:[#allocation66_spill]]  ;;  %s3234_s0 = scalar_lea.sflag [#allocation7], %s5870_s25 }
 0xd34   : > { %s5107_s29 = scalar_lea.vmem %s6647_s26, 2048  ;;  %p6842_p7 = scmp.ne.s32.totalorder %s6827_s2, 0 }
 0xd35   : > { %p5108_p1 = scmp.ne.s32.totalorder %s6647_s26, %s5107_s29  ;;  %s5295_s30 = smov [#allocation31]  }
 0xd36   : > { %s5111_s6 = sshll.u32 %s5295_s30, 4  ;;  %s5112_s6 = int_to_ptr.vmem [resolvable:$false] %s5111_s6 }
 0xd37   : > { %p5109_p12 = pnand %p5108_p1, %p6842_p7  ;;  %s5113_s7 = scalar_lea.vmem %s5112_s6, 4096 }
 0xd38   : > { %s6779_s23 = sshll.u32 %s6840_s27, 11  ;;  %p5114_p4 = scmp.lt.s32.totalorder %s6647_s26, %s5112_s6 }
 0xd39   : > { %s6644_s11 = scalar_lea.hbm %s6841_s3, %s6779_s23  ;;  %p5110_p13 = pneg %p5109_p12 }
 0xd3a   : > { %p5115_p8 = scmp.lt.s32.totalorder %s5113_s7, %s5107_s29 }
 0xd3c   : > { %p5116_p0 = por %p5115_p8, %p5114_p4 }
 0xd3e   : > { %p5117_p2 = pnand %p5116_p0, %p5110_p13 }
 0xd40   : > { %5120 = shalt.err (!%p5117_p2)
}
 0xd41   : > { %s5121_s5 = scalar_lea.hbm %s6644_s11, 2048  ;;  %s5125_s30 = scalar_lea.hbm %s6841_s3, 4096 }
 0xd42   : > { %p5122_p3 = scmp.ne.s32.totalorder %s6644_s11, %s5121_s5  ;;  %p5126_p5 = scmp.lt.u32.totalorder %s6644_s11, %s6841_s3 }
 0xd43   : > { %p5127_p11 = scmp.lt.u32.totalorder %s5125_s30, %s5121_s5  ;;  %p5129_p1 = scmp.lt.u32.totalorder %s5121_s5, %s6644_s11 }
 0xd44   : > { %p5123_p6 = pnand %p5122_p3, %p6842_p7 }
 0xd45   : > { %p5128_p10 = por %p5127_p11, %p5126_p5 }
 0xd46   : > { %p5124_p9 = pneg %p5123_p6 }
 0xd47   : > { %p5130_p12 = por %p5129_p1, %p5128_p10 }
 0xd49   : > { %p5131_p13 = pnand %p5130_p12, %p5124_p9 }
 0xd4b   : > { %5134 = shalt.err (!%p5131_p13)
}
 0xd4c   : > { %s5296_s7 = smov 128   ;;  %s5297_s29 = smov 8  }
 0xd4d   : > { %4243 = dma.vmem_to_hbm [thread:$0]  (%p6842_p7), %s6647_s26, 2048, %s6644_s11, %s3234_s0, %s5296_s7, %s5296_s7, %s5297_s29  }
 0xd4e   : > { %s6843_s23 = sshll.u32 %s6840_s27, 11  ;;  %s6844_s1 = sld [smem:[#allocation67_spill]] }
 0xd4f   : > { %s3268_s6 = sshll.u32 %s5914_s24, 4  ;;  %s3239_s3 = scalar_lea.sflag [#allocation33], %s5870_s25  ;;  %s6684_s6 = int_to_ptr.vmem [resolvable:$true] %s3268_s6 }
 0xd50   : > { %s5135_s8 = scalar_lea.vmem %s6684_s6, 2048  ;;  %s5298_s9 = smov [#allocation32]  }
 0xd51   : > { %p5136_p4 = scmp.ne.s32.totalorder %s6684_s6, %s5135_s8  ;;  %s5139_s11 = sshll.u32 %s5298_s9, 4  ;;  %s5140_s11 = int_to_ptr.vmem [resolvable:$false] %s5139_s11 }
 0xd52   : > { %s5141_s27 = scalar_lea.vmem %s5140_s11, 4096  ;;  %p5142_p2 = scmp.lt.s32.totalorder %s6684_s6, %s5140_s11 }
 0xd53   : > { %p5137_p8 = pnand %p5136_p4, %p6842_p7  ;;  %p5143_p3 = scmp.lt.s32.totalorder %s5141_s27, %s5135_s8 }
 0xd54   : > { %s6681_s30 = scalar_lea.hbm %s6844_s1, %s6843_s23 }
 0xd55   : > { %p5138_p0 = pneg %p5137_p8  ;;  %p5144_p6 = por %p5143_p3, %p5142_p2 }
 0xd57   : > { %p5145_p9 = pnand %p5144_p6, %p5138_p0 }
 0xd59   : > { %5148 = shalt.err (!%p5145_p9)
}
 0xd5a   : > { %s5149_s24 = scalar_lea.hbm %s6681_s30, 2048  ;;  %s5153_s9 = scalar_lea.hbm %s6844_s1, 4096 }
 0xd5b   : > { %p5150_p5 = scmp.ne.s32.totalorder %s6681_s30, %s5149_s24  ;;  %p5154_p1 = scmp.lt.u32.totalorder %s6681_s30, %s6844_s1 }
 0xd5c   : > { %p5155_p12 = scmp.lt.u32.totalorder %s5153_s9, %s5149_s24  ;;  %p5157_p4 = scmp.lt.u32.totalorder %s5149_s24, %s6681_s30 }
 0xd5d   : > { %p5151_p11 = pnand %p5150_p5, %p6842_p7 }
 0xd5e   : > { %p5156_p13 = por %p5155_p12, %p5154_p1 }
 0xd5f   : > { %p5152_p10 = pneg %p5151_p11 }
 0xd60   : > { %p5158_p8 = por %p5157_p4, %p5156_p13 }
 0xd62   : > { %p5159_p0 = pnand %p5158_p8, %p5152_p10 }
 0xd64   : > { %5162 = shalt.err (!%p5159_p0)
}
 0xd65   : > { %4244 = dma.vmem_to_hbm [thread:$0]  (%p6842_p7), %s6684_s6, 2048, %s6681_s30, %s3239_s3, %s5296_s7, %s5296_s7, %s5297_s29  }
 0xd66 PF: > { %s6845_s8 = sld [smem:[#allocation46_spill]]  ;;  %p4335_p2 = scmp.ge.s32.totalorder %s5271_s28, 2 }
 0xd67   : > { %p6846_p3 = scmp.ne.s32.totalorder %s6828_s18, 0 }
 0xd69   : > { %p4298_p6 = pnand %p4335_p2, %p6846_p3 }
 0xd6c   : > { %s3283_s4 = sand.u32 1, %s6845_s8  }
 0xd6d   : > { %s3284_s11 = scalar_lea.sflag [#allocation7], %s3283_s4 }
 0xd6e   : > { %5234 = dma.done.wait (!%p4298_p6), %s3284_s11, 2048  }
 0xd6f   : > { %5236 = vsyncadd (!%p4298_p6), %s3284_s11, 4294965248  ;;  %s3293_s2 = scalar_lea.sflag [#allocation33], %s3283_s4 }
 0xd70   : > { %5238 = dma.done.wait (!%p4298_p6), %s3293_s2, 2048  }
 0xd71   : > { %5240 = vsyncadd (!%p4298_p6), %s3293_s2, 4294965248  ;;  %s50_s28 = sadd.s32 1, %s5271_s28   ;;  %s6847_s11 = sld [smem:[#allocation47_spill]] }
 0xd72   : > { %p47_p9 = scmp.ge.s32.totalorder %s50_s28, 8   ;;  %s6848_s2 = sld [smem:[#allocation48_spill]] }
 0xd73   : > { %s6849_s24 = sld [smem:[#allocation51_spill]]  ;;  %s6850_s25 = sld [smem:[#allocation52_spill]] }
 0xd74   : > { %s6851_s23 = smov %s6861_s21  ;;  %s6852_s26 = smov %s6855_s17 }
 0xd75   : > { %s6853_s27 = smov %s6859_s22  ;;  %49 = sbr.rel (!%p47_p9) target bundleno = 40 (0x28), region = 218 }
 0xd7c   :  { %3298 = vsyncpa [#allocation6], 1 }
 0xd7d   :  { %3300 = vsyncpa [#allocation6 + $0x1], 1 }
 0xd7e   :  { %3301 = vsyncpa [#allocation9], 1 }
 0xd7f   :  { %3302 = vsyncpa [#allocation12], 1 }
 0xd80   :  { %3303 = vsyncpa [#allocation15], 1 }
 0xd81   :  { %3304 = vsyncpa [#allocation18], 1 }
 0xd82   :  { %3305 = vsyncpa [#allocation21], 1 }
 0xd83   :  { %3306 = vsyncpa [#allocation24], 1 }
 0xd84   :  { %3307 = vsyncpa [#allocation27], 1 }
 0xd85   :  { %3308 = vsyncpa [#allocation30], 1 }
 0xd86   :  { %3309 = vsyncpa [#allocation7], 1 }
 0xd87   :  { %3311 = vsyncpa [#allocation7 + $0x1], 1 }
 0xd88   :  { %3312 = vsyncpa [#allocation33], 1 }
 0xd89   :  { %3314 = vsyncpa [#allocation33 + $0x1], 1 }

// kernel: tpu_custom_call.1
= control target key start
LH: loop header
LB: loop body
LE: loop exit
PB: predicated region body
PF: predicated region fallthrough
CT: control target
= control target key end

     0   :  { %s6741_s0 = inlined_call_operand.hbm [shape: s32[2], index: 0, kind: input, shape index: {}]   ;;  %s6742_s1 = inlined_call_operand.hbm [shape: f32[2,128,128], index: 1, kind: input, shape index: {}]   ;;  %s6743_s2 = inlined_call_operand.hbm [shape: bf16[128,128], index: 2, kind: input, shape index: {}]   ;;  %s6744_s3 = inlined_call_operand.hbm [shape: f32[1,128], index: 3, kind: input, shape index: {}]   ;;  %s6745_s4 = inlined_call_operand.hbm [shape: bf16[128,128], index: 4, kind: input, shape index: {}]   ;;  %s6746_s5 = inlined_call_operand.hbm [shape: f32[1,128], index: 5, kind: input, shape index: {}]   ;;  %s6747_s6 = inlined_call_operand.hbm [shape: bf16[128,128], index: 6, kind: input, shape index: {}]   ;;  %s6748_s7 = inlined_call_operand.hbm [shape: bf16[128,128], index: 7, kind: input, shape index: {}]   ;;  %s6749_s8 = inlined_call_operand.hbm [shape: f32[1,128], index: 8, kind: input, shape index: {}]   ;;  %s6750_s9 = inlined_call_operand.hbm [shape: bf16[128,128], index: 9, kind: input, shape index: {}]   ;;  %s6751_s10 = inlined_call_operand.hbm [shape: f32[1,128], index: 10, kind: input, shape index: {}]   ;;  %s6752_s11 = inlined_call_operand.hbm [shape: f32[1,128], index: 11, kind: input, shape index: {}]   ;;  %s6753_s12 = inlined_call_operand.hbm [shape: bf16[128,128], index: 12, kind: input, shape index: {}]   ;;  %s6754_s13 = inlined_call_operand.hbm [shape: f32[1,128], index: 13, kind: input, shape index: {}]   ;;  %s6755_s14 = inlined_call_operand.hbm [shape: bf16[128,128], index: 14, kind: input, shape index: {}]   ;;  %s6756_s15 = inlined_call_operand.hbm [shape: f32[1,128], index: 15, kind: input, shape index: {}]   ;;  %s6757_s16 = inlined_call_operand.hbm [shape: bf16[128,128], index: 16, kind: input, shape index: {}]   ;;  %s6758_s17 = inlined_call_operand.hbm [shape: f32[2,128,128], index: 17, kind: output, shape index: {0}]   ;;  %s6759_s18 = inlined_call_operand.hbm [shape: f32[2,128,128], index: 18, kind: output, shape index: {1}]  }
   0x1   :  { %6781 = sst [smem:[#allocation55_spill]] %s6741_s0 }
   0x2   :  { %6782 = sst [smem:[#allocation56_spill]] %s6742_s1  ;;  %s6794_s29 = sld [smem:[#allocation55_spill]] }
   0x3   :  { %6783 = sst [smem:[#allocation57_spill]] %s6743_s2 }
   0x4   :  { %6784 = sst [smem:[#allocation58_spill]] %s6744_s3 }
   0x5   :  { %6785 = sst [smem:[#allocation59_spill]] %s6745_s4 }
   0x6   :  { %6786 = sst [smem:[#allocation60_spill]] %s6746_s5 }
   0x7   :  { %6787 = sst [smem:[#allocation61_spill]] %s6747_s6 }
   0x8   :  { %6788 = sst [smem:[#allocation62_spill]] %s6748_s7 }
   0x9   :  { %6789 = sst [smem:[#allocation63_spill]] %s6749_s8 }
   0xa   :  { %6790 = sst [smem:[#allocation64_spill]] %s6750_s9 }
   0xb   :  { %6791 = sst [smem:[#allocation65_spill]] %s6752_s11  ;;  %s4647_s11 = scalar_lea.hbm %s6794_s29, 16 }
   0xc   :  { %6792 = sst [smem:[#allocation66_spill]] %s6758_s17  ;;  %p4648_p0 = scmp.ne.s32.totalorder %s6794_s29, %s4647_s11 }
   0xd   :  { %6793 = sst [smem:[#allocation67_spill]] %s6759_s18  ;;  %p4651_p1 = scmp.lt.u32.totalorder %s4647_s11, %s6794_s29 }
   0xf   :  { %p4653_p2 = pnand %p4651_p1, %p4648_p0 }
  0x11   :  { %4656 = shalt.err (!%p4653_p2)  }
  0x12   :  { %s5273_s20 = smov [#allocation4]  }
  0x13   :  { %25 = dma.hbm_to_smem %s6794_s29, 16, %s5273_s20, [#allocation3] }
  0x14   :  { %5195 = dma.done.wait [#allocation3], 16 }
  0x15   :  { %5196 = vsyncadd [#allocation3], 4294967280 }
  0x16   :  { %27 = sfence }
  0x17   :  { %28 = vsyncpa [#allocation6], 0 }
  0x18   :  { %30 = vsyncpa [#allocation6 + $0x1], 0 }
  0x19   :  { %31 = vsyncpa [#allocation9], 0 }
  0x1a   :  { %32 = vsyncpa [#allocation12], 0 }
  0x1b   :  { %33 = vsyncpa [#allocation15], 0 }
  0x1c   :  { %34 = vsyncpa [#allocation18], 0 }
  0x1d   :  { %35 = vsyncpa [#allocation21], 0 }
  0x1e   :  { %36 = vsyncpa [#allocation24], 0 }
  0x1f   :  { %37 = vsyncpa [#allocation27], 0 }
  0x20   :  { %38 = vsyncpa [#allocation30], 0 }
  0x21   :  { %39 = vsyncpa [#allocation7], 0 }
  0x22   :  { %41 = vsyncpa [#allocation7 + $0x1], 0 }
  0x23   :  { %42 = vsyncpa [#allocation33], 0 }
  0x24   :  { %44 = vsyncpa [#allocation33 + $0x1], 0  ;;  %s5406_s11 = smov 0   ;;  %s5408_s2 = smov 0  }
  0x25   :  { %s5410_s23 = smov 0   ;;  %s5412_s24 = smov 0  }
  0x26   :  { %s5414_s25 = smov 0   ;;  %s5416_s26 = smov 0  }
  0x27   :  { %s5418_s27 = smov 0   ;;  %s5420_s28 = smov 0  }
  0x28 LB: > { %6795 = sst [smem:[#allocation46_spill]] %s5243_s11  ;;  %s6764_s29 = sadd.s32 4294967295, %s5271_s28   ;;  %s5271_s28 = sphi %s5420_s28, %s50_s28   ;;  %s5267_s27 = sphi %s5418_s27, %s6853_s27   ;;  %s5263_s26 = sphi %s5416_s26, %s6852_s26   ;;  %s5259_s25 = sphi %s5414_s25, %s6850_s25   ;;  %s5255_s24 = sphi %s5412_s24, %s6849_s24   ;;  %s5251_s23 = sphi %s5410_s23, %s6851_s23   ;;  %s5247_s2 = sphi %s5408_s2, %s6848_s2   ;;  %s5243_s11 = sphi %s5406_s11, %s6847_s11  }
  0x29   : > { %6796 = sst [smem:[#allocation47_spill]] %s5247_s2  ;;  %p3529_p3 = scmp.ge.s32.totalorder %s5271_s28, 1 }
  0x2a   : > { %6797 = sst [smem:[#allocation48_spill]] %s5251_s23  ;;  %p5450_p4 = scmp.eq.s32.totalorder %s6764_s29, 0 }
  0x2b   : > { %6798 = sst [smem:[#allocation49_spill]] %s5255_s24  ;;  %p460_p5 = scmp.lt.s32.totalorder %s5271_s28, 7 }
  0x2c   : > { %6799 = sst [smem:[#allocation50_spill]] %s5259_s25  ;;  %s5274_s19 = smov [#allocation8]  }
  0x2d   : > { %6800 = sst [smem:[#allocation51_spill]] %s5263_s26  ;;  %p5455_p6 = pnand %p3529_p3, %p460_p5 }
  0x2e   : > { %6801 = sst [smem:[#allocation52_spill]] %s5267_s27  ;;  %s472_s1 = sshll.u32 %s5274_s19, 4  ;;  %s5459_s1 = int_to_ptr.vmem [resolvable:$true] %s472_s1 }
  0x2f   : > { %s6802_s30 = scalar_select %p5450_p4, 1, 0 }
  0x30   : > { %s6804_s0 = scalar_select %p5455_p6, 1, 0 }
  0x31   : > { %6803 = sst [smem:[#allocation53_spill]] %s6802_s30  ;;  %p4247_p7 = pneg %p5455_p6 }
  0x32   : > { %6805 = sst [smem:[#allocation54_spill]] %s6804_s0  ;;  %s5275_s21 = smov [#allocation11]  }
  0x33   : > { %p5465_p8 = pnand %p4247_p7, %p5450_p4  ;;  %s496_s22 = sshll.u32 %s5275_s21, 4  ;;  %s5469_s22 = int_to_ptr.vmem [resolvable:$true] %s496_s22 }
  0x34   : > { %s5276_s29 = smov [#allocation14]   ;;  %s6807_s19 = sld [smem:[#allocation57_spill]] }
  0x35   : > { %s5471_s18 = sshll.u32 %s5276_s29, 4  ;;  %p5481_p10 = pneg %p5465_p8  ;;  %s521_s18 = int_to_ptr.vmem [resolvable:$true] %s5471_s18 }
  0x3a   : > { %s4657_s24 = scalar_lea.hbm %s6807_s19, 1024 }
  0x3b   : > { %p4658_p9 = scmp.ne.s32.totalorder %s6807_s19, %s4657_s24  ;;  %p4664_p13 = scmp.lt.u32.totalorder %s4657_s24, %s6807_s19 }
  0x3d   : > { %p4660_p11 = pnand %p5481_p10, %p4658_p9 }
  0x3f   : > { %p4661_p12 = pneg %p4660_p11 }
  0x41   : > { %p4666_p0 = pnand %p4664_p13, %p4661_p12 }
  0x43   : > { %4669 = shalt.err (!%p4666_p0)
}
  0x44   : > { %s4670_s17 = scalar_lea.vmem %s5459_s1, 1024  ;;  %p4678_p5 = scmp.lt.s32.totalorder %s5459_s1, %s5459_s1 }
  0x45   : > { %p4671_p1 = scmp.ne.s32.totalorder %s5459_s1, %s4670_s17  ;;  %p4679_p7 = scmp.lt.s32.totalorder %s4670_s17, %s4670_s17 }
  0x47   : > { %p4673_p2 = pnand %p4671_p1, %p5481_p10  ;;  %p4680_p9 = por %p4679_p7, %p4678_p5 }
  0x49   : > { %p4674_p3 = pneg %p4673_p2 }
  0x4b   : > { %p4681_p11 = pnand %p4680_p9, %p4674_p3 }
  0x4d   : > { %4684 = shalt.err (!%p4681_p11)
}
  0x4e   : > { %s5277_s11 = smov 64   ;;  %s5278_s24 = smov 4  }
  0x4f   : > { %4250 = dma.hbm_to_vmem [thread:$0]  (!%p5465_p8), %s6807_s19, 1024, %s5459_s1, [#allocation9], %s5277_s11, %s5277_s11, %s5278_s24  }
  0x50   : > { %s6809_s4 = sld [smem:[#allocation59_spill]] }
  0x56   : > { %s4685_s17 = scalar_lea.hbm %s6809_s4, 1024 }
  0x57   : > { %p4686_p12 = scmp.ne.s32.totalorder %s6809_s4, %s4685_s17  ;;  %p4692_p1 = scmp.lt.u32.totalorder %s4685_s17, %s6809_s4 }
  0x59   : > { %p4688_p13 = pnand %p4686_p12, %p5481_p10 }
  0x5b   : > { %p4689_p0 = pneg %p4688_p13 }
  0x5d   : > { %p4694_p2 = pnand %p4692_p1, %p4689_p0 }
  0x5f   : > { %4697 = shalt.err (!%p4694_p2)
}
  0x60   : > { %s4698_s1 = scalar_lea.vmem %s5469_s22, 1024  ;;  %p4706_p9 = scmp.lt.s32.totalorder %s5469_s22, %s5469_s22 }
  0x61   : > { %p4699_p3 = scmp.ne.s32.totalorder %s5469_s22, %s4698_s1  ;;  %p4707_p11 = scmp.lt.s32.totalorder %s4698_s1, %s4698_s1 }
  0x63   : > { %p4701_p5 = pnand %p4699_p3, %p5481_p10  ;;  %p4708_p12 = por %p4707_p11, %p4706_p9 }
  0x65   : > { %p4702_p7 = pneg %p4701_p5 }
  0x67   : > { %p4709_p13 = pnand %p4708_p12, %p4702_p7 }
  0x69   : > { %4712 = shalt.err (!%p4709_p13)
}
  0x6a   : > { %4256 = dma.hbm_to_vmem [thread:$0]  (!%p5465_p8), %s6809_s4, 1024, %s5469_s22, [#allocation12], %s5277_s11, %s5277_s11, %s5278_s24  }
  0x6b   : > { %s6810_s6 = sld [smem:[#allocation61_spill]] }
  0x71   : > { %s4713_s25 = scalar_lea.hbm %s6810_s6, 1024 }
  0x72   : > { %p4714_p0 = scmp.ne.s32.totalorder %s6810_s6, %s4713_s25  ;;  %p4720_p3 = scmp.lt.u32.totalorder %s4713_s25, %s6810_s6 }
  0x74   : > { %p4716_p1 = pnand %p4714_p0, %p5481_p10 }
  0x76   : > { %p4717_p2 = pneg %p4716_p1 }
  0x78   : > { %p4722_p5 = pnand %p4720_p3, %p4717_p2 }
  0x7a   : > { %4725 = shalt.err (!%p4722_p5)
}
  0x7b   : > { %s4726_s1 = scalar_lea.vmem %s521_s18, 1024  ;;  %p4734_p12 = scmp.lt.s32.totalorder %s521_s18, %s521_s18 }
  0x7c   : > { %p4727_p7 = scmp.ne.s32.totalorder %s521_s18, %s4726_s1  ;;  %p4735_p13 = scmp.lt.s32.totalorder %s4726_s1, %s4726_s1 }
  0x7e   : > { %p4729_p9 = pnand %p4727_p7, %p5481_p10  ;;  %p4736_p6 = por %p4735_p13, %p4734_p12 }
  0x80   : > { %p4730_p11 = pneg %p4729_p9 }
  0x82   : > { %p4737_p4 = pnand %p4736_p6, %p4730_p11 }
  0x84   : > { %4740 = shalt.err (!%p4737_p4)
}
  0x85   : > { %4262 = dma.hbm_to_vmem [thread:$0]  (!%p5465_p8), %s6810_s6, 1024, %s521_s18, [#allocation15], %s5277_s11, %s5277_s11, %s5278_s24  }
  0x86   : > { %s5279_s23 = smov [#allocation17]   ;;  %s5280_s27 = smov [#allocation20]  }
  0x87   : > { %s547_s26 = sshll.u32 %s5279_s23, 4  ;;  %s571_s25 = sshll.u32 %s5280_s27, 4  ;;  %s548_s26 = int_to_ptr.vmem [resolvable:$true] %s547_s26  ;;  %s572_s25 = int_to_ptr.vmem [resolvable:$true] %s571_s25 }
  0x88   : > { %s6811_s8 = sld [smem:[#allocation63_spill]] }
  0x8e   : > { %s4741_s29 = scalar_lea.hbm %s6811_s8, 16 }
  0x8f   : > { %p4742_p4 = scmp.ne.s32.totalorder %s6811_s8, %s4741_s29  ;;  %p4748_p1 = scmp.lt.u32.totalorder %s4741_s29, %s6811_s8 }
  0x91   : > { %p4744_p6 = pnand %p4742_p4, %p5481_p10 }
  0x93   : > { %p4745_p0 = pneg %p4744_p6 }
  0x95   : > { %p4750_p2 = pnand %p4748_p1, %p4745_p0 }
  0x97   : > { %4753 = shalt.err (!%p4750_p2)
}
  0x98   : > { %s4754_s18 = scalar_lea.vmem %s548_s26, 16  ;;  %s4761_s2 = scalar_lea.vmem %s548_s26, 32 }
  0x99   : > { %p4755_p3 = scmp.ne.s32.totalorder %s548_s26, %s4754_s18  ;;  %p4762_p9 = scmp.lt.s32.totalorder %s548_s26, %s548_s26 }
  0x9a   : > { %p4763_p11 = scmp.lt.s32.totalorder %s4761_s2, %s4754_s18 }
  0x9b   : > { %p4757_p5 = pnand %p4755_p3, %p5481_p10 }
  0x9c   : > { %p4764_p12 = por %p4763_p11, %p4762_p9 }
  0x9d   : > { %p4758_p7 = pneg %p4757_p5 }
  0x9f   : > { %p4765_p13 = pnand %p4764_p12, %p4758_p7 }
  0xa1   : > { %4768 = shalt.err (!%p4765_p13)
}
  0xa2   : > { %4268 = dma.hbm_to_vmem [thread:$0]  (!%p5465_p8), %s6811_s8, 16, %s548_s26, [#allocation18]  }
  0xa3   : > { %s4769_s21 = scalar_lea.hbm %s6751_s10, 16 }
  0xa4   : > { %p4770_p4 = scmp.ne.s32.totalorder %s6751_s10, %s4769_s21  ;;  %p4776_p1 = scmp.lt.u32.totalorder %s4769_s21, %s6751_s10 }
  0xa6   : > { %p4772_p6 = pnand %p4770_p4, %p5481_p10 }
  0xa8   : > { %p4773_p0 = pneg %p4772_p6 }
  0xaa   : > { %p4778_p2 = pnand %p4776_p1, %p4773_p0 }
  0xac   : > { %4781 = shalt.err (!%p4778_p2)
}
  0xad   : > { %s4782_s18 = scalar_lea.vmem %s572_s25, 16  ;;  %s4789_s26 = scalar_lea.vmem %s572_s25, 32 }
  0xae   : > { %p4783_p3 = scmp.ne.s32.totalorder %s572_s25, %s4782_s18  ;;  %p4790_p9 = scmp.lt.s32.totalorder %s572_s25, %s572_s25 }
  0xaf   : > { %p4791_p11 = scmp.lt.s32.totalorder %s4789_s26, %s4782_s18 }
  0xb0   : > { %p4785_p5 = pnand %p4783_p3, %p5481_p10 }
  0xb1   : > { %p4792_p12 = por %p4791_p11, %p4790_p9 }
  0xb2   : > { %p4786_p7 = pneg %p4785_p5 }
  0xb4   : > { %p4793_p13 = pnand %p4792_p12, %p4786_p7 }
  0xb6   : > { %4796 = shalt.err (!%p4793_p13)
}
  0xb7   : > { %4274 = dma.hbm_to_vmem [thread:$0]  (!%p5465_p8), %s6751_s10, 16, %s572_s25, [#allocation21]  }
  0xb8   : > { %s5281_s27 = smov [#allocation23]   ;;  %s5282_s0 = smov [#allocation26]  }
  0xb9   : > { %s592_s4 = sshll.u32 %s5281_s27, 4  ;;  %s616_s21 = sshll.u32 %s5282_s0, 4  ;;  %s593_s4 = int_to_ptr.vmem [resolvable:$true] %s592_s4  ;;  %s617_s21 = int_to_ptr.vmem [resolvable:$true] %s616_s21 }
  0xba   : > { %s4797_s1 = scalar_lea.hbm %s6753_s12, 1024 }
  0xbb   : > { %p4798_p4 = scmp.ne.s32.totalorder %s6753_s12, %s4797_s1  ;;  %p4804_p1 = scmp.lt.u32.totalorder %s4797_s1, %s6753_s12 }
  0xbd   : > { %p4800_p6 = pnand %p4798_p4, %p5481_p10 }
  0xbf   : > { %p4801_p0 = pneg %p4800_p6 }
  0xc1   : > { %p4806_p2 = pnand %p4804_p1, %p4801_p0 }
  0xc3   : > { %4809 = shalt.err (!%p4806_p2)
}
  0xc4   : > { %s4810_s25 = scalar_lea.vmem %s593_s4, 1024  ;;  %p4818_p9 = scmp.lt.s32.totalorder %s593_s4, %s593_s4 }
  0xc5   : > { %p4811_p3 = scmp.ne.s32.totalorder %s593_s4, %s4810_s25  ;;  %p4819_p11 = scmp.lt.s32.totalorder %s4810_s25, %s4810_s25 }
  0xc7   : > { %p4813_p5 = pnand %p4811_p3, %p5481_p10  ;;  %p4820_p12 = por %p4819_p11, %p4818_p9 }
  0xc9   : > { %p4814_p7 = pneg %p4813_p5 }
  0xcb   : > { %p4821_p13 = pnand %p4820_p12, %p4814_p7 }
  0xcd   : > { %4824 = shalt.err (!%p4821_p13)
}
  0xce   : > { %4280 = dma.hbm_to_vmem [thread:$0]  (!%p5465_p8), %s6753_s12, 1024, %s593_s4, [#allocation24], %s5277_s11, %s5277_s11, %s5278_s24  }
  0xcf   : > { %s4825_s17 = scalar_lea.hbm %s6755_s14, 1024 }
  0xd0   : > { %p4826_p4 = scmp.ne.s32.totalorder %s6755_s14, %s4825_s17  ;;  %p4832_p1 = scmp.lt.u32.totalorder %s4825_s17, %s6755_s14 }
  0xd2   : > { %p4828_p6 = pnand %p4826_p4, %p5481_p10 }
  0xd4   : > { %p4829_p0 = pneg %p4828_p6 }
  0xd6   : > { %p4834_p2 = pnand %p4832_p1, %p4829_p0 }
  0xd8   : > { %4837 = shalt.err (!%p4834_p2)
}
  0xd9   : > { %s4838_s2 = scalar_lea.vmem %s617_s21, 1024  ;;  %p4846_p9 = scmp.lt.s32.totalorder %s617_s21, %s617_s21 }
  0xda   : > { %p4839_p3 = scmp.ne.s32.totalorder %s617_s21, %s4838_s2  ;;  %p4847_p11 = scmp.lt.s32.totalorder %s4838_s2, %s4838_s2 }
  0xdc   : > { %p4841_p5 = pnand %p4839_p3, %p5481_p10  ;;  %p4848_p12 = por %p4847_p11, %p4846_p9 }
  0xde   : > { %p4842_p7 = pneg %p4841_p5 }
  0xe0   : > { %p4849_p13 = pnand %p4848_p12, %p4842_p7 }
  0xe2   : > { %4852 = shalt.err (!%p4849_p13)
}
  0xe3   : > { %4286 = dma.hbm_to_vmem [thread:$0]  (!%p5465_p8), %s6755_s14, 1024, %s617_s21, [#allocation27], %s5277_s11, %s5277_s11, %s5278_s24  }
  0xe4   : > { %s5283_s23 = smov [#allocation10]   ;;  %s5284_s0 = smov [#allocation13]  }
  0xe5   : > { %s486_s27 = sshll.u32 %s5283_s23, 4  ;;  %s510_s29 = sshll.u32 %s5284_s0, 4  ;;  %s487_s27 = int_to_ptr.vmem [resolvable:$true] %s486_s27  ;;  %s511_s29 = int_to_ptr.vmem [resolvable:$true] %s510_s29 }
  0xe6   : > { %s6812_s3 = sld [smem:[#allocation58_spill]] }
  0xec   : > { %s4853_s22 = scalar_lea.hbm %s6812_s3, 16 }
  0xed   : > { %p4854_p4 = scmp.ne.s32.totalorder %s6812_s3, %s4853_s22  ;;  %p4860_p1 = scmp.lt.u32.totalorder %s4853_s22, %s6812_s3 }
  0xef   : > { %p4856_p6 = pnand %p4854_p4, %p5481_p10 }
  0xf1   : > { %p4857_p0 = pneg %p4856_p6 }
  0xf3   : > { %p4862_p2 = pnand %p4860_p1, %p4857_p0 }
  0xf5   : > { %4865 = shalt.err (!%p4862_p2)
}
  0xf6   : > { %s4866_s21 = scalar_lea.vmem %s487_s27, 16  ;;  %s4873_s25 = scalar_lea.vmem %s487_s27, 32 }
  0xf7   : > { %p4867_p3 = scmp.ne.s32.totalorder %s487_s27, %s4866_s21  ;;  %p4874_p9 = scmp.lt.s32.totalorder %s487_s27, %s487_s27 }
  0xf8   : > { %p4875_p11 = scmp.lt.s32.totalorder %s4873_s25, %s4866_s21 }
  0xf9   : > { %p4869_p5 = pnand %p4867_p3, %p5481_p10 }
  0xfa   : > { %p4876_p12 = por %p4875_p11, %p4874_p9 }
  0xfb   : > { %p4870_p7 = pneg %p4869_p5 }
  0xfd   : > { %p4877_p13 = pnand %p4876_p12, %p4870_p7 }
  0xff   : > { %4880 = shalt.err (!%p4877_p13)
}
 0x100   : > { %4253 = dma.hbm_to_vmem [thread:$0]  (!%p5465_p8), %s6812_s3, 16, %s487_s27, [#allocation9]  }
 0x101   : > { %s6813_s5 = sld [smem:[#allocation60_spill]] }
 0x107   : > { %s4881_s22 = scalar_lea.hbm %s6813_s5, 16 }
 0x108   : > { %p4882_p4 = scmp.ne.s32.totalorder %s6813_s5, %s4881_s22  ;;  %p4888_p1 = scmp.lt.u32.totalorder %s4881_s22, %s6813_s5 }
 0x10a   : > { %p4884_p6 = pnand %p4882_p4, %p5481_p10 }
 0x10c   : > { %p4885_p0 = pneg %p4884_p6 }
 0x10e   : > { %p4890_p2 = pnand %p4888_p1, %p4885_p0 }
 0x110   : > { %4893 = shalt.err (!%p4890_p2)
}
 0x111   : > { %s4894_s21 = scalar_lea.vmem %s511_s29, 16  ;;  %s4901_s27 = scalar_lea.vmem %s511_s29, 32 }
 0x112   : > { %p4895_p3 = scmp.ne.s32.totalorder %s511_s29, %s4894_s21  ;;  %p4902_p9 = scmp.lt.s32.totalorder %s511_s29, %s511_s29 }
 0x113   : > { %p4903_p11 = scmp.lt.s32.totalorder %s4901_s27, %s4894_s21 }
 0x114   : > { %p4897_p5 = pnand %p4895_p3, %p5481_p10 }
 0x115   : > { %p4904_p12 = por %p4903_p11, %p4902_p9 }
 0x116   : > { %p4898_p7 = pneg %p4897_p5 }
 0x118   : > { %p4905_p13 = pnand %p4904_p12, %p4898_p7 }
 0x11a   : > { %4908 = shalt.err (!%p4905_p13)
}
 0x11b   : > { %4259 = dma.hbm_to_vmem [thread:$0]  (!%p5465_p8), %s6813_s5, 16, %s511_s29, [#allocation12]  }
 0x11c   : > { %s5285_s0 = smov [#allocation16]   ;;  %s5286_s1 = smov [#allocation19]  }
 0x11d   : > { %s533_s17 = sshll.u32 %s5285_s0, 4  ;;  %s557_s22 = sshll.u32 %s5286_s1, 4  ;;  %s534_s17 = int_to_ptr.vmem [resolvable:$true] %s533_s17  ;;  %s558_s22 = int_to_ptr.vmem [resolvable:$true] %s557_s22 }
 0x11e   : > { %s6814_s7 = sld [smem:[#allocation62_spill]] }
 0x124   : > { %s4909_s2 = scalar_lea.hbm %s6814_s7, 1024 }
 0x125   : > { %p4910_p4 = scmp.ne.s32.totalorder %s6814_s7, %s4909_s2  ;;  %p4916_p1 = scmp.lt.u32.totalorder %s4909_s2, %s6814_s7 }
 0x127   : > { %p4912_p6 = pnand %p4910_p4, %p5481_p10 }
 0x129   : > { %p4913_p0 = pneg %p4912_p6 }
 0x12b   : > { %p4918_p2 = pnand %p4916_p1, %p4913_p0 }
 0x12d   : > { %4921 = shalt.err (!%p4918_p2)
}
 0x12e   : > { %s4922_s29 = scalar_lea.vmem %s534_s17, 1024  ;;  %p4930_p9 = scmp.lt.s32.totalorder %s534_s17, %s534_s17 }
 0x12f   : > { %p4923_p3 = scmp.ne.s32.totalorder %s534_s17, %s4922_s29  ;;  %p4931_p11 = scmp.lt.s32.totalorder %s4922_s29, %s4922_s29 }
 0x131   : > { %p4925_p5 = pnand %p4923_p3, %p5481_p10  ;;  %p4932_p12 = por %p4931_p11, %p4930_p9 }
 0x133   : > { %p4926_p7 = pneg %p4925_p5 }
 0x135   : > { %p4933_p13 = pnand %p4932_p12, %p4926_p7 }
 0x137   : > { %4936 = shalt.err (!%p4933_p13)
}
 0x138   : > { %4265 = dma.hbm_to_vmem [thread:$0]  (!%p5465_p8), %s6814_s7, 1024, %s534_s17, [#allocation15], %s5277_s11, %s5277_s11, %s5278_s24  }
 0x139   : > { %s6815_s9 = sld [smem:[#allocation64_spill]] }
 0x13f   : > { %s4937_s26 = scalar_lea.hbm %s6815_s9, 1024 }
 0x140   : > { %p4938_p4 = scmp.ne.s32.totalorder %s6815_s9, %s4937_s26  ;;  %p4944_p1 = scmp.lt.u32.totalorder %s4937_s26, %s6815_s9 }
 0x142   : > { %p4940_p6 = pnand %p4938_p4, %p5481_p10 }
 0x144   : > { %p4941_p0 = pneg %p4940_p6 }
 0x146   : > { %p4946_p2 = pnand %p4944_p1, %p4941_p0 }
 0x148   : > { %4949 = shalt.err (!%p4946_p2)
}
 0x149   : > { %s4950_s25 = scalar_lea.vmem %s558_s22, 1024  ;;  %p4958_p9 = scmp.lt.s32.totalorder %s558_s22, %s558_s22 }
 0x14a   : > { %p4951_p3 = scmp.ne.s32.totalorder %s558_s22, %s4950_s25  ;;  %p4959_p11 = scmp.lt.s32.totalorder %s4950_s25, %s4950_s25 }
 0x14c   : > { %p4953_p5 = pnand %p4951_p3, %p5481_p10  ;;  %p4960_p12 = por %p4959_p11, %p4958_p9 }
 0x14e   : > { %p4954_p7 = pneg %p4953_p5 }
 0x150   : > { %p4961_p13 = pnand %p4960_p12, %p4954_p7 }
 0x152   : > { %4964 = shalt.err (!%p4961_p13)
}
 0x153   : > { %4271 = dma.hbm_to_vmem [thread:$0]  (!%p5465_p8), %s6815_s9, 1024, %s558_s22, [#allocation18], %s5277_s11, %s5277_s11, %s5278_s24  }
 0x154   : > { %s5287_s23 = smov [#allocation22]   ;;  %s5288_s1 = smov [#allocation25]  }
 0x155   : > { %s582_s0 = sshll.u32 %s5287_s23, 4  ;;  %s606_s18 = sshll.u32 %s5288_s1, 4  ;;  %s583_s0 = int_to_ptr.vmem [resolvable:$true] %s582_s0  ;;  %s607_s18 = int_to_ptr.vmem [resolvable:$true] %s606_s18 }
 0x156   : > { %s6816_s4 = sld [smem:[#allocation65_spill]] }
 0x15c   : > { %s4965_s21 = scalar_lea.hbm %s6816_s4, 16 }
 0x15d   : > { %p4966_p4 = scmp.ne.s32.totalorder %s6816_s4, %s4965_s21  ;;  %p4972_p1 = scmp.lt.u32.totalorder %s4965_s21, %s6816_s4 }
 0x15f   : > { %p4968_p6 = pnand %p4966_p4, %p5481_p10 }
 0x161   : > { %p4969_p0 = pneg %p4968_p6 }
 0x163   : > { %p4974_p2 = pnand %p4972_p1, %p4969_p0 }
 0x165   : > { %4977 = shalt.err (!%p4974_p2)
}
 0x166   : > { %s4978_s22 = scalar_lea.vmem %s583_s0, 16  ;;  %s4985_s29 = scalar_lea.vmem %s583_s0, 32 }
 0x167   : > { %p4979_p3 = scmp.ne.s32.totalorder %s583_s0, %s4978_s22  ;;  %p4986_p9 = scmp.lt.s32.totalorder %s583_s0, %s583_s0 }
 0x168   : > { %p4987_p11 = scmp.lt.s32.totalorder %s4985_s29, %s4978_s22 }
 0x169   : > { %p4981_p5 = pnand %p4979_p3, %p5481_p10 }
 0x16a   : > { %p4988_p12 = por %p4987_p11, %p4986_p9 }
 0x16b   : > { %p4982_p7 = pneg %p4981_p5 }
 0x16d   : > { %p4989_p13 = pnand %p4988_p12, %p4982_p7 }
 0x16f   : > { %4992 = shalt.err (!%p4989_p13)
}
 0x170   : > { %4277 = dma.hbm_to_vmem [thread:$0]  (!%p5465_p8), %s6816_s4, 16, %s583_s0, [#allocation21]  }
 0x171   : > { %s4993_s2 = scalar_lea.hbm %s6754_s13, 16 }
 0x172   : > { %p4994_p4 = scmp.ne.s32.totalorder %s6754_s13, %s4993_s2  ;;  %p5000_p1 = scmp.lt.u32.totalorder %s4993_s2, %s6754_s13 }
 0x174   : > { %p4996_p6 = pnand %p4994_p4, %p5481_p10 }
 0x176   : > { %p4997_p0 = pneg %p4996_p6 }
 0x178   : > { %p5002_p2 = pnand %p5000_p1, %p4997_p0 }
 0x17a   : > { %5005 = shalt.err (!%p5002_p2)
}
 0x17b   : > { %s5006_s22 = scalar_lea.vmem %s607_s18, 16  ;;  %s5013_s0 = scalar_lea.vmem %s607_s18, 32 }
 0x17c   : > { %p5007_p3 = scmp.ne.s32.totalorder %s607_s18, %s5006_s22  ;;  %p5014_p9 = scmp.lt.s32.totalorder %s607_s18, %s607_s18 }
 0x17d   : > { %p5015_p11 = scmp.lt.s32.totalorder %s5013_s0, %s5006_s22 }
 0x17e   : > { %p5009_p5 = pnand %p5007_p3, %p5481_p10 }
 0x17f   : > { %p5016_p12 = por %p5015_p11, %p5014_p9 }
 0x180   : > { %p5010_p7 = pneg %p5009_p5 }
 0x182   : > { %p5017_p13 = pnand %p5016_p12, %p5010_p7 }
 0x184   : > { %5020 = shalt.err (!%p5017_p13)
}
 0x185   : > { %4283 = dma.hbm_to_vmem [thread:$0]  (!%p5465_p8), %s6754_s13, 16, %s607_s18, [#allocation24]  }
 0x186   : > { %s5289_s1 = smov [#allocation28]   ;;  %s5290_s26 = smov [#allocation29]  }
 0x187   : > { %s630_s3 = sshll.u32 %s5289_s1, 4  ;;  %s640_s2 = sshll.u32 %s5290_s26, 4  ;;  %s631_s3 = int_to_ptr.vmem [resolvable:$true] %s630_s3  ;;  %s641_s2 = int_to_ptr.vmem [resolvable:$true] %s640_s2 }
 0x188   : > { %s5021_s25 = scalar_lea.hbm %s6756_s15, 16 }
 0x189   : > { %p5022_p4 = scmp.ne.s32.totalorder %s6756_s15, %s5021_s25  ;;  %p5028_p1 = scmp.lt.u32.totalorder %s5021_s25, %s6756_s15 }
 0x18b   : > { %p5024_p6 = pnand %p5022_p4, %p5481_p10 }
 0x18d   : > { %p5025_p0 = pneg %p5024_p6 }
 0x18f   : > { %p5030_p2 = pnand %p5028_p1, %p5025_p0 }
 0x191   : > { %5033 = shalt.err (!%p5030_p2)
}
 0x192   : > { %s5034_s18 = scalar_lea.vmem %s631_s3, 16  ;;  %s5041_s23 = scalar_lea.vmem %s631_s3, 32 }
 0x193   : > { %p5035_p3 = scmp.ne.s32.totalorder %s631_s3, %s5034_s18  ;;  %p5042_p9 = scmp.lt.s32.totalorder %s631_s3, %s631_s3 }
 0x194   : > { %p5043_p11 = scmp.lt.s32.totalorder %s5041_s23, %s5034_s18 }
 0x195   : > { %p5037_p5 = pnand %p5035_p3, %p5481_p10 }
 0x196   : > { %p5044_p12 = por %p5043_p11, %p5042_p9 }
 0x197   : > { %p5038_p7 = pneg %p5037_p5 }
 0x199   : > { %p5045_p13 = pnand %p5044_p12, %p5038_p7 }
 0x19b   : > { %5048 = shalt.err (!%p5045_p13)
}
 0x19c   : > { %4289 = dma.hbm_to_vmem [thread:$0]  (!%p5465_p8), %s6756_s15, 16, %s631_s3, [#allocation27]  }
 0x19d   : > { %s5049_s25 = scalar_lea.hbm %s6757_s16, 1024 }
 0x19e   : > { %p5050_p4 = scmp.ne.s32.totalorder %s6757_s16, %s5049_s25  ;;  %p5056_p1 = scmp.lt.u32.totalorder %s5049_s25, %s6757_s16 }
 0x1a0   : > { %p5052_p6 = pnand %p5050_p4, %p5481_p10 }
 0x1a2   : > { %p5053_p0 = pneg %p5052_p6 }
 0x1a4   : > { %p5058_p2 = pnand %p5056_p1, %p5053_p0 }
 0x1a6   : > { %5061 = shalt.err (!%p5058_p2)
}
 0x1a7   : > { %s5062_s18 = scalar_lea.vmem %s641_s2, 1024  ;;  %p5070_p9 = scmp.lt.s32.totalorder %s641_s2, %s641_s2 }
 0x1a8   : > { %p5063_p3 = scmp.ne.s32.totalorder %s641_s2, %s5062_s18  ;;  %p5071_p11 = scmp.lt.s32.totalorder %s5062_s18, %s5062_s18 }
 0x1aa   : > { %p5065_p5 = pnand %p5063_p3, %p5481_p10  ;;  %p5072_p12 = por %p5071_p11, %p5070_p9 }
 0x1ac   : > { %p5066_p7 = pneg %p5065_p5 }
 0x1ae   : > { %p5073_p13 = pnand %p5072_p12, %p5066_p7 }
 0x1b0   : > { %5076 = shalt.err (!%p5073_p13)
}
 0x1b1   : > { %s6817_s1 = sld [smem:[#allocation51_spill]]  ;;  %s6818_s26 = sld [smem:[#allocation52_spill]] }
 0x1b2   : > { %s6819_s21 = sld [smem:[#allocation48_spill]]  ;;  %s6820_s30 = sld [smem:[#allocation47_spill]] }
 0x1b3   : > { %s6821_s27 = sld [smem:[#allocation46_spill]]  ;;  %s6822_s25 = sld [smem:[#allocation53_spill]] }
 0x1b4   : > { %4292 = dma.hbm_to_vmem [thread:$0]  (!%p5465_p8), %s6757_s16, 1024, %s641_s2, [#allocation30], %s5277_s11, %s5277_s11, %s5278_s24  }
 0x1b5   : > { %s3528_s20 = sadd.s32 4294967294, %s5271_s28   ;;  %p77_p6 = scmp.eq.s32.totalorder %s5271_s28, 0 }
 0x1b6   : > { %s6824_s11 = sadd.s32 4294967295, %s5271_s28   ;;  %p427_p7 = scmp.eq.s32.totalorder %s3528_s20, 5 }
 0x1b7   : > { %s59_s17 = sadd.s32 1, %s6817_s1  ;;  %s62_s22 = sadd.s32 1, %s6818_s26 }
 0x1b8   : > { %p60_p10 = scmp.ge.s32.totalorder %s59_s17, 3  ;;  %s69_s0 = sadd.s32 1, %s6819_s21 }
 0x1b9   : > { %p76_p4 = scmp.ne.s32.totalorder %s6819_s21, %s6820_s30  ;;  %p82_p8 = scmp.ne.s32.totalorder %s6820_s30, %s6821_s27 }
 0x1ba   : > { %s6855_s17 = smov (%p60_p10, %s59_s17), 0  ;;  %s6857_s22 = smov (!%p60_p10, %s62_s22), %s6818_s26 }
 0x1bb   : > { %p5794_p0 = por %p77_p6, %p76_p4  ;;  %p64_p1 = scmp.ge.s32.totalorder %s6857_s22, 2 }
 0x1bc   : > { %p421_p2 = scmp.eq.s32.totalorder %s6824_s11, 5  ;;  %p6825_p3 = scmp.ne.s32.totalorder %s6822_s25, 0 }
 0x1bd   : > { %s6859_s22 = smov (%p64_p1, %s6857_s22), 0  ;;  %p5814_p11 = por %p427_p7, %p82_p8 }
 0x1be   : > { %p5804_p5 = por %p6825_p3, %p82_p8  ;;  %p5810_p9 = por %p421_p2, %p76_p4 }
 0x1bf   : > { %s6828_s18 = scalar_select %p5814_p11, 1, 0 }
 0x1c0   : > { %s6827_s2 = scalar_select %p5810_p9, 1, 0 }
 0x1c1   : > { %s66_s3 = ssub.s32 %s6818_s26, %s6859_s22  ;;  %p4319_p12 = scmp.lt.s32.totalorder %s5271_s28, 6 }
 0x1c2   : > { %p67_p13 = scmp.eq.s32.totalorder %s66_s3, 0  ;;  %s654_s23 = sand.u32 1, %s6819_s21  }
 0x1c3   : > { %s3546_s1 = sshll.u32 %s654_s23, 7  ;;  %s3650_s30 = sshll.u32 %s6818_s26, 11 }
 0x1c4   : > { %s6861_s21 = smov (!%p67_p13, %s6819_s21), %s69_s0  ;;  %s6829_s20 = sld [smem:[#allocation56_spill]] }
 0x1c5   : > { %s658_s4 = scalar_lea.vmem [#allocation5], %s3546_s1  ;;  %p5835_p10 = pnand %p4319_p12, %p5794_p0 }
 0x1c6   : > { %s665_s5 = sshll.u32 %s658_s4, 4  ;;  %s5839_s26 = scalar_lea.sflag [#allocation6], %s654_s23  ;;  %s5831_s5 = int_to_ptr.vmem [resolvable:$true] %s665_s5 }
 0x1c7   : > { %p5079_p6 = pneg %p5835_p10 }
 0x1ca   : > { %s5829_s11 = scalar_lea.hbm %s6829_s20, %s3650_s30  ;;  %s5082_s29 = scalar_lea.hbm %s6829_s20, 4096 }
 0x1cb   : > { %s5077_s0 = scalar_lea.hbm %s5829_s11, 2048  ;;  %p5083_p0 = scmp.lt.u32.totalorder %s5829_s11, %s6829_s20 }
 0x1cc   : > { %p5078_p4 = scmp.ne.s32.totalorder %s5829_s11, %s5077_s0  ;;  %p5084_p2 = scmp.lt.u32.totalorder %s5082_s29, %s5077_s0 }
 0x1cd   : > { %p5086_p7 = scmp.lt.u32.totalorder %s5077_s0, %s5829_s11 }
 0x1ce   : > { %p5080_p8 = pnand %p5079_p6, %p5078_p4  ;;  %p5085_p3 = por %p5084_p2, %p5083_p0 }
 0x1d0   : > { %p5081_p1 = pneg %p5080_p8  ;;  %p5087_p12 = por %p5086_p7, %p5085_p3 }
 0x1d2   : > { %p5088_p13 = pnand %p5087_p12, %p5081_p1 }
 0x1d4   : > { %5091 = shalt.err (!%p5088_p13)
}
 0x1d5   : > { %s5092_s23 = scalar_lea.vmem %s5831_s5, 2048  ;;  %s5291_s25 = smov [#allocation5]  }
 0x1d6   : > { %p5093_p4 = scmp.ne.s32.totalorder %s5831_s5, %s5092_s23  ;;  %s5097_s4 = sshll.u32 %s5291_s25, 4  ;;  %s5098_s4 = int_to_ptr.vmem [resolvable:$false] %s5097_s4 }
 0x1d7   : > { %s5099_s1 = scalar_lea.vmem %s5098_s4, 4096  ;;  %p5100_p9 = scmp.lt.s32.totalorder %s5831_s5, %s5098_s4 }
 0x1d8   : > { %p5095_p8 = pnand %p5093_p4, %p5079_p6  ;;  %p5101_p0 = scmp.lt.s32.totalorder %s5099_s1, %s5092_s23 }
 0x1da   : > { %p5096_p11 = pneg %p5095_p8  ;;  %p5102_p2 = por %p5101_p0, %p5100_p9 }
 0x1dc   : > { %p5103_p3 = pnand %p5102_p2, %p5096_p11 }
 0x1de   : > { %5106 = shalt.err (!%p5103_p3)
}
 0x1df   : > { %s5292_s0 = smov 128   ;;  %s5293_s29 = smov 8  }
 0x1e0   : > { %4296 = dma.hbm_to_vmem [thread:$0]  (!%p5835_p10), %s5829_s11, 2048, %s5831_s5, %s5839_s26, %s5292_s0, %s5292_s0, %s5293_s29  }
 0x1e1   : > { %s6831_s30 = sld [smem:[#allocation54_spill]] }
 0x1e7   : > { %p6832_p6 = scmp.ne.s32.totalorder %s6831_s30, 0 }
 0x1e8   : > { %s6833_s27 = sld [smem:[#allocation47_spill]] (!%p6832_p6) }
 0x1e9   : > { %677 = sbr.rel (%p6832_p6) target bundleno = 3430 (0xd66), region = 84 }
 0x1ee   : > { %s5870_s25 = sand.u32 (!%p6832_p6), 1, %s6833_s27  }
 0x1ef   : > { %s3550_s23 = sshll.u32 (!%p6832_p6), %s5870_s25, 7  ;;  %s680_s4 = scalar_lea.sflag (!%p6832_p6), [#allocation6], %s5870_s25 }
 0x1f0   : > { %s5874_s1 = scalar_lea.vmem [#allocation5], %s3550_s23 }
 0x1f1   : > { %5198 = dma.done.wait (%p5804_p5), %s680_s4, 2048  }
 0x1f2   : > { %5200 = vsyncadd (%p5804_p5), %s680_s4, 4294965248  ;;  %s6834_s3 = sld [smem:[#allocation53_spill]] }
 0x1f8   : > { %p6835_p9 = scmp.ne.s32.totalorder %s6834_s3, 0 }
 0x1fa   : > { %5202 = dma.done.wait (%p6835_p9), [#allocation9], 1040  }
 0x1fb   : > { %5204 = vsyncadd (%p6835_p9), [#allocation9], 4294966256 }
 0x1fc   : > { %5206 = dma.done.wait (%p6835_p9), [#allocation12], 1040  }
 0x1fd   : > { %5208 = vsyncadd (%p6835_p9), [#allocation12], 4294966256 }
 0x1fe   : > { %5210 = dma.done.wait (%p6835_p9), [#allocation15], 2048  }
 0x1ff   : > { %5212 = vsyncadd (%p6835_p9), [#allocation15], 4294965248 }
 0x200   : > { %5214 = dma.done.wait (%p6835_p9), [#allocation18], 1040  }
 0x201   : > { %5216 = vsyncadd (%p6835_p9), [#allocation18], 4294966256 }
 0x202   : > { %5218 = dma.done.wait (%p6835_p9), [#allocation21], 32  }
 0x203   : > { %5220 = vsyncadd (%p6835_p9), [#allocation21], 4294967264 }
 0x204   : > { %5222 = dma.done.wait (%p6835_p9), [#allocation24], 1040  }
 0x205   : > { %5224 = vsyncadd (%p6835_p9), [#allocation24], 4294966256 }
 0x206   : > { %5226 = dma.done.wait (%p6835_p9), [#allocation27], 1040  }
 0x207   : > { %5228 = vsyncadd (%p6835_p9), [#allocation27], 4294966256 }
 0x208   : > { %5230 = dma.done.wait (%p6835_p9), [#allocation30], 1024  }
 0x209   : > { %5232 = vsyncadd (%p6835_p9), [#allocation30], 4294966272  ;;  %s5912_s5 = scalar_lea.vmem [#allocation31], %s3550_s23  ;;  %s5914_s24 = scalar_lea.vmem [#allocation32], %s3550_s23 }
 0x20a   : > { %s6836_s11 = sld [smem:[#allocation49_spill]] }
 0x210   : > { %p3568_p5 = scmp.ne.s32.totalorder %s6836_s11, 0 }
 0x211   : > { %s6837_s26 = sld [smem:[#allocation50_spill]] (!%p3568_p5)  ;;  %v804_v0 = vld [vmem:[%s5874_s1] sm:$0xff] (!%p3568_p5)  ;;  %v805_v1 = vld [vmem:[%s5874_s1 + $0x8] sm:$0xff] (!%p3568_p5)  ;;  %v806_v2 = vld [vmem:[%s5874_s1 + $0x10] sm:$0xff] (!%p3568_p5)  ;;  %v836_v3 = vlaneseq (!%p3568_p5)  ;;  %v5294_v19 = vmov (!%p3568_p5), -1e+30  }
 0x212   : > { %803 = sbr.rel (%p3568_p5) target bundleno = 545 (0x221), region = 152  ;;  %820 = vst [vmem:[%s5914_s24] sm:$0xff] (!%p3568_p5), %v804_v0  ;;  %821 = vst [vmem:[%s5914_s24 + $0x8] sm:$0xff] (!%p3568_p5), %v805_v1  ;;  %v807_v4 = vld [vmem:[%s5874_s1 + $0x18] sm:$0xff] (!%p3568_p5)  ;;  %v808_v5 = vld [vmem:[%s5874_s1 + $0x20] sm:$0xff] (!%p3568_p5) }
 0x213   : > { %822 = vst [vmem:[%s5914_s24 + $0x10] sm:$0xff] (!%p3568_p5), %v806_v2  ;;  %v809_v6 = vld [vmem:[%s5874_s1 + $0x28] sm:$0xff] (!%p3568_p5)  ;;  %823 = vst [vmem:[%s5914_s24 + $0x18] sm:$0xff] (!%p3568_p5), %v807_v4  ;;  %v810_v7 = vld [vmem:[%s5874_s1 + $0x30] sm:$0xff] (!%p3568_p5)  ;;  %v837_v13 = vand.u32 (!%p3568_p5), 127, %v836_v3 }
 0x214   : > { %824 = vst [vmem:[%s5914_s24 + $0x20] sm:$0xff] (!%p3568_p5), %v808_v5  ;;  %825 = vst [vmem:[%s5914_s24 + $0x28] sm:$0xff] (!%p3568_p5), %v809_v6  ;;  %v811_v8 = vld [vmem:[%s5874_s1 + $0x38] sm:$0xff] (!%p3568_p5)  ;;  %v812_v9 = vld [vmem:[%s5874_s1 + $0x40] sm:$0xff] (!%p3568_p5) }
 0x215   : > { %826 = vst [vmem:[%s5914_s24 + $0x30] sm:$0xff] (!%p3568_p5), %v810_v7  ;;  %827 = vst [vmem:[%s5914_s24 + $0x38] sm:$0xff] (!%p3568_p5), %v811_v8  ;;  %v813_v10 = vld [vmem:[%s5874_s1 + $0x48] sm:$0xff] (!%p3568_p5)  ;;  %v814_v11 = vld [vmem:[%s5874_s1 + $0x50] sm:$0xff] (!%p3568_p5) }
 0x216   : > { %828 = vst [vmem:[%s5914_s24 + $0x40] sm:$0xff] (!%p3568_p5), %v812_v9  ;;  %v815_v12 = vld [vmem:[%s5874_s1 + $0x58] sm:$0xff] (!%p3568_p5)  ;;  %829 = vst [vmem:[%s5914_s24 + $0x48] sm:$0xff] (!%p3568_p5), %v813_v10  ;;  %v816_v14 = vld [vmem:[%s5874_s1 + $0x60] sm:$0xff] (!%p3568_p5) }
 0x217   : > { %s5921_s0 = sld [smem:[#allocation4 + %s6837_s26]] (!%p3568_p5)  ;;  %830 = vst [vmem:[%s5914_s24 + $0x50] sm:$0xff] (!%p3568_p5), %v814_v11  ;;  %831 = vst [vmem:[%s5914_s24 + $0x58] sm:$0xff] (!%p3568_p5), %v815_v12  ;;  %v817_v15 = vld [vmem:[%s5874_s1 + $0x68] sm:$0xff] (!%p3568_p5)  ;;  %v818_v16 = vld [vmem:[%s5874_s1 + $0x70] sm:$0xff] (!%p3568_p5) }
 0x218   : > { %832 = vst [vmem:[%s5914_s24 + $0x60] sm:$0xff] (!%p3568_p5), %v816_v14  ;;  %833 = vst [vmem:[%s5914_s24 + $0x68] sm:$0xff] (!%p3568_p5), %v817_v15  ;;  %v819_v17 = vld [vmem:[%s5874_s1 + $0x78] sm:$0xff] (!%p3568_p5) }
 0x219   : > { %834 = vst [vmem:[%s5914_s24 + $0x70] sm:$0xff] %v818_v16  ;;  %835 = vst [vmem:[%s5914_s24 + $0x78] sm:$0xff] %v819_v17 }
 0x21d   : > { %v839_v18 = vstv %s5921_s0 }
 0x21e   : > { %vm840_vm0 = vcmp.lt.s32.totalorder %v837_v13, %v839_v18 }
 0x21f   : > { %v841_v20 = vsel %vm840_vm0, 0.0, %v5294_v19 }
 0x220   : > { %842 = vst [vmem:[#allocation2] sm:$0x1] %v841_v20 }
 0x221 PF: > { %v5954_v21 = vld [vmem:[%s5914_s24] sm:$0xff]  ;;  %v5957_v22 = vld [vmem:[%s5914_s24 + $0x8] sm:$0xff]  ;;  %s6838_s29 = sld [smem:[#allocation49_spill]] }
 0x222   : > { %v5960_v23 = vld [vmem:[%s5914_s24 + $0x10] sm:$0xff]  ;;  %v5963_v24 = vld [vmem:[%s5914_s24 + $0x18] sm:$0xff]  ;;  %v5973_v27 = vpack.c.bf16 %v5957_v22, %v5954_v21 }
 0x223   : > { %v5966_v25 = vld [vmem:[%s5914_s24 + $0x20] sm:$0xff]  ;;  %v5969_v26 = vld [vmem:[%s5914_s24 + $0x28] sm:$0xff]  ;;  %v5986_v31 = vpack.c.bf16 %v5963_v24, %v5960_v23 }
 0x224   : > { %v5976_v28 = vld [vmem:[%s5914_s24 + $0x30] sm:$0xff]  ;;  %v5979_v29 = vld [vmem:[%s5914_s24 + $0x38] sm:$0xff]  ;;  %v5990_v32 = vpack.c.bf16 %v5969_v26, %v5966_v25 }
 0x225   : > { %v5982_v30 = vld [vmem:[%s5914_s24 + $0x40] sm:$0xff]  ;;  %v5993_v33 = vld [vmem:[%s5914_s24 + $0x48] sm:$0xff]  ;;  %v6003_v36 = vpack.c.bf16 %v5979_v29, %v5976_v28 }
 0x226   : > { %v5996_v34 = vld [vmem:[%s5914_s24 + $0x50] sm:$0xff]  ;;  %v5999_v35 = vld [vmem:[%s5914_s24 + $0x58] sm:$0xff]  ;;  %v6016_v40 = vpack.c.bf16 %v5993_v33, %v5982_v30 }
 0x227   : > { %v6006_v37 = vld [vmem:[%s5914_s24 + $0x60] sm:$0xff]  ;;  %v6009_v38 = vld [vmem:[%s5914_s24 + $0x68] sm:$0xff]  ;;  %v6020_v41 = vpack.c.bf16 %v5999_v35, %v5996_v34  ;;  %v6029_v44 = vld [vmem:[#allocation2] sm:$0x1]  ;;  %p3569_p11 = scmp.ge.s32.totalorder %s6838_s29, 2 }
 0x228   : > { %v6012_v39 = vld [vmem:[%s5914_s24 + $0x70] sm:$0xff]  ;;  %v6023_v42 = vld [vmem:[%s5914_s24 + $0x78] sm:$0xff]  ;;  %v6027_v43 = vpack.c.bf16 %v6009_v38, %v6006_v37  ;;  %3845 = vmatprep.mubr.bf16.mxu0 (!%p3569_p11), %v5973_v27  ;;  %3877 = vmatprep.mubr.bf16.mxu1 (!%p3569_p11), %v5973_v27  ;;  %v4425_v48 = vld [vmem:[#allocation8 + $0x10] sm:$0xff] (!%p3569_p11)  }
 0x229   : > { %v6033_v45 = vpack.c.bf16 %v6023_v42, %v6012_v39  ;;  %871 = sbr.rel (%p3569_p11) target bundleno = 2339 (0x923), region = 156  ;;  %v4423_v46 = vld [vmem:[#allocation8] sm:$0xff] (!%p3569_p11)   ;;  %v4424_v47 = vld [vmem:[#allocation8 + $0x8] sm:$0xff] (!%p3569_p11)   ;;  %v4426_v49 = vld [vmem:[#allocation8 + $0x18] sm:$0xff] (!%p3569_p11)  }
 0x22a   : > { %3829 = vmatprep.subr.bf16.mxu0 (!%p3569_p11), %v4423_v46  ;;  %v4431_v50 = vld [vmem:[#allocation11] sm:$0xff] (!%p3569_p11)   ;;  %v4432_v51 = vld [vmem:[#allocation11 + $0x8] sm:$0xff] (!%p3569_p11)   ;;  %v4433_v53 = vld [vmem:[#allocation11 + $0x10] sm:$0xff] (!%p3569_p11)  }
 0x22b   : > { %3830 = vmatpush3.bf16.msra.mxu0 (!%p3569_p11), %v4423_v46  ;;  %3861 = vmatprep.subr.bf16.mxu1 (!%p3569_p11), %v4431_v50  ;;  %v4427_v52 = vld [vmem:[#allocation8 + $0x20] sm:$0xff] (!%p3569_p11)   ;;  %v4428_v54 = vld [vmem:[#allocation8 + $0x28] sm:$0xff] (!%p3569_p11)   ;;  %v4429_v56 = vld [vmem:[#allocation8 + $0x30] sm:$0xff] (!%p3569_p11)  }
 0x22c   : > { %3831 = vmatprep.subr.bf16.mxu0 (!%p3569_p11), %v4424_v47  ;;  %3862 = vmatpush3.bf16.msra.mxu1 (!%p3569_p11), %v4431_v50  ;;  %v4434_v55 = vld [vmem:[#allocation11 + $0x18] sm:$0xff] (!%p3569_p11)   ;;  %v4435_v57 = vld [vmem:[#allocation11 + $0x20] sm:$0xff] (!%p3569_p11)   ;;  %v4436_v59 = vld [vmem:[#allocation11 + $0x28] sm:$0xff] (!%p3569_p11)  }
 0x22d   : > { %3863 = vmatprep.subr.bf16.mxu1 (!%p3569_p11), %v4432_v51  ;;  %v4430_v58 = vld [vmem:[#allocation8 + $0x38] sm:$0xff] (!%p3569_p11)   ;;  %v4439_v61 = vld [vmem:[#allocation14] sm:$0xff] (!%p3569_p11)   ;;  %v4440_v63 = vld [vmem:[#allocation14 + $0x8] sm:$0xff] (!%p3569_p11)  }
 0x22e   : > { %v4437_v60 = vld [vmem:[#allocation11 + $0x30] sm:$0xff] (!%p3569_p11)   ;;  %v4438_v62 = vld [vmem:[#allocation11 + $0x38] sm:$0xff] (!%p3569_p11)   ;;  %v4443_v2 = vld [vmem:[#allocation14 + $0x20] sm:$0xff] (!%p3569_p11)  }
 0x22f   : > { %3832 = vmatpush3.bf16.msra.mxu0 (!%p3569_p11), %v4424_v47  ;;  %v4441_v0 = vld [vmem:[#allocation14 + $0x10] sm:$0xff] (!%p3569_p11)   ;;  %v4442_v1 = vld [vmem:[#allocation14 + $0x18] sm:$0xff] (!%p3569_p11)   ;;  %v4444_v3 = vld [vmem:[#allocation14 + $0x28] sm:$0xff] (!%p3569_p11)  }
 0x230   : > { %3833 = vmatprep.subr.bf16.mxu0 %v4425_v48  ;;  %3864 = vmatpush3.bf16.msra.mxu1 %v4432_v51  ;;  %v4445_v4 = vld [vmem:[#allocation14 + $0x30] sm:$0xff]   ;;  %v4446_v5 = vld [vmem:[#allocation14 + $0x38] sm:$0xff]  }
 0x231   : > { %3865 = vmatprep.subr.bf16.mxu1 %v4433_v53  ;;  %v6052_v6 = vld [vmem:[#allocation10] ss:$0 sm:$0xff]  ;;  %v6058_v20 = vld [vmem:[#allocation13] ss:$0 sm:$0xff] }
 0x233   : > { %3834 = vmatpush3.bf16.msra.mxu0 %v4425_v48 }
 0x234   : > { %3835 = vmatprep.subr.bf16.mxu0 %v4426_v49  ;;  %3866 = vmatpush3.bf16.msra.mxu1 %v4433_v53 }
 0x235   : > { %3867 = vmatprep.subr.bf16.mxu1 %v4434_v55 }
 0x237   : > { %3836 = vmatpush3.bf16.msra.mxu0 %v4426_v49 }
 0x238   : > { %3837 = vmatprep.subr.bf16.mxu0 %v4427_v52  ;;  %3868 = vmatpush3.bf16.msra.mxu1 %v4434_v55 }
 0x239   : > { %3869 = vmatprep.subr.bf16.mxu1 %v4435_v57 }
 0x23b   : > { %3838 = vmatpush3.bf16.msra.mxu0 %v4427_v52 }
 0x23c   : > { %3839 = vmatprep.subr.bf16.mxu0 %v4428_v54  ;;  %3870 = vmatpush3.bf16.msra.mxu1 %v4435_v57 }
 0x23d   : > { %3871 = vmatprep.subr.bf16.mxu1 %v4436_v59 }
 0x23f   : > { %3840 = vmatpush3.bf16.msra.mxu0 %v4428_v54 }
 0x240   : > { %3841 = vmatprep.subr.bf16.mxu0 %v4429_v56  ;;  %3872 = vmatpush3.bf16.msra.mxu1 %v4436_v59 }
 0x241   : > { %3873 = vmatprep.subr.bf16.mxu1 %v4437_v60 }
 0x243   : > { %3842 = vmatpush3.bf16.msra.mxu0 %v4429_v56 }
 0x244   : > { %3843 = vmatprep.subr.bf16.mxu0 %v4430_v58  ;;  %3874 = vmatpush3.bf16.msra.mxu1 %v4437_v60 }
 0x245   : > { %3875 = vmatprep.subr.bf16.mxu1 %v4438_v62 }
 0x247   : > { %3844 = vmatpush3.bf16.msra.mxu0 %v4430_v58 }
 0x248   : > { %3893 = vmatprep.subr.bf16.mxu0 %v4439_v61  ;;  %3876 = vmatpush3.bf16.msra.mxu1 %v4438_v62 }
 0x24a   : > { %3846 = vmatmul.mubr.bf16.vlgmr.msra.gmra.mrb[0].mxu0 %v5986_v31 }
 0x24b   : > { %3849 = vmatprep.mubr.bf16.mxu0 %v5990_v32  ;;  %3894 = vmatpush3.bf16.msra.mxu0 %v4439_v61 }
 0x24c   : > { %3895 = vmatprep.subr.bf16.mxu0 %v4440_v63  ;;  %3878 = vmatmul.mubr.bf16.vlgmr.msra.gmra.mrb[0].mxu1 %v5986_v31 }
 0x24d   : > { %3881 = vmatprep.mubr.bf16.mxu1 %v5990_v32 }
 0x24f   : > { %3896 = vmatpush3.bf16.msra.mxu0 %v4440_v63 }
 0x250   : > { %3897 = vmatprep.subr.bf16.mxu0 %v4441_v0 }
 0x252   : > { %3850 = vmatmul.mubr.bf16.gmra.mrb[4].mxu0 %v6003_v36 }
 0x253   : > { %3853 = vmatprep.mubr.bf16.mxu0 %v6016_v40  ;;  %3898 = vmatpush3.bf16.msra.mxu0 %v4441_v0 }
 0x254   : > { %3899 = vmatprep.subr.bf16.mxu0 %v4442_v1  ;;  %3882 = vmatmul.mubr.bf16.gmra.mrb[4].mxu1 %v6003_v36 }
 0x255   : > { %3885 = vmatprep.mubr.bf16.mxu1 %v6016_v40 }
 0x257   : > { %3900 = vmatpush3.bf16.msra.mxu0 %v4442_v1 }
 0x258   : > { %3901 = vmatprep.subr.bf16.mxu0 %v4443_v2 }
 0x25a   : > { %3854 = vmatmul.mubr.bf16.gmra.mrb[8].mxu0 %v6020_v41 }
 0x25b   : > { %3857 = vmatprep.mubr.bf16.mxu0 %v6027_v43  ;;  %3902 = vmatpush3.bf16.msra.mxu0 %v4443_v2 }
 0x25c   : > { %3903 = vmatprep.subr.bf16.mxu0 %v4444_v3  ;;  %3886 = vmatmul.mubr.bf16.gmra.mrb[8].mxu1 %v6020_v41 }
 0x25d   : > { %3889 = vmatprep.mubr.bf16.mxu1 %v6027_v43 }
 0x25f   : > { %3904 = vmatpush3.bf16.msra.mxu0 %v4444_v3 }
 0x260   : > { %3905 = vmatprep.subr.bf16.mxu0 %v4445_v4 }
 0x262   : > { %3858 = vmatmul.mubr.bf16.gmra.mrb[12].mxu0 %v6033_v45 }
 0x263   : > { %3906 = vmatpush3.bf16.msra.mxu0 %v4445_v4 }
 0x264   : > { %3890 = vmatmul.mubr.bf16.gmra.mrb[12].mxu1 %v6033_v45  ;;  %3907 = vmatprep.subr.bf16.mxu0 %v4446_v5 }
 0x267   : > { %3908 = vmatpush3.bf16.msra.mxu0 %v4446_v5 }
 0x31d   : > { %v3847_v7 = vpop.f32.mrb[0].mxu0 }
 0x31e   : > { %v1019_v8 = vadd.f32 %v3847_v7, %v6052_v6  ;;  %v1010_v9 = vpop.f32.mrb[1].mxu0 }
 0x31f   : > { %v1011_v10 = vadd.f32 %v6052_v6, %v1010_v9  ;;  %v3848_v11 = vpop.f32.mrb[2].mxu0  ;;  %v3879_v48 = vpop.f32.mrb[0].mxu1 }
 0x320   : > { %v1022_v12 = vadd.f32 %v3848_v11, %v6052_v6  ;;  %v1013_v13 = vpop.f32.mrb[3].mxu0  ;;  %v1075_v15 = vmax.f32 %v1019_v8, 0.0  ;;  %v1186_v51 = vadd.f32 %v3879_v48, %v6058_v20  ;;  %v1177_v52 = vpop.f32.mrb[1].mxu1 }
 0x321   : > { %v1014_v14 = vadd.f32 %v6052_v6, %v1013_v13  ;;  %v1073_v17 = vmax.f32 %v1011_v10, 0.0  ;;  %v1178_v55 = vadd.f32 %v6058_v20, %v1177_v52  ;;  %v3880_v56 = vpop.f32.mrb[2].mxu1 }
 0x322   : > { %v1076_v16 = vmax.f32 %v1022_v12, 0.0  ;;  %v1242_v60 = vmax.f32 %v1186_v51, 0.0  ;;  %v1189_v61 = vadd.f32 %v3880_v56, %v6058_v20  ;;  %v1180_v62 = vpop.f32.mrb[3].mxu1 }
 0x323   : > { %v1074_v18 = vmax.f32 %v1014_v14, 0.0  ;;  %v1240_v1 = vmax.f32 %v1178_v55, 0.0  ;;  %v1181_v2 = vadd.f32 %v6058_v20, %v1180_v62 }
 0x324   : > { %v1257_v19 = vpack.c.bf16 %v1076_v16, %v1075_v15  ;;  %v1243_v4 = vmax.f32 %v1189_v61, 0.0 }
 0x325   : > { %v1256_v46 = vpack.c.bf16 %v1074_v18, %v1073_v17  ;;  %v3851_v47 = vpop.f32.mrb[4].mxu0  ;;  %v1241_v7 = vmax.f32 %v1181_v2, 0.0 }
 0x326   : > { %v1035_v49 = vadd.f32 %v3851_v47, %v6052_v6  ;;  %v1026_v50 = vpop.f32.mrb[5].mxu0  ;;  %v1418_v9 = vpack.c.bf16 %v1243_v4, %v1242_v60 }
 0x327   : > { %v1027_v53 = vadd.f32 %v6052_v6, %v1026_v50  ;;  %v3852_v54 = vpop.f32.mrb[6].mxu0  ;;  %3909 = vmatprep.mubr.bf16.mxu0 %v1256_v46  ;;  %v1417_v12 = vpack.c.bf16 %v1241_v7, %v1240_v1  ;;  %v3883_v13 = vpop.f32.mrb[4].mxu1 }
 0x328   : > { %v1079_v57 = vmax.f32 %v1035_v49, 0.0  ;;  %v1038_v58 = vadd.f32 %v3852_v54, %v6052_v6  ;;  %v1029_v59 = vpop.f32.mrb[7].mxu0  ;;  %3910 = vmatmul.mubr.bf16.vlgmr.msra.gmra.mrb[16].mxu0 %v1257_v19  ;;  %v1202_v16 = vadd.f32 %v3883_v13, %v6058_v20  ;;  %v1193_v17 = vpop.f32.mrb[5].mxu1 }
 0x329   : > { %v1077_v63 = vmax.f32 %v1027_v53, 0.0  ;;  %v1030_v0 = vadd.f32 %v6052_v6, %v1029_v59  ;;  %3925 = vmatprep.subr.bf16.mxu1 %v1417_v12  ;;  %v1194_v46 = vadd.f32 %v6058_v20, %v1193_v17  ;;  %v3884_v47 = vpop.f32.mrb[6].mxu1 }
 0x32a   : > { %v1080_v3 = vmax.f32 %v1038_v58, 0.0  ;;  %3926 = vmatpush3.bf16.xpose.msra.mxu1 %v1417_v12  ;;  %v1246_v51 = vmax.f32 %v1202_v16, 0.0  ;;  %v1205_v52 = vadd.f32 %v3884_v47, %v6058_v20  ;;  %v1196_v53 = vpop.f32.mrb[7].mxu1 }
 0x32b   : > { %v1078_v5 = vmax.f32 %v1030_v0, 0.0  ;;  %v1244_v56 = vmax.f32 %v1194_v46, 0.0  ;;  %3927 = vmatprep.subr.bf16.mxu1 %v1418_v9 }
 0x32c   : > { %v1259_v8 = vpack.c.bf16 %v1080_v3, %v1079_v57  ;;  %v1197_v57 = vadd.f32 %v6058_v20, %v1196_v53  ;;  %v1247_v59 = vmax.f32 %v1205_v52, 0.0 }
 0x32d   : > { %v1258_v10 = vpack.c.bf16 %v1078_v5, %v1077_v63  ;;  %v3855_v11 = vpop.f32.mrb[8].mxu0 }
 0x32e   : > { %v1051_v14 = vadd.f32 %v3855_v11, %v6052_v6  ;;  %v1042_v15 = vpop.f32.mrb[9].mxu0  ;;  %v1245_v61 = vmax.f32 %v1197_v57, 0.0  ;;  %v1420_v63 = vpack.c.bf16 %v1247_v59, %v1246_v51 }
 0x32f   : > { %v1043_v18 = vadd.f32 %v6052_v6, %v1042_v15  ;;  %v3856_v19 = vpop.f32.mrb[10].mxu0  ;;  %3913 = vmatprep.mubr.bf16.mxu0 %v1258_v10  ;;  %v3887_v3 = vpop.f32.mrb[8].mxu1 }
 0x330   : > { %v1083_v48 = vmax.f32 %v1051_v14, 0.0  ;;  %v1054_v49 = vadd.f32 %v3856_v19, %v6052_v6  ;;  %v1045_v50 = vpop.f32.mrb[11].mxu0  ;;  %3914 = vmatmul.mubr.bf16.gmra.mrb[20].mxu0 %v1259_v8  ;;  %v1419_v2 = vpack.c.bf16 %v1245_v61, %v1244_v56  ;;  %v1218_v7 = vadd.f32 %v3887_v3, %v6058_v20  ;;  %v1209_v8 = vpop.f32.mrb[9].mxu1 }
 0x331   : > { %v1081_v54 = vmax.f32 %v1043_v18, 0.0  ;;  %v1046_v55 = vadd.f32 %v6052_v6, %v1045_v50  ;;  %v1210_v12 = vadd.f32 %v6058_v20, %v1209_v8  ;;  %v3888_v13 = vpop.f32.mrb[10].mxu1 }
 0x332   : > { %v1084_v58 = vmax.f32 %v1054_v49, 0.0  ;;  %3928 = vmatpush3.bf16.xpose.msra.mxu1 %v1418_v9  ;;  %v1250_v17 = vmax.f32 %v1218_v7, 0.0  ;;  %v1221_v18 = vadd.f32 %v3888_v13, %v6058_v20  ;;  %v1212_v19 = vpop.f32.mrb[11].mxu1 }
 0x333   : > { %v1082_v60 = vmax.f32 %v1046_v55, 0.0  ;;  %3929 = vmatprep.subr.bf16.mxu1 %v1419_v2  ;;  %v1213_v49 = vadd.f32 %v6058_v20, %v1212_v19 }
 0x334   : > { %v1261_v62 = vpack.c.bf16 %v1084_v58, %v1083_v48  ;;  %v1248_v48 = vmax.f32 %v1210_v12, 0.0  ;;  %v1251_v51 = vmax.f32 %v1221_v18, 0.0 }
 0x335   : > { %v1260_v0 = vpack.c.bf16 %v1082_v60, %v1081_v54  ;;  %v3859_v1 = vpop.f32.mrb[12].mxu0  ;;  %v1249_v53 = vmax.f32 %v1213_v49, 0.0 }
 0x336   : > { %v1067_v4 = vadd.f32 %v3859_v1, %v6052_v6  ;;  %v1058_v5 = vpop.f32.mrb[13].mxu0  ;;  %v1422_v55 = vpack.c.bf16 %v1251_v51, %v1250_v17 }
 0x337   : > { %v1059_v10 = vadd.f32 %v6052_v6, %v1058_v5  ;;  %v3860_v11 = vpop.f32.mrb[14].mxu0  ;;  %3917 = vmatprep.mubr.bf16.mxu0 %v1260_v0  ;;  %v1421_v57 = vpack.c.bf16 %v1249_v53, %v1248_v48  ;;  %v3891_v9 = vpop.f32.mrb[12].mxu1 }
 0x338   : > { %v1087_v14 = vmax.f32 %v1067_v4, 0.0  ;;  %v1070_v15 = vadd.f32 %v3860_v11, %v6052_v6  ;;  %v1061_v16 = vpop.f32.mrb[15].mxu0  ;;  %3918 = vmatmul.mubr.bf16.gmra.mrb[24].mxu0 %v1261_v62  ;;  %v1234_v58 = vadd.f32 %v3891_v9, %v6058_v20  ;;  %v1225_v59 = vpop.f32.mrb[13].mxu1  ;;  %v4448_v9 = vld [vmem:[#allocation16 + $0x8] sm:$0xff]  }
 0x339   : > { %v1085_v46 = vmax.f32 %v1059_v10, 0.0  ;;  %v1062_v47 = vadd.f32 %v6052_v6, %v1061_v16  ;;  %v1226_v60 = vadd.f32 %v6058_v20, %v1225_v59  ;;  %v3892_v6 = vpop.f32.mrb[14].mxu1  ;;  %v4450_v59 = vld [vmem:[#allocation16 + $0x18] sm:$0xff]  }
 0x33a   : > { %v1088_v50 = vmax.f32 %v1070_v15, 0.0  ;;  %3930 = vmatpush3.bf16.xpose.msra.mxu1 %v1419_v2  ;;  %v1254_v61 = vmax.f32 %v1234_v58, 0.0  ;;  %v1237_v62 = vadd.f32 %v3892_v6, %v6058_v20  ;;  %v1228_v0 = vpop.f32.mrb[15].mxu1  ;;  %v4449_v58 = vld [vmem:[#allocation16 + $0x10] sm:$0xff]   ;;  %v4452_v6 = vld [vmem:[#allocation16 + $0x28] sm:$0xff]  }
 0x33b   : > { %v1086_v52 = vmax.f32 %v1062_v47, 0.0  ;;  %3931 = vmatprep.subr.bf16.mxu1 %v1420_v63  ;;  %v1252_v1 = vmax.f32 %v1226_v60, 0.0  ;;  %v1229_v3 = vadd.f32 %v6058_v20, %v1228_v0  ;;  %v4451_v60 = vld [vmem:[#allocation16 + $0x20] sm:$0xff]   ;;  %v1426_v0 = vlaneseq }
 0x33c   : > { %v1263_v54 = vpack.c.bf16 %v1088_v50, %v1087_v14  ;;  %v1255_v4 = vmax.f32 %v1237_v62, 0.0  ;;  %v4454_v62 = vld [vmem:[#allocation16 + $0x38] sm:$0xff]  }
 0x33d   : > { %v1262_v56 = vpack.c.bf16 %v1086_v52, %v1085_v46  ;;  %v1253_v5 = vmax.f32 %v1229_v3, 0.0 }
 0x33e   : > { %v1424_v7 = vpack.c.bf16 %v1255_v4, %v1254_v61  ;;  %v4453_v61 = vld [vmem:[#allocation16 + $0x30] sm:$0xff]  }
 0x33f   : > { %3921 = vmatprep.mubr.bf16.mxu0 %v1262_v56  ;;  %v1423_v8 = vpack.c.bf16 %v1253_v5, %v1252_v1  ;;  %v1427_v1 = vshrl.u32 %v1426_v0, 7 }
 0x340   : > { %3922 = vmatmul.mubr.bf16.gmra.mrb[28].mxu0 %v1263_v54 }
 0x341   : > { %3973 = vmatprep.mubr.bf16.mxu0 %v5973_v27  ;;  %v1428_v3 = vsub.s32 0, %v1427_v1 }
 0x342   : > { %3932 = vmatpush3.bf16.xpose.msra.mxu1 %v1420_v63 }
 0x343   : > { %3933 = vmatprep.subr.bf16.mxu1 %v1421_v57  ;;  %v1429_v4 = vrot.slane %v6029_v44, %v1428_v3  ;;  %v6137_v3 = vld [vmem:[#allocation17] ss:$0 sm:$0xff] }
 0x34a   : > { %3934 = vmatpush3.bf16.xpose.msra.mxu1 %v1421_v57  ;;  %v4447_v57 = vld [vmem:[#allocation16] sm:$0xff]  }
 0x34b   : > { %3935 = vmatprep.subr.bf16.mxu1 %v1422_v55  ;;  %3957 = vmatprep.subr.bf16.mxu0 %v4447_v57 }
 0x34c   : > { %3958 = vmatpush3.bf16.msra.mxu0 %v4447_v57 }
 0x34d   : > { %3959 = vmatprep.subr.bf16.mxu0 %v4448_v9 }
 0x350   : > { %3960 = vmatpush3.bf16.msra.mxu0 %v4448_v9 }
 0x351   : > { %3961 = vmatprep.subr.bf16.mxu0 %v4449_v58 }
 0x352   : > { %3936 = vmatpush3.bf16.xpose.msra.mxu1 %v1422_v55 }
 0x353   : > { %3937 = vmatprep.subr.bf16.mxu1 %v1423_v8 }
 0x354   : > { %3962 = vmatpush3.bf16.msra.mxu0 %v4449_v58 }
 0x355   : > { %3963 = vmatprep.subr.bf16.mxu0 %v4450_v59 }
 0x358   : > { %3964 = vmatpush3.bf16.msra.mxu0 %v4450_v59 }
 0x359   : > { %3965 = vmatprep.subr.bf16.mxu0 %v4451_v60 }
 0x35a   : > { %3938 = vmatpush3.bf16.xpose.msra.mxu1 %v1423_v8 }
 0x35b   : > { %3939 = vmatprep.subr.bf16.mxu1 %v1424_v7 }
 0x35c   : > { %3966 = vmatpush3.bf16.msra.mxu0 %v4451_v60 }
 0x35d   : > { %3967 = vmatprep.subr.bf16.mxu0 %v4452_v6 }
 0x360   : > { %3968 = vmatpush3.bf16.msra.mxu0 %v4452_v6 }
 0x361   : > { %3969 = vmatprep.subr.bf16.mxu0 %v4453_v61 }
 0x362   : > { %3940 = vmatpush3.bf16.xpose.msra.mxu1 %v1424_v7 }
 0x364   : > { %3970 = vmatpush3.bf16.msra.mxu0 %v4453_v61 }
 0x365   : > { %3971 = vmatprep.subr.bf16.mxu0 %v4454_v62 }
 0x368   : > { %3972 = vmatpush3.bf16.msra.mxu0 %v4454_v62 }
 0x36b   : > { %3974 = vmatmul.mubr.bf16.vlgmr.msra.gmra.mrb[32].mxu0 %v5986_v31 }
 0x36c   : > { %3977 = vmatprep.mubr.bf16.mxu0 %v5990_v32 }
 0x373   : > { %3978 = vmatmul.mubr.bf16.gmra.mrb[36].mxu0 %v6003_v36 }
 0x374   : > { %3981 = vmatprep.mubr.bf16.mxu0 %v6016_v40 }
 0x37b   : > { %3982 = vmatmul.mubr.bf16.gmra.mrb[40].mxu0 %v6020_v41 }
 0x37c   : > { %3985 = vmatprep.mubr.bf16.mxu0 %v6027_v43 }
 0x383   : > { %3986 = vmatmul.mubr.bf16.gmra.mrb[44].mxu0 %v6033_v45 }
 0x3fb   : > { %v3911_v2 = vpop.f32.mrb[16].mxu0 }
 0x3fc   : > { %v1346_v10 = vpop.f32.mrb[17].mxu0 }
 0x3fd   : > { %v3912_v11 = vpop.f32.mrb[18].mxu0 }
 0x3fe   : > { %v1410_v12 = vpack.c.bf16 %v3912_v11, %v3911_v2  ;;  %v1349_v20 = vpop.f32.mrb[19].mxu0 }
 0x3ff   : > { %v1409_v13 = vpack.c.bf16 %v1349_v20, %v1346_v10 }
 0x401   : > { %3941 = vmatprep.mubr.bf16.mxu1 %v1409_v13 }
 0x402   : > { %3942 = vmatmul.mubr.bf16.vlgmr.msra.gmra.mrb[16].mxu1 %v1410_v12 }
 0x403   : > { %v3915_v14 = vpop.f32.mrb[20].mxu0 }
 0x404   : > { %v1362_v15 = vpop.f32.mrb[21].mxu0 }
 0x405   : > { %v3916_v16 = vpop.f32.mrb[22].mxu0 }
 0x406   : > { %v1412_v63 = vpack.c.bf16 %v3916_v16, %v3915_v14  ;;  %v1365_v17 = vpop.f32.mrb[23].mxu0 }
 0x407   : > { %v1411_v18 = vpack.c.bf16 %v1365_v17, %v1362_v15 }
 0x409   : > { %3945 = vmatprep.mubr.bf16.mxu1 %v1411_v18 }
 0x40a   : > { %3946 = vmatmul.mubr.bf16.gmra.mrb[20].mxu1 %v1412_v63 }
 0x40b   : > { %v3919_v19 = vpop.f32.mrb[24].mxu0 }
 0x40c   : > { %v1378_v46 = vpop.f32.mrb[25].mxu0 }
 0x40d   : > { %v3920_v47 = vpop.f32.mrb[26].mxu0 }
 0x40e   : > { %v1414_v48 = vpack.c.bf16 %v3920_v47, %v3919_v19  ;;  %v1381_v49 = vpop.f32.mrb[27].mxu0 }
 0x40f   : > { %v1413_v50 = vpack.c.bf16 %v1381_v49, %v1378_v46 }
 0x411   : > { %3949 = vmatprep.mubr.bf16.mxu1 %v1413_v50 }
 0x412   : > { %3950 = vmatmul.mubr.bf16.gmra.mrb[24].mxu1 %v1414_v48 }
 0x413   : > { %v3923_v51 = vpop.f32.mrb[28].mxu0 }
 0x414   : > { %v1394_v52 = vpop.f32.mrb[29].mxu0 }
 0x415   : > { %v3924_v53 = vpop.f32.mrb[30].mxu0 }
 0x416   : > { %v1416_v54 = vpack.c.bf16 %v3924_v53, %v3923_v51  ;;  %v1397_v55 = vpop.f32.mrb[31].mxu0 }
 0x417   : > { %v1415_v56 = vpack.c.bf16 %v1397_v55, %v1394_v52 }
 0x419   : > { %3953 = vmatprep.mubr.bf16.mxu1 %v1415_v56 }
 0x41a   : > { %3954 = vmatmul.mubr.bf16.gmra.mrb[28].mxu1 %v1416_v54 }
 0x4d5   : > { %v3943_v5 = vpop.f32.mrb[16].mxu1 }
 0x4d6   : > { %v1474_v7 = vadd.f32 %v3943_v5, %v1429_v4  ;;  %v1465_v8 = vpop.f32.mrb[17].mxu1  ;;  %v3975_v5 = vpop.f32.mrb[32].mxu0 }
 0x4d7   : > { %v1466_v2 = vadd.f32 %v1465_v8, %v1429_v4  ;;  %v3944_v10 = vpop.f32.mrb[18].mxu1 }
 0x4d8   : > { %1532 = vmax.xlane.f32.xlu1 %v1474_v7  ;;  %v1468_v11 = vpop.f32.mrb[19].mxu1  ;;  %v6098_v12 = vadd.f32 %v3944_v10, %v1429_v4 }
 0x4d9   : > { %1528 = vmax.xlane.f32.xlu0 %v1466_v2  ;;  %v1469_v20 = vadd.f32 %v1468_v11, %v1429_v4  ;;  %v1786_v11 = vadd.f32 %v3975_v5, %v6137_v3 }
 0x4dc   : > { %1534 = vmax.xlane.f32.xlu1 %v6098_v12 }
 0x4dd   : > { %1530 = vmax.xlane.f32.xlu0 %v1469_v20  ;;  %v3947_v13 = vpop.f32.mrb[20].mxu1 }
 0x4de   : > { %v1481_v14 = vpop.f32.mrb[21].mxu1  ;;  %v6106_v18 = vadd.f32 %v3947_v13, %v1429_v4  ;;  %v1777_v13 = vpop.f32.mrb[33].mxu0 }
 0x4df   : > { %v6101_v15 = vadd.f32 %v1481_v14, %v1429_v4  ;;  %v3948_v16 = vpop.f32.mrb[22].mxu1 }
 0x4e0   : > { %v1484_v63 = vpop.f32.mrb[23].mxu1  ;;  %v6109_v19 = vadd.f32 %v3948_v16, %v1429_v4 }
 0x4e1   : > { %v6103_v17 = vadd.f32 %v1484_v63, %v1429_v4  ;;  %1536 = vmax.xlane.f32.xlu0 %v6101_v15  ;;  %v1778_v63 = vadd.f32 %v6137_v3, %v1777_v13 }
 0x4e3   : > { %1538 = vmax.xlane.f32.xlu1 %v6103_v17 }
 0x4e5   : > { %1540 = vmax.xlane.f32.xlu0 %v6106_v18  ;;  %v3951_v46 = vpop.f32.mrb[24].mxu1 }
 0x4e6   : > { %v1497_v47 = vpop.f32.mrb[25].mxu1  ;;  %v6118_v52 = vadd.f32 %v3951_v46, %v1429_v4  ;;  %v3976_v46 = vpop.f32.mrb[34].mxu0 }
 0x4e7   : > { %v6112_v48 = vadd.f32 %v1497_v47, %v1429_v4  ;;  %1542 = vmax.xlane.f32.xlu1 %v6109_v19  ;;  %v3952_v49 = vpop.f32.mrb[26].mxu1 }
 0x4e8   : > { %v1500_v50 = vpop.f32.mrb[27].mxu1  ;;  %v6121_v53 = vadd.f32 %v3952_v49, %v1429_v4  ;;  %v1780_v49 = vpop.f32.mrb[35].mxu0 }
 0x4e9   : > { %v6115_v51 = vadd.f32 %v1500_v50, %v1429_v4  ;;  %1544 = vmax.xlane.f32.xlu0 %v6112_v48  ;;  %v1840_v50 = vmax.f32 %v1778_v63, 0.0 }
 0x4eb   : > { %1546 = vmax.xlane.f32.xlu1 %v6115_v51 }
 0x4ed   : > { %1548 = vmax.xlane.f32.xlu0 %v6118_v52  ;;  %v3955_v54 = vpop.f32.mrb[28].mxu1 }
 0x4ee   : > { %v1513_v55 = vpop.f32.mrb[29].mxu1  ;;  %v6130_v59 = vadd.f32 %v3955_v54, %v1429_v4  ;;  %v1781_v54 = vadd.f32 %v6137_v3, %v1780_v49 }
 0x4ef   : > { %v6124_v56 = vadd.f32 %v1513_v55, %v1429_v4  ;;  %1550 = vmax.xlane.f32.xlu1 %v6121_v53  ;;  %v3956_v57 = vpop.f32.mrb[30].mxu1 }
 0x4f0   : > { %v1516_v9 = vpop.f32.mrb[31].mxu1  ;;  %v6133_v60 = vadd.f32 %v3956_v57, %v1429_v4 }
 0x4f1   : > { %v6127_v58 = vadd.f32 %v1516_v9, %v1429_v4  ;;  %1552 = vmax.xlane.f32.xlu0 %v6124_v56 }
 0x4f3   : > { %1554 = vmax.xlane.f32.xlu1 %v6127_v58 }
 0x4f5   : > { %1556 = vmax.xlane.f32.xlu0 %v6130_v59 }
 0x4f7   : > { %1558 = vmax.xlane.f32.xlu1 %v6133_v60 }
 0x565   : > { %v1533_v6 = vpop.xlane.xlu1 %1532 }
 0x566   : > { %v1562_v61 = vsub.f32 %v1474_v7, %v1533_v6  ;;  %v1529_v62 = vpop.xlane.xlu0 %1528  ;;  %v1842_v7 = vmax.f32 %v1786_v11, 0.0 }
 0x567   : > { %v1560_v1 = vsub.f32 %v1466_v2, %v1529_v62  ;;  %v1789_v2 = vadd.f32 %v3976_v46, %v6137_v3 }
 0x568   : > { %v1580_v14 = vmul.f32 1.442695, %v1562_v61  ;;  %v1841_v61 = vmax.f32 %v1781_v54, 0.0 }
 0x569   : > { %v1576_v8 = vmul.f32 1.442695, %v1560_v1  ;;  %v1535_v10 = vpop.xlane.xlu1 %1534  ;;  %v1843_v57 = vmax.f32 %v1789_v2, 0.0 }
 0x56a   : > { %v1563_v4 = vsub.f32 %v6098_v12, %v1535_v10  ;;  %v1531_v16 = vpop.xlane.xlu0 %1530  ;;  %v1856_v5 = vpack.c.bf16 %v1841_v61, %v1840_v50 }
 0x56b   : > { %4463 = vpow2.f32 %v1576_v8  ;;  %v1561_v47 = vsub.f32 %v1469_v20, %v1531_v16  ;;  %v1857_v62 = vpack.c.bf16 %v1843_v57, %v1842_v7  ;;  %v3979_v20 = vpop.f32.mrb[36].mxu0 }
 0x56c   : > { %4465 = vpow2.f32 %v1580_v14  ;;  %v1582_v9 = vmul.f32 1.442695, %v1563_v4  ;;  %v1802_v11 = vadd.f32 %v3979_v20, %v6137_v3  ;;  %v1793_v13 = vpop.f32.mrb[37].mxu0  ;;  %3989 = vmatprep.subr.bf16.mxu0 %v1856_v5 }
 0x56d   : > { %v1578_v55 = vmul.f32 1.442695, %v1561_v47  ;;  %v1794_v14 = vadd.f32 %v6137_v3, %v1793_v13  ;;  %v3980_v4 = vpop.f32.mrb[38].mxu0  ;;  %3990 = vmatpush3.bf16.msra.mxu0 %v1856_v5 }
 0x56e   : > { %v1537_v6 = vpop.xlane.xlu0 %1536  ;;  %v1796_v46 = vpop.f32.mrb[39].mxu0  ;;  %v1846_v7 = vmax.f32 %v1802_v11, 0.0  ;;  %3991 = vmatprep.subr.bf16.mxu0 %v1857_v62 }
 0x56f   : > { %4467 = vpow2.f32 %v1578_v55  ;;  %v1564_v12 = vsub.f32 %v6101_v15, %v1537_v6  ;;  %v1844_v2 = vmax.f32 %v1794_v14, 0.0  ;;  %v1797_v49 = vadd.f32 %v6137_v3, %v1796_v46 }
 0x570   : > { %v1539_v1 = vpop.xlane.xlu1 %1538  ;;  %4469 = vpow2.f32 %v1582_v9 }
 0x571   : > { %v1584_v8 = vmul.f32 1.442695, %v1564_v12  ;;  %v1565_v10 = vsub.f32 %v6103_v17, %v1539_v1  ;;  %v1805_v17 = vadd.f32 %v3980_v4, %v6137_v3  ;;  %v1845_v9 = vmax.f32 %v1797_v49, 0.0  ;;  %3992 = vmatpush3.bf16.msra.mxu0 %v1857_v62 }
 0x572   : > { %v1541_v16 = vpop.xlane.xlu0 %1540 }
 0x573   : > { %4471 = vpow2.f32 %v1584_v8  ;;  %v1586_v63 = vmul.f32 1.442695, %v1565_v10  ;;  %v1566_v15 = vsub.f32 %v6106_v18, %v1541_v16  ;;  %v1847_v18 = vmax.f32 %v1805_v17, 0.0  ;;  %v3983_v8 = vpop.f32.mrb[40].mxu0 }
 0x574   : > { %v1543_v47 = vpop.xlane.xlu1 %1542  ;;  %v1858_v20 = vpack.c.bf16 %v1845_v9, %v1844_v2  ;;  %v1818_v13 = vadd.f32 %v3983_v8, %v6137_v3  ;;  %v1809_v16 = vpop.f32.mrb[41].mxu0 }
 0x575   : > { %v6151_v50 = vpop.eup %4463  ;;  %v1588_v54 = vmul.f32 1.442695, %v1566_v15  ;;  %v1567_v55 = vsub.f32 %v6109_v19, %v1543_v47  ;;  %4473 = vpow2.f32 %v1586_v63  ;;  %v1859_v5 = vpack.c.bf16 %v1847_v18, %v1846_v7  ;;  %v3984_v62 = vpop.f32.mrb[42].mxu0 }
 0x576   : > { %v1545_v57 = vpop.xlane.xlu0 %1544  ;;  %1608 = vadd.xlane.f32.xlu0 %v6151_v50  ;;  %v6156_v12 = vpop.eup %4465  ;;  %3993 = vmatprep.subr.bf16.mxu0 %v1858_v20  ;;  %v1850_v47 = vmax.f32 %v1818_v13, 0.0  ;;  %v1821_v2 = vadd.f32 %v3984_v62, %v6137_v3 }
 0x577   : > { %4475 = vpow2.f32 %v1588_v54  ;;  %v1590_v6 = vmul.f32 1.442695, %v1567_v55  ;;  %v1568_v61 = vsub.f32 %v6112_v48, %v1545_v57  ;;  %v1810_v48 = vadd.f32 %v6137_v3, %v1809_v16  ;;  %v1812_v15 = vpop.f32.mrb[43].mxu0  ;;  %3994 = vmatpush3.bf16.msra.mxu0 %v1858_v20 }
 0x578   : > { %v1547_v1 = vpop.xlane.xlu1 %1546  ;;  %v1813_v17 = vadd.f32 %v6137_v3, %v1812_v15  ;;  %3995 = vmatprep.subr.bf16.mxu0 %v1859_v5  ;;  %v1851_v57 = vmax.f32 %v1821_v2, 0.0 }
 0x579   : > { %v6158_v10 = vpop.eup %4467  ;;  %v1592_v19 = vmul.f32 1.442695, %v1568_v61  ;;  %v1569_v11 = vsub.f32 %v6115_v51, %v1547_v1  ;;  %4477 = vpow2.f32 %v1590_v6  ;;  %v1848_v7 = vmax.f32 %v1810_v48, 0.0 }
 0x57a   : > { %v1549_v14 = vpop.xlane.xlu0 %1548  ;;  %1610 = vadd.xlane.f32.xlu1 %v6158_v10  ;;  %1612 = vadd.xlane.f32.xlu0 %v6156_v12  ;;  %v6166_v46 = vpop.eup %4469  ;;  %v1849_v18 = vmax.f32 %v1813_v17, 0.0  ;;  %v1861_v20 = vpack.c.bf16 %v1851_v57, %v1850_v47 }
 0x57b   : > { %4479 = vpow2.f32 %v1592_v19  ;;  %v1594_v4 = vmul.f32 1.442695, %v1569_v11  ;;  %v1570_v63 = vsub.f32 %v6118_v52, %v1549_v14  ;;  %3996 = vmatpush3.bf16.msra.mxu0 %v1859_v5 }
 0x57c   : > { %v1551_v51 = vpop.xlane.xlu1 %1550  ;;  %v1860_v8 = vpack.c.bf16 %v1849_v18, %v1848_v7 }
 0x57d   : > { %v6170_v49 = vpop.eup %4471  ;;  %v1596_v54 = vmul.f32 1.442695, %v1570_v63  ;;  %v1571_v55 = vsub.f32 %v6121_v53, %v1551_v51  ;;  %4481 = vpow2.f32 %v1594_v4  ;;  %v3987_v53 = vpop.f32.mrb[44].mxu0 }
 0x57e   : > { %1614 = vadd.xlane.f32.xlu1 %v6166_v46  ;;  %1616 = vadd.xlane.f32.xlu0 %v6170_v49  ;;  %v1553_v52 = vpop.xlane.xlu0 %1552  ;;  %v1834_v16 = vadd.f32 %v3987_v53, %v6137_v3  ;;  %v1825_v14 = vpop.f32.mrb[45].mxu0 }
 0x57f   : > { %4483 = vpow2.f32 %v1596_v54  ;;  %v1598_v9 = vmul.f32 1.442695, %v1571_v55  ;;  %v1572_v6 = vsub.f32 %v6124_v56, %v1553_v52  ;;  %v6176_v61 = vpop.eup %4473  ;;  %v1826_v48 = vadd.f32 %v6137_v3, %v1825_v14  ;;  %v3988_v62 = vpop.f32.mrb[46].mxu0  ;;  %3997 = vmatprep.subr.bf16.mxu0 %v1860_v8  ;;  %v4458_v14 = vld [vmem:[#allocation19 + $0x18] sm:$0xff]  }
 0x580   : > { %v1555_v1 = vpop.xlane.xlu1 %1554  ;;  %v1828_v63 = vpop.f32.mrb[47].mxu0  ;;  %v1854_v51 = vmax.f32 %v1834_v16, 0.0  ;;  %v1837_v7 = vadd.f32 %v3988_v62, %v6137_v3  ;;  %3998 = vmatpush3.bf16.msra.mxu0 %v1860_v8  ;;  %v4457_v16 = vld [vmem:[#allocation19 + $0x10] sm:$0xff]  }
 0x581   : > { %v6178_v19 = vpop.eup %4475  ;;  %v1600_v11 = vmul.f32 1.442695, %v1572_v6  ;;  %v1573_v13 = vsub.f32 %v6127_v58, %v1555_v1  ;;  %4485 = vpow2.f32 %v1598_v9  ;;  %v1852_v47 = vmax.f32 %v1826_v48, 0.0  ;;  %3999 = vmatprep.subr.bf16.mxu0 %v1861_v20  ;;  %v4460_v48 = vld [vmem:[#allocation19 + $0x28] sm:$0xff]   ;;  %v4461_v62 = vld [vmem:[#allocation19 + $0x30] sm:$0xff]  }
 0x582   : > { %1618 = vadd.xlane.f32.xlu1 %v6176_v61  ;;  %1620 = vadd.xlane.f32.xlu0 %v6178_v19  ;;  %v1557_v56 = vpop.xlane.xlu0 %1556  ;;  %v1829_v2 = vadd.f32 %v6137_v3, %v1828_v63 }
 0x583   : > { %4487 = vpow2.f32 %v1600_v11  ;;  %v1602_v5 = vmul.f32 1.442695, %v1573_v13  ;;  %v1574_v4 = vsub.f32 %v6130_v59, %v1557_v56  ;;  %v6186_v15 = vpop.eup %4477  ;;  %v1855_v59 = vmax.f32 %v1837_v7, 0.0  ;;  %v4455_v11 = vld [vmem:[#allocation19] sm:$0xff]   ;;  %v4456_v13 = vld [vmem:[#allocation19 + $0x8] sm:$0xff]  }
 0x584   : > { %v1559_v58 = vpop.xlane.xlu1 %1558  ;;  %v1853_v52 = vmax.f32 %v1829_v2, 0.0  ;;  %4000 = vmatpush3.bf16.msra.mxu0 %v1861_v20  ;;  %4021 = vmatprep.subr.bf16.mxu1 %v4455_v11  ;;  %v4459_v56 = vld [vmem:[#allocation19 + $0x20] sm:$0xff]  }
 0x585   : > { %v6190_v17 = vpop.eup %4479  ;;  %v1604_v54 = vmul.f32 1.442695, %v1574_v4  ;;  %v1575_v55 = vsub.f32 %v6133_v60, %v1559_v58  ;;  %4489 = vpow2.f32 %v1602_v5  ;;  %v1863_v9 = vpack.c.bf16 %v1855_v59, %v1854_v51  ;;  %4022 = vmatpush3.bf16.msra.mxu1 %v4455_v11 }
 0x586   : > { %1622 = vadd.xlane.f32.xlu1 %v6186_v15  ;;  %1624 = vadd.xlane.f32.xlu0 %v6190_v17  ;;  %v1862_v3 = vpack.c.bf16 %v1853_v52, %v1852_v47 }
 0x587   : > { %4491 = vpow2.f32 %v1604_v54  ;;  %v1606_v57 = vmul.f32 1.442695, %v1575_v55  ;;  %v6195_v18 = vpop.eup %4481  ;;  %4023 = vmatprep.subr.bf16.mxu1 %v4456_v13 }
 0x588   : > { %4001 = vmatprep.subr.bf16.mxu0 %v1862_v3 }
 0x589   : > { %v6197_v6 = vpop.eup %4483  ;;  %4493 = vpow2.f32 %v1606_v57  ;;  %4002 = vmatpush3.bf16.msra.mxu0 %v1862_v3  ;;  %4024 = vmatpush3.bf16.msra.mxu1 %v4456_v13 }
 0x58a   : > { %1626 = vadd.xlane.f32.xlu1 %v6195_v18  ;;  %1628 = vadd.xlane.f32.xlu0 %v6197_v6 }
 0x58b   : > { %v6201_v60 = vpop.eup %4485  ;;  %4003 = vmatprep.subr.bf16.mxu0 %v1863_v9  ;;  %4025 = vmatprep.subr.bf16.mxu1 %v4457_v16 }
 0x58d   : > { %v6203_v1 = vpop.eup %4487  ;;  %4004 = vmatpush3.bf16.msra.mxu0 %v1863_v9  ;;  %4026 = vmatpush3.bf16.msra.mxu1 %v4457_v16 }
 0x58e   : > { %1630 = vadd.xlane.f32.xlu1 %v6201_v60  ;;  %1632 = vadd.xlane.f32.xlu0 %v6203_v1 }
 0x58f   : > { %v6207_v8 = vpop.eup %4489  ;;  %4027 = vmatprep.subr.bf16.mxu1 %v4458_v14 }
 0x591   : > { %v6209_v20 = vpop.eup %4491  ;;  %4028 = vmatpush3.bf16.msra.mxu1 %v4458_v14 }
 0x592   : > { %1634 = vadd.xlane.f32.xlu1 %v6207_v8  ;;  %1636 = vadd.xlane.f32.xlu0 %v6209_v20 }
 0x593   : > { %v6213_v53 = vpop.eup %4493  ;;  %4029 = vmatprep.subr.bf16.mxu1 %v4459_v56 }
 0x595   : > { %4030 = vmatpush3.bf16.msra.mxu1 %v4459_v56 }
 0x596   : > { %1638 = vadd.xlane.f32.xlu1 %v6213_v53  ;;  %4031 = vmatprep.subr.bf16.mxu1 %v4460_v48 }
 0x599   : > { %4032 = vmatpush3.bf16.msra.mxu1 %v4460_v48 }
 0x59a   : > { %4033 = vmatprep.subr.bf16.mxu1 %v4461_v62 }
 0x59d   : > { %4034 = vmatpush3.bf16.msra.mxu1 %v4461_v62 }
 0x603   : > { %v1609_v5 = vpop.xlane.xlu0 %1608 }
 0x604   : > { %4495 = vrcp.f32 %v1609_v5 }
 0x607   : > { %v1611_v4 = vpop.xlane.xlu1 %1610  ;;  %v1613_v63 = vpop.xlane.xlu0 %1612 }
 0x608   : > { %4497 = vrcp.f32 %v1611_v4 }
 0x609   : > { %4499 = vrcp.f32 %v1613_v63 }
 0x60b   : > { %v1615_v58 = vpop.xlane.xlu1 %1614  ;;  %v1617_v51 = vpop.xlane.xlu0 %1616 }
 0x60c   : > { %4501 = vrcp.f32 %v1615_v58 }
 0x60d   : > { %4503 = vrcp.f32 %v1617_v51 }
 0x60e   : > { %v4496_v2 = vpop.eup %4495 }
 0x60f   : > { %v1619_v47 = vpop.xlane.xlu1 %1618  ;;  %v1621_v7 = vpop.xlane.xlu0 %1620  ;;  %v1656_v52 = vmul.f32 %v4496_v2, %v6151_v50 }
 0x610   : > { %4505 = vrcp.f32 %v1619_v47 }
 0x611   : > { %4507 = vrcp.f32 %v1621_v7 }
 0x612   : > { %v4498_v54 = vpop.eup %4497 }
 0x613   : > { %v1623_v55 = vpop.xlane.xlu1 %1622  ;;  %v1625_v59 = vpop.xlane.xlu0 %1624  ;;  %v1657_v57 = vmul.f32 %v4498_v54, %v6158_v10 }
 0x614   : > { %v4500_v9 = vpop.eup %4499  ;;  %4509 = vrcp.f32 %v1623_v55 }
 0x615   : > { %v1864_v3 = vpack.c.bf16 %v1657_v57, %v1656_v52  ;;  %4511 = vrcp.f32 %v1625_v59  ;;  %v1658_v13 = vmul.f32 %v4500_v9, %v6156_v12 }
 0x616   : > { %v4502_v11 = vpop.eup %4501 }
 0x617   : > { %v1659_v16 = vmul.f32 %v4502_v11, %v6166_v46  ;;  %v1627_v14 = vpop.xlane.xlu1 %1626  ;;  %4005 = vmatprep.mubr.bf16.mxu0 %v1864_v3  ;;  %v1629_v56 = vpop.xlane.xlu0 %1628 }
 0x618   : > { %v4504_v48 = vpop.eup %4503  ;;  %4513 = vrcp.f32 %v1627_v14 }
 0x619   : > { %v1865_v62 = vpack.c.bf16 %v1659_v16, %v1658_v13  ;;  %4515 = vrcp.f32 %v1629_v56  ;;  %v1660_v4 = vmul.f32 %v4504_v48, %v6170_v49 }
 0x61a   : > { %v4506_v5 = vpop.eup %4505 }
 0x61b   : > { %v1631_v50 = vpop.xlane.xlu1 %1630  ;;  %4006 = vmatmul.mubr.bf16.vlgmr.msra.gmra.mrb[48].mxu0 %v1865_v62  ;;  %v1633_v10 = vpop.xlane.xlu0 %1632  ;;  %v1661_v63 = vmul.f32 %v4506_v5, %v6176_v61 }
 0x61c   : > { %v4508_v58 = vpop.eup %4507  ;;  %4517 = vrcp.f32 %v1631_v50 }
 0x61d   : > { %v1866_v12 = vpack.c.bf16 %v1661_v63, %v1660_v4  ;;  %4519 = vrcp.f32 %v1633_v10  ;;  %v1662_v7 = vmul.f32 %v4508_v58, %v6178_v19 }
 0x61e   : > { %v4510_v51 = vpop.eup %4509 }
 0x61f   : > { %v1635_v46 = vpop.xlane.xlu1 %1634  ;;  %4009 = vmatprep.mubr.bf16.mxu0 %v1866_v12  ;;  %v1637_v47 = vpop.xlane.xlu0 %1636  ;;  %v1663_v2 = vmul.f32 %v4510_v51, %v6186_v15 }
 0x620   : > { %v4512_v54 = vpop.eup %4511  ;;  %4521 = vrcp.f32 %v1635_v46 }
 0x621   : > { %v1867_v55 = vpack.c.bf16 %v1663_v2, %v1662_v7  ;;  %4523 = vrcp.f32 %v1637_v47  ;;  %v1664_v61 = vmul.f32 %v4512_v54, %v6190_v17 }
 0x622   : > { %v4514_v59 = vpop.eup %4513 }
 0x623   : > { %v1639_v49 = vpop.xlane.xlu1 %1638  ;;  %4010 = vmatmul.mubr.bf16.gmra.mrb[52].mxu0 %v1867_v55  ;;  %v1665_v52 = vmul.f32 %v4514_v59, %v6195_v18  ;;  %v4516_v57 = vpop.eup %4515 }
 0x624   : > { %4525 = vrcp.f32 %v1639_v49  ;;  %v1666_v19 = vmul.f32 %v4516_v57, %v6197_v6  ;;  %v4462_v6 = vld [vmem:[#allocation19 + $0x38] sm:$0xff]  }
 0x625   : > { %v1868_v9 = vpack.c.bf16 %v1665_v52, %v1664_v61  ;;  %4035 = vmatprep.subr.bf16.mxu1 %v4462_v6 }
 0x626   : > { %v4518_v3 = vpop.eup %4517  ;;  %4036 = vmatpush3.bf16.msra.mxu1 %v4462_v6 }
 0x627   : > { %4013 = vmatprep.mubr.bf16.mxu0 %v1868_v9  ;;  %v1667_v15 = vmul.f32 %v4518_v3, %v6201_v60  ;;  %v4520_v11 = vpop.eup %4519 }
 0x628   : > { %v1668_v14 = vmul.f32 %v4520_v11, %v6203_v1 }
 0x629   : > { %v1869_v13 = vpack.c.bf16 %v1667_v15, %v1666_v19 }
 0x62a   : > { %v4522_v16 = vpop.eup %4521 }
 0x62b   : > { %4014 = vmatmul.mubr.bf16.gmra.mrb[56].mxu0 %v1869_v13  ;;  %v1669_v56 = vmul.f32 %v4522_v16, %v6207_v8  ;;  %v4524_v17 = vpop.eup %4523 }
 0x62c   : > { %v1670_v62 = vmul.f32 %v4524_v17, %v6209_v20 }
 0x62d   : > { %v1870_v48 = vpack.c.bf16 %v1669_v56, %v1668_v14 }
 0x62e   : > { %v4526_v18 = vpop.eup %4525 }
 0x62f   : > { %4017 = vmatprep.mubr.bf16.mxu0 %v1870_v48  ;;  %v1671_v5 = vmul.f32 %v4526_v18, %v6213_v53 }
 0x631   : > { %v1871_v50 = vpack.c.bf16 %v1671_v5, %v1670_v62 }
 0x633   : > { %4018 = vmatmul.mubr.bf16.gmra.mrb[60].mxu0 %v1871_v50 }
 0x6ee   : > { %v4007_v60 = vpop.f32.mrb[48].mxu0 }
 0x6ef   : > { %v1906_v10 = vpop.f32.mrb[49].mxu0 }
 0x6f0   : > { %v4008_v4 = vpop.f32.mrb[50].mxu0 }
 0x6f1   : > { %v1970_v63 = vpack.c.bf16 %v4008_v4, %v4007_v60  ;;  %v1909_v1 = vpop.f32.mrb[51].mxu0 }
 0x6f2   : > { %v1969_v58 = vpack.c.bf16 %v1909_v1, %v1906_v10 }
 0x6f4   : > { %4037 = vmatprep.mubr.bf16.mxu1 %v1969_v58 }
 0x6f5   : > { %4038 = vmatmul.mubr.bf16.vlgmr.msra.gmra.mrb[32].mxu1 %v1970_v63 }
 0x6f6   : > { %v4011_v8 = vpop.f32.mrb[52].mxu0 }
 0x6f7   : > { %v1922_v12 = vpop.f32.mrb[53].mxu0 }
 0x6f8   : > { %v4012_v51 = vpop.f32.mrb[54].mxu0 }
 0x6f9   : > { %v1972_v46 = vpack.c.bf16 %v4012_v51, %v4011_v8  ;;  %v1925_v20 = vpop.f32.mrb[55].mxu0 }
 0x6fa   : > { %v1971_v47 = vpack.c.bf16 %v1925_v20, %v1922_v12 }
 0x6fc   : > { %4041 = vmatprep.mubr.bf16.mxu1 %v1971_v47 }
 0x6fd   : > { %4042 = vmatmul.mubr.bf16.gmra.mrb[36].mxu1 %v1972_v46 }
 0x6fe   : > { %v4015_v53 = vpop.f32.mrb[56].mxu0 }
 0x6ff   : > { %v1938_v7 = vpop.f32.mrb[57].mxu0 }
 0x700   : > { %v4016_v2 = vpop.f32.mrb[58].mxu0 }
 0x701   : > { %v1974_v54 = vpack.c.bf16 %v4016_v2, %v4015_v53  ;;  %v1941_v55 = vpop.f32.mrb[59].mxu0 }
 0x702   : > { %v1973_v59 = vpack.c.bf16 %v1941_v55, %v1938_v7 }
 0x704   : > { %4045 = vmatprep.mubr.bf16.mxu1 %v1973_v59 }
 0x705   : > { %4046 = vmatmul.mubr.bf16.gmra.mrb[40].mxu1 %v1974_v54 }
 0x706   : > { %v4019_v49 = vpop.f32.mrb[60].mxu0 }
 0x707   : > { %v1954_v61 = vpop.f32.mrb[61].mxu0 }
 0x708   : > { %v4020_v52 = vpop.f32.mrb[62].mxu0 }
 0x709   : > { %v1976_v57 = vpack.c.bf16 %v4020_v52, %v4019_v49  ;;  %v1957_v9 = vpop.f32.mrb[63].mxu0 }
 0x70a   : > { %v1975_v3 = vpack.c.bf16 %v1957_v9, %v1954_v61 }
 0x70c   : > { %4049 = vmatprep.mubr.bf16.mxu1 %v1975_v3 }
 0x70d   : > { %4050 = vmatmul.mubr.bf16.gmra.mrb[44].mxu1 %v1976_v57 }
 0x7c8   : > { %v4039_v19 = vpop.f32.mrb[32].mxu1 }
 0x7c9   : > { %v2140_v15 = vadd.f32 %v4039_v19, %v5960_v23  ;;  %v2075_v11 = vpop.f32.mrb[33].mxu1 }
 0x7ca   : > { %v4040_v13 = vpop.f32.mrb[34].mxu1  ;;  %v6235_v56 = vadd.f32 %v2075_v11, %v5954_v21 }
 0x7cb   : > { %v2141_v16 = vadd.f32 %v4040_v13, %v5963_v24  ;;  %2158 = vadd.xlane.f32.xlu0 %v2140_v15  ;;  %v2078_v14 = vpop.f32.mrb[35].mxu1 }
 0x7cc   : > { %v6238_v17 = vadd.f32 %v2078_v14, %v5957_v22 }
 0x7cd   : > { %2160 = vadd.xlane.f32.xlu1 %v2141_v16 }
 0x7cf   : > { %2154 = vadd.xlane.f32.xlu0 %v6235_v56 }
 0x7d0   : > { %v4043_v48 = vpop.f32.mrb[36].mxu1 }
 0x7d1   : > { %v6242_v18 = vadd.f32 %v4043_v48, %v5976_v28  ;;  %2156 = vadd.xlane.f32.xlu1 %v6238_v17  ;;  %v2091_v23 = vpop.f32.mrb[37].mxu1 }
 0x7d2   : > { %v4044_v62 = vpop.f32.mrb[38].mxu1  ;;  %v6250_v5 = vadd.f32 %v2091_v23, %v5966_v25 }
 0x7d3   : > { %v6246_v24 = vadd.f32 %v4044_v62, %v5979_v29  ;;  %2166 = vadd.xlane.f32.xlu0 %v6242_v18  ;;  %v2094_v21 = vpop.f32.mrb[39].mxu1 }
 0x7d4   : > { %v6254_v22 = vadd.f32 %v2094_v21, %v5969_v26 }
 0x7d5   : > { %2168 = vadd.xlane.f32.xlu1 %v6246_v24 }
 0x7d7   : > { %2162 = vadd.xlane.f32.xlu0 %v6250_v5 }
 0x7d8   : > { %v4047_v28 = vpop.f32.mrb[40].mxu1 }
 0x7d9   : > { %v6258_v50 = vadd.f32 %v4047_v28, %v5996_v34  ;;  %2164 = vadd.xlane.f32.xlu1 %v6254_v22  ;;  %v2107_v29 = vpop.f32.mrb[41].mxu1 }
 0x7da   : > { %v4048_v6 = vpop.f32.mrb[42].mxu1  ;;  %v6266_v10 = vadd.f32 %v2107_v29, %v5982_v30 }
 0x7db   : > { %v6262_v60 = vadd.f32 %v4048_v6, %v5999_v35  ;;  %2174 = vadd.xlane.f32.xlu0 %v6258_v50  ;;  %v2110_v25 = vpop.f32.mrb[43].mxu1 }
 0x7dc   : > { %v6270_v26 = vadd.f32 %v2110_v25, %v5993_v33 }
 0x7dd   : > { %2176 = vadd.xlane.f32.xlu1 %v6262_v60 }
 0x7df   : > { %2170 = vadd.xlane.f32.xlu0 %v6266_v10 }
 0x7e0   : > { %v4051_v34 = vpop.f32.mrb[44].mxu1 }
 0x7e1   : > { %2172 = vadd.xlane.f32.xlu1 %v6270_v26  ;;  %v2123_v4 = vpop.f32.mrb[45].mxu1  ;;  %v6282_v30 = vadd.f32 %v4051_v34, %v6012_v39 }
 0x7e2   : > { %v6275_v35 = vadd.f32 %v2123_v4, %v6006_v37  ;;  %v4052_v63 = vpop.f32.mrb[46].mxu1  ;;  %v6291_v37 = vand.u32 127, %v1426_v0 }
 0x7e3   : > { %v2126_v1 = vpop.f32.mrb[47].mxu1  ;;  %v6286_v33 = vadd.f32 %v4052_v63, %v6023_v42 }
 0x7e4   : > { %v6278_v58 = vadd.f32 %v2126_v1, %v6009_v38  ;;  %2178 = vadd.xlane.f32.xlu0 %v6275_v35  ;;  %vm2220_vm1 = vcmp.lt.s32.totalorder %v6291_v37, 32 }
 0x7e6   : > { %2180 = vadd.xlane.f32.xlu1 %v6278_v58 }
 0x7e8   : > { %2182 = vadd.xlane.f32.xlu0 %v6282_v30 }
 0x7ea   : > { %2184 = vadd.xlane.f32.xlu1 %v6286_v33 }
 0x858   : > { %v2159_v8 = vpop.xlane.xlu0 %2158 }
 0x859   : > { %v2188_v38 = vmul.f32 0.03125, %v2159_v8 }
 0x85a   : > { %v2161_v12 = vpop.xlane.xlu1 %2160 }
 0x85b   : > { %v2204_v51 = vsub.f32 %v2140_v15, %v2188_v38  ;;  %v2189_v39 = vmul.f32 0.03125, %v2161_v12 }
 0x85c   : > { %v2155_v46 = vpop.xlane.xlu0 %2154 }
 0x85d   : > { %v2205_v20 = vsub.f32 %v2141_v16, %v2189_v39  ;;  %v2186_v47 = vmul.f32 0.03125, %v2155_v46  ;;  %v6296_v42 = vsel %vm2220_vm1, %v2204_v51, 0.0 }
 0x85e   : > { %v2157_v53 = vpop.xlane.xlu1 %2156  ;;  %v2241_v7 = vmul.f32 %v6296_v42, %v6296_v42 }
 0x85f   : > { %v2202_v0 = vsub.f32 %v6235_v56, %v2186_v47  ;;  %v2187_v2 = vmul.f32 0.03125, %v2157_v53  ;;  %v6303_v54 = vsel %vm2220_vm1, %v2205_v20, 0.0 }
 0x860   : > { %2259 = vadd.xlane.f32.xlu0 %v2241_v7  ;;  %v2167_v55 = vpop.xlane.xlu0 %2166  ;;  %v2242_v59 = vmul.f32 %v6303_v54, %v6303_v54 }
 0x861   : > { %v2203_v49 = vsub.f32 %v6238_v17, %v2187_v2  ;;  %v2192_v61 = vmul.f32 0.03125, %v2167_v55  ;;  %v6310_v52 = vsel %vm2220_vm1, %v2202_v0, 0.0 }
 0x862   : > { %v2169_v57 = vpop.xlane.xlu1 %2168  ;;  %2261 = vadd.xlane.f32.xlu1 %v2242_v59  ;;  %v2239_v9 = vmul.f32 %v6310_v52, %v6310_v52 }
 0x863   : > { %v2208_v3 = vsub.f32 %v6242_v18, %v2192_v61  ;;  %v2193_v19 = vmul.f32 0.03125, %v2169_v57  ;;  %v6317_v15 = vsel %vm2220_vm1, %v2203_v49, 0.0 }
 0x864   : > { %2255 = vadd.xlane.f32.xlu0 %v2239_v9  ;;  %v2163_v11 = vpop.xlane.xlu0 %2162  ;;  %v2240_v13 = vmul.f32 %v6317_v15, %v6317_v15 }
 0x865   : > { %v2209_v16 = vsub.f32 %v6246_v24, %v2193_v19  ;;  %v2190_v14 = vmul.f32 0.03125, %v2163_v11  ;;  %v6324_v56 = vsel %vm2220_vm1, %v2208_v3, 0.0 }
 0x866   : > { %v2165_v17 = vpop.xlane.xlu1 %2164  ;;  %2257 = vadd.xlane.f32.xlu1 %v2240_v13  ;;  %v2245_v48 = vmul.f32 %v6324_v56, %v6324_v56 }
 0x867   : > { %v2206_v18 = vsub.f32 %v6250_v5, %v2190_v14  ;;  %v2191_v23 = vmul.f32 0.03125, %v2165_v17  ;;  %v6331_v62 = vsel %vm2220_vm1, %v2209_v16, 0.0 }
 0x868   : > { %2267 = vadd.xlane.f32.xlu0 %v2245_v48  ;;  %v2175_v21 = vpop.xlane.xlu0 %2174  ;;  %v2246_v24 = vmul.f32 %v6331_v62, %v6331_v62 }
 0x869   : > { %v2207_v28 = vsub.f32 %v6254_v22, %v2191_v23  ;;  %v2196_v29 = vmul.f32 0.03125, %v2175_v21  ;;  %v6338_v6 = vsel %vm2220_vm1, %v2206_v18, 0.0 }
 0x86a   : > { %v2177_v25 = vpop.xlane.xlu1 %2176  ;;  %2269 = vadd.xlane.f32.xlu1 %v2246_v24  ;;  %v2243_v5 = vmul.f32 %v6338_v6, %v6338_v6 }
 0x86b   : > { %v2212_v34 = vsub.f32 %v6258_v50, %v2196_v29  ;;  %v2197_v4 = vmul.f32 0.03125, %v2177_v25  ;;  %v6345_v63 = vsel %vm2220_vm1, %v2207_v28, 0.0 }
 0x86c   : > { %2263 = vadd.xlane.f32.xlu0 %v2243_v5  ;;  %v2171_v1 = vpop.xlane.xlu0 %2170  ;;  %v2244_v22 = vmul.f32 %v6345_v63, %v6345_v63 }
 0x86d   : > { %v2213_v8 = vsub.f32 %v6262_v60, %v2197_v4  ;;  %v2194_v38 = vmul.f32 0.03125, %v2171_v1  ;;  %v6352_v12 = vsel %vm2220_vm1, %v2212_v34, 0.0 }
 0x86e   : > { %v2173_v51 = vpop.xlane.xlu1 %2172  ;;  %2265 = vadd.xlane.f32.xlu1 %v2244_v22  ;;  %v2249_v50 = vmul.f32 %v6352_v12, %v6352_v12 }
 0x86f   : > { %v2210_v39 = vsub.f32 %v6266_v10, %v2194_v38  ;;  %v2195_v46 = vmul.f32 0.03125, %v2173_v51  ;;  %v6359_v20 = vsel %vm2220_vm1, %v2213_v8, 0.0 }
 0x870   : > { %2275 = vadd.xlane.f32.xlu0 %v2249_v50  ;;  %v2250_v60 = vmul.f32 %v6359_v20, %v6359_v20 }
 0x871   : > { %v2211_v47 = vsub.f32 %v6270_v26, %v2195_v46  ;;  %v2179_v53 = vpop.xlane.xlu0 %2178  ;;  %v6366_v7 = vsel %vm2220_vm1, %v2210_v39, 0.0 }
 0x872   : > { %v2198_v0 = vmul.f32 0.03125, %v2179_v53  ;;  %2277 = vadd.xlane.f32.xlu1 %v2250_v60  ;;  %v2247_v10 = vmul.f32 %v6366_v7, %v6366_v7 }
 0x873   : > { %v2181_v2 = vpop.xlane.xlu1 %2180  ;;  %v6372_v55 = vsel %vm2220_vm1, %v2211_v47, 0.0 }
 0x874   : > { %v2214_v59 = vsub.f32 %v6275_v35, %v2198_v0  ;;  %v2199_v49 = vmul.f32 0.03125, %v2181_v2  ;;  %2271 = vadd.xlane.f32.xlu0 %v2247_v10  ;;  %v2248_v26 = vmul.f32 %v6372_v55, %v6372_v55  ;;  %v6404_v0 = vld [vmem:[#allocation20] ss:$0 sm:$0xff] }
 0x875   : > { %v2183_v61 = vpop.xlane.xlu0 %2182 }
 0x876   : > { %v2215_v57 = vsub.f32 %v6278_v58, %v2199_v49  ;;  %v2200_v9 = vmul.f32 0.03125, %v2183_v61  ;;  %2273 = vadd.xlane.f32.xlu1 %v2248_v26  ;;  %v6380_v3 = vsel %vm2220_vm1, %v2214_v59, 0.0  ;;  %v6407_v61 = vld [vmem:[#allocation22] ss:$0 sm:$0xff] }
 0x877   : > { %v2185_v19 = vpop.xlane.xlu1 %2184  ;;  %v2251_v11 = vmul.f32 %v6380_v3, %v6380_v3 }
 0x878   : > { %v2216_v35 = vsub.f32 %v6282_v30, %v2200_v9  ;;  %v2201_v13 = vmul.f32 0.03125, %v2185_v19  ;;  %v6387_v16 = vsel %vm2220_vm1, %v2215_v57, 0.0 }
 0x879   : > { %2279 = vadd.xlane.f32.xlu0 %v2251_v11  ;;  %v2252_v58 = vmul.f32 %v6387_v16, %v6387_v16 }
 0x87a   : > { %v2217_v14 = vsub.f32 %v6286_v33, %v2201_v13  ;;  %v6394_v17 = vsel %vm2220_vm1, %v2216_v35, 0.0 }
 0x87b   : > { %2281 = vadd.xlane.f32.xlu1 %v2252_v58  ;;  %v2253_v48 = vmul.f32 %v6394_v17, %v6394_v17 }
 0x87c   : > { %v6400_v30 = vsel %vm2220_vm1, %v2217_v14, 0.0 }
 0x87d   : > { %2283 = vadd.xlane.f32.xlu0 %v2253_v48  ;;  %v2254_v18 = vmul.f32 %v6400_v30, %v6400_v30 }
 0x87f   : > { %2285 = vadd.xlane.f32.xlu1 %v2254_v18 }
 0x8ed   : > { %v2260_v23 = vpop.xlane.xlu0 %2259 }
 0x8ee   : > { %v2289_v21 = vmul.f32 0.03125, %v2260_v23 }
 0x8ef   : > { %v2262_v33 = vpop.xlane.xlu1 %2261 }
 0x8f0   : > { %v2305_v24 = vadd.f32 1e-05, %v2289_v21  ;;  %v2290_v28 = vmul.f32 0.03125, %v2262_v33 }
 0x8f1   : > { %v2256_v29 = vpop.xlane.xlu0 %2255 }
 0x8f2   : > { %4527 = vrsqrt.f32 %v2305_v24  ;;  %v2306_v25 = vadd.f32 1e-05, %v2290_v28  ;;  %v2287_v5 = vmul.f32 0.03125, %v2256_v29 }
 0x8f3   : > { %v2258_v34 = vpop.xlane.xlu1 %2257 }
 0x8f4   : > { %4529 = vrsqrt.f32 %v2306_v25  ;;  %v2303_v4 = vadd.f32 1e-05, %v2287_v5  ;;  %v2288_v37 = vmul.f32 0.03125, %v2258_v34 }
 0x8f5   : > { %v2268_v1 = vpop.xlane.xlu0 %2267 }
 0x8f6   : > { %4531 = vrsqrt.f32 %v2303_v4  ;;  %v2304_v22 = vadd.f32 1e-05, %v2288_v37  ;;  %v2293_v8 = vmul.f32 0.03125, %v2268_v1 }
 0x8f7   : > { %v2270_v38 = vpop.xlane.xlu1 %2269 }
 0x8f8   : > { %4533 = vrsqrt.f32 %v2304_v22  ;;  %v2309_v51 = vadd.f32 1e-05, %v2293_v8  ;;  %v2294_v50 = vmul.f32 0.03125, %v2270_v38 }
 0x8f9   : > { %v2264_v39 = vpop.xlane.xlu0 %2263 }
 0x8fa   : > { %4535 = vrsqrt.f32 %v2309_v51  ;;  %v2310_v46 = vadd.f32 1e-05, %v2294_v50  ;;  %v2291_v60 = vmul.f32 0.03125, %v2264_v39 }
 0x8fb   : > { %v2266_v47 = vpop.xlane.xlu1 %2265 }
 0x8fc   : > { %v4528_v53 = vpop.eup %4527  ;;  %4537 = vrsqrt.f32 %v2310_v46  ;;  %v2307_v10 = vadd.f32 1e-05, %v2291_v60  ;;  %v2292_v2 = vmul.f32 0.03125, %v2266_v47 }
 0x8fd   : > { %v2337_v59 = vmul.f32 %v4528_v53, %v6296_v42  ;;  %v2276_v49 = vpop.xlane.xlu0 %2275 }
 0x8fe   : > { %v4530_v26 = vpop.eup %4529  ;;  %4539 = vrsqrt.f32 %v2307_v10  ;;  %v2308_v57 = vadd.f32 1e-05, %v2292_v2  ;;  %v2297_v9 = vmul.f32 0.03125, %v2276_v49 }
 0x8ff   : > { %v2360_v19 = vmul.f32 %v6404_v0, %v2337_v59  ;;  %v2338_v11 = vmul.f32 %v4530_v26, %v6303_v54  ;;  %v2278_v35 = vpop.xlane.xlu1 %2277 }
 0x900   : > { %v4532_v13 = vpop.eup %4531  ;;  %4541 = vrsqrt.f32 %v2308_v57  ;;  %v2313_v58 = vadd.f32 1e-05, %v2297_v9  ;;  %v2298_v14 = vmul.f32 0.03125, %v2278_v35 }
 0x901   : > { %v2383_v48 = vadd.f32 %v6407_v61, %v2360_v19  ;;  %v2361_v42 = vmul.f32 %v6404_v0, %v2338_v11  ;;  %v2335_v18 = vmul.f32 %v4532_v13, %v6310_v52  ;;  %v2272_v23 = vpop.xlane.xlu0 %2271 }
 0x902   : > { %v4534_v21 = vpop.eup %4533  ;;  %4543 = vrsqrt.f32 %v2313_v58  ;;  %v2314_v33 = vadd.f32 1e-05, %v2298_v14  ;;  %v2295_v24 = vmul.f32 0.03125, %v2272_v23 }
 0x903   : > { %2399 = vst [vmem:[%s5914_s24 + $0x10] sm:$0xff] %v2383_v48  ;;  %v2384_v54 = vadd.f32 %v6407_v61, %v2361_v42  ;;  %v2358_v28 = vmul.f32 %v6404_v0, %v2335_v18  ;;  %v2336_v29 = vmul.f32 %v4534_v21, %v6317_v15  ;;  %v2274_v25 = vpop.xlane.xlu1 %2273 }
 0x904   : > { %v4536_v5 = vpop.eup %4535  ;;  %4545 = vrsqrt.f32 %v2314_v33  ;;  %v2311_v34 = vadd.f32 1e-05, %v2295_v24  ;;  %v2296_v4 = vmul.f32 0.03125, %v2274_v25 }
 0x905   : > { %2400 = vst [vmem:[%s5914_s24 + $0x18] sm:$0xff] %v2384_v54  ;;  %v2381_v52 = vadd.f32 %v6407_v61, %v2358_v28  ;;  %v2359_v37 = vmul.f32 %v6404_v0, %v2336_v29  ;;  %v2341_v1 = vmul.f32 %v4536_v5, %v6324_v56 }
 0x906   : > { %v4538_v22 = vpop.eup %4537  ;;  %4547 = vrsqrt.f32 %v2311_v34  ;;  %v2312_v8 = vadd.f32 1e-05, %v2296_v4  ;;  %v2280_v38 = vpop.xlane.xlu0 %2279 }
 0x907   : > { %2397 = vst [vmem:[%s5914_s24] sm:$0xff] %v2381_v52  ;;  %v2382_v15 = vadd.f32 %v6407_v61, %v2359_v37  ;;  %v2364_v51 = vmul.f32 %v6404_v0, %v2341_v1  ;;  %v2342_v50 = vmul.f32 %v4538_v22, %v6331_v62  ;;  %v2299_v39 = vmul.f32 0.03125, %v2280_v38 }
 0x908   : > { %v4540_v46 = vpop.eup %4539  ;;  %4549 = vrsqrt.f32 %v2312_v8  ;;  %v2282_v60 = vpop.xlane.xlu1 %2281 }
 0x909   : > { %2398 = vst [vmem:[%s5914_s24 + $0x8] sm:$0xff] %v2382_v15  ;;  %v2387_v47 = vadd.f32 %v6407_v61, %v2364_v51  ;;  %v2365_v56 = vmul.f32 %v6404_v0, %v2342_v50  ;;  %v2339_v53 = vmul.f32 %v4540_v46, %v6338_v6  ;;  %v2315_v10 = vadd.f32 1e-05, %v2299_v39 }
 0x90a   : > { %v4542_v2 = vpop.eup %4541  ;;  %v2300_v59 = vmul.f32 0.03125, %v2282_v60  ;;  %v2284_v49 = vpop.xlane.xlu0 %2283 }
 0x90b   : > { %2403 = vst [vmem:[%s5914_s24 + $0x30] sm:$0xff] %v2387_v47  ;;  %v2388_v26 = vadd.f32 %v6407_v61, %v2365_v56  ;;  %v2362_v62 = vmul.f32 %v6404_v0, %v2339_v53  ;;  %v2340_v57 = vmul.f32 %v4542_v2, %v6345_v63  ;;  %4551 = vrsqrt.f32 %v2315_v10 }
 0x90c   : > { %v4544_v9 = vpop.eup %4543  ;;  %v2316_v19 = vadd.f32 1e-05, %v2300_v59  ;;  %v2301_v11 = vmul.f32 0.03125, %v2284_v49  ;;  %v2286_v35 = vpop.xlane.xlu1 %2285 }
 0x90d   : > { %2404 = vst [vmem:[%s5914_s24 + $0x38] sm:$0xff] %v2388_v26  ;;  %v2385_v6 = vadd.f32 %v6407_v61, %v2362_v62  ;;  %v2363_v13 = vmul.f32 %v6404_v0, %v2340_v57  ;;  %v2345_v58 = vmul.f32 %v4544_v9, %v6352_v12  ;;  %v2302_v14 = vmul.f32 0.03125, %v2286_v35 }
 0x90e   : > { %v4546_v48 = vpop.eup %4545  ;;  %4553 = vrsqrt.f32 %v2316_v19  ;;  %v2317_v42 = vadd.f32 1e-05, %v2301_v11 }
 0x90f   : > { %2401 = vst [vmem:[%s5914_s24 + $0x20] sm:$0xff] %v2385_v6  ;;  %v2386_v63 = vadd.f32 %v6407_v61, %v2363_v13  ;;  %v2368_v18 = vmul.f32 %v6404_v0, %v2345_v58  ;;  %v2346_v23 = vmul.f32 %v4546_v48, %v6359_v20  ;;  %v2318_v21 = vadd.f32 1e-05, %v2302_v14 }
 0x910   : > { %v4548_v33 = vpop.eup %4547  ;;  %4555 = vrsqrt.f32 %v2317_v42 }
 0x911   : > { %2402 = vst [vmem:[%s5914_s24 + $0x28] sm:$0xff] %v2386_v63  ;;  %v2391_v12 = vadd.f32 %v6407_v61, %v2368_v18  ;;  %v2369_v24 = vmul.f32 %v6404_v0, %v2346_v23  ;;  %v2343_v54 = vmul.f32 %v4548_v33, %v6366_v7  ;;  %4557 = vrsqrt.f32 %v2318_v21 }
 0x912   : > { %v4550_v28 = vpop.eup %4549 }
 0x913   : > { %2407 = vst [vmem:[%s5914_s24 + $0x50] sm:$0xff] %v2391_v12  ;;  %v2392_v29 = vadd.f32 %v6407_v61, %v2369_v24  ;;  %v2366_v25 = vmul.f32 %v6404_v0, %v2343_v54  ;;  %v2344_v20 = vmul.f32 %v4550_v28, %v6372_v55 }
 0x915   : > { %v4552_v5 = vpop.eup %4551  ;;  %2408 = vst [vmem:[%s5914_s24 + $0x58] sm:$0xff] %v2392_v29  ;;  %v2389_v34 = vadd.f32 %v6407_v61, %v2366_v25  ;;  %v2367_v4 = vmul.f32 %v6404_v0, %v2344_v20 }
 0x916   : > { %v2347_v52 = vmul.f32 %v4552_v5, %v6380_v3 }
 0x917   : > { %2405 = vst [vmem:[%s5914_s24 + $0x40] sm:$0xff] %v2389_v34  ;;  %v2390_v7 = vadd.f32 %v6407_v61, %v2367_v4 }
 0x918   : > { %v4554_v37 = vpop.eup %4553  ;;  %v2370_v1 = vmul.f32 %v6404_v0, %v2347_v52 }
 0x919   : > { %2406 = vst [vmem:[%s5914_s24 + $0x48] sm:$0xff] %v2390_v7  ;;  %v2348_v55 = vmul.f32 %v4554_v37, %v6387_v16 }
 0x91a   : > { %v4556_v22 = vpop.eup %4555  ;;  %v2393_v8 = vadd.f32 %v6407_v61, %v2370_v1 }
 0x91b   : > { %v4558_v38 = vpop.eup %4557  ;;  %v2371_v15 = vmul.f32 %v6404_v0, %v2348_v55  ;;  %v2349_v3 = vmul.f32 %v4556_v22, %v6394_v17 }
 0x91c   : > { %2409 = vst [vmem:[%s5914_s24 + $0x60] sm:$0xff] %v2393_v8  ;;  %v2350_v51 = vmul.f32 %v4558_v38, %v6400_v30 }
 0x91d   : > { %v2394_v50 = vadd.f32 %v6407_v61, %v2371_v15  ;;  %v2372_v39 = vmul.f32 %v6404_v0, %v2349_v3 }
 0x91e   : > { %v2373_v46 = vmul.f32 %v6404_v0, %v2350_v51 }
 0x91f   : > { %2410 = vst [vmem:[%s5914_s24 + $0x68] sm:$0xff] %v2394_v50  ;;  %v2395_v16 = vadd.f32 %v6407_v61, %v2372_v39 }
 0x920   : > { %v2396_v60 = vadd.f32 %v6407_v61, %v2373_v46 }
 0x921   : > { %2411 = vst [vmem:[%s5914_s24 + $0x70] sm:$0xff] %v2395_v16 }
 0x922   : > { %2412 = vst [vmem:[%s5914_s24 + $0x78] sm:$0xff] %v2396_v60 }
 0x923 PF: > { %s6839_s30 = sld [smem:[#allocation49_spill]] }
 0x929   : > { %p3615_p10 = scmp.ne.s32.totalorder %s6839_s30, 2 }
 0x92a   : > { %v4559_v17 = vld [vmem:[#allocation23] sm:$0xff] (!%p3615_p10)   ;;  %4069 = vmatprep.mubr.bf16.mxu0 (!%p3615_p10), %v5973_v27  ;;  %4101 = vmatprep.mubr.bf16.mxu1 (!%p3615_p10), %v5973_v27  ;;  %v4560_v30 = vld [vmem:[#allocation23 + $0x8] sm:$0xff] (!%p3615_p10)   ;;  %v4561_v0 = vld [vmem:[#allocation23 + $0x10] sm:$0xff] (!%p3615_p10)  }
 0x92b   : > { %2416 = sbr.rel (%p3615_p10) target bundleno = 3378 (0xd32), region = 160  ;;  %4053 = vmatprep.subr.bf16.mxu0 (!%p3615_p10), %v4559_v17  ;;  %v4562_v47 = vld [vmem:[#allocation23 + $0x18] sm:$0xff] (!%p3615_p10)   ;;  %v4567_v61 = vld [vmem:[#allocation26] sm:$0xff] (!%p3615_p10)   ;;  %v4568_v56 = vld [vmem:[#allocation26 + $0x8] sm:$0xff] (!%p3615_p10)  }
 0x92c   : > { %4054 = vmatpush3.bf16.msra.mxu0 (!%p3615_p10), %v4559_v17  ;;  %4085 = vmatprep.subr.bf16.mxu1 (!%p3615_p10), %v4567_v61  ;;  %v4563_v53 = vld [vmem:[#allocation23 + $0x20] sm:$0xff] (!%p3615_p10)   ;;  %v4569_v10 = vld [vmem:[#allocation26 + $0x10] sm:$0xff] (!%p3615_p10)   ;;  %v4564_v2 = vld [vmem:[#allocation23 + $0x28] sm:$0xff] (!%p3615_p10)  }
 0x92d   : > { %4055 = vmatprep.subr.bf16.mxu0 (!%p3615_p10), %v4560_v30  ;;  %4086 = vmatpush3.bf16.msra.mxu1 (!%p3615_p10), %v4567_v61  ;;  %v4570_v27 = vld [vmem:[#allocation26 + $0x18] sm:$0xff] (!%p3615_p10)   ;;  %v4565_v59 = vld [vmem:[#allocation23 + $0x30] sm:$0xff] (!%p3615_p10)   ;;  %v4571_v49 = vld [vmem:[#allocation26 + $0x20] sm:$0xff] (!%p3615_p10)  }
 0x92e   : > { %4087 = vmatprep.subr.bf16.mxu1 (!%p3615_p10), %v4568_v56  ;;  %v4566_v26 = vld [vmem:[#allocation23 + $0x38] sm:$0xff] (!%p3615_p10)   ;;  %v4572_v62 = vld [vmem:[#allocation26 + $0x28] sm:$0xff] (!%p3615_p10)   ;;  %v6495_v24 = vld [vmem:[#allocation28] ss:$0 sm:$0xff] (!%p3615_p10) }
 0x92f   : > { %v4573_v57 = vld [vmem:[#allocation26 + $0x30] sm:$0xff] (!%p3615_p10)   ;;  %v4575_v9 = vld [vmem:[#allocation29] sm:$0xff] (!%p3615_p10)   ;;  %v4574_v19 = vld [vmem:[#allocation26 + $0x38] sm:$0xff] (!%p3615_p10)  }
 0x930   : > { %4056 = vmatpush3.bf16.msra.mxu0 (!%p3615_p10), %v4560_v30  ;;  %v4576_v11 = vld [vmem:[#allocation29 + $0x8] sm:$0xff] (!%p3615_p10)   ;;  %v4577_v35 = vld [vmem:[#allocation29 + $0x10] sm:$0xff] (!%p3615_p10)   ;;  %v4578_v6 = vld [vmem:[#allocation29 + $0x18] sm:$0xff] (!%p3615_p10)  }
 0x931   : > { %4057 = vmatprep.subr.bf16.mxu0 (!%p3615_p10), %v4561_v0  ;;  %4088 = vmatpush3.bf16.msra.mxu1 (!%p3615_p10), %v4568_v56  ;;  %v4579_v13 = vld [vmem:[#allocation29 + $0x20] sm:$0xff] (!%p3615_p10)   ;;  %v4580_v58 = vld [vmem:[#allocation29 + $0x28] sm:$0xff] (!%p3615_p10)  }
 0x932   : > { %4089 = vmatprep.subr.bf16.mxu1 %v4569_v10 }
 0x934   : > { %4058 = vmatpush3.bf16.msra.mxu0 %v4561_v0 }
 0x935   : > { %4059 = vmatprep.subr.bf16.mxu0 %v4562_v47  ;;  %4090 = vmatpush3.bf16.msra.mxu1 %v4569_v10 }
 0x936   : > { %4091 = vmatprep.subr.bf16.mxu1 %v4570_v27 }
 0x938   : > { %4060 = vmatpush3.bf16.msra.mxu0 %v4562_v47 }
 0x939   : > { %4061 = vmatprep.subr.bf16.mxu0 %v4563_v53  ;;  %4092 = vmatpush3.bf16.msra.mxu1 %v4570_v27 }
 0x93a   : > { %4093 = vmatprep.subr.bf16.mxu1 %v4571_v49 }
 0x93c   : > { %4062 = vmatpush3.bf16.msra.mxu0 %v4563_v53 }
 0x93d   : > { %4063 = vmatprep.subr.bf16.mxu0 %v4564_v2  ;;  %4094 = vmatpush3.bf16.msra.mxu1 %v4571_v49 }
 0x93e   : > { %4095 = vmatprep.subr.bf16.mxu1 %v4572_v62 }
 0x940   : > { %4064 = vmatpush3.bf16.msra.mxu0 %v4564_v2 }
 0x941   : > { %4065 = vmatprep.subr.bf16.mxu0 %v4565_v59  ;;  %4096 = vmatpush3.bf16.msra.mxu1 %v4572_v62 }
 0x942   : > { %4097 = vmatprep.subr.bf16.mxu1 %v4573_v57 }
 0x944   : > { %4066 = vmatpush3.bf16.msra.mxu0 %v4565_v59 }
 0x945   : > { %4067 = vmatprep.subr.bf16.mxu0 %v4566_v26  ;;  %4098 = vmatpush3.bf16.msra.mxu1 %v4573_v57 }
 0x946   : > { %4099 = vmatprep.subr.bf16.mxu1 %v4574_v19 }
 0x948   : > { %4068 = vmatpush3.bf16.msra.mxu0 %v4566_v26 }
 0x949   : > { %4117 = vmatprep.subr.bf16.mxu0 %v4575_v9  ;;  %4100 = vmatpush3.bf16.msra.mxu1 %v4574_v19 }
 0x94b   : > { %4070 = vmatmul.mubr.bf16.vlgmr.msra.gmra.mrb[0].mxu0 %v5986_v31 }
 0x94c   : > { %4073 = vmatprep.mubr.bf16.mxu0 %v5990_v32  ;;  %4118 = vmatpush3.bf16.msra.mxu0 %v4575_v9 }
 0x94d   : > { %4119 = vmatprep.subr.bf16.mxu0 %v4576_v11  ;;  %4102 = vmatmul.mubr.bf16.vlgmr.msra.gmra.mrb[0].mxu1 %v5986_v31  ;;  %v4581_v31 = vld [vmem:[#allocation29 + $0x30] sm:$0xff]  }
 0x94e   : > { %4105 = vmatprep.mubr.bf16.mxu1 %v5990_v32  ;;  %v4582_v32 = vld [vmem:[#allocation29 + $0x38] sm:$0xff]  }
 0x950   : > { %4120 = vmatpush3.bf16.msra.mxu0 %v4576_v11 }
 0x951   : > { %4121 = vmatprep.subr.bf16.mxu0 %v4577_v35 }
 0x953   : > { %4074 = vmatmul.mubr.bf16.gmra.mrb[4].mxu0 %v6003_v36 }
 0x954   : > { %4077 = vmatprep.mubr.bf16.mxu0 %v6016_v40  ;;  %4122 = vmatpush3.bf16.msra.mxu0 %v4577_v35 }
 0x955   : > { %4123 = vmatprep.subr.bf16.mxu0 %v4578_v6  ;;  %4106 = vmatmul.mubr.bf16.gmra.mrb[4].mxu1 %v6003_v36  ;;  %v6489_v36 = vld [vmem:[#allocation25] ss:$0 sm:$0xff] }
 0x956   : > { %4109 = vmatprep.mubr.bf16.mxu1 %v6016_v40 }
 0x958   : > { %4124 = vmatpush3.bf16.msra.mxu0 %v4578_v6 }
 0x959   : > { %4125 = vmatprep.subr.bf16.mxu0 %v4579_v13 }
 0x95b   : > { %4078 = vmatmul.mubr.bf16.gmra.mrb[8].mxu0 %v6020_v41 }
 0x95c   : > { %4081 = vmatprep.mubr.bf16.mxu0 %v6027_v43  ;;  %4126 = vmatpush3.bf16.msra.mxu0 %v4579_v13 }
 0x95d   : > { %4127 = vmatprep.subr.bf16.mxu0 %v4580_v58  ;;  %4110 = vmatmul.mubr.bf16.gmra.mrb[8].mxu1 %v6020_v41 }
 0x95e   : > { %4113 = vmatprep.mubr.bf16.mxu1 %v6027_v43 }
 0x960   : > { %4128 = vmatpush3.bf16.msra.mxu0 %v4580_v58 }
 0x961   : > { %4129 = vmatprep.subr.bf16.mxu0 %v4581_v31 }
 0x963   : > { %4082 = vmatmul.mubr.bf16.gmra.mrb[12].mxu0 %v6033_v45 }
 0x964   : > { %4130 = vmatpush3.bf16.msra.mxu0 %v4581_v31 }
 0x965   : > { %4114 = vmatmul.mubr.bf16.gmra.mrb[12].mxu1 %v6033_v45  ;;  %4131 = vmatprep.subr.bf16.mxu0 %v4582_v32 }
 0x968   : > { %4132 = vmatpush3.bf16.msra.mxu0 %v4582_v32 }
 0xa1e   : > { %v4071_v40 = vpop.f32.mrb[0].mxu0 }
 0xa1f   : > { %v2564_v14 = vadd.f32 %v4071_v40, %v6489_v36  ;;  %v2555_v48 = vpop.f32.mrb[1].mxu0 }
 0xa20   : > { %v2556_v42 = vadd.f32 %v6489_v36, %v2555_v48  ;;  %v4072_v63 = vpop.f32.mrb[2].mxu0  ;;  %v4103_v29 = vpop.f32.mrb[0].mxu1 }
 0xa21   : > { %v2567_v41 = vadd.f32 %v4072_v63, %v6489_v36  ;;  %v2558_v43 = vpop.f32.mrb[3].mxu0  ;;  %v2620_v18 = vmax.f32 %v2564_v14, 0.0  ;;  %v2731_v5 = vadd.f32 %v4103_v29, %v6495_v24  ;;  %v2722_v34 = vpop.f32.mrb[1].mxu1 }
 0xa22   : > { %v2559_v45 = vadd.f32 %v6489_v36, %v2558_v43  ;;  %v2618_v21 = vmax.f32 %v2556_v42, 0.0  ;;  %v2723_v7 = vadd.f32 %v6495_v24, %v2722_v34  ;;  %v4104_v37 = vpop.f32.mrb[2].mxu1 }
 0xa23   : > { %v2621_v23 = vmax.f32 %v2567_v41, 0.0  ;;  %v2787_v8 = vmax.f32 %v2731_v5, 0.0  ;;  %v2734_v38 = vadd.f32 %v4104_v37, %v6495_v24  ;;  %v2725_v15 = vpop.f32.mrb[3].mxu1 }
 0xa24   : > { %v2619_v33 = vmax.f32 %v2559_v45, 0.0  ;;  %v2785_v51 = vmax.f32 %v2723_v7, 0.0  ;;  %v2726_v50 = vadd.f32 %v6495_v24, %v2725_v15 }
 0xa25   : > { %v2802_v12 = vpack.c.bf16 %v2621_v23, %v2620_v18  ;;  %v2788_v46 = vmax.f32 %v2734_v38, 0.0 }
 0xa26   : > { %v2801_v54 = vpack.c.bf16 %v2619_v33, %v2618_v21  ;;  %v4075_v28 = vpop.f32.mrb[4].mxu0  ;;  %v2786_v17 = vmax.f32 %v2726_v50, 0.0 }
 0xa27   : > { %v2580_v25 = vadd.f32 %v4075_v28, %v6489_v36  ;;  %v2571_v20 = vpop.f32.mrb[5].mxu0  ;;  %v2963_v0 = vpack.c.bf16 %v2788_v46, %v2787_v8 }
 0xa28   : > { %v2572_v4 = vadd.f32 %v6489_v36, %v2571_v20  ;;  %v4076_v52 = vpop.f32.mrb[6].mxu0  ;;  %4133 = vmatprep.mubr.bf16.mxu0 %v2801_v54  ;;  %v2962_v56 = vpack.c.bf16 %v2786_v17, %v2785_v51  ;;  %v4107_v53 = vpop.f32.mrb[4].mxu1 }
 0xa29   : > { %v2624_v1 = vmax.f32 %v2580_v25, 0.0  ;;  %v2583_v55 = vadd.f32 %v4076_v52, %v6489_v36  ;;  %v2574_v22 = vpop.f32.mrb[7].mxu0  ;;  %4134 = vmatmul.mubr.bf16.vlgmr.msra.gmra.mrb[16].mxu0 %v2802_v12  ;;  %v2747_v27 = vadd.f32 %v4107_v53, %v6495_v24  ;;  %v2738_v59 = vpop.f32.mrb[5].mxu1 }
 0xa2a   : > { %v2575_v3 = vadd.f32 %v6489_v36, %v2574_v22  ;;  %v2622_v16 = vmax.f32 %v2572_v4, 0.0  ;;  %4149 = vmatprep.subr.bf16.mxu1 %v2962_v56  ;;  %v2739_v62 = vadd.f32 %v6495_v24, %v2738_v59  ;;  %v4108_v57 = vpop.f32.mrb[6].mxu1 }
 0xa2b   : > { %v2625_v39 = vmax.f32 %v2583_v55, 0.0  ;;  %4150 = vmatpush3.bf16.xpose.msra.mxu1 %v2962_v56  ;;  %v2791_v35 = vmax.f32 %v2747_v27, 0.0  ;;  %v2750_v6 = vadd.f32 %v4108_v57, %v6495_v24  ;;  %v2741_v13 = vpop.f32.mrb[7].mxu1 }
 0xa2c   : > { %v2623_v60 = vmax.f32 %v2575_v3, 0.0  ;;  %v2789_v31 = vmax.f32 %v2739_v62, 0.0  ;;  %4151 = vmatprep.subr.bf16.mxu1 %v2963_v0  ;;  %v2742_v32 = vadd.f32 %v6495_v24, %v2741_v13 }
 0xa2d   : > { %v2804_v30 = vpack.c.bf16 %v2625_v39, %v2624_v1  ;;  %v2792_v14 = vmax.f32 %v2750_v6, 0.0 }
 0xa2e   : > { %v2803_v47 = vpack.c.bf16 %v2623_v60, %v2622_v16  ;;  %v4079_v61 = vpop.f32.mrb[8].mxu0  ;;  %v2790_v63 = vmax.f32 %v2742_v32, 0.0 }
 0xa2f   : > { %v2596_v10 = vadd.f32 %v4079_v61, %v6489_v36  ;;  %v2587_v2 = vpop.f32.mrb[9].mxu0  ;;  %v2965_v43 = vpack.c.bf16 %v2792_v14, %v2791_v35 }
 0xa30   : > { %v2588_v49 = vadd.f32 %v6489_v36, %v2587_v2  ;;  %v4080_v26 = vpop.f32.mrb[10].mxu0  ;;  %4137 = vmatprep.mubr.bf16.mxu0 %v2803_v47  ;;  %v2964_v23 = vpack.c.bf16 %v2790_v63, %v2789_v31  ;;  %v4111_v21 = vpop.f32.mrb[8].mxu1 }
 0xa31   : > { %v2628_v9 = vmax.f32 %v2596_v10, 0.0  ;;  %v2599_v19 = vadd.f32 %v4080_v26, %v6489_v36  ;;  %v2590_v11 = vpop.f32.mrb[11].mxu0  ;;  %4138 = vmatmul.mubr.bf16.gmra.mrb[20].mxu0 %v2804_v30  ;;  %v2763_v54 = vadd.f32 %v4111_v21, %v6495_v24  ;;  %v2754_v28 = vpop.f32.mrb[9].mxu1 }
 0xa32   : > { %v2591_v58 = vadd.f32 %v6489_v36, %v2590_v11  ;;  %v2626_v48 = vmax.f32 %v2588_v49, 0.0  ;;  %v2755_v20 = vadd.f32 %v6495_v24, %v2754_v28  ;;  %v4112_v5 = vpop.f32.mrb[10].mxu1 }
 0xa33   : > { %v2629_v40 = vmax.f32 %v2599_v19, 0.0  ;;  %4152 = vmatpush3.bf16.xpose.msra.mxu1 %v2963_v0  ;;  %v2795_v7 = vmax.f32 %v2763_v54, 0.0  ;;  %v2766_v37 = vadd.f32 %v4112_v5, %v6495_v24  ;;  %v2757_v1 = vpop.f32.mrb[11].mxu1 }
 0xa34   : > { %v2627_v42 = vmax.f32 %v2591_v58, 0.0  ;;  %4153 = vmatprep.subr.bf16.mxu1 %v2964_v23  ;;  %v2793_v22 = vmax.f32 %v2755_v20, 0.0  ;;  %v2758_v8 = vadd.f32 %v6495_v24, %v2757_v1 }
 0xa35   : > { %v2806_v41 = vpack.c.bf16 %v2629_v40, %v2628_v9  ;;  %v2796_v15 = vmax.f32 %v2766_v37, 0.0 }
 0xa36   : > { %v2805_v45 = vpack.c.bf16 %v2627_v42, %v2626_v48  ;;  %v4083_v18 = vpop.f32.mrb[12].mxu0  ;;  %v2794_v50 = vmax.f32 %v2758_v8, 0.0 }
 0xa37   : > { %v2612_v33 = vadd.f32 %v4083_v18, %v6489_v36  ;;  %v2603_v12 = vpop.f32.mrb[13].mxu0  ;;  %v2967_v46 = vpack.c.bf16 %v2796_v15, %v2795_v7 }
 0xa38   : > { %v2604_v29 = vadd.f32 %v6489_v36, %v2603_v12  ;;  %v4084_v25 = vpop.f32.mrb[14].mxu0  ;;  %4141 = vmatprep.mubr.bf16.mxu0 %v2805_v45  ;;  %v2966_v60 = vpack.c.bf16 %v2794_v50, %v2793_v22  ;;  %v4115_v17 = vpop.f32.mrb[12].mxu1  ;;  %v2971_v12 = vlaneseq }
 0xa39   : > { %v2632_v34 = vmax.f32 %v2612_v33, 0.0  ;;  %v2615_v4 = vadd.f32 %v4084_v25, %v6489_v36  ;;  %v2606_v52 = vpop.f32.mrb[15].mxu0  ;;  %4142 = vmatmul.mubr.bf16.gmra.mrb[24].mxu0 %v2806_v41  ;;  %v2779_v30 = vadd.f32 %v4115_v17, %v6495_v24  ;;  %v2770_v0 = vpop.f32.mrb[13].mxu1 }
 0xa3a   : > { %v2607_v55 = vadd.f32 %v6489_v36, %v2606_v52  ;;  %v2630_v3 = vmax.f32 %v2604_v29, 0.0  ;;  %v2771_v36 = vadd.f32 %v6495_v24, %v2770_v0  ;;  %v4116_v47 = vpop.f32.mrb[14].mxu1  ;;  %v2972_v54 = vshrl.u32 %v2971_v12, 7 }
 0xa3b   : > { %v2633_v38 = vmax.f32 %v2615_v4, 0.0  ;;  %4154 = vmatpush3.bf16.xpose.msra.mxu1 %v2964_v23  ;;  %v2799_v61 = vmax.f32 %v2779_v30, 0.0  ;;  %v2782_v56 = vadd.f32 %v4116_v47, %v6495_v24  ;;  %v2773_v53 = vpop.f32.mrb[15].mxu1 }
 0xa3c   : > { %v2631_v51 = vmax.f32 %v2607_v55, 0.0  ;;  %4155 = vmatprep.subr.bf16.mxu1 %v2965_v43  ;;  %v2797_v10 = vmax.f32 %v2771_v36, 0.0  ;;  %v2774_v2 = vadd.f32 %v6495_v24, %v2773_v53  ;;  %v2973_v28 = vsub.s32 0, %v2972_v54 }
 0xa3d   : > { %v2808_v39 = vpack.c.bf16 %v2633_v38, %v2632_v34  ;;  %v2800_v27 = vmax.f32 %v2782_v56, 0.0 }
 0xa3e   : > { %v2807_v16 = vpack.c.bf16 %v2631_v51, %v2630_v3  ;;  %v2798_v59 = vmax.f32 %v2774_v2, 0.0  ;;  %v2974_v29 = vrot.slane %v6029_v44, %v2973_v28 }
 0xa3f   : > { %v2969_v49 = vpack.c.bf16 %v2800_v27, %v2799_v61 }
 0xa40   : > { %4145 = vmatprep.mubr.bf16.mxu0 %v2807_v16  ;;  %v2968_v26 = vpack.c.bf16 %v2798_v59, %v2797_v10 }
 0xa41   : > { %4146 = vmatmul.mubr.bf16.gmra.mrb[28].mxu0 %v2808_v39 }
 0xa43   : > { %4156 = vmatpush3.bf16.xpose.msra.mxu1 %v2965_v43 }
 0xa44   : > { %4157 = vmatprep.subr.bf16.mxu1 %v2966_v60 }
 0xa4b   : > { %4158 = vmatpush3.bf16.xpose.msra.mxu1 %v2966_v60 }
 0xa4c   : > { %4159 = vmatprep.subr.bf16.mxu1 %v2967_v46 }
 0xa53   : > { %4160 = vmatpush3.bf16.xpose.msra.mxu1 %v2967_v46 }
 0xa54   : > { %4161 = vmatprep.subr.bf16.mxu1 %v2968_v26 }
 0xa5b   : > { %4162 = vmatpush3.bf16.xpose.msra.mxu1 %v2968_v26 }
 0xa5c   : > { %4163 = vmatprep.subr.bf16.mxu1 %v2969_v49 }
 0xa63   : > { %4164 = vmatpush3.bf16.xpose.msra.mxu1 %v2969_v49 }
 0xafc   : > { %v4135_v62 = vpop.f32.mrb[16].mxu0 }
 0xafd   : > { %v2891_v57 = vpop.f32.mrb[17].mxu0 }
 0xafe   : > { %v4136_v9 = vpop.f32.mrb[18].mxu0 }
 0xaff   : > { %v2955_v19 = vpack.c.bf16 %v4136_v9, %v4135_v62  ;;  %v2894_v11 = vpop.f32.mrb[19].mxu0 }
 0xb00   : > { %v2954_v35 = vpack.c.bf16 %v2894_v11, %v2891_v57 }
 0xb02   : > { %4165 = vmatprep.mubr.bf16.mxu1 %v2954_v35 }
 0xb03   : > { %4166 = vmatmul.mubr.bf16.vlgmr.msra.gmra.mrb[16].mxu1 %v2955_v19 }
 0xb04   : > { %v4139_v24 = vpop.f32.mrb[20].mxu0 }
 0xb05   : > { %v2907_v6 = vpop.f32.mrb[21].mxu0 }
 0xb06   : > { %v4140_v13 = vpop.f32.mrb[22].mxu0 }
 0xb07   : > { %v2957_v58 = vpack.c.bf16 %v4140_v13, %v4139_v24  ;;  %v2910_v31 = vpop.f32.mrb[23].mxu0 }
 0xb08   : > { %v2956_v32 = vpack.c.bf16 %v2910_v31, %v2907_v6 }
 0xb0a   : > { %4169 = vmatprep.mubr.bf16.mxu1 %v2956_v32 }
 0xb0b   : > { %4170 = vmatmul.mubr.bf16.gmra.mrb[20].mxu1 %v2957_v58 }
 0xb0c   : > { %v4143_v40 = vpop.f32.mrb[24].mxu0 }
 0xb0d   : > { %v2923_v14 = vpop.f32.mrb[25].mxu0 }
 0xb0e   : > { %v4144_v48 = vpop.f32.mrb[26].mxu0 }
 0xb0f   : > { %v2959_v42 = vpack.c.bf16 %v4144_v48, %v4143_v40  ;;  %v2926_v63 = vpop.f32.mrb[27].mxu0 }
 0xb10   : > { %v2958_v41 = vpack.c.bf16 %v2926_v63, %v2923_v14 }
 0xb12   : > { %4173 = vmatprep.mubr.bf16.mxu1 %v2958_v41 }
 0xb13   : > { %4174 = vmatmul.mubr.bf16.gmra.mrb[24].mxu1 %v2959_v42 }
 0xb14   : > { %v4147_v43 = vpop.f32.mrb[28].mxu0 }
 0xb15   : > { %v2939_v45 = vpop.f32.mrb[29].mxu0 }
 0xb16   : > { %v4148_v18 = vpop.f32.mrb[30].mxu0 }
 0xb17   : > { %v2961_v23 = vpack.c.bf16 %v4148_v18, %v4147_v43  ;;  %v2942_v21 = vpop.f32.mrb[31].mxu0 }
 0xb18   : > { %v2960_v33 = vpack.c.bf16 %v2942_v21, %v2939_v45 }
 0xb1a   : > { %4177 = vmatprep.mubr.bf16.mxu1 %v2960_v33 }
 0xb1b   : > { %4178 = vmatmul.mubr.bf16.gmra.mrb[28].mxu1 %v2961_v23 }
 0xbd6   : > { %v4167_v25 = vpop.f32.mrb[16].mxu1 }
 0xbd7   : > { %v3019_v20 = vadd.f32 %v4167_v25, %v2974_v29  ;;  %v3010_v5 = vpop.f32.mrb[17].mxu1 }
 0xbd8   : > { %v3011_v34 = vadd.f32 %v3010_v5, %v2974_v29  ;;  %v4168_v4 = vpop.f32.mrb[18].mxu1 }
 0xbd9   : > { %3077 = vmax.xlane.f32.xlu1 %v3019_v20  ;;  %v3013_v52 = vpop.f32.mrb[19].mxu1  ;;  %v3022_v7 = vadd.f32 %v4168_v4, %v2974_v29 }
 0xbda   : > { %3073 = vmax.xlane.f32.xlu0 %v3011_v34  ;;  %v3014_v37 = vadd.f32 %v3013_v52, %v2974_v29 }
 0xbdd   : > { %3079 = vmax.xlane.f32.xlu1 %v3022_v7 }
 0xbde   : > { %3075 = vmax.xlane.f32.xlu0 %v3014_v37  ;;  %v4171_v1 = vpop.f32.mrb[20].mxu1 }
 0xbdf   : > { %v3035_v55 = vadd.f32 %v4171_v1, %v2974_v29  ;;  %v3026_v22 = vpop.f32.mrb[21].mxu1 }
 0xbe0   : > { %v4172_v8 = vpop.f32.mrb[22].mxu1  ;;  %v3027_v44 = vadd.f32 %v3026_v22, %v2974_v29 }
 0xbe1   : > { %v3038_v38 = vadd.f32 %v4172_v8, %v2974_v29  ;;  %v3029_v15 = vpop.f32.mrb[23].mxu1 }
 0xbe2   : > { %3085 = vmax.xlane.f32.xlu0 %v3035_v55  ;;  %v3030_v3 = vadd.f32 %v3029_v15, %v2974_v29 }
 0xbe3   : > { %3087 = vmax.xlane.f32.xlu1 %v3038_v38 }
 0xbe6   : > { %3081 = vmax.xlane.f32.xlu0 %v3027_v44  ;;  %v4175_v51 = vpop.f32.mrb[24].mxu1 }
 0xbe7   : > { %v6526_v50 = vadd.f32 %v4175_v51, %v2974_v29  ;;  %3083 = vmax.xlane.f32.xlu1 %v3030_v3  ;;  %v3042_v39 = vpop.f32.mrb[25].mxu1 }
 0xbe8   : > { %v4176_v46 = vpop.f32.mrb[26].mxu1  ;;  %v6532_v17 = vadd.f32 %v3042_v39, %v2974_v29 }
 0xbe9   : > { %v6528_v16 = vadd.f32 %v4176_v46, %v2974_v29  ;;  %v3045_v60 = vpop.f32.mrb[27].mxu1 }
 0xbea   : > { %3093 = vmax.xlane.f32.xlu0 %v6526_v50  ;;  %v6534_v30 = vadd.f32 %v3045_v60, %v2974_v29 }
 0xbeb   : > { %3095 = vmax.xlane.f32.xlu1 %v6528_v16 }
 0xbee   : > { %3089 = vmax.xlane.f32.xlu0 %v6532_v17  ;;  %v4179_v0 = vpop.f32.mrb[28].mxu1 }
 0xbef   : > { %3091 = vmax.xlane.f32.xlu1 %v6534_v30  ;;  %v3058_v36 = vpop.f32.mrb[29].mxu1  ;;  %v6543_v10 = vadd.f32 %v4179_v0, %v2974_v29 }
 0xbf0   : > { %v6538_v47 = vadd.f32 %v3058_v36, %v2974_v29  ;;  %v4180_v61 = vpop.f32.mrb[30].mxu1 }
 0xbf1   : > { %v3061_v56 = vpop.f32.mrb[31].mxu1  ;;  %v6546_v2 = vadd.f32 %v4180_v61, %v2974_v29 }
 0xbf2   : > { %v6540_v53 = vadd.f32 %v3061_v56, %v2974_v29  ;;  %3097 = vmax.xlane.f32.xlu0 %v6538_v47 }
 0xbf4   : > { %3099 = vmax.xlane.f32.xlu1 %v6540_v53 }
 0xbf6   : > { %3101 = vmax.xlane.f32.xlu0 %v6543_v10 }
 0xbf8   : > { %3103 = vmax.xlane.f32.xlu1 %v6546_v2 }
 0xc66   : > { %v3078_v27 = vpop.xlane.xlu1 %3077 }
 0xc67   : > { %v3107_v59 = vsub.f32 %v3019_v20, %v3078_v27  ;;  %v3074_v49 = vpop.xlane.xlu0 %3073 }
 0xc68   : > { %v3105_v26 = vsub.f32 %v3011_v34, %v3074_v49 }
 0xc69   : > { %v3125_v62 = vmul.f32 1.442695, %v3107_v59 }
 0xc6a   : > { %v3121_v57 = vmul.f32 1.442695, %v3105_v26  ;;  %v3080_v9 = vpop.xlane.xlu1 %3079 }
 0xc6b   : > { %4583 = vpow2.f32 %v3125_v62  ;;  %v3108_v19 = vsub.f32 %v3022_v7, %v3080_v9  ;;  %v3076_v11 = vpop.xlane.xlu0 %3075 }
 0xc6c   : > { %v3106_v35 = vsub.f32 %v3014_v37, %v3076_v11  ;;  %4585 = vpow2.f32 %v3121_v57 }
 0xc6d   : > { %v3127_v24 = vmul.f32 1.442695, %v3108_v19 }
 0xc6e   : > { %v3123_v6 = vmul.f32 1.442695, %v3106_v35 }
 0xc6f   : > { %4587 = vpow2.f32 %v3127_v24  ;;  %v3086_v13 = vpop.xlane.xlu0 %3085 }
 0xc70   : > { %v3111_v58 = vsub.f32 %v3035_v55, %v3086_v13  ;;  %v3088_v31 = vpop.xlane.xlu1 %3087  ;;  %4589 = vpow2.f32 %v3123_v6 }
 0xc71   : > { %v3112_v32 = vsub.f32 %v3038_v38, %v3088_v31 }
 0xc72   : > { %v3133_v40 = vmul.f32 1.442695, %v3111_v58 }
 0xc73   : > { %v3135_v14 = vmul.f32 1.442695, %v3112_v32  ;;  %v3082_v48 = vpop.xlane.xlu0 %3081 }
 0xc74   : > { %4591 = vpow2.f32 %v3133_v40  ;;  %v3109_v42 = vsub.f32 %v3027_v44, %v3082_v48  ;;  %v3084_v63 = vpop.xlane.xlu1 %3083 }
 0xc75   : > { %v6550_v41 = vpop.eup %4583  ;;  %v3110_v43 = vsub.f32 %v3030_v3, %v3084_v63  ;;  %4593 = vpow2.f32 %v3135_v14 }
 0xc76   : > { %v3129_v45 = vmul.f32 1.442695, %v3109_v42  ;;  %3157 = vadd.xlane.f32.xlu0 %v6550_v41  ;;  %v6553_v21 = vpop.eup %4585 }
 0xc77   : > { %v3131_v18 = vmul.f32 1.442695, %v3110_v43  ;;  %v3094_v23 = vpop.xlane.xlu0 %3093 }
 0xc78   : > { %4595 = vpow2.f32 %v3129_v45  ;;  %v3115_v33 = vsub.f32 %v6526_v50, %v3094_v23  ;;  %v3096_v12 = vpop.xlane.xlu1 %3095 }
 0xc79   : > { %v6556_v54 = vpop.eup %4587  ;;  %v3116_v28 = vsub.f32 %v6528_v16, %v3096_v12  ;;  %4597 = vpow2.f32 %v3131_v18 }
 0xc7a   : > { %v3141_v29 = vmul.f32 1.442695, %v3115_v33  ;;  %3159 = vadd.xlane.f32.xlu1 %v6556_v54  ;;  %3153 = vadd.xlane.f32.xlu0 %v6553_v21  ;;  %v6562_v4 = vpop.eup %4589 }
 0xc7b   : > { %v3143_v25 = vmul.f32 1.442695, %v3116_v28  ;;  %v3090_v20 = vpop.xlane.xlu0 %3089 }
 0xc7c   : > { %4599 = vpow2.f32 %v3141_v29  ;;  %v3113_v5 = vsub.f32 %v6532_v17, %v3090_v20  ;;  %v3092_v34 = vpop.xlane.xlu1 %3091 }
 0xc7d   : > { %v3114_v52 = vsub.f32 %v6534_v30, %v3092_v34  ;;  %4601 = vpow2.f32 %v3143_v25 }
 0xc7e   : > { %v6565_v7 = vpop.eup %4591  ;;  %v3137_v37 = vmul.f32 1.442695, %v3113_v5  ;;  %3155 = vadd.xlane.f32.xlu1 %v6562_v4 }
 0xc7f   : > { %v3139_v1 = vmul.f32 1.442695, %v3114_v52  ;;  %3165 = vadd.xlane.f32.xlu0 %v6565_v7  ;;  %v3098_v55 = vpop.xlane.xlu0 %3097  ;;  %v6570_v8 = vpop.eup %4593 }
 0xc80   : > { %4603 = vpow2.f32 %v3137_v37  ;;  %v3117_v22 = vsub.f32 %v6538_v47, %v3098_v55 }
 0xc81   : > { %v3100_v38 = vpop.xlane.xlu1 %3099  ;;  %4605 = vpow2.f32 %v3139_v1 }
 0xc82   : > { %v6572_v15 = vpop.eup %4595  ;;  %v3145_v44 = vmul.f32 1.442695, %v3117_v22  ;;  %v3118_v3 = vsub.f32 %v6540_v53, %v3100_v38  ;;  %3167 = vadd.xlane.f32.xlu1 %v6570_v8 }
 0xc83   : > { %3161 = vadd.xlane.f32.xlu0 %v6572_v15  ;;  %v3102_v51 = vpop.xlane.xlu0 %3101  ;;  %v6578_v46 = vpop.eup %4597 }
 0xc84   : > { %4607 = vpow2.f32 %v3145_v44  ;;  %v3147_v50 = vmul.f32 1.442695, %v3118_v3  ;;  %v3119_v39 = vsub.f32 %v6543_v10, %v3102_v51 }
 0xc85   : > { %v3104_v16 = vpop.xlane.xlu1 %3103 }
 0xc86   : > { %v6580_v60 = vpop.eup %4599  ;;  %4609 = vpow2.f32 %v3147_v50  ;;  %v3149_v17 = vmul.f32 1.442695, %v3119_v39  ;;  %v3120_v30 = vsub.f32 %v6546_v2, %v3104_v16  ;;  %3163 = vadd.xlane.f32.xlu1 %v6578_v46 }
 0xc87   : > { %3173 = vadd.xlane.f32.xlu0 %v6580_v60  ;;  %v6585_v36 = vpop.eup %4601 }
 0xc88   : > { %4611 = vpow2.f32 %v3149_v17  ;;  %v3151_v0 = vmul.f32 1.442695, %v3120_v30 }
 0xc8a   : > { %v6587_v47 = vpop.eup %4603  ;;  %4613 = vpow2.f32 %v3151_v0  ;;  %3175 = vadd.xlane.f32.xlu1 %v6585_v36 }
 0xc8b   : > { %3169 = vadd.xlane.f32.xlu0 %v6587_v47  ;;  %v6591_v61 = vpop.eup %4605 }
 0xc8e   : > { %v6593_v56 = vpop.eup %4607  ;;  %3171 = vadd.xlane.f32.xlu1 %v6591_v61 }
 0xc8f   : > { %3177 = vadd.xlane.f32.xlu0 %v6593_v56 }
 0xc90   : > { %v6597_v53 = vpop.eup %4609 }
 0xc92   : > { %v6599_v10 = vpop.eup %4611  ;;  %3179 = vadd.xlane.f32.xlu1 %v6597_v53 }
 0xc93   : > { %3181 = vadd.xlane.f32.xlu0 %v6599_v10 }
 0xc94   : > { %v6603_v2 = vpop.eup %4613 }
 0xc96   : > { %3183 = vadd.xlane.f32.xlu1 %v6603_v2 }
 0xd03   : > { %v3158_v27 = vpop.xlane.xlu0 %3157 }
 0xd04   : > { %4615 = vrcp.f32 %v3158_v27 }
 0xd07   : > { %v3160_v59 = vpop.xlane.xlu1 %3159  ;;  %v3154_v49 = vpop.xlane.xlu0 %3153 }
 0xd08   : > { %4617 = vrcp.f32 %v3160_v59 }
 0xd09   : > { %4619 = vrcp.f32 %v3154_v49 }
 0xd0b   : > { %v3156_v26 = vpop.xlane.xlu1 %3155 }
 0xd0c   : > { %4621 = vrcp.f32 %v3156_v26  ;;  %v3166_v62 = vpop.xlane.xlu0 %3165 }
 0xd0d   : > { %4623 = vrcp.f32 %v3166_v62 }
 0xd0e   : > { %v4616_v57 = vpop.eup %4615 }
 0xd0f   : > { %v3203_v9 = vmul.f32 %v4616_v57, %v6550_v41  ;;  %v3168_v19 = vpop.xlane.xlu1 %3167 }
 0xd10   : > { %4625 = vrcp.f32 %v3168_v19  ;;  %v3162_v11 = vpop.xlane.xlu0 %3161 }
 0xd11   : > { %3219 = vst [vmem:[%s5912_s5 + $0x10] sm:$0xff] %v3203_v9  ;;  %4627 = vrcp.f32 %v3162_v11 }
 0xd12   : > { %v4618_v35 = vpop.eup %4617 }
 0xd13   : > { %v4620_v24 = vpop.eup %4619  ;;  %v3204_v6 = vmul.f32 %v4618_v35, %v6556_v54  ;;  %v3164_v13 = vpop.xlane.xlu1 %3163 }
 0xd14   : > { %v3201_v58 = vmul.f32 %v4620_v24, %v6553_v21  ;;  %4629 = vrcp.f32 %v3164_v13  ;;  %v3174_v31 = vpop.xlane.xlu0 %3173 }
 0xd15   : > { %3220 = vst [vmem:[%s5912_s5 + $0x18] sm:$0xff] %v3204_v6  ;;  %4631 = vrcp.f32 %v3174_v31 }
 0xd16   : > { %v4622_v32 = vpop.eup %4621  ;;  %3217 = vst [vmem:[%s5912_s5] sm:$0xff] %v3201_v58 }
 0xd17   : > { %v4624_v40 = vpop.eup %4623  ;;  %v3202_v14 = vmul.f32 %v4622_v32, %v6562_v4  ;;  %v3176_v48 = vpop.xlane.xlu1 %3175 }
 0xd18   : > { %v3207_v42 = vmul.f32 %v4624_v40, %v6565_v7  ;;  %4633 = vrcp.f32 %v3176_v48  ;;  %v3170_v63 = vpop.xlane.xlu0 %3169 }
 0xd19   : > { %3218 = vst [vmem:[%s5912_s5 + $0x8] sm:$0xff] %v3202_v14  ;;  %4635 = vrcp.f32 %v3170_v63 }
 0xd1a   : > { %v4626_v41 = vpop.eup %4625  ;;  %3223 = vst [vmem:[%s5912_s5 + $0x30] sm:$0xff] %v3207_v42 }
 0xd1b   : > { %v4628_v43 = vpop.eup %4627  ;;  %v3208_v45 = vmul.f32 %v4626_v41, %v6570_v8  ;;  %v3172_v18 = vpop.xlane.xlu1 %3171 }
 0xd1c   : > { %v3205_v23 = vmul.f32 %v4628_v43, %v6572_v15  ;;  %4637 = vrcp.f32 %v3172_v18  ;;  %v3178_v21 = vpop.xlane.xlu0 %3177 }
 0xd1d   : > { %3224 = vst [vmem:[%s5912_s5 + $0x38] sm:$0xff] %v3208_v45  ;;  %4639 = vrcp.f32 %v3178_v21 }
 0xd1e   : > { %v4630_v33 = vpop.eup %4629  ;;  %3221 = vst [vmem:[%s5912_s5 + $0x20] sm:$0xff] %v3205_v23 }
 0xd1f   : > { %v4632_v12 = vpop.eup %4631  ;;  %v3206_v54 = vmul.f32 %v4630_v33, %v6578_v46  ;;  %v3180_v28 = vpop.xlane.xlu1 %3179 }
 0xd20   : > { %v3211_v29 = vmul.f32 %v4632_v12, %v6580_v60  ;;  %4641 = vrcp.f32 %v3180_v28  ;;  %v3182_v25 = vpop.xlane.xlu0 %3181 }
 0xd21   : > { %3222 = vst [vmem:[%s5912_s5 + $0x28] sm:$0xff] %v3206_v54  ;;  %4643 = vrcp.f32 %v3182_v25 }
 0xd22   : > { %v4634_v20 = vpop.eup %4633  ;;  %3227 = vst [vmem:[%s5912_s5 + $0x50] sm:$0xff] %v3211_v29 }
 0xd23   : > { %v4636_v5 = vpop.eup %4635  ;;  %v3212_v34 = vmul.f32 %v4634_v20, %v6585_v36  ;;  %v3184_v4 = vpop.xlane.xlu1 %3183 }
 0xd24   : > { %v3209_v52 = vmul.f32 %v4636_v5, %v6587_v47  ;;  %4645 = vrcp.f32 %v3184_v4 }
 0xd25   : > { %3228 = vst [vmem:[%s5912_s5 + $0x58] sm:$0xff] %v3212_v34 }
 0xd26   : > { %v4638_v7 = vpop.eup %4637  ;;  %3225 = vst [vmem:[%s5912_s5 + $0x40] sm:$0xff] %v3209_v52 }
 0xd27   : > { %v4640_v37 = vpop.eup %4639  ;;  %v3210_v1 = vmul.f32 %v4638_v7, %v6591_v61 }
 0xd28   : > { %v3213_v55 = vmul.f32 %v4640_v37, %v6593_v56 }
 0xd29   : > { %3226 = vst [vmem:[%s5912_s5 + $0x48] sm:$0xff] %v3210_v1 }
 0xd2a   : > { %v4642_v22 = vpop.eup %4641  ;;  %3229 = vst [vmem:[%s5912_s5 + $0x60] sm:$0xff] %v3213_v55 }
 0xd2b   : > { %v4644_v8 = vpop.eup %4643  ;;  %v3214_v38 = vmul.f32 %v4642_v22, %v6597_v53 }
 0xd2c   : > { %v3215_v15 = vmul.f32 %v4644_v8, %v6599_v10 }
 0xd2d   : > { %3230 = vst [vmem:[%s5912_s5 + $0x68] sm:$0xff] %v3214_v38 }
 0xd2e   : > { %v4646_v44 = vpop.eup %4645  ;;  %3231 = vst [vmem:[%s5912_s5 + $0x70] sm:$0xff] %v3215_v15 }
 0xd2f   : > { %v3216_v3 = vmul.f32 %v4646_v44, %v6603_v2 }
 0xd31   : > { %3232 = vst [vmem:[%s5912_s5 + $0x78] sm:$0xff] %v3216_v3 }
 0xd32 PF: > { %s6840_s27 = sld [smem:[#allocation50_spill]]  ;;  %s3252_s26 = sshll.u32 %s5912_s5, 4  ;;  %s6647_s26 = int_to_ptr.vmem [resolvable:$true] %s3252_s26 }
 0xd33   : > { %s6841_s3 = sld [smem:[#allocation66_spill]]  ;;  %s3234_s0 = scalar_lea.sflag [#allocation7], %s5870_s25 }
 0xd34   : > { %s5107_s29 = scalar_lea.vmem %s6647_s26, 2048  ;;  %p6842_p7 = scmp.ne.s32.totalorder %s6827_s2, 0 }
 0xd35   : > { %p5108_p1 = scmp.ne.s32.totalorder %s6647_s26, %s5107_s29  ;;  %s5295_s30 = smov [#allocation31]  }
 0xd36   : > { %s5111_s6 = sshll.u32 %s5295_s30, 4  ;;  %s5112_s6 = int_to_ptr.vmem [resolvable:$false] %s5111_s6 }
 0xd37   : > { %p5109_p12 = pnand %p5108_p1, %p6842_p7  ;;  %s5113_s7 = scalar_lea.vmem %s5112_s6, 4096 }
 0xd38   : > { %s6779_s23 = sshll.u32 %s6840_s27, 11  ;;  %p5114_p4 = scmp.lt.s32.totalorder %s6647_s26, %s5112_s6 }
 0xd39   : > { %s6644_s11 = scalar_lea.hbm %s6841_s3, %s6779_s23  ;;  %p5110_p13 = pneg %p5109_p12 }
 0xd3a   : > { %p5115_p8 = scmp.lt.s32.totalorder %s5113_s7, %s5107_s29 }
 0xd3c   : > { %p5116_p0 = por %p5115_p8, %p5114_p4 }
 0xd3e   : > { %p5117_p2 = pnand %p5116_p0, %p5110_p13 }
 0xd40   : > { %5120 = shalt.err (!%p5117_p2)
}
 0xd41   : > { %s5121_s5 = scalar_lea.hbm %s6644_s11, 2048  ;;  %s5125_s30 = scalar_lea.hbm %s6841_s3, 4096 }
 0xd42   : > { %p5122_p3 = scmp.ne.s32.totalorder %s6644_s11, %s5121_s5  ;;  %p5126_p5 = scmp.lt.u32.totalorder %s6644_s11, %s6841_s3 }
 0xd43   : > { %p5127_p11 = scmp.lt.u32.totalorder %s5125_s30, %s5121_s5  ;;  %p5129_p1 = scmp.lt.u32.totalorder %s5121_s5, %s6644_s11 }
 0xd44   : > { %p5123_p6 = pnand %p5122_p3, %p6842_p7 }
 0xd45   : > { %p5128_p10 = por %p5127_p11, %p5126_p5 }
 0xd46   : > { %p5124_p9 = pneg %p5123_p6 }
 0xd47   : > { %p5130_p12 = por %p5129_p1, %p5128_p10 }
 0xd49   : > { %p5131_p13 = pnand %p5130_p12, %p5124_p9 }
 0xd4b   : > { %5134 = shalt.err (!%p5131_p13)
}
 0xd4c   : > { %s5296_s7 = smov 128   ;;  %s5297_s29 = smov 8  }
 0xd4d   : > { %4243 = dma.vmem_to_hbm [thread:$0]  (%p6842_p7), %s6647_s26, 2048, %s6644_s11, %s3234_s0, %s5296_s7, %s5296_s7, %s5297_s29  }
 0xd4e   : > { %s6843_s23 = sshll.u32 %s6840_s27, 11  ;;  %s6844_s1 = sld [smem:[#allocation67_spill]] }
 0xd4f   : > { %s3268_s6 = sshll.u32 %s5914_s24, 4  ;;  %s3239_s3 = scalar_lea.sflag [#allocation33], %s5870_s25  ;;  %s6684_s6 = int_to_ptr.vmem [resolvable:$true] %s3268_s6 }
 0xd50   : > { %s5135_s8 = scalar_lea.vmem %s6684_s6, 2048  ;;  %s5298_s9 = smov [#allocation32]  }
 0xd51   : > { %p5136_p4 = scmp.ne.s32.totalorder %s6684_s6, %s5135_s8  ;;  %s5139_s11 = sshll.u32 %s5298_s9, 4  ;;  %s5140_s11 = int_to_ptr.vmem [resolvable:$false] %s5139_s11 }
 0xd52   : > { %s5141_s27 = scalar_lea.vmem %s5140_s11, 4096  ;;  %p5142_p2 = scmp.lt.s32.totalorder %s6684_s6, %s5140_s11 }
 0xd53   : > { %p5137_p8 = pnand %p5136_p4, %p6842_p7  ;;  %p5143_p3 = scmp.lt.s32.totalorder %s5141_s27, %s5135_s8 }
 0xd54   : > { %s6681_s30 = scalar_lea.hbm %s6844_s1, %s6843_s23 }
 0xd55   : > { %p5138_p0 = pneg %p5137_p8  ;;  %p5144_p6 = por %p5143_p3, %p5142_p2 }
 0xd57   : > { %p5145_p9 = pnand %p5144_p6, %p5138_p0 }
 0xd59   : > { %5148 = shalt.err (!%p5145_p9)
}
 0xd5a   : > { %s5149_s24 = scalar_lea.hbm %s6681_s30, 2048  ;;  %s5153_s9 = scalar_lea.hbm %s6844_s1, 4096 }
 0xd5b   : > { %p5150_p5 = scmp.ne.s32.totalorder %s6681_s30, %s5149_s24  ;;  %p5154_p1 = scmp.lt.u32.totalorder %s6681_s30, %s6844_s1 }
 0xd5c   : > { %p5155_p12 = scmp.lt.u32.totalorder %s5153_s9, %s5149_s24  ;;  %p5157_p4 = scmp.lt.u32.totalorder %s5149_s24, %s6681_s30 }
 0xd5d   : > { %p5151_p11 = pnand %p5150_p5, %p6842_p7 }
 0xd5e   : > { %p5156_p13 = por %p5155_p12, %p5154_p1 }
 0xd5f   : > { %p5152_p10 = pneg %p5151_p11 }
 0xd60   : > { %p5158_p8 = por %p5157_p4, %p5156_p13 }
 0xd62   : > { %p5159_p0 = pnand %p5158_p8, %p5152_p10 }
 0xd64   : > { %5162 = shalt.err (!%p5159_p0)
}
 0xd65   : > { %4244 = dma.vmem_to_hbm [thread:$0]  (%p6842_p7), %s6684_s6, 2048, %s6681_s30, %s3239_s3, %s5296_s7, %s5296_s7, %s5297_s29  }
 0xd66 PF: > { %s6845_s8 = sld [smem:[#allocation46_spill]]  ;;  %p4335_p2 = scmp.ge.s32.totalorder %s5271_s28, 2 }
 0xd67   : > { %p6846_p3 = scmp.ne.s32.totalorder %s6828_s18, 0 }
 0xd69   : > { %p4298_p6 = pnand %p4335_p2, %p6846_p3 }
 0xd6c   : > { %s3283_s4 = sand.u32 1, %s6845_s8  }
 0xd6d   : > { %s3284_s11 = scalar_lea.sflag [#allocation7], %s3283_s4 }
 0xd6e   : > { %5234 = dma.done.wait (!%p4298_p6), %s3284_s11, 2048  }
 0xd6f   : > { %5236 = vsyncadd (!%p4298_p6), %s3284_s11, 4294965248  ;;  %s3293_s2 = scalar_lea.sflag [#allocation33], %s3283_s4 }
 0xd70   : > { %5238 = dma.done.wait (!%p4298_p6), %s3293_s2, 2048  }
 0xd71   : > { %5240 = vsyncadd (!%p4298_p6), %s3293_s2, 4294965248  ;;  %s50_s28 = sadd.s32 1, %s5271_s28   ;;  %s6847_s11 = sld [smem:[#allocation47_spill]] }
 0xd72   : > { %p47_p9 = scmp.ge.s32.totalorder %s50_s28, 8   ;;  %s6848_s2 = sld [smem:[#allocation48_spill]] }
 0xd73   : > { %s6849_s24 = sld [smem:[#allocation51_spill]]  ;;  %s6850_s25 = sld [smem:[#allocation52_spill]] }
 0xd74   : > { %s6851_s23 = smov %s6861_s21  ;;  %s6852_s26 = smov %s6855_s17 }
 0xd75   : > { %s6853_s27 = smov %s6859_s22  ;;  %49 = sbr.rel (!%p47_p9) target bundleno = 40 (0x28), region = 218 }
 0xd7c   :  { %3298 = vsyncpa [#allocation6], 1 }
 0xd7d   :  { %3300 = vsyncpa [#allocation6 + $0x1], 1 }
 0xd7e   :  { %3301 = vsyncpa [#allocation9], 1 }
 0xd7f   :  { %3302 = vsyncpa [#allocation12], 1 }
 0xd80   :  { %3303 = vsyncpa [#allocation15], 1 }
 0xd81   :  { %3304 = vsyncpa [#allocation18], 1 }
 0xd82   :  { %3305 = vsyncpa [#allocation21], 1 }
 0xd83   :  { %3306 = vsyncpa [#allocation24], 1 }
 0xd84   :  { %3307 = vsyncpa [#allocation27], 1 }
 0xd85   :  { %3308 = vsyncpa [#allocation30], 1 }
 0xd86   :  { %3309 = vsyncpa [#allocation7], 1 }
 0xd87   :  { %3311 = vsyncpa [#allocation7 + $0x1], 1 }
 0xd88   :  { %3312 = vsyncpa [#allocation33], 1 }
 0xd89   :  { %3314 = vsyncpa [#allocation33 + $0x1], 1 }

</bundles_post_ra>
